<compile_context>
chip_gen: v7x
topology: tpu7x:2x2x1
jax: 0.10.0
libtpu: 0.0.40
codegen_flags: <defaults>
</compile_context>

<pallas_src>
import jax
import jax.numpy as jnp
import numpy as np
from jax import lax
from jax.experimental import pallas as pl
from jax.experimental.pallas import tpu as pltpu

LANES = 128


def _round_up(x, m):
    return (x + m - 1) // m * m


# --------------------------------- kernel -----------------------------------


def ibasic_block_kernel(x_ref, w1_ref, w2_ref,
                        s1_ref, b1_ref, s2_ref, b2_ref,
                        alpha_ref, s3_ref, b3_ref,
                        out_ref, pad_ref):
    nb, h, w, c = x_ref.shape
    cp = pad_ref.shape[-1]                       # padded channels (mult of 128)
    m = nb * h * w

    # Fresh zero border / zero channel-pad lanes for this step's images.
    # (Re-zeroing the whole small slab is ~40 vreg stores and stays correct
    # under any megacore sharding of the "parallel" batch axis.)
    pad_ref[...] = jnp.zeros(pad_ref.shape, pad_ref.dtype)

    xf = x_ref[...].astype(jnp.float32)          # (Nb, H, W, C)

    # ---- bn1 (folded scale/bias), f32 ----
    s1 = s1_ref[...][:, :c].reshape(1, 1, 1, c)
    b1 = b1_ref[...][:, :c].reshape(1, 1, 1, c)
    y = xf * s1 + b1

    # interior of the padded slab; spatial border & channel-pad lanes stay zero
    pad_ref[:, 1:h + 1, 1:w + 1, :c] = y.astype(jnp.bfloat16)

    def im2col():
        # 9 shifted views of the zero-bordered slab, concatenated on the lane
        # (channel) axis -> (M, 9*Cp).  ky slices index an untiled outer dim
        # (free); kx slices are +-1 sublane shifts; the lane concat is fully
        # 128-aligned because Cp is a multiple of 128.
        taps = [pad_ref[:, ky:ky + h, kx:kx + w, :]
                for ky in range(3) for kx in range(3)]        # 9 x (Nb,H,W,Cp)
        return jnp.concatenate(taps, axis=-1).reshape(m, 9 * cp)

    # ---- conv1: single MXU matmul, K = 9*Cp, f32 accumulation ----
    o1 = jnp.dot(im2col(), w1_ref[...],
                 preferred_element_type=jnp.float32)          # (M, Cp)

    # ---- bn2 + PReLU (per-channel alpha), f32 ----
    z = o1 * s2_ref[...] + b2_ref[...]
    z = jnp.where(z >= 0.0, z, alpha_ref[...] * z)            # pad lanes stay 0

    # full-width interior rewrite (z's channel-pad lanes are exactly zero)
    pad_ref[:, 1:h + 1, 1:w + 1, :] = z.reshape(nb, h, w, cp).astype(jnp.bfloat16)

    # ---- conv2: single MXU matmul ----
    o2 = jnp.dot(im2col(), w2_ref[...],
                 preferred_element_type=jnp.float32)          # (M, Cp)

    # ---- bn3 + residual add ----
    o2 = o2 * s3_ref[...] + b3_ref[...]
    out = o2[:, :c].reshape(nb, h, w, c) + xf
    # TODO(synk): lane-dense (Nb, H, W*C) store for C < 128 to avoid masked vst.
    out_ref[...] = out.astype(out_ref.dtype)


# -------------------------------- wrappers -----------------------------------


def _pick_nb(n, hw):
    """Images per grid step: grow M while small, but keep >= 2 grid steps."""
    nb = 1
    while (n % (nb * 2) == 0) and (nb * hw < 512) and (n // (nb * 2) >= 2):
        nb *= 2
    return nb


@jax.jit
def ibasic_block_nhwc(x, w1, w2, s1, b1, s2, b2, alpha, s3, b3):
    n, h, w, c = x.shape
    cp = w1.shape[-1]
    nb = _pick_nb(n, h * w)
    grid = (n // nb,)

    act_spec = pl.BlockSpec((nb, h, w, c), lambda i: (i, 0, 0, 0))
    # Weights / BN vectors: constant index_map -> fetched once, VMEM-resident.
    # TODO(synk): pipeline_mode=pl.Buffered(1) here for large-C stages on v7x.
    w_spec = pl.BlockSpec((9 * cp, cp), lambda i: (0, 0))
    vec_spec = pl.BlockSpec((1, cp), lambda i: (0, 0))

    flops = 2 * 2 * n * h * w * (9 * cp) * cp                 # two fused convs
    bytes_accessed = (2 * x.size * x.dtype.itemsize
                      + (w1.size + w2.size) * w1.dtype.itemsize
                      + 7 * cp * 4)
    cost = pl.CostEstimate(flops=flops, transcendentals=0,
                           bytes_accessed=bytes_accessed)

    return pl.pallas_call(
        ibasic_block_kernel,
        out_shape=jax.ShapeDtypeStruct((n, h, w, c), x.dtype),
        grid=grid,
        in_specs=[act_spec, w_spec, w_spec,
                  vec_spec, vec_spec, vec_spec, vec_spec,
                  vec_spec, vec_spec, vec_spec],
        out_specs=act_spec,
        scratch_shapes=[pltpu.VMEM((nb, h + 2, w + 2, cp), jnp.bfloat16)],
        compiler_params=pltpu.CompilerParams(
            dimension_semantics=("parallel",),
            vmem_limit_bytes=32 * 1024 * 1024),
        cost_estimate=cost,
    )(x, w1, w2, s1, b1, s2, b2, alpha, s3, b3)


@jax.jit
def ibasic_block(x_nchw, w1, w2, s1, b1, s2, b2, alpha, s3, b3):
    # TODO(synk): keep the whole model NHWC end-to-end to drop these two
    #             HBM-bound layout transposes around the kernel.
    x = jnp.transpose(x_nchw, (0, 2, 3, 1))                   # NCHW -> NHWC
    out = ibasic_block_nhwc(x, w1, w2, s1, b1, s2, b2, alpha, s3, b3)
    return jnp.transpose(out, (0, 3, 1, 2))                   # NHWC -> NCHW


# --------------------------- parameter construction --------------------------


def make_params(key, inplanes, planes, eps=2e-5):
    assert inplanes == planes, "residual (downsample=None) requires equal planes"
    cp = _round_up(planes, LANES)
    ks = jax.random.split(key, 15)

    def bn_fold(kg, kb, km, kv, ch):
        gamma = jax.random.uniform(kg, (ch,), jnp.float32, 0.5, 1.5)
        beta = 0.1 * jax.random.normal(kb, (ch,), jnp.float32)
        mean = 0.1 * jax.random.normal(km, (ch,), jnp.float32)
        var = jax.random.uniform(kv, (ch,), jnp.float32, 0.5, 1.5)
        scale = gamma / jnp.sqrt(var + eps)
        bias = beta - mean * scale
        return scale, bias

    def pad_vec(v):
        return jnp.pad(v, (0, cp - v.shape[0])).reshape(1, cp)

    def conv_w(k, cin, cout):
        # PyTorch layout OIHW; the fused-K weight matrix rows are ordered
        # ((ky*3 + kx) * Cp + ci) to match the im2col lane-concat order.
        w_oihw = jax.random.normal(k, (cout, cin, 3, 3), jnp.float32)
        w_oihw = w_oihw * np.sqrt(2.0 / (9 * cin))
        w_taps = jnp.transpose(w_oihw, (2, 3, 1, 0))          # (3,3,ci,co)
        w_taps = jnp.pad(w_taps, ((0, 0), (0, 0),
                                  (0, cp - cin), (0, cp - cout)))
        return w_oihw, w_taps.reshape(9 * cp, cp).astype(jnp.bfloat16)

    s1, b1 = bn_fold(ks[0], ks[1], ks[2], ks[3], inplanes)
    s2, b2 = bn_fold(ks[4], ks[5], ks[6], ks[7], planes)
    s3, b3 = bn_fold(ks[8], ks[9], ks[10], ks[11], planes)
    w1_oihw, w1 = conv_w(ks[12], inplanes, planes)
    w2_oihw, w2 = conv_w(ks[13], planes, planes)
    alpha = jax.random.uniform(ks[14], (planes,), jnp.float32, 0.1, 0.4)

    return dict(
        # kernel-side (channel-padded) parameters
        w1=w1, w2=w2,
        s1p=pad_vec(s1), b1p=pad_vec(b1),
        s2p=pad_vec(s2), b2p=pad_vec(b2),
        s3p=pad_vec(s3), b3p=pad_vec(b3),
        alphap=pad_vec(alpha),
        # reference-side (unpadded) parameters
        w1_oihw=w1_oihw, w2_oihw=w2_oihw,
        s1=s1, b1=b1, s2=s2, b2=b2, s3=s3, b3=b3, alpha=alpha)


# ----------------------------- pure-JAX reference ----------------------------


def reference(x, p):
    def bn(t, s, b):
        return t * s.reshape(1, -1, 1, 1) + b.reshape(1, -1, 1, 1)

    dn = ("NCHW", "OIHW", "NCHW")
    out = bn(x, p["s1"], p["b1"])
    out = lax.conv_general_dilated(out, p["w1_oihw"], (1, 1), "SAME",
                                   dimension_numbers=dn,
                                   precision=lax.Precision.HIGHEST)
    out = bn(out, p["s2"], p["b2"])
    a = p["alpha"].reshape(1, -1, 1, 1)
    out = jnp.where(out >= 0.0, out, a * out)
    out = lax.conv_general_dilated(out, p["w2_oihw"], (1, 1), "SAME",
                                   dimension_numbers=dn,
                                   precision=lax.Precision.HIGHEST)
    out = bn(out, p["s3"], p["b3"])
    return out + x


# ----------------------------------- main ------------------------------------


if __name__ == "__main__":
    N, C, H, W = 4, 64, 16, 16                 # inplanes = planes = 64
    key = jax.random.PRNGKey(0)
    kx, kp = jax.random.split(key)
    x = jax.random.normal(kx, (N, C, H, W), jnp.float32)
    p = make_params(kp, C, C)

    out = ibasic_block(x, p["w1"], p["w2"], p["s1p"], p["b1p"],
                       p["s2p"], p["b2p"], p["alphap"], p["s3p"], p["b3p"])
    out = jax.block_until_ready(out)

    ref = jax.block_until_ready(reference(x, p))
    np.testing.assert_allclose(np.asarray(out), np.asarray(ref),
                               rtol=5e-2, atol=5e-2)
    print("KERNEL_OK")
</pallas_src>

<mosaic_0001>
module attributes {stable_mosaic.version = 11 : i64} {
  func.func @ibasic_block_kernel(%arg0: i32, %arg1: memref<2x16x16x64xf32, #tpu.memory_space<vmem>>, %arg2: memref<1152x128xbf16, #tpu.memory_space<vmem>>, %arg3: memref<1152x128xbf16, #tpu.memory_space<vmem>>, %arg4: memref<1x128xf32, #tpu.memory_space<vmem>>, %arg5: memref<1x128xf32, #tpu.memory_space<vmem>>, %arg6: memref<1x128xf32, #tpu.memory_space<vmem>>, %arg7: memref<1x128xf32, #tpu.memory_space<vmem>>, %arg8: memref<1x128xf32, #tpu.memory_space<vmem>>, %arg9: memref<1x128xf32, #tpu.memory_space<vmem>>, %arg10: memref<1x128xf32, #tpu.memory_space<vmem>>, %arg11: memref<2x16x16x64xf32, #tpu.memory_space<vmem>>, %arg12: memref<2x18x18x128xbf16, #tpu.memory_space<vmem>>) attributes {dimension_semantics = [#tpu.dimension_semantics<parallel>], iteration_bounds = array<i64: 2>, scalar_prefetch = 0 : i64, scratch_operands = 1 : i64, tpu.core_type = #tpu.core_type<tc>, window_params = [{transform_indices = @transform_0, window_bounds = array<i64: 2, 16, 16, 64>}, {pipeline_mode = #tpu.pipeline_mode<synchronous>, transform_indices = @transform_1, window_bounds = array<i64: 1152, 128>}, {pipeline_mode = #tpu.pipeline_mode<synchronous>, transform_indices = @transform_2, window_bounds = array<i64: 1152, 128>}, {pipeline_mode = #tpu.pipeline_mode<synchronous>, transform_indices = @transform_3, window_bounds = array<i64: 1, 128>}, {pipeline_mode = #tpu.pipeline_mode<synchronous>, transform_indices = @transform_4, window_bounds = array<i64: 1, 128>}, {pipeline_mode = #tpu.pipeline_mode<synchronous>, transform_indices = @transform_5, window_bounds = array<i64: 1, 128>}, {pipeline_mode = #tpu.pipeline_mode<synchronous>, transform_indices = @transform_6, window_bounds = array<i64: 1, 128>}, {pipeline_mode = #tpu.pipeline_mode<synchronous>, transform_indices = @transform_7, window_bounds = array<i64: 1, 128>}, {pipeline_mode = #tpu.pipeline_mode<synchronous>, transform_indices = @transform_8, window_bounds = array<i64: 1, 128>}, {pipeline_mode = #tpu.pipeline_mode<synchronous>, transform_indices = @transform_9, window_bounds = array<i64: 1, 128>}, {transform_indices = @transform_10, window_bounds = array<i64: 2, 16, 16, 64>}]} {
    %cst = arith.constant 0.000000e+00 : bf16
    %0 = vector.broadcast %cst : bf16 to vector<2x18x18x128xbf16>
    %c0 = arith.constant 0 : index
    %c0_0 = arith.constant 0 : index
    %c0_1 = arith.constant 0 : index
    %c0_2 = arith.constant 0 : index
    %1 = vector.load %arg12[%c0, %c0_0, %c0_1, %c0_2] : memref<2x18x18x128xbf16, #tpu.memory_space<vmem>>, vector<2x18x18x128xbf16>
    tpu.vector_store %arg12[%c0, %c0_0, %c0_1, %c0_2], %0 {strides = array<i32>} : memref<2x18x18x128xbf16, #tpu.memory_space<vmem>>, vector<2x18x18x128xbf16>,
    %c0_3 = arith.constant 0 : index
    %c0_4 = arith.constant 0 : index
    %c0_5 = arith.constant 0 : index
    %c0_6 = arith.constant 0 : index
    %2 = vector.load %arg1[%c0_3, %c0_4, %c0_5, %c0_6] : memref<2x16x16x64xf32, #tpu.memory_space<vmem>>, vector<2x16x16x64xf32>
    %c0_7 = arith.constant 0 : index
    %c0_8 = arith.constant 0 : index
    %3 = vector.load %arg4[%c0_7, %c0_8] : memref<1x128xf32, #tpu.memory_space<vmem>>, vector<1x128xf32>
    %4 = vector.extract_strided_slice %3 {offsets = [0, 0], sizes = [1, 64], strides = [1, 1]} : vector<1x128xf32> to vector<1x64xf32>
    %5 = vector.shape_cast %4 : vector<1x64xf32> to vector<1x1x1x64xf32>
    %c0_9 = arith.constant 0 : index
    %c0_10 = arith.constant 0 : index
    %6 = vector.load %arg5[%c0_9, %c0_10] : memref<1x128xf32, #tpu.memory_space<vmem>>, vector<1x128xf32>
    %7 = vector.extract_strided_slice %6 {offsets = [0, 0], sizes = [1, 64], strides = [1, 1]} : vector<1x128xf32> to vector<1x64xf32>
    %8 = vector.shape_cast %7 : vector<1x64xf32> to vector<1x1x1x64xf32>
    %9 = vector.broadcast %5 : vector<1x1x1x64xf32> to vector<2x16x16x64xf32>
    %10 = arith.mulf %2, %9 : vector<2x16x16x64xf32>
    %11 = vector.broadcast %8 : vector<1x1x1x64xf32> to vector<2x16x16x64xf32>
    %12 = arith.addf %10, %11 : vector<2x16x16x64xf32>
    %13 = arith.truncf %12 : vector<2x16x16x64xf32> to vector<2x16x16x64xbf16>
    %c0_11 = arith.constant 0 : index
    %c1 = arith.constant 1 : index
    %c1_12 = arith.constant 1 : index
    %c0_13 = arith.constant 0 : index
    %14 = vector.load %arg12[%c0_11, %c1, %c1_12, %c0_13] : memref<2x18x18x128xbf16, #tpu.memory_space<vmem>>, vector<2x16x16x64xbf16>
    tpu.vector_store %arg12[%c0_11, %c1, %c1_12, %c0_13], %13 {strides = array<i32>} : memref<2x18x18x128xbf16, #tpu.memory_space<vmem>>, vector<2x16x16x64xbf16>,
    %c0_14 = arith.constant 0 : index
    %c0_15 = arith.constant 0 : index
    %c0_16 = arith.constant 0 : index
    %c0_17 = arith.constant 0 : index
    %15 = vector.load %arg12[%c0_14, %c0_15, %c0_16, %c0_17] : memref<2x18x18x128xbf16, #tpu.memory_space<vmem>>, vector<2x16x16x128xbf16>
    %c0_18 = arith.constant 0 : index
    %c0_19 = arith.constant 0 : index
    %c1_20 = arith.constant 1 : index
    %c0_21 = arith.constant 0 : index
    %16 = vector.load %arg12[%c0_18, %c0_19, %c1_20, %c0_21] : memref<2x18x18x128xbf16, #tpu.memory_space<vmem>>, vector<2x16x16x128xbf16>
    %c0_22 = arith.constant 0 : index
    %c0_23 = arith.constant 0 : index
    %c2 = arith.constant 2 : index
    %c0_24 = arith.constant 0 : index
    %17 = vector.load %arg12[%c0_22, %c0_23, %c2, %c0_24] : memref<2x18x18x128xbf16, #tpu.memory_space<vmem>>, vector<2x16x16x128xbf16>
    %c0_25 = arith.constant 0 : index
    %c1_26 = arith.constant 1 : index
    %c0_27 = arith.constant 0 : index
    %c0_28 = arith.constant 0 : index
    %18 = vector.load %arg12[%c0_25, %c1_26, %c0_27, %c0_28] : memref<2x18x18x128xbf16, #tpu.memory_space<vmem>>, vector<2x16x16x128xbf16>
    %c0_29 = arith.constant 0 : index
    %c1_30 = arith.constant 1 : index
    %c1_31 = arith.constant 1 : index
    %c0_32 = arith.constant 0 : index
    %19 = vector.load %arg12[%c0_29, %c1_30, %c1_31, %c0_32] : memref<2x18x18x128xbf16, #tpu.memory_space<vmem>>, vector<2x16x16x128xbf16>
    %c0_33 = arith.constant 0 : index
    %c1_34 = arith.constant 1 : index
    %c2_35 = arith.constant 2 : index
    %c0_36 = arith.constant 0 : index
    %20 = vector.load %arg12[%c0_33, %c1_34, %c2_35, %c0_36] : memref<2x18x18x128xbf16, #tpu.memory_space<vmem>>, vector<2x16x16x128xbf16>
    %c0_37 = arith.constant 0 : index
    %c2_38 = arith.constant 2 : index
    %c0_39 = arith.constant 0 : index
    %c0_40 = arith.constant 0 : index
    %21 = vector.load %arg12[%c0_37, %c2_38, %c0_39, %c0_40] : memref<2x18x18x128xbf16, #tpu.memory_space<vmem>>, vector<2x16x16x128xbf16>
    %c0_41 = arith.constant 0 : index
    %c2_42 = arith.constant 2 : index
    %c1_43 = arith.constant 1 : index
    %c0_44 = arith.constant 0 : index
    %22 = vector.load %arg12[%c0_41, %c2_42, %c1_43, %c0_44] : memref<2x18x18x128xbf16, #tpu.memory_space<vmem>>, vector<2x16x16x128xbf16>
    %c0_45 = arith.constant 0 : index
    %c2_46 = arith.constant 2 : index
    %c2_47 = arith.constant 2 : index
    %c0_48 = arith.constant 0 : index
    %23 = vector.load %arg12[%c0_45, %c2_46, %c2_47, %c0_48] : memref<2x18x18x128xbf16, #tpu.memory_space<vmem>>, vector<2x16x16x128xbf16>
    %24 = tpu.concatenate %15, %16, %17, %18, %19, %20, %21, %22, %23 in 3 : vector<2x16x16x128xbf16>, vector<2x16x16x128xbf16>, vector<2x16x16x128xbf16>, vector<2x16x16x128xbf16>, vector<2x16x16x128xbf16>, vector<2x16x16x128xbf16>, vector<2x16x16x128xbf16>, vector<2x16x16x128xbf16>, vector<2x16x16x128xbf16> -> vector<2x16x16x1152xbf16>
    %25 = vector.shape_cast %24 : vector<2x16x16x1152xbf16> to vector<512x1152xbf16>
    %c0_49 = arith.constant 0 : index
    %c0_50 = arith.constant 0 : index
    %26 = vector.load %arg2[%c0_49, %c0_50] : memref<1152x128xbf16, #tpu.memory_space<vmem>>, vector<1152x128xbf16>
    %cst_51 = arith.constant dense<0.000000e+00> : vector<512x128xf32>
    %27 = tpu.matmul %25, %26, %cst_51 {dimension_numbers = #tpu.dot_dimension_numbers<[1], [0], [0], [1], [0, 0, 1, 1], [], []>} : vector<512x1152xbf16>, vector<1152x128xbf16>, vector<512x128xf32> -> vector<512x128xf32>
    %c0_52 = arith.constant 0 : index
    %c0_53 = arith.constant 0 : index
    %28 = vector.load %arg6[%c0_52, %c0_53] : memref<1x128xf32, #tpu.memory_space<vmem>>, vector<1x128xf32>
    %29 = vector.broadcast %28 : vector<1x128xf32> to vector<512x128xf32>
    %30 = arith.mulf %27, %29 : vector<512x128xf32>
    %c0_54 = arith.constant 0 : index
    %c0_55 = arith.constant 0 : index
    %31 = vector.load %arg7[%c0_54, %c0_55] : memref<1x128xf32, #tpu.memory_space<vmem>>, vector<1x128xf32>
    %32 = vector.broadcast %31 : vector<1x128xf32> to vector<512x128xf32>
    %33 = arith.addf %30, %32 : vector<512x128xf32>
    %cst_56 = arith.constant 0.000000e+00 : f32
    %34 = vector.broadcast %cst_56 : f32 to vector<512x128xf32>
    %35 = arith.cmpf oge, %33, %34 : vector<512x128xf32>
    %c0_57 = arith.constant 0 : index
    %c0_58 = arith.constant 0 : index
    %36 = vector.load %arg8[%c0_57, %c0_58] : memref<1x128xf32, #tpu.memory_space<vmem>>, vector<1x128xf32>
    %37 = vector.broadcast %36 : vector<1x128xf32> to vector<512x128xf32>
    %38 = arith.mulf %37, %33 : vector<512x128xf32>
    %39 = arith.select %35, %33, %38 : vector<512x128xi1>, vector<512x128xf32>
    %40 = vector.shape_cast %39 : vector<512x128xf32> to vector<2x16x16x128xf32>
    %41 = arith.truncf %40 : vector<2x16x16x128xf32> to vector<2x16x16x128xbf16>
    %c0_59 = arith.constant 0 : index
    %c1_60 = arith.constant 1 : index
    %c1_61 = arith.constant 1 : index
    %c0_62 = arith.constant 0 : index
    %42 = vector.load %arg12[%c0_59, %c1_60, %c1_61, %c0_62] : memref<2x18x18x128xbf16, #tpu.memory_space<vmem>>, vector<2x16x16x128xbf16>
    tpu.vector_store %arg12[%c0_59, %c1_60, %c1_61, %c0_62], %41 {strides = array<i32>} : memref<2x18x18x128xbf16, #tpu.memory_space<vmem>>, vector<2x16x16x128xbf16>,
    %c0_63 = arith.constant 0 : index
    %c0_64 = arith.constant 0 : index
    %c0_65 = arith.constant 0 : index
    %c0_66 = arith.constant 0 : index
    %43 = vector.load %arg12[%c0_63, %c0_64, %c0_65, %c0_66] : memref<2x18x18x128xbf16, #tpu.memory_space<vmem>>, vector<2x16x16x128xbf16>
    %c0_67 = arith.constant 0 : index
    %c0_68 = arith.constant 0 : index
    %c1_69 = arith.constant 1 : index
    %c0_70 = arith.constant 0 : index
    %44 = vector.load %arg12[%c0_67, %c0_68, %c1_69, %c0_70] : memref<2x18x18x128xbf16, #tpu.memory_space<vmem>>, vector<2x16x16x128xbf16>
    %c0_71 = arith.constant 0 : index
    %c0_72 = arith.constant 0 : index
    %c2_73 = arith.constant 2 : index
    %c0_74 = arith.constant 0 : index
    %45 = vector.load %arg12[%c0_71, %c0_72, %c2_73, %c0_74] : memref<2x18x18x128xbf16, #tpu.memory_space<vmem>>, vector<2x16x16x128xbf16>
    %c0_75 = arith.constant 0 : index
    %c1_76 = arith.constant 1 : index
    %c0_77 = arith.constant 0 : index
    %c0_78 = arith.constant 0 : index
    %46 = vector.load %arg12[%c0_75, %c1_76, %c0_77, %c0_78] : memref<2x18x18x128xbf16, #tpu.memory_space<vmem>>, vector<2x16x16x128xbf16>
    %c0_79 = arith.constant 0 : index
    %c1_80 = arith.constant 1 : index
    %c1_81 = arith.constant 1 : index
    %c0_82 = arith.constant 0 : index
    %47 = vector.load %arg12[%c0_79, %c1_80, %c1_81, %c0_82] : memref<2x18x18x128xbf16, #tpu.memory_space<vmem>>, vector<2x16x16x128xbf16>
    %c0_83 = arith.constant 0 : index
    %c1_84 = arith.constant 1 : index
    %c2_85 = arith.constant 2 : index
    %c0_86 = arith.constant 0 : index
    %48 = vector.load %arg12[%c0_83, %c1_84, %c2_85, %c0_86] : memref<2x18x18x128xbf16, #tpu.memory_space<vmem>>, vector<2x16x16x128xbf16>
    %c0_87 = arith.constant 0 : index
    %c2_88 = arith.constant 2 : index
    %c0_89 = arith.constant 0 : index
    %c0_90 = arith.constant 0 : index
    %49 = vector.load %arg12[%c0_87, %c2_88, %c0_89, %c0_90] : memref<2x18x18x128xbf16, #tpu.memory_space<vmem>>, vector<2x16x16x128xbf16>
    %c0_91 = arith.constant 0 : index
    %c2_92 = arith.constant 2 : index
    %c1_93 = arith.constant 1 : index
    %c0_94 = arith.constant 0 : index
    %50 = vector.load %arg12[%c0_91, %c2_92, %c1_93, %c0_94] : memref<2x18x18x128xbf16, #tpu.memory_space<vmem>>, vector<2x16x16x128xbf16>
    %c0_95 = arith.constant 0 : index
    %c2_96 = arith.constant 2 : index
    %c2_97 = arith.constant 2 : index
    %c0_98 = arith.constant 0 : index
    %51 = vector.load %arg12[%c0_95, %c2_96, %c2_97, %c0_98] : memref<2x18x18x128xbf16, #tpu.memory_space<vmem>>, vector<2x16x16x128xbf16>
    %52 = tpu.concatenate %43, %44, %45, %46, %47, %48, %49, %50, %51 in 3 : vector<2x16x16x128xbf16>, vector<2x16x16x128xbf16>, vector<2x16x16x128xbf16>, vector<2x16x16x128xbf16>, vector<2x16x16x128xbf16>, vector<2x16x16x128xbf16>, vector<2x16x16x128xbf16>, vector<2x16x16x128xbf16>, vector<2x16x16x128xbf16> -> vector<2x16x16x1152xbf16>
    %53 = vector.shape_cast %52 : vector<2x16x16x1152xbf16> to vector<512x1152xbf16>
    %c0_99 = arith.constant 0 : index
    %c0_100 = arith.constant 0 : index
    %54 = vector.load %arg3[%c0_99, %c0_100] : memref<1152x128xbf16, #tpu.memory_space<vmem>>, vector<1152x128xbf16>
    %cst_101 = arith.constant dense<0.000000e+00> : vector<512x128xf32>
    %55 = tpu.matmul %53, %54, %cst_101 {dimension_numbers = #tpu.dot_dimension_numbers<[1], [0], [0], [1], [0, 0, 1, 1], [], []>} : vector<512x1152xbf16>, vector<1152x128xbf16>, vector<512x128xf32> -> vector<512x128xf32>
    %c0_102 = arith.constant 0 : index
    %c0_103 = arith.constant 0 : index
    %56 = vector.load %arg9[%c0_102, %c0_103] : memref<1x128xf32, #tpu.memory_space<vmem>>, vector<1x128xf32>
    %57 = vector.broadcast %56 : vector<1x128xf32> to vector<512x128xf32>
    %58 = arith.mulf %55, %57 : vector<512x128xf32>
    %c0_104 = arith.constant 0 : index
    %c0_105 = arith.constant 0 : index
    %59 = vector.load %arg10[%c0_104, %c0_105] : memref<1x128xf32, #tpu.memory_space<vmem>>, vector<1x128xf32>
    %60 = vector.broadcast %59 : vector<1x128xf32> to vector<512x128xf32>
    %61 = arith.addf %58, %60 : vector<512x128xf32>
    %62 = vector.extract_strided_slice %61 {offsets = [0, 0], sizes = [512, 64], strides = [1, 1]} : vector<512x128xf32> to vector<512x64xf32>
    %63 = vector.shape_cast %62 : vector<512x64xf32> to vector<2x16x16x64xf32>
    %64 = arith.addf %63, %2 : vector<2x16x16x64xf32>
    %c0_106 = arith.constant 0 : index
    %c0_107 = arith.constant 0 : index
    %c0_108 = arith.constant 0 : index
    %c0_109 = arith.constant 0 : index
    %65 = vector.load %arg11[%c0_106, %c0_107, %c0_108, %c0_109] : memref<2x16x16x64xf32, #tpu.memory_space<vmem>>, vector<2x16x16x64xf32>
    tpu.vector_store %arg11[%c0_106, %c0_107, %c0_108, %c0_109], %64 {strides = array<i32>} : memref<2x16x16x64xf32, #tpu.memory_space<vmem>>, vector<2x16x16x64xf32>,
    return
  }
  func.func @transform_0(%arg0: i32) -> (i32, i32, i32, i32) {
    %c0_i32 = arith.constant 0 : i32
    %c0_i32_0 = arith.constant 0 : i32
    %c0_i32_1 = arith.constant 0 : i32
    %c0_i32_2 = arith.constant 0 : i32
    return %arg0, %c0_i32, %c0_i32_0, %c0_i32_1 : i32, i32, i32, i32
  }
  func.func @transform_1(%arg0: i32) -> (i32, i32) {
    %c0_i32 = arith.constant 0 : i32
    %c0_i32_0 = arith.constant 0 : i32
    %c0_i32_1 = arith.constant 0 : i32
    return %c0_i32, %c0_i32_0 : i32, i32
  }
  func.func @transform_2(%arg0: i32) -> (i32, i32) {
    %c0_i32 = arith.constant 0 : i32
    %c0_i32_0 = arith.constant 0 : i32
    %c0_i32_1 = arith.constant 0 : i32
    return %c0_i32, %c0_i32_0 : i32, i32
  }
  func.func @transform_3(%arg0: i32) -> (i32, i32) {
    %c0_i32 = arith.constant 0 : i32
    %c0_i32_0 = arith.constant 0 : i32
    %c0_i32_1 = arith.constant 0 : i32
    return %c0_i32, %c0_i32_0 : i32, i32
  }
  func.func @transform_4(%arg0: i32) -> (i32, i32) {
    %c0_i32 = arith.constant 0 : i32
    %c0_i32_0 = arith.constant 0 : i32
    %c0_i32_1 = arith.constant 0 : i32
    return %c0_i32, %c0_i32_0 : i32, i32
  }
  func.func @transform_5(%arg0: i32) -> (i32, i32) {
    %c0_i32 = arith.constant 0 : i32
    %c0_i32_0 = arith.constant 0 : i32
    %c0_i32_1 = arith.constant 0 : i32
    return %c0_i32, %c0_i32_0 : i32, i32
  }
  func.func @transform_6(%arg0: i32) -> (i32, i32) {
    %c0_i32 = arith.constant 0 : i32
    %c0_i32_0 = arith.constant 0 : i32
    %c0_i32_1 = arith.constant 0 : i32
    return %c0_i32, %c0_i32_0 : i32, i32
  }
  func.func @transform_7(%arg0: i32) -> (i32, i32) {
    %c0_i32 = arith.constant 0 : i32
    %c0_i32_0 = arith.constant 0 : i32
    %c0_i32_1 = arith.constant 0 : i32
    return %c0_i32, %c0_i32_0 : i32, i32
  }
  func.func @transform_8(%arg0: i32) -> (i32, i32) {
    %c0_i32 = arith.constant 0 : i32
    %c0_i32_0 = arith.constant 0 : i32
    %c0_i32_1 = arith.constant 0 : i32
    return %c0_i32, %c0_i32_0 : i32, i32
  }
  func.func @transform_9(%arg0: i32) -> (i32, i32) {
    %c0_i32 = arith.constant 0 : i32
    %c0_i32_0 = arith.constant 0 : i32
    %c0_i32_1 = arith.constant 0 : i32
    return %c0_i32, %c0_i32_0 : i32, i32
  }
  func.func @transform_10(%arg0: i32) -> (i32, i32, i32, i32) {
    %c0_i32 = arith.constant 0 : i32
    %c0_i32_0 = arith.constant 0 : i32
    %c0_i32_1 = arith.constant 0 : i32
    %c0_i32_2 = arith.constant 0 : i32
    return %arg0, %c0_i32, %c0_i32_0, %c0_i32_1 : i32, i32, i32, i32
  }
}

</mosaic_0001>

<bundles_post_ra>
// kernel: ibasic_block_nhwc.1
= control target key start
LH: loop header
LB: loop body
LE: loop exit
PB: predicated region body
PF: predicated region fallthrough
CT: control target
= control target key end

     0   :  { %15 = vsyncpa [#allocation4], 0  ;;  %s20972_s0 = inlined_call_operand.hbm [shape: f32[4,16,16,64], index: 0, kind: input, shape index: {}]   ;;  %s20973_s1 = inlined_call_operand.hbm [shape: bf16[1152,128], index: 1, kind: input, shape index: {}]   ;;  %s20974_s2 = inlined_call_operand.hbm [shape: bf16[1152,128], index: 2, kind: input, shape index: {}]   ;;  %s20975_s3 = inlined_call_operand.vmem [shape: f32[1,128], index: 3, kind: input, shape index: {}]   ;;  %s20976_s4 = inlined_call_operand.vmem [shape: f32[1,128], index: 4, kind: input, shape index: {}]   ;;  %s20977_s5 = inlined_call_operand.vmem [shape: f32[1,128], index: 5, kind: input, shape index: {}]   ;;  %s20978_s6 = inlined_call_operand.vmem [shape: f32[1,128], index: 6, kind: input, shape index: {}]   ;;  %s20979_s7 = inlined_call_operand.vmem [shape: f32[1,128], index: 7, kind: input, shape index: {}]   ;;  %s20980_s8 = inlined_call_operand.vmem [shape: f32[1,128], index: 8, kind: input, shape index: {}]   ;;  %s20981_s9 = inlined_call_operand.vmem [shape: f32[1,128], index: 9, kind: input, shape index: {}]   ;;  %s20982_s10 = inlined_call_operand.hbm [shape: f32[4,16,16,64], index: 10, kind: output, shape index: {}]  }
   0x1   :  { %17 = vsyncpa [#allocation4 + $0x1], 0 }
   0x2   :  { %18 = vsyncpa [#allocation7], 0 }
   0x3   :  { %19 = vsyncpa [#allocation5], 0 }
   0x4   :  { %21 = vsyncpa [#allocation5 + $0x1], 0  ;;  %s17212_s13 = smov 0   ;;  %s17214_s14 = smov 0  }
   0x5   :  { %s17216_s15 = smov 0   ;;  %s17218_s16 = smov 0  }
   0x6 LB: > { %21036 = sst [smem:[#allocation13_spill]] %s17132_s13  ;;  %s17233_s17 = sadd.s32 4294967295, %s17144_s16   ;;  %s17144_s16 = sphi %s17218_s16, %s21243_s16   ;;  %s17140_s15 = sphi %s17216_s15, %s21242_s15   ;;  %s17136_s14 = sphi %s17214_s14, %s21241_s14   ;;  %s17132_s13 = sphi %s17212_s13, %s21240_s13  }
   0x7   : > { %s13950_s18 = sadd.s32 4294967294, %s17144_s16   ;;  %p47_p0 = scmp.ne.s32.totalorder %s17136_s14, %s17132_s13 }
   0x8   : > { %p20983_p1 = scmp.eq.s32.totalorder %s17233_s17, 0  ;;  %p266_p3 = scmp.eq.s32.totalorder %s13950_s18, 1 }
   0x9   : > { %p13951_p5 = scmp.ge.s32.totalorder %s17144_s16, 1  ;;  %p273_p7 = scmp.lt.s32.totalorder %s17144_s16, 3 }
   0xa   : > { %p17242_p4 = por %p20983_p1, %p47_p0  ;;  %p17247_p6 = por %p266_p3, %p47_p0 }
   0xb   : > { %p17252_p8 = pnand %p13951_p5, %p273_p7  ;;  %s17146_s22 = smov [#allocation6]  }
   0xc   : > { %s21037_s19 = scalar_select %p17242_p4, 1, 0 }
   0xd   : > { %s21038_s20 = scalar_select %p17247_p6, 1, 0 }
   0xe   : > { %s285_s23 = sshll.u32 %s17146_s22, 4  ;;  %p15993_p9 = pneg %p17252_p8  ;;  %s17256_s23 = int_to_ptr.vmem [resolvable:$true] %s285_s23 }
   0xf   : > { %21039 = sst [smem:[#allocation14_spill]] %s21038_s20  ;;  %s17147_s25 = smov [#allocation8]  }
  0x10   : > { %p17263_p11 = pnand %p15993_p9, %p20983_p1  ;;  %s298_s26 = sshll.u32 %s17147_s25, 4  ;;  %s17267_s26 = int_to_ptr.vmem [resolvable:$true] %s298_s26 }
  0x11   : > { %s16988_s29 = scalar_lea.hbm %s20973_s1, 9216 }
  0x12   : > { %p16989_p12 = scmp.ne.s32.totalorder %s20973_s1, %s16988_s29  ;;  %p16990_p13 = pneg %p17263_p11 }
  0x13   : > { %p16995_p5 = scmp.lt.u32.totalorder %s16988_s29, %s20973_s1 }
  0x14   : > { %p16991_p0 = pnand %p16990_p13, %p16989_p12 }
  0x16   : > { %p16992_p3 = pneg %p16991_p0 }
  0x18   : > { %p16997_p7 = pnand %p16995_p5, %p16992_p3 }
  0x1a   : > { %17000 = shalt.err (!%p16997_p7)
}
  0x1b   : > { %s17001_s22 = scalar_lea.vmem %s17256_s23, 9216  ;;  %p17009_p2 = scmp.lt.s32.totalorder %s17256_s23, %s17256_s23 }
  0x1c   : > { %p17002_p9 = scmp.ne.s32.totalorder %s17256_s23, %s17001_s22  ;;  %p17010_p12 = scmp.lt.s32.totalorder %s17001_s22, %s17001_s22 }
  0x1e   : > { %p17004_p10 = pnand %p17002_p9, %p16990_p13  ;;  %p17011_p0 = por %p17010_p12, %p17009_p2 }
  0x20   : > { %p17005_p1 = pneg %p17004_p10 }
  0x22   : > { %p17012_p6 = pnand %p17011_p0, %p17005_p1 }
  0x24   : > { %17015 = shalt.err (!%p17012_p6)
}
  0x25   : > { %s17148_s25 = smov 64   ;;  %s17149_s27 = smov 4  }
  0x26   : > { %15996 = dma.hbm_to_vmem [thread:$0]  (!%p17263_p11), %s20973_s1, 9216, %s17256_s23, [#allocation7], %s17148_s25, %s17148_s25, %s17149_s27  }
  0x27   : > { %s17016_s12 = scalar_lea.hbm %s20974_s2, 9216 }
  0x28   : > { %p17017_p2 = scmp.ne.s32.totalorder %s20974_s2, %s17016_s12  ;;  %p17023_p10 = scmp.lt.u32.totalorder %s17016_s12, %s20974_s2 }
  0x2a   : > { %p17019_p1 = pnand %p17017_p2, %p16990_p13 }
  0x2c   : > { %p17020_p6 = pneg %p17019_p1 }
  0x2e   : > { %p17025_p3 = pnand %p17023_p10, %p17020_p6 }
  0x30   : > { %17028 = shalt.err (!%p17025_p3)
}
  0x31   : > { %s17029_s23 = scalar_lea.vmem %s17267_s26, 9216  ;;  %p17037_p12 = scmp.lt.s32.totalorder %s17267_s26, %s17267_s26 }
  0x32   : > { %p17030_p5 = scmp.ne.s32.totalorder %s17267_s26, %s17029_s23  ;;  %p17038_p0 = scmp.lt.s32.totalorder %s17029_s23, %s17029_s23 }
  0x34   : > { %p17032_p7 = pnand %p17030_p5, %p16990_p13  ;;  %p17039_p2 = por %p17038_p0, %p17037_p12 }
  0x36   : > { %p17033_p9 = pneg %p17032_p7 }
  0x38   : > { %p17040_p1 = pnand %p17039_p2, %p17033_p9 }
  0x3a   : > { %17043 = shalt.err (!%p17040_p1)
}
  0x3b   : > { %15999 = dma.hbm_to_vmem [thread:$0]  (!%p17263_p11), %s20974_s2, 9216, %s17267_s26, [#allocation7], %s17148_s25, %s17148_s25, %s17149_s27  }
  0x3c   : > { %s17322_s28 = sadd.s32 1, %s17144_s16   ;;  %s34_s24 = sadd.s32 1, %s17140_s15 }
  0x3d   : > { %s31_s29 = ssub.s32 %s17144_s16, %s17322_s28  ;;  %p41_p13 = scmp.ne.s32.totalorder %s17140_s15, %s17136_s14 }
  0x3e   : > { %p32_p6 = scmp.eq.s32.totalorder %s31_s29, 0  ;;  %p42_p10 = scmp.eq.s32.totalorder %s17144_s16, 0 }
  0x3f   : > { %p21042_p3 = scmp.eq.s32.totalorder %s17233_s17, 1  ;;  %p16010_p7 = scmp.lt.s32.totalorder %s17144_s16, 2 }
  0x40   : > { %s17338_s11 = scalar_select %p32_p6, %s17140_s15, %s34_s24  }
  0x41   : > { %p17332_p5 = por %p21042_p3, %p41_p13  ;;  %p43_p9 = por %p42_p10, %p41_p13 }
  0x42   : > { %s333_s12 = sand.u32 1, %s17140_s15   ;;  %s14826_s26 = sshll.u32 %s17144_s16, 13 }
  0x43   : > { %s21043_s30 = scalar_select %p17332_p5, 1, 0 }
  0x44   : > { %s13955_s18 = sshll.u32 %s333_s12, 9  ;;  %s17345_s22 = scalar_lea.hbm %s20972_s0, %s14826_s26 }
  0x45   : > { %s337_s23 = scalar_lea.vmem [#allocation3], %s13955_s18  ;;  %p17349_p11 = pnand %p16010_p7, %p43_p9 }
  0x46   : > { %s345_s13 = sshll.u32 %s337_s23, 4  ;;  %s17353_s24 = scalar_lea.sflag [#allocation4], %s333_s12  ;;  %s17347_s13 = int_to_ptr.vmem [resolvable:$true] %s345_s13 }
  0x47   : > { %s17044_s29 = scalar_lea.hbm %s17345_s22, 8192  ;;  %p17046_p0 = pneg %p17349_p11 }
  0x48   : > { %p17045_p12 = scmp.ne.s32.totalorder %s17345_s22, %s17044_s29  ;;  %s17049_s25 = scalar_lea.hbm %s20972_s0, 16384 }
  0x49   : > { %p17050_p13 = scmp.lt.u32.totalorder %s17345_s22, %s20972_s0  ;;  %p17051_p6 = scmp.lt.u32.totalorder %s17049_s25, %s17044_s29 }
  0x4a   : > { %p17047_p2 = pnand %p17046_p0, %p17045_p12  ;;  %p17053_p3 = scmp.lt.u32.totalorder %s17044_s29, %s17345_s22 }
  0x4b   : > { %p17052_p10 = por %p17051_p6, %p17050_p13 }
  0x4c   : > { %p17048_p1 = pneg %p17047_p2 }
  0x4d   : > { %p17054_p7 = por %p17053_p3, %p17052_p10 }
  0x4f   : > { %p17055_p9 = pnand %p17054_p7, %p17048_p1 }
  0x51   : > { %17058 = shalt.err (!%p17055_p9)
}
  0x52   : > { %s17059_s12 = scalar_lea.vmem %s17347_s13, 8192  ;;  %s17150_s18 = smov [#allocation3]  }
  0x53   : > { %p17060_p12 = scmp.ne.s32.totalorder %s17347_s13, %s17059_s12  ;;  %s17064_s26 = sshll.u32 %s17150_s18, 4  ;;  %s17065_s26 = int_to_ptr.vmem [resolvable:$false] %s17064_s26 }
  0x54   : > { %s17066_s27 = scalar_lea.vmem %s17065_s26, 16384  ;;  %p17067_p4 = scmp.lt.s32.totalorder %s17347_s13, %s17065_s26 }
  0x55   : > { %p17062_p2 = pnand %p17060_p12, %p17046_p0  ;;  %p17068_p13 = scmp.lt.s32.totalorder %s17066_s27, %s17059_s12 }
  0x57   : > { %p17063_p5 = pneg %p17062_p2  ;;  %p17069_p6 = por %p17068_p13, %p17067_p4 }
  0x59   : > { %p17070_p10 = pnand %p17069_p6, %p17063_p5 }
  0x5b   : > { %17073 = shalt.err (!%p17070_p10)
}
  0x5c   : > { %s17151_s29 = smov 128   ;;  %s17152_s25 = smov 8  }
  0x5d   : > { %16003 = dma.hbm_to_vmem [thread:$0]  (!%p17349_p11), %s17345_s22, 8192, %s17347_s13, %s17353_s24, %s17151_s29, %s17151_s29, %s17152_s25  }
  0x5e   : > { %357 = sbr.rel (%p17252_p8) target bundleno = 2530 (0x9e2), region = 60 }
  0x65   : > { %s17384_s23 = sand.u32 1, %s17136_s14   ;;  %p21045_p4 = scmp.ne.s32.totalorder %s21037_s19, 0 }
  0x66   : > { %s13960_s12 = sshll.u32 %s17384_s23, 9  ;;  %s360_s18 = scalar_lea.sflag [#allocation4], %s17384_s23 }
  0x67   : > { %s17390_s26 = scalar_lea.vmem [#allocation3], %s13960_s12 }
  0x68   : > { %17119 = dma.done.wait (%p21045_p4), %s360_s18, 8192  }
  0x69   : > { %17121 = vsyncadd (%p21045_p4), %s360_s18, 4294959104  ;;  %p21046_p5 = scmp.eq.s32.totalorder %s17233_s17, 0 }
  0x6b   : > { %17123 = dma.done.wait (%p21046_p5), [#allocation7], 18432   ;;  %p21047_p8 = pmov %p21046_p5 }
  0x6c   : > { %v20988_v0 = vmov 0   ;;  %v16055_v1 = vld [vmem:[#allocation6] sm:$0xff]   ;;  %v16056_v2 = vld [vmem:[#allocation6 + $0x8] sm:$0xff]   ;;  %v16057_v3 = vld [vmem:[#allocation6 + $0x10] sm:$0xff]   ;;  %vm2464_vm0 = vsmask.f32 7424 }
  0x6d   : > { %17125 = vsyncadd (%p21047_p8), [#allocation7], 4294948864  ;;  %5538 = vmatprep.subr.bf16.mxu0 %v20988_v0  ;;  %411 = vst [vmem:[#allocation2] sm:$0xf] %v20988_v0  ;;  %v16058_v4 = vld [vmem:[#allocation6 + $0x18] sm:$0xff]   ;;  %v16059_v5 = vld [vmem:[#allocation6 + $0x20] sm:$0xff]  }
  0x6e   : > { %412 = vst [vmem:[#allocation2 + $0x4] sm:$0xf] %v20988_v0  ;;  %413 = vst [vmem:[#allocation2 + $0x8] sm:$0x1] %v20988_v0  ;;  %5539 = vmatpush1.bf16.msra.mxu0 %v16055_v1  ;;  %v16060_v8 = vld [vmem:[#allocation6 + $0x28] sm:$0xff]   ;;  %v519_v11 = vld [vmem:[%s17390_s26] sm:$0xff] }
  0x6f   : > { %414 = vst [vmem:[#allocation2 + $0xc] sm:$0xf] %v20988_v0  ;;  %415 = vst [vmem:[#allocation2 + $0x10] sm:$0xf] %v20988_v0  ;;  %5540 = vmatprep.subr.bf16.mxu0 %v20988_v0  ;;  %v520_v12 = vld [vmem:[%s17390_s26 + $0x8] sm:$0xff]  ;;  %v521_v22 = vld [vmem:[%s17390_s26 + $0x10] sm:$0xff] }
  0x70   : > { %416 = vst [vmem:[#allocation2 + $0x14] sm:$0x1] %v20988_v0  ;;  %417 = vst [vmem:[#allocation2 + $0x18] sm:$0xf] %v20988_v0  ;;  %v17523_v16 = vld [vmem:[%s20975_s3] ss:$0 sm:$0xff] }
  0x71   : > { %418 = vst [vmem:[#allocation2 + $0x1c] sm:$0xf] %v20988_v0  ;;  %419 = vst [vmem:[#allocation2 + $0x20] sm:$0x1] %v20988_v0  ;;  %v17528_v17 = vld [vmem:[%s20976_s4] ss:$0 sm:$0xff]  ;;  %v591_v18 = vmul.f32 %v17523_v16, %v519_v11  ;;  %v592_v19 = vmul.f32 %v17523_v16, %v520_v12  ;;  %v593_v27 = vmul.f32 %v17523_v16, %v521_v22 }
  0x72   : > { %420 = vst [vmem:[#allocation2 + $0x24] sm:$0xf] %v20988_v0  ;;  %421 = vst [vmem:[#allocation2 + $0x28] sm:$0xf] %v20988_v0  ;;  %5541 = vmatpush1.bf16.msra.mxu0 %v16056_v2  ;;  %vm917_vm1 = vsmask.f32 256 }
  0x73   : > { %422 = vst [vmem:[#allocation2 + $0x2c] sm:$0x1] %v20988_v0  ;;  %423 = vst [vmem:[#allocation2 + $0x30] sm:$0xf] %v20988_v0  ;;  %5542 = vmatprep.subr.bf16.mxu0 %v20988_v0  ;;  %vm918_vm2 = vsmask.f32 4368  ;;  %v661_v25 = vadd.f32 %v17528_v17, %v591_v18  ;;  %v662_v26 = vadd.f32 %v17528_v17, %v592_v19  ;;  %v663_v34 = vadd.f32 %v17528_v17, %v593_v27 }
  0x74   : > { %424 = vst [vmem:[#allocation2 + $0x34] sm:$0xf] %v20988_v0  ;;  %425 = vst [vmem:[#allocation2 + $0x38] sm:$0x1] %v20988_v0  ;;  %v1791_v6 = vld [vmem:[#allocation2] sm:$0xf] }
  0x75   : > { %426 = vst [vmem:[#allocation2 + $0x3c] sm:$0xf] %v20988_v0  ;;  %427 = vst [vmem:[#allocation2 + $0x40] sm:$0xf] %v20988_v0  ;;  %v1792_v7 = vld [vmem:[#allocation2 + $0x4] sm:$0xf]  ;;  %v14827_v32 = vpack.c.bf16 %v661_v25, %v661_v25  ;;  %v14828_v33 = vpack.c.bf16 %v662_v26, %v662_v26  ;;  %v14829_v48 = vpack.c.bf16 %v663_v34, %v663_v34 }
  0x76   : > { %428 = vst [vmem:[#allocation2 + $0x44] sm:$0x1] %v20988_v0  ;;  %429 = vst [vmem:[#allocation2 + $0x48] sm:$0xf] %v20988_v0  ;;  %5543 = vmatpush1.bf16.msra.mxu0 %v16057_v3  ;;  %v17513_v9 = vcombine.low %v1791_v6, %v1792_v7  ;;  %v522_v23 = vld [vmem:[%s17390_s26 + $0x18] sm:$0xff]  ;;  %v16061_v24 = vld [vmem:[#allocation6 + $0x30] sm:$0xff]  }
  0x77   : > { %430 = vst [vmem:[#allocation2 + $0x4c] sm:$0xf] %v20988_v0  ;;  %431 = vst [vmem:[#allocation2 + $0x50] sm:$0x1] %v20988_v0  ;;  %5544 = vmatprep.subr.bf16.mxu0 %v20988_v0  ;;  %v594_v28 = vmul.f32 %v17523_v16, %v522_v23  ;;  %vm1561_vm3 = vcmask 519168   ;;  %vm1569_vm5 = vcmask 516096  }
  0x78   : > { %432 = vst [vmem:[#allocation2 + $0x54] sm:$0xf] %v20988_v0  ;;  %433 = vst [vmem:[#allocation2 + $0x58] sm:$0xf] %v20988_v0  ;;  %v2466_v13 = vshrl.u32 %v17513_v9, 16  ;;  %v2468_v14 = vshll.u32 %v17513_v9, 16 }
  0x79   : > { %434 = vst [vmem:[#allocation2 + $0x5c] sm:$0x1] %v20988_v0  ;;  %435 = vst [vmem:[#allocation2 + $0x60] sm:$0xf] %v20988_v0  ;;  %vm1562_vm4 = vsmask.f32 7938  ;;  %v664_v35 = vadd.f32 %v17528_v17, %v594_v28 }
  0x7a   : > { %436 = vst [vmem:[#allocation2 + $0x64] sm:$0xf] %v20988_v0  ;;  %437 = vst [vmem:[#allocation2 + $0x68] sm:$0x1] %v20988_v0  ;;  %5545 = vmatpush1.bf16.msra.mxu0 %v16058_v4  ;;  %v2470_v20 = vrot.slane %v2468_v14, 1  ;;  %v523_v30 = vld [vmem:[%s17390_s26 + $0x20] sm:$0xff] }
  0x7b   : > { %438 = vst [vmem:[#allocation2 + $0x6c] sm:$0xf] %v20988_v0  ;;  %439 = vst [vmem:[#allocation2 + $0x70] sm:$0xf] %v20988_v0  ;;  %5546 = vmatprep.subr.bf16.mxu0 %v20988_v0  ;;  %v524_v31 = vld [vmem:[%s17390_s26 + $0x28] sm:$0xff]  ;;  %v525_v36 = vld [vmem:[%s17390_s26 + $0x30] sm:$0xff]  ;;  %v595_v39 = vmul.f32 %v17523_v16, %v523_v30  ;;  %v14830_v49 = vpack.c.bf16 %v664_v35, %v664_v35 }
  0x7c   : > { %440 = vst [vmem:[#allocation2 + $0x74] sm:$0x1] %v20988_v0  ;;  %441 = vst [vmem:[#allocation2 + $0x78] sm:$0xf] %v20988_v0  ;;  %v2471_v29 = vor.u32 %v2470_v20, %v2466_v13  ;;  %v16062_v37 = vld [vmem:[#allocation6 + $0x38] sm:$0xff]   ;;  %v596_v40 = vmul.f32 %v17523_v16, %v524_v31  ;;  %v597_v42 = vmul.f32 %v17523_v16, %v525_v36  ;;  %v921_v43 = vshrl.u32 %v14827_v32, 16 }
  0x7d   : > { %442 = vst [vmem:[#allocation2 + $0x7c] sm:$0xf] %v20988_v0  ;;  %443 = vst [vmem:[#allocation2 + $0x80] sm:$0x1] %v20988_v0  ;;  %v526_v41 = vld [vmem:[%s17390_s26 + $0x38] sm:$0xff]  ;;  %v924_v44 = vshll.u32 %v14827_v32, 16  ;;  %v665_v50 = vadd.f32 %v17528_v17, %v595_v39 }
  0x7e   : > { %444 = vst [vmem:[#allocation2 + $0x84] sm:$0xf] %v20988_v0  ;;  %445 = vst [vmem:[#allocation2 + $0x88] sm:$0xf] %v20988_v0  ;;  %5547 = vmatpush1.bf16.msra.mxu0 %v16059_v5  ;;  %v929_v45 = vshrl.u32 %v14828_v33, 16  ;;  %v932_v46 = vshll.u32 %v14828_v33, 16  ;;  %v666_v51 = vadd.f32 %v17528_v17, %v596_v40  ;;  %v598_v56 = vmul.f32 %v17523_v16, %v526_v41 }
  0x7f   : > { %446 = vst [vmem:[#allocation2 + $0x8c] sm:$0x1] %v20988_v0  ;;  %447 = vst [vmem:[#allocation2 + $0x90] sm:$0xf] %v20988_v0  ;;  %5548 = vmatprep.subr.bf16.mxu0 %v20988_v0  ;;  %v21048_v47 = vmov 0  ;;  %v923_v52 = vrot.slane %v921_v43, 7  ;;  %v667_v57 = vadd.f32 %v17528_v17, %v597_v42 }
  0x80   : > { %448 = vst [vmem:[#allocation2 + $0x94] sm:$0xf] %v20988_v0  ;;  %449 = vst [vmem:[#allocation2 + $0x98] sm:$0x1] %v20988_v0  ;;  %v931_v53 = vrot.slane %v929_v45, 7  ;;  %v938_v60 = vshrl.u32 %v14829_v48, 16  ;;  %v668_v18 = vadd.f32 %v17528_v17, %v598_v56 }
  0x81   : > { %450 = vst [vmem:[#allocation2 + $0x9c] sm:$0xf] %v20988_v0  ;;  %451 = vst [vmem:[#allocation2 + $0xa0] sm:$0xf] %v20988_v0  ;;  %v1564_v55 = vld [vmem:[#allocation2 + $0xc] sm:$0xf]  ;;  %v926_v2 = vor.u32 %v924_v44, %v923_v52  ;;  %v14833_v34 = vpack.c.bf16 %v667_v57, %v667_v57 }
  0x82   : > { %452 = vst [vmem:[#allocation2 + $0xa4] sm:$0x1] %v20988_v0  ;;  %453 = vst [vmem:[#allocation2 + $0xa8] sm:$0xf] %v20988_v0  ;;  %5549 = vmatpush1.bf16.msra.mxu0 %v16060_v8  ;;  %v1571_v59 = vld [vmem:[#allocation2 + $0x14] sm:$0x1]  ;;  %v934_v4 = vor.u32 %v932_v46, %v931_v53  ;;  %v14831_v8 = vpack.c.bf16 %v665_v50, %v665_v50 }
  0x83   : > { %454 = vst [vmem:[#allocation2 + $0xac] sm:$0xf] %v20988_v0  ;;  %455 = vst [vmem:[#allocation2 + $0xb0] sm:$0x1] %v20988_v0  ;;  %5550 = vmatprep.subr.bf16.mxu0 %v20988_v0  ;;  %v941_v61 = vshll.u32 %v14829_v48, 16  ;;  %v946_v62 = vshrl.u32 %v14830_v49, 16 }
  0x84   : > { %456 = vst [vmem:[#allocation2 + $0xb4] sm:$0xf] %v20988_v0  ;;  %457 = vst [vmem:[#allocation2 + $0xb8] sm:$0xf] %v20988_v0  ;;  %v949_v63 = vshll.u32 %v14830_v49, 16  ;;  %v16063_v1 = vld [vmem:[#allocation6 + $0x40] sm:$0xff]  }
  0x85   : > { %458 = vst [vmem:[#allocation2 + $0xbc] sm:$0x1] %v20988_v0  ;;  %459 = vst [vmem:[#allocation2 + $0xc0] sm:$0xf] %v20988_v0  ;;  %v927_v3 = vrot.slane %v923_v52, 4  ;;  %v936_v5 = vrot.slane %v931_v53, 4 }
  0x86   : > { %460 = vst [vmem:[#allocation2 + $0xc4] sm:$0xf] %v20988_v0  ;;  %461 = vst [vmem:[#allocation2 + $0xc8] sm:$0x1] %v20988_v0  ;;  %5551 = vmatpush1.bf16.msra.mxu0 %v16061_v24  ;;  %v940_v6 = vrot.slane %v938_v60, 7  ;;  %v948_v7 = vrot.slane %v946_v62, 7 }
  0x87   : > { %462 = vst [vmem:[#allocation2 + $0xcc] sm:$0xf] %v20988_v0  ;;  %463 = vst [vmem:[#allocation2 + $0xd0] sm:$0xf] %v20988_v0  ;;  %5552 = vmatprep.subr.bf16.mxu0 %v20988_v0  ;;  %v1574_v14 = vld [vmem:[#allocation2 + $0x18] sm:$0xf] }
  0x88   : > { %464 = vst [vmem:[#allocation2 + $0xd4] sm:$0x1] %v20988_v0  ;;  %465 = vst [vmem:[#allocation2 + $0xd8] sm:$0xf] %v20988_v0  ;;  %v16064_v19 = vld [vmem:[#allocation6 + $0x48] sm:$0xff]   ;;  %v943_v20 = vor.u32 %v941_v61, %v940_v6  ;;  %v951_v22 = vor.u32 %v949_v63, %v948_v7  ;;  %v953_v23 = vrot.slane %v948_v7, 4 }
  0x89   : > { %466 = vst [vmem:[#allocation2 + $0xdc] sm:$0xf] %v20988_v0  ;;  %467 = vst [vmem:[#allocation2 + $0xe0] sm:$0x1] %v20988_v0  ;;  %v527_v24 = vld [vmem:[%s17390_s26 + $0x40] sm:$0xff]  ;;  %v955_v25 = vshrl.u32 %v14831_v8, 16 }
  0x8a   : > { %468 = vst [vmem:[#allocation2 + $0xe4] sm:$0xf] %v20988_v0  ;;  %469 = vst [vmem:[#allocation2 + $0xe8] sm:$0xf] %v20988_v0  ;;  %5553 = vmatpush1.bf16.msra.mxu0 %v16062_v37  ;;  %v958_v26 = vshll.u32 %v14831_v8, 16  ;;  %v529_v30 = vld [vmem:[%s17390_s26 + $0x50] sm:$0xff]  ;;  %v14834_v37 = vpack.c.bf16 %v668_v18, %v668_v18 }
  0x8b   : > { %470 = vst [vmem:[#allocation2 + $0xec] sm:$0x1] %v20988_v0  ;;  %471 = vst [vmem:[#allocation2 + $0xf0] sm:$0xf] %v20988_v0  ;;  %5554 = vmatprep.subr.bf16.mxu0 %v20988_v0  ;;  %v957_v35 = vrot.slane %v955_v25, 7  ;;  %v972_v41 = vshrl.u32 %v14833_v34, 16  ;;  %v601_v44 = vmul.f32 %v17523_v16, %v529_v30 }
  0x8c   : > { %472 = vst [vmem:[#allocation2 + $0xf4] sm:$0xf] %v20988_v0  ;;  %473 = vst [vmem:[#allocation2 + $0xf8] sm:$0x1] %v20988_v0  ;;  %v1581_v39 = vld [vmem:[#allocation2 + $0x24] sm:$0xf] }
  0x8d   : > { %474 = vst [vmem:[#allocation2 + $0xfc] sm:$0xf] %v20988_v0  ;;  %475 = vst [vmem:[#allocation2 + $0x100] sm:$0xf] %v20988_v0  ;;  %v1585_v40 = vld [vmem:[#allocation2 + $0x2c] sm:$0x1]  ;;  %v960_v46 = vor.u32 %v958_v26, %v957_v35  ;;  %v671_v18 = vadd.f32 %v17528_v17, %v601_v44 }
  0x8e   : > { %476 = vst [vmem:[#allocation2 + $0x104] sm:$0x1] %v20988_v0  ;;  %477 = vst [vmem:[#allocation2 + $0x108] sm:$0xf] %v20988_v0  ;;  %5555 = vmatpush1.bf16.msra.mxu0 %v16063_v1  ;;  %v975_v42 = vshll.u32 %v14833_v34, 16  ;;  %v16065_v45 = vld [vmem:[#allocation6 + $0x50] sm:$0xff]  }
  0x8f   : > { %478 = vst [vmem:[#allocation2 + $0x10c] sm:$0xf] %v20988_v0  ;;  %479 = vst [vmem:[#allocation2 + $0x110] sm:$0x1] %v20988_v0  ;;  %5556 = vmatprep.subr.bf16.mxu0 %v20988_v0  ;;  %v961_v48 = vrot.slane %v957_v35, 4  ;;  %v980_v52 = vshrl.u32 %v14834_v37, 16 }
  0x90   : > { %480 = vst [vmem:[#allocation2 + $0x114] sm:$0xf] %v20988_v0  ;;  %481 = vst [vmem:[#allocation2 + $0x118] sm:$0xf] %v20988_v0  ;;  %v983_v53 = vshll.u32 %v14834_v37, 16  ;;  %v530_v56 = vld [vmem:[%s17390_s26 + $0x58] sm:$0xff] }
  0x91   : > { %482 = vst [vmem:[#allocation2 + $0x11c] sm:$0x1] %v20988_v0  ;;  %483 = vst [vmem:[#allocation2 + $0x120] sm:$0xf] %v20988_v0  ;;  %v602_v8 = vmul.f32 %v17523_v16, %v530_v56  ;;  %v16068_v34 = vld [vmem:[#allocation6 + $0x68] sm:$0xff]   ;;  %v531_v44 = vld [vmem:[%s17390_s26 + $0x60] sm:$0xff] }
  0x92   : > { %484 = vst [vmem:[#allocation2 + $0x124] sm:$0xf] %v20988_v0  ;;  %485 = vst [vmem:[#allocation2 + $0x128] sm:$0x1] %v20988_v0  ;;  %5557 = vmatpush1.bf16.msra.mxu0 %v16064_v19  ;;  %v16069_v56 = vld [vmem:[#allocation6 + $0x70] sm:$0xff]   ;;  %vm2977_vm9 = vcmask 1046528  }
  0x93   : > { %486 = vst [vmem:[#allocation2 + $0x12c] sm:$0xf] %v20988_v0  ;;  %487 = vst [vmem:[#allocation2 + $0x130] sm:$0xf] %v20988_v0  ;;  %5558 = vmatprep.subr.bf16.mxu0 %v20988_v0  ;;  %v16250_v58 = vld [vmem:[#allocation6 + $0x1f8] sm:$0xff]   ;;  %vm8156_vm12 = vcmask 1043456  }
  0x94   : > { %488 = vst [vmem:[#allocation2 + $0x134] sm:$0x1] %v20988_v0  ;;  %489 = vst [vmem:[#allocation2 + $0x138] sm:$0xf] %v20988_v0  ;;  %vm8161_vm13 = vcmask 1040384   ;;  %s20516_s20 = scalar_lea.vmem [#allocation9], %s13960_s12 }
  0x95   : > { %490 = vst [vmem:[#allocation2 + $0x13c] sm:$0xf] %v20988_v0  ;;  %491 = vst [vmem:[#allocation2 + $0x140] sm:$0x1] %v20988_v0  ;;  %s14956_s27 = sshll.u32 %s17233_s17, 13  ;;  %s13858_s29 = sshll.u32 %s20516_s20, 4  ;;  %s20921_s29 = int_to_ptr.vmem [resolvable:$true] %s13858_s29 }
  0x96   : > { %492 = vst [vmem:[#allocation2 + $0x144] sm:$0xf] %v20988_v0  ;;  %493 = vst [vmem:[#allocation2 + $0x148] sm:$0xf] %v20988_v0  ;;  %5559 = vmatpush1.bf16.msra.mxu0 %v16065_v45  ;;  %s20919_s21 = scalar_lea.hbm %s20982_s10, %s14956_s27  ;;  %s13844_s22 = scalar_lea.sflag [#allocation5], %s17384_s23 }
  0x97   : > { %494 = vst [vmem:[#allocation2 + $0x14c] sm:$0x1] %v20988_v0  ;;  %495 = vst [vmem:[#allocation2 + $0x150] sm:$0xf] %v20988_v0  ;;  %5560 = vmatprep.subr.bf16.mxu0 %v20988_v0  ;;  %s17074_s13 = scalar_lea.vmem %s20921_s29, 8192  ;;  %p21235_p0 = scmp.ne.s32.totalorder %s21043_s30, 0 }
  0x98   : > { %496 = vst [vmem:[#allocation2 + $0x154] sm:$0xf] %v20988_v0  ;;  %497 = vst [vmem:[#allocation2 + $0x158] sm:$0x1] %v20988_v0  ;;  %p17075_p11 = scmp.ne.s32.totalorder %s20921_s29, %s17074_s13  ;;  %s17154_s12 = smov [#allocation9]  }
  0x99   : > { %498 = vst [vmem:[#allocation2 + $0x15c] sm:$0xf] %v20988_v0  ;;  %499 = vst [vmem:[#allocation2 + $0x160] sm:$0xf] %v20988_v0  ;;  %s17078_s24 = sshll.u32 %s17154_s12, 4  ;;  %s17079_s24 = int_to_ptr.vmem [resolvable:$false] %s17078_s24 }
  0x9a   : > { %500 = vst [vmem:[#allocation2 + $0x164] sm:$0x1] %v20988_v0  ;;  %501 = vst [vmem:[#allocation2 + $0x168] sm:$0xf] %v20988_v0  ;;  %p17076_p1 = pnand %p17075_p11, %p21235_p0  ;;  %s17080_s27 = scalar_lea.vmem %s17079_s24, 16384 }
  0x9b   : > { %502 = vst [vmem:[#allocation2 + $0x16c] sm:$0xf] %v20988_v0  ;;  %503 = vst [vmem:[#allocation2 + $0x170] sm:$0x1] %v20988_v0  ;;  %p17081_p7 = scmp.lt.s32.totalorder %s20921_s29, %s17079_s24  ;;  %p17082_p9 = scmp.lt.s32.totalorder %s17080_s27, %s17074_s13 }
  0x9c   : > { %504 = vst [vmem:[#allocation2 + $0x174] sm:$0xf] %v20988_v0  ;;  %505 = vst [vmem:[#allocation2 + $0x178] sm:$0xf] %v20988_v0  ;;  %p17077_p3 = pneg %p17076_p1 }
  0x9d   : > { %506 = vst [vmem:[#allocation2 + $0x17c] sm:$0x1] %v20988_v0  ;;  %507 = vst [vmem:[#allocation2 + $0x180] sm:$0xf] %v20988_v0  ;;  %p17083_p12 = por %p17082_p9, %p17081_p7 }
  0x9e   : > { %508 = vst [vmem:[#allocation2 + $0x184] sm:$0xf] %v20988_v0  ;;  %509 = vst [vmem:[#allocation2 + $0x188] sm:$0x1] %v20988_v0 }
  0x9f   : > { %510 = vst [vmem:[#allocation2 + $0x18c] sm:$0xf] %v20988_v0  ;;  %511 = vst [vmem:[#allocation2 + $0x190] sm:$0xf] %v20988_v0  ;;  %p17084_p2 = pnand %p17083_p12, %p17077_p3 }
  0xa0   : > { %512 = vst [vmem:[#allocation2 + $0x194] sm:$0x1] %v20988_v0  ;;  %513 = vst [vmem:[#allocation2 + $0x198] sm:$0xf] %v20988_v0 }
  0xa1   : > { %514 = vst [vmem:[#allocation2 + $0x19c] sm:$0xf] %v20988_v0  ;;  %515 = vst [vmem:[#allocation2 + $0x1a0] sm:$0x1] %v20988_v0 }
  0xa2   : > { %516 = vst [vmem:[#allocation2 + $0x1a4] sm:$0xf] %v20988_v0  ;;  %517 = vst [vmem:[#allocation2 + $0x1a8] sm:$0xf] %v20988_v0 }
  0xa3   : > { %518 = vst [vmem:[#allocation2 + $0x1ac] sm:$0x1] %v20988_v0  ;;  %v16072_v10 = vld [vmem:[#allocation2 + $0x8] ss:$0 sps:$4 sm:$0x11]   ;;  %vm17552_vm6 = vmor %vm917_vm1, %vm918_vm2 }
  0xa4   : > { %v2473_v15 = vshll.u32 %v16072_v10, 16  ;;  %v21049_v47 = vsel %vm17552_vm6, 4294967295, %v21048_v47  ;;  %vm17560_vm7 = vmand %vm1561_vm3, %vm1562_vm4  ;;  %v14832_v10 = vpack.c.bf16 %v666_v51, %v666_v51  ;;  %v935_v11 = vsel %vm17552_vm6, %v927_v3, %v934_v4  ;;  %v1588_v4 = vld [vmem:[#allocation2 + $0x30] sm:$0xf] }
  0xa5   : > { %21050 = vst [vmem:[#allocation15_spill] sm:$0xff] %v21049_v47  ;;  %vm17568_vm8 = vmand %vm1569_vm5, %vm917_vm1  ;;  %v1565_v12 = vsel %vm17560_vm7, %v926_v2, %v1564_v55  ;;  %v1575_v32 = vsel %vm17560_vm7, %v943_v20, %v1574_v14  ;;  %v974_v51 = vrot.slane %v972_v41, 7  ;;  %v1582_v61 = vsel %vm17560_vm7, %v960_v46, %v1581_v39 }
  0xa6   : > { %v2475_v21 = vrot.slane %v2473_v15, 1  ;;  %v1572_v13 = vsel %vm17568_vm8, %v936_v5, %v1571_v59  ;;  %v1578_v15 = vld [vmem:[#allocation2 + $0x20] sm:$0x1]  ;;  %1566 = vst [vmem:[#allocation2 + $0xc] sm:$0xf] %v1565_v12  ;;  %v963_v27 = vshrl.u32 %v14832_v10, 16  ;;  %v672_v20 = vadd.f32 %v17528_v17, %v602_v8  ;;  %vm19087_vm14 = vmand %vm8156_vm12, %vm1562_vm4 }
  0xa7   : > { %1568 = vst.msk [vmem:[#allocation2 + $0x10] sm:$0xf] %vm1561_vm3, %v935_v11  ;;  %1573 = vst [vmem:[#allocation2 + $0x14] sm:$0x1] %v1572_v13  ;;  %v966_v28 = vshll.u32 %v14832_v10, 16  ;;  %v1579_v33 = vsel %vm17568_vm8, %v953_v23, %v1578_v15  ;;  %v977_v1 = vor.u32 %v975_v42, %v974_v51  ;;  %v978_v2 = vrot.slane %v974_v51, 4 }
  0xa8   : > { %v2476_v38 = vsel %vm2464_vm0, %v2471_v29, %v2475_v21  ;;  %v944_v21 = vrot.slane %v940_v6, 4  ;;  %v528_v29 = vld [vmem:[%s17390_s26 + $0x48] sm:$0xff]  ;;  %1576 = vst [vmem:[#allocation2 + $0x18] sm:$0xf] %v1575_v32  ;;  %1580 = vst [vmem:[#allocation2 + $0x20] sm:$0x1] %v1579_v33  ;;  %v14837_v32 = vpack.c.bf16 %v671_v18, %v671_v18  ;;  %v14838_v33 = vpack.c.bf16 %v672_v20, %v672_v20 }
  0xa9   : > { %5570 = vmatprep.mubr.bf16.mxu0 %v2476_v38  ;;  %v965_v36 = vrot.slane %v963_v27, 7  ;;  %v599_v38 = vmul.f32 %v17523_v16, %v527_v24  ;;  %v600_v43 = vmul.f32 %v17523_v16, %v528_v29  ;;  %1583 = vst [vmem:[#allocation2 + $0x24] sm:$0xf] %v1582_v61  ;;  %v982_v3 = vrot.slane %v980_v52, 7  ;;  %v16066_v5 = vld [vmem:[#allocation6 + $0x58] sm:$0xff]   ;;  %v533_v8 = vld [vmem:[%s17390_s26 + $0x70] sm:$0xff]  ;;  %vm19095_vm2 = vmand %vm8161_vm13, %vm917_vm1 }
  0xaa   : > { %v952_v31 = vsel %vm17552_vm6, %v944_v21, %v951_v22  ;;  %v1592_v12 = vld [vmem:[#allocation2 + $0x38] sm:$0x1]  ;;  %v1589_v14 = vsel %vm17560_vm7, %v977_v1, %v1588_v4  ;;  %5561 = vmatpush1.bf16.msra.mxu0 %v16066_v5  ;;  %v16067_v21 = vld [vmem:[#allocation6 + $0x60] sm:$0xff]   ;;  %v1017_v1 = vshll.u32 %v14838_v33, 16 }
  0xab   : > { %1577 = vst.msk [vmem:[#allocation2 + $0x1c] sm:$0xf] %vm1561_vm3, %v952_v31  ;;  %v968_v49 = vor.u32 %v966_v28, %v965_v36  ;;  %v970_v50 = vrot.slane %v965_v36, 4  ;;  %v669_v55 = vadd.f32 %v17528_v17, %v599_v38  ;;  %v670_v63 = vadd.f32 %v17528_v17, %v600_v43  ;;  %1590 = vst [vmem:[#allocation2 + $0x30] sm:$0xf] %v1589_v14  ;;  %v535_v18 = vld [vmem:[%s17390_s26 + $0x80] sm:$0xff] }
  0xac   : > { %v985_v11 = vor.u32 %v983_v53, %v982_v3  ;;  %v987_v13 = vrot.slane %v982_v3, 4  ;;  %5562 = vmatprep.subr.bf16.mxu0 %v20988_v0  ;;  %v1595_v28 = vld [vmem:[#allocation2 + $0x3c] sm:$0xf]  ;;  %v1599_v43 = vld [vmem:[#allocation2 + $0x44] sm:$0x1]  ;;  %v1014_v53 = vshrl.u32 %v14838_v33, 16 }
  0xad   : > { %v1793_v57 = vld [vmem:[#allocation2 + $0xc] sm:$0xf]  ;;  %v969_v60 = vsel %vm17552_vm6, %v961_v48, %v968_v49  ;;  %v1586_v62 = vsel %vm17568_vm8, %v970_v50, %v1585_v40  ;;  %v14835_v6 = vpack.c.bf16 %v669_v55, %v669_v55  ;;  %v14836_v7 = vpack.c.bf16 %v670_v63, %v670_v63  ;;  %v532_v50 = vld [vmem:[%s17390_s26 + $0x68] sm:$0xff]  ;;  %v1602_v55 = vld [vmem:[#allocation2 + $0x48] sm:$0xf] }
  0xae   : > { %v1794_v59 = vld [vmem:[#allocation2 + $0x10] sm:$0xf]  ;;  %1584 = vst.msk [vmem:[#allocation2 + $0x28] sm:$0xf] %vm1561_vm3, %v969_v60  ;;  %1587 = vst [vmem:[#allocation2 + $0x2c] sm:$0x1] %v1586_v62  ;;  %v986_v19 = vsel %vm17552_vm6, %v978_v2, %v985_v11  ;;  %v1593_v22 = vsel %vm17568_vm8, %v987_v13, %v1592_v12  ;;  %5563 = vmatpush1.bf16.msra.mxu0 %v16067_v21  ;;  %v603_v62 = vmul.f32 %v17523_v16, %v531_v44 }
  0xaf   : > { %v17608_v10 = vcombine.low %v1793_v57, %v1794_v59  ;;  %v989_v15 = vshrl.u32 %v14835_v6, 16  ;;  %1591 = vst.msk [vmem:[#allocation2 + $0x34] sm:$0xf] %vm1561_vm3, %v986_v19  ;;  %v992_v24 = vshll.u32 %v14835_v6, 16  ;;  %v997_v25 = vshrl.u32 %v14836_v7, 16  ;;  %5564 = vmatprep.subr.bf16.mxu0 %v20988_v0  ;;  %v16070_v19 = vld [vmem:[#allocation6 + $0x78] sm:$0xff]  }
  0xb0   : > { %v16075_v26 = vld [vmem:[#allocation2 + $0x14] ss:$0 sps:$4 sm:$0x11]   ;;  %1594 = vst [vmem:[#allocation2 + $0x38] sm:$0x1] %v1593_v22  ;;  %v1000_v37 = vshll.u32 %v14836_v7, 16  ;;  %v604_v2 = vmul.f32 %v17523_v16, %v532_v50 }
  0xb1   : > { %v991_v23 = vrot.slane %v989_v15, 7  ;;  %v2480_v27 = vshll.u32 %v17608_v10, 16  ;;  %v1795_v29 = vld [vmem:[#allocation2 + $0x18] sm:$0xf]  ;;  %v999_v36 = vrot.slane %v997_v25, 7  ;;  %v2478_v39 = vshrl.u32 %v17608_v10, 16 }
  0xb2   : > { %v1796_v30 = vld [vmem:[#allocation2 + $0x1c] sm:$0xf]  ;;  %v2485_v41 = vshll.u32 %v16075_v26, 16  ;;  %v1006_v48 = vshrl.u32 %v14837_v32, 16  ;;  %v1009_v49 = vshll.u32 %v14837_v32, 16  ;;  %5565 = vmatpush1.bf16.msra.mxu0 %v16068_v34  ;;  %v1016_v63 = vrot.slane %v1014_v53, 7 }
  0xb3   : > { %v994_v31 = vor.u32 %v992_v24, %v991_v23  ;;  %v995_v35 = vrot.slane %v991_v23, 4  ;;  %v2482_v40 = vrot.slane %v2480_v27, 1  ;;  %v17625_v42 = vcombine.low %v1795_v29, %v1796_v30  ;;  %v16077_v51 = vld [vmem:[#allocation2 + $0x20] ss:$0 sps:$4 sm:$0x11]   ;;  %5566 = vmatprep.subr.bf16.mxu0 %v20988_v0  ;;  %v534_v15 = vld [vmem:[%s17390_s26 + $0x78] sm:$0xff] }
  0xb4   : > { %v1002_v45 = vor.u32 %v1000_v37, %v999_v36  ;;  %v1004_v46 = vrot.slane %v999_v36, 4  ;;  %v1797_v52 = vld [vmem:[#allocation2 + $0x24] sm:$0xf]  ;;  %v1008_v61 = vrot.slane %v1006_v48, 7  ;;  %v2487_v4 = vrot.slane %v2485_v41, 1 }
  0xb5   : > { %v1596_v38 = vsel %vm17560_vm7, %v994_v31, %v1595_v28  ;;  %v1798_v57 = vld [vmem:[#allocation2 + $0x28] sm:$0xf]  ;;  %v2483_v3 = vor.u32 %v2482_v40, %v2478_v39  ;;  %v2492_v5 = vshll.u32 %v17625_v42, 16  ;;  %v1606_v7 = vld [vmem:[#allocation2 + $0x50] sm:$0x1]  ;;  %v1019_v13 = vor.u32 %v1017_v1, %v1016_v63  ;;  %v536_v31 = vld [vmem:[%s17390_s26 + $0x88] sm:$0xff] }
  0xb6   : > { %1597 = vst [vmem:[#allocation2 + $0x3c] sm:$0xf] %v1596_v38  ;;  %v1003_v59 = vsel %vm17552_vm6, %v995_v35, %v1002_v45  ;;  %v1600_v60 = vsel %vm17568_vm8, %v1004_v46, %v1599_v43  ;;  %v1011_v6 = vor.u32 %v1009_v49, %v1008_v61  ;;  %v17639_v11 = vcombine.low %v1797_v52, %v1798_v57  ;;  %v16080_v34 = vld [vmem:[#allocation2 + $0x2c] ss:$0 sps:$4 sm:$0x11]   ;;  %v16073_v38 = vld [vmem:[#allocation6 + $0x80] sm:$0xff]  }
  0xb7   : > { %1598 = vst.msk [vmem:[#allocation2 + $0x40] sm:$0xf] %vm1561_vm3, %v1003_v59  ;;  %1601 = vst [vmem:[#allocation2 + $0x44] sm:$0x1] %v1600_v60  ;;  %v1012_v12 = vrot.slane %v1008_v61, 4  ;;  %v1021_v14 = vrot.slane %v1016_v63, 4  ;;  %5567 = vmatpush1.bf16.msra.mxu0 %v16069_v56  ;;  %v673_v23 = vadd.f32 %v17528_v17, %v603_v62  ;;  %v674_v26 = vadd.f32 %v17528_v17, %v604_v2 }
  0xb8   : > { %v2490_v20 = vshrl.u32 %v17625_v42, 16  ;;  %v2497_v21 = vshll.u32 %v16077_v51, 16  ;;  %v1603_v22 = vsel %vm17560_vm7, %v1011_v6, %v1602_v55  ;;  %5568 = vmatprep.subr.bf16.mxu0 %v20988_v0  ;;  %v605_v27 = vmul.f32 %v17523_v16, %v533_v8  ;;  %v1799_v44 = vld [vmem:[#allocation2 + $0x30] sm:$0xf]  ;;  %v1800_v45 = vld [vmem:[#allocation2 + $0x34] sm:$0xf] }
  0xb9   : > { %v1020_v24 = vsel %vm17552_vm6, %v1012_v12, %v1019_v13  ;;  %1604 = vst [vmem:[#allocation2 + $0x48] sm:$0xf] %v1603_v22  ;;  %v1607_v25 = vsel %vm17568_vm8, %v1021_v14, %v1606_v7  ;;  %v2494_v28 = vrot.slane %v2492_v5, 1  ;;  %v14839_v29 = vpack.c.bf16 %v673_v23, %v673_v23  ;;  %v1609_v60 = vld [vmem:[#allocation2 + $0x54] sm:$0xf]  ;;  %v16078_v62 = vld [vmem:[#allocation6 + $0x88] sm:$0xff]  }
  0xba   : > { %1605 = vst.msk [vmem:[#allocation2 + $0x4c] sm:$0xf] %vm1561_vm3, %v1020_v24  ;;  %1608 = vst [vmem:[#allocation2 + $0x50] sm:$0x1] %v1607_v25  ;;  %v606_v30 = vmul.f32 %v17523_v16, %v534_v15  ;;  %v607_v32 = vmul.f32 %v17523_v16, %v535_v18  ;;  %v2488_v33 = vsel %vm2464_vm0, %v2483_v3, %v2487_v4  ;;  %v2504_v35 = vshll.u32 %v17639_v11, 16  ;;  %v537_v15 = vld [vmem:[%s17390_s26 + $0x90] sm:$0xff] }
  0xbb   : > { %v14840_v36 = vpack.c.bf16 %v674_v26, %v674_v26  ;;  %v675_v37 = vadd.f32 %v17528_v17, %v605_v27  ;;  %5569 = vmatpush1.bf16.msra.mxu0 %v16070_v19  ;;  %v2499_v39 = vrot.slane %v2497_v21, 1  ;;  %v1023_v40 = vshrl.u32 %v14839_v29, 16  ;;  %v1613_v5 = vld [vmem:[#allocation2 + $0x5c] sm:$0x1]  ;;  %v16083_v19 = vld [vmem:[#allocation6 + $0x90] sm:$0xff]  }
  0xbc   : > { %v1026_v41 = vshll.u32 %v14839_v29, 16  ;;  %v676_v43 = vadd.f32 %v17528_v17, %v606_v30  ;;  %5827 = vmatprep.subr.bf16.mxu0 %v20988_v0  ;;  %v608_v50 = vmul.f32 %v17523_v16, %v536_v31  ;;  %v2495_v51 = vor.u32 %v2494_v28, %v2490_v20  ;;  %v17671_v7 = vld [vmem:[#allocation2 + $0x38] ss:$0 sps:$4 sm:$0x11]   ;;  %v1616_v27 = vld [vmem:[#allocation2 + $0x60] sm:$0xf] }
  0xbd   : > { %v1031_v46 = vshrl.u32 %v14840_v36, 16  ;;  %v1034_v48 = vshll.u32 %v14840_v36, 16  ;;  %v14841_v49 = vpack.c.bf16 %v675_v37, %v675_v37  ;;  %v2502_v52 = vshrl.u32 %v17639_v11, 16  ;;  %v1620_v28 = vld [vmem:[#allocation2 + $0x68] sm:$0x1] }
  0xbe   : > { %v1025_v53 = vrot.slane %v1023_v40, 7  ;;  %v677_v55 = vadd.f32 %v17528_v17, %v607_v32  ;;  %5571 = vmatmul.mubr.bf16.vlgmr.msra.gmra.mrb[0].mxu0 %v17513_v9  ;;  %v2506_v56 = vrot.slane %v2504_v35, 1  ;;  %v2509_v57 = vshll.u32 %v16080_v34, 16  ;;  %v538_v32 = vld [vmem:[%s17390_s26 + $0x98] sm:$0xff]  ;;  %v1801_v40 = vld [vmem:[#allocation2 + $0x3c] sm:$0xf] }
  0xbf   : > { %v1033_v59 = vrot.slane %v1031_v46, 7  ;;  %v14842_v61 = vpack.c.bf16 %v676_v43, %v676_v43  ;;  %5828 = vmatpush1.bf16.msra.mxu0 %v16073_v38  ;;  %5578 = vmatprep.mubr.bf16.mxu0 %v2488_v33  ;;  %v17667_v63 = vcombine.low %v1799_v44, %v1800_v45  ;;  %v1040_v3 = vshrl.u32 %v14841_v49, 16  ;;  %v16088_v36 = vld [vmem:[#allocation6 + $0x98] sm:$0xff]  }
  0xc0   : > { %v1028_v1 = vor.u32 %v1026_v41, %v1025_v53  ;;  %v1029_v2 = vrot.slane %v1025_v53, 4  ;;  %5829 = vmatprep.subr.bf16.mxu0 %v20988_v0  ;;  %v1043_v6 = vshll.u32 %v14841_v49, 16  ;;  %v678_v9 = vadd.f32 %v17528_v17, %v608_v50  ;;  %v1802_v41 = vld [vmem:[#allocation2 + $0x40] sm:$0xf] }
  0xc1   : > { %v1036_v4 = vor.u32 %v1034_v48, %v1033_v59  ;;  %v1038_v8 = vrot.slane %v1033_v59, 4  ;;  %v1042_v13 = vrot.slane %v1040_v3, 7  ;;  %v14843_v14 = vpack.c.bf16 %v677_v55, %v677_v55  ;;  %v1623_v48 = vld [vmem:[#allocation2 + $0x6c] sm:$0xf]  ;;  %v1803_v3 = vld [vmem:[#allocation2 + $0x48] sm:$0xf] }
  0xc2   : > { %v1610_v12 = vsel %vm17560_vm7, %v1028_v1, %v1609_v60  ;;  %v2500_v18 = vsel %vm2464_vm0, %v2495_v51, %v2499_v39  ;;  %v1048_v21 = vshrl.u32 %v14842_v61, 16  ;;  %v1051_v22 = vshll.u32 %v14842_v61, 16  ;;  %v539_v39 = vld [vmem:[%s17390_s26 + $0xa0] sm:$0xff] }
  0xc3   : > { %v1037_v20 = vsel %vm17552_vm6, %v1029_v2, %v1036_v4  ;;  %1611 = vst [vmem:[#allocation2 + $0x54] sm:$0xf] %v1610_v12  ;;  %5830 = vmatpush1.bf16.msra.mxu0 %v16078_v62  ;;  %v2507_v23 = vor.u32 %v2506_v56, %v2502_v52  ;;  %v2511_v24 = vrot.slane %v2509_v57, 1  ;;  %v2516_v25 = vshll.u32 %v17667_v63, 16  ;;  %v540_v57 = vld [vmem:[%s17390_s26 + $0xa8] sm:$0xff] }
  0xc4   : > { %1612 = vst.msk [vmem:[#allocation2 + $0x58] sm:$0xf] %vm1561_vm3, %v1037_v20  ;;  %v1614_v26 = vsel %vm17568_vm8, %v1038_v8, %v1613_v5  ;;  %5831 = vmatprep.subr.bf16.mxu0 %v20988_v0  ;;  %v1045_v29 = vor.u32 %v1043_v6, %v1042_v13  ;;  %v1046_v30 = vrot.slane %v1042_v13, 4  ;;  %v1050_v31 = vrot.slane %v1048_v21, 7  ;;  %v1627_v4 = vld [vmem:[#allocation2 + $0x74] sm:$0x1] }
  0xc5   : > { %1615 = vst [vmem:[#allocation2 + $0x5c] sm:$0x1] %v1614_v26  ;;  %v609_v33 = vmul.f32 %v17523_v16, %v537_v15  ;;  %v2514_v34 = vshrl.u32 %v17667_v63, 16  ;;  %v2521_v35 = vshll.u32 %v17671_v7, 16  ;;  %v14844_v37 = vpack.c.bf16 %v678_v9, %v678_v9  ;;  %v1804_v7 = vld [vmem:[#allocation2 + $0x4c] sm:$0xf] }
  0xc6   : > { %v1057_v38 = vshrl.u32 %v14843_v14, 16  ;;  %5579 = vmatmul.mubr.bf16.gmra.mrb[4].mxu0 %v17608_v10  ;;  %v1053_v43 = vor.u32 %v1051_v22, %v1050_v31  ;;  %v1055_v44 = vrot.slane %v1050_v31, 4  ;;  %v1617_v45 = vsel %vm17560_vm7, %v1045_v29, %v1616_v27  ;;  %v17704_v2 = vld [vmem:[#allocation2 + $0x44] ss:$0 sps:$4 sm:$0x11]   ;;  %v16093_v8 = vld [vmem:[#allocation6 + $0xa0] sm:$0xff]  }
  0xc7   : > { %v1060_v46 = vshll.u32 %v14843_v14, 16  ;;  %5586 = vmatprep.mubr.bf16.mxu0 %v2500_v18  ;;  %v2518_v49 = vrot.slane %v2516_v25, 1  ;;  %5832 = vmatpush1.bf16.msra.mxu0 %v16083_v19  ;;  %1618 = vst [vmem:[#allocation2 + $0x60] sm:$0xf] %v1617_v45  ;;  %v1065_v51 = vshrl.u32 %v14844_v37, 16  ;;  %v1068_v52 = vshll.u32 %v14844_v37, 16 }
  0xc8   : > { %v1059_v50 = vrot.slane %v1057_v38, 7  ;;  %5833 = vmatprep.subr.bf16.mxu0 %v20988_v0  ;;  %v1054_v10 = vsel %vm17552_vm6, %v1046_v30, %v1053_v43  ;;  %v1621_v53 = vsel %vm17568_vm8, %v1055_v44, %v1620_v28  ;;  %v610_v55 = vmul.f32 %v17523_v16, %v538_v32  ;;  %v541_v30 = vld [vmem:[%s17390_s26 + $0xb0] sm:$0xff] }
  0xc9   : > { %v679_v56 = vadd.f32 %v17528_v17, %v609_v33  ;;  %v17700_v59 = vcombine.low %v1801_v40, %v1802_v41  ;;  %1619 = vst.msk [vmem:[#allocation2 + $0x64] sm:$0xf] %vm1561_vm3, %v1054_v10  ;;  %1622 = vst [vmem:[#allocation2 + $0x68] sm:$0x1] %v1621_v53  ;;  %v1067_v62 = vrot.slane %v1065_v51, 7  ;;  %v2512_v1 = vsel %vm2464_vm0, %v2507_v23, %v2511_v24  ;;  %v542_v51 = vld [vmem:[%s17390_s26 + $0xb8] sm:$0xff] }
  0xca   : > { %v1062_v60 = vor.u32 %v1060_v46, %v1059_v50  ;;  %v1063_v61 = vrot.slane %v1059_v50, 4  ;;  %v680_v5 = vadd.f32 %v17528_v17, %v610_v55  ;;  %v611_v9 = vmul.f32 %v17523_v16, %v539_v39  ;;  %v1630_v33 = vld [vmem:[#allocation2 + $0x78] sm:$0xf]  ;;  %v1634_v41 = vld [vmem:[#allocation2 + $0x80] sm:$0x1] }
  0xcb   : > { %v14845_v6 = vpack.c.bf16 %v679_v56, %v679_v56  ;;  %5834 = vmatpush1.bf16.msra.mxu0 %v16088_v36  ;;  %v1070_v12 = vor.u32 %v1068_v52, %v1067_v62  ;;  %v1072_v13 = vrot.slane %v1067_v62, 4  ;;  %v612_v15 = vmul.f32 %v17523_v16, %v540_v57  ;;  %v16087_v10 = vld [vmem:[#allocation2 + $0x50] ss:$0 sps:$4 sm:$0x11]   ;;  %v16103_v55 = vld [vmem:[#allocation6 + $0xb0] sm:$0xff]  }
  0xcc   : > { %v1624_v14 = vsel %vm17560_vm7, %v1062_v60, %v1623_v48  ;;  %5835 = vmatprep.subr.bf16.mxu0 %v20988_v0  ;;  %v14846_v18 = vpack.c.bf16 %v680_v5, %v680_v5  ;;  %v681_v21 = vadd.f32 %v17528_v17, %v611_v9  ;;  %v2519_v22 = vor.u32 %v2518_v49, %v2514_v34  ;;  %v16098_v34 = vld [vmem:[#allocation6 + $0xa8] sm:$0xff]  }
  0xcd   : > { %1625 = vst [vmem:[#allocation2 + $0x6c] sm:$0xf] %v1624_v14  ;;  %v1074_v19 = vshrl.u32 %v14845_v6, 16  ;;  %v1077_v20 = vshll.u32 %v14845_v6, 16  ;;  %v2523_v23 = vrot.slane %v2521_v35, 1  ;;  %v2528_v24 = vshll.u32 %v17700_v59, 16 }
  0xce   : > { %v1071_v25 = vsel %vm17552_vm6, %v1063_v61, %v1070_v12  ;;  %5587 = vmatmul.mubr.bf16.gmra.mrb[8].mxu0 %v17625_v42  ;;  %v1628_v26 = vsel %vm17568_vm8, %v1072_v13, %v1627_v4  ;;  %v1082_v28 = vshrl.u32 %v14846_v18, 16  ;;  %v1085_v29 = vshll.u32 %v14846_v18, 16  ;;  %v543_v4 = vld [vmem:[%s17390_s26 + $0xc0] sm:$0xff]  ;;  %v1806_v9 = vld [vmem:[#allocation2 + $0x58] sm:$0xf] }
  0xcf   : > { %1626 = vst.msk [vmem:[#allocation2 + $0x70] sm:$0xf] %vm1561_vm3, %v1071_v25  ;;  %v1076_v27 = vrot.slane %v1074_v19, 7  ;;  %5594 = vmatprep.mubr.bf16.mxu0 %v2512_v1  ;;  %v2526_v31 = vshrl.u32 %v17700_v59, 16  ;;  %v17722_v32 = vcombine.low %v1803_v3, %v1804_v7  ;;  %5836 = vmatpush1.bf16.msra.mxu0 %v16093_v8  ;;  %1629 = vst [vmem:[#allocation2 + $0x74] sm:$0x1] %v1628_v26 }
  0xd0   : > { %v682_v42 = vadd.f32 %v17528_v17, %v612_v15  ;;  %v14847_v35 = vpack.c.bf16 %v681_v21, %v681_v21  ;;  %v2533_v36 = vshll.u32 %v17704_v2, 16  ;;  %v1084_v39 = vrot.slane %v1082_v28, 7  ;;  %5837 = vmatprep.subr.bf16.mxu0 %v20988_v0  ;;  %v1637_v2 = vld [vmem:[#allocation2 + $0x84] sm:$0xf]  ;;  %v1805_v6 = vld [vmem:[#allocation2 + $0x54] sm:$0xf] }
  0xd1   : > { %v1079_v37 = vor.u32 %v1077_v20, %v1076_v27  ;;  %v1080_v38 = vrot.slane %v1076_v27, 4  ;;  %v2530_v40 = vrot.slane %v2528_v24, 1  ;;  %v613_v45 = vmul.f32 %v17523_v16, %v541_v30  ;;  %v544_v18 = vld [vmem:[%s17390_s26 + $0xc8] sm:$0xff]  ;;  %v16108_v19 = vld [vmem:[#allocation6 + $0xb8] sm:$0xff]   ;;  %v1807_v30 = vld [vmem:[#allocation2 + $0x60] sm:$0xf] }
  0xd2   : > { %v14848_v43 = vpack.c.bf16 %v682_v42, %v682_v42  ;;  %v1091_v44 = vshrl.u32 %v14847_v35, 16  ;;  %v1087_v46 = vor.u32 %v1085_v29, %v1084_v39  ;;  %v1089_v48 = vrot.slane %v1084_v39, 4  ;;  %v17752_v25 = vld [vmem:[#allocation2 + $0x5c] ss:$0 sps:$4 sm:$0x11]   ;;  %v545_v42 = vld [vmem:[%s17390_s26 + $0xd0] sm:$0xff] }
  0xd3   : > { %v1631_v49 = vsel %vm17560_vm7, %v1079_v37, %v1630_v33  ;;  %v1094_v50 = vshll.u32 %v14847_v35, 16  ;;  %v2524_v52 = vsel %vm2464_vm0, %v2519_v22, %v2523_v23  ;;  %v2540_v53 = vshll.u32 %v17722_v32, 16  ;;  %5838 = vmatpush1.bf16.msra.mxu0 %v16098_v34  ;;  %v1641_v22 = vld [vmem:[#allocation2 + $0x8c] sm:$0x1]  ;;  %v16113_v35 = vld [vmem:[#allocation6 + $0xc0] sm:$0xff]  }
  0xd4   : > { %1632 = vst [vmem:[#allocation2 + $0x78] sm:$0xf] %v1631_v49  ;;  %v1088_v56 = vsel %vm17552_vm6, %v1080_v38, %v1087_v46  ;;  %v1635_v57 = vsel %vm17568_vm8, %v1089_v48, %v1634_v41  ;;  %v1093_v60 = vrot.slane %v1091_v44, 7  ;;  %v1099_v61 = vshrl.u32 %v14848_v43, 16  ;;  %5839 = vmatprep.subr.bf16.mxu0 %v20988_v0 }
  0xd5   : > { %v2535_v62 = vrot.slane %v2533_v36, 1  ;;  %1633 = vst.msk [vmem:[#allocation2 + $0x7c] sm:$0xf] %vm1561_vm3, %v1088_v56  ;;  %1636 = vst [vmem:[#allocation2 + $0x80] sm:$0x1] %v1635_v57  ;;  %v1102_v1 = vshll.u32 %v14848_v43, 16  ;;  %v614_v3 = vmul.f32 %v17523_v16, %v542_v51  ;;  %v2531_v5 = vor.u32 %v2530_v40, %v2526_v31 }
  0xd6   : > { %5595 = vmatmul.mubr.bf16.gmra.mrb[12].mxu0 %v17639_v11  ;;  %v1096_v7 = vor.u32 %v1094_v50, %v1093_v60  ;;  %v683_v8 = vadd.f32 %v17528_v17, %v613_v45  ;;  %v2538_v12 = vshrl.u32 %v17722_v32, 16  ;;  %v1097_v13 = vrot.slane %v1093_v60, 4  ;;  %v1808_v31 = vld [vmem:[#allocation2 + $0x64] sm:$0xf]  ;;  %v1648_v57 = vld [vmem:[#allocation2 + $0x98] sm:$0x1] }
  0xd7   : > { %5602 = vmatprep.mubr.bf16.mxu0 %v2524_v52  ;;  %v1101_v14 = vrot.slane %v1099_v61, 7  ;;  %v684_v15 = vadd.f32 %v17528_v17, %v614_v3  ;;  %5840 = vmatpush1.bf16.msra.mxu0 %v16103_v55  ;;  %v2542_v20 = vrot.slane %v2540_v53, 1  ;;  %v2545_v21 = vshll.u32 %v16087_v10, 16  ;;  %v1644_v10 = vld [vmem:[#allocation2 + $0x90] sm:$0xf]  ;;  %v16118_v61 = vld [vmem:[#allocation6 + $0xc8] sm:$0xff]  }
  0xd8   : > { %v1638_v11 = vsel %vm17560_vm7, %v1096_v7, %v1637_v2  ;;  %v615_v23 = vmul.f32 %v17523_v16, %v543_v4  ;;  %5841 = vmatprep.subr.bf16.mxu0 %v20988_v0  ;;  %v17750_v24 = vcombine.low %v1805_v6, %v1806_v9  ;;  %v14849_v28 = vpack.c.bf16 %v683_v8, %v683_v8  ;;  %v17775_v60 = vld [vmem:[%s20975_s3] ss:$0 sm:$0xff]  ;;  %v17782_v7 = vld [vmem:[#allocation2 + $0x68] ss:$0 sps:$4 sm:$0x11]  }
  0xd9   : > { %v1104_v26 = vor.u32 %v1102_v1, %v1101_v14  ;;  %v1106_v27 = vrot.slane %v1101_v14, 4  ;;  %1639 = vst [vmem:[#allocation2 + $0x84] sm:$0xf] %v1638_v11  ;;  %v2536_v29 = vsel %vm2464_vm0, %v2531_v5, %v2535_v62  ;;  %v14850_v33 = vpack.c.bf16 %v684_v15, %v684_v15  ;;  %v1809_v5 = vld [vmem:[#allocation2 + $0x6c] sm:$0xf] }
  0xda   : > { %v616_v34 = vmul.f32 %v17523_v16, %v544_v18  ;;  %v1108_v38 = vshrl.u32 %v14849_v28, 16  ;;  %v1111_v39 = vshll.u32 %v14849_v28, 16  ;;  %v2547_v40 = vrot.slane %v2545_v21, 1  ;;  %v546_v16 = vld [vmem:[%s17390_s26 + $0xd8] sm:$0xff]  ;;  %v1810_v8 = vld [vmem:[#allocation2 + $0x70] sm:$0xf] }
  0xdb   : > { %v1105_v36 = vsel %vm17552_vm6, %v1097_v13, %v1104_v26  ;;  %v1642_v37 = vsel %vm17568_vm8, %v1106_v27, %v1641_v22  ;;  %5842 = vmatpush1.bf16.msra.mxu0 %v16108_v19  ;;  %v1116_v41 = vshrl.u32 %v14850_v33, 16  ;;  %v1119_v43 = vshll.u32 %v14850_v33, 16  ;;  %v1651_v18 = vld [vmem:[#allocation2 + $0x9c] sm:$0xf]  ;;  %v17793_v11 = vld [vmem:[%s20976_s4] ss:$0 sm:$0xff] }
  0xdc   : > { %1640 = vst.msk [vmem:[#allocation2 + $0x88] sm:$0xf] %vm1561_vm3, %v1105_v36  ;;  %1643 = vst [vmem:[#allocation2 + $0x8c] sm:$0x1] %v1642_v37  ;;  %v685_v44 = vadd.f32 %v17528_v17, %v615_v23  ;;  %5843 = vmatprep.subr.bf16.mxu0 %v20988_v0  ;;  %v2543_v45 = vor.u32 %v2542_v20, %v2538_v12  ;;  %v2552_v46 = vshll.u32 %v17750_v24, 16  ;;  %v1110_v48 = vrot.slane %v1108_v38, 7 }
  0xdd   : > { %v686_v49 = vadd.f32 %v17528_v17, %v616_v34  ;;  %v2550_v50 = vshrl.u32 %v17750_v24, 16  ;;  %v17769_v51 = vcombine.low %v1807_v30, %v1808_v31  ;;  %v1118_v52 = vrot.slane %v1116_v41, 7  ;;  %v547_v23 = vld [vmem:[%s17390_s26 + $0xe0] sm:$0xff]  ;;  %v1655_v37 = vld [vmem:[#allocation2 + $0xa4] sm:$0x1]  ;;  %v548_v38 = vld [vmem:[%s17390_s26 + $0xe8] sm:$0xff] }
  0xde   : > { %5603 = vmatmul.mubr.bf16.gmra.mrb[16].mxu0 %v17667_v63  ;;  %v14851_v53 = vpack.c.bf16 %v685_v44, %v685_v44  ;;  %v2557_v55 = vshll.u32 %v17752_v25, 16  ;;  %v1113_v56 = vor.u32 %v1111_v39, %v1110_v48  ;;  %v617_v17 = vmul.f32 %v17775_v60, %v545_v42  ;;  %v16123_v25 = vld [vmem:[#allocation6 + $0xd0] sm:$0xff]  }
  0xdf   : > { %5610 = vmatprep.mubr.bf16.mxu0 %v2536_v29  ;;  %v618_v63 = vmul.f32 %v17775_v60, %v546_v16  ;;  %5844 = vmatpush1.bf16.msra.mxu0 %v16113_v35  ;;  %v1114_v62 = vrot.slane %v1110_v48, 4  ;;  %v1121_v1 = vor.u32 %v1119_v43, %v1118_v52  ;;  %v1123_v2 = vrot.slane %v1118_v52, 4 }
  0xe0   : > { %v14852_v3 = vpack.c.bf16 %v686_v49, %v686_v49  ;;  %5845 = vmatprep.subr.bf16.mxu0 %v20988_v0  ;;  %v2554_v4 = vrot.slane %v2552_v46, 1  ;;  %v1645_v6 = vsel %vm17560_vm7, %v1113_v56, %v1644_v10  ;;  %v1125_v9 = vshrl.u32 %v14851_v53, 16  ;;  %v1658_v10 = vld [vmem:[#allocation2 + $0xa8] sm:$0xf] }
  0xe1   : > { %v1122_v12 = vsel %vm17552_vm6, %v1114_v62, %v1121_v1  ;;  %1646 = vst [vmem:[#allocation2 + $0x90] sm:$0xf] %v1645_v6  ;;  %v1649_v13 = vsel %vm17568_vm8, %v1123_v2, %v1648_v57  ;;  %v1128_v14 = vshll.u32 %v14851_v53, 16  ;;  %v2548_v19 = vsel %vm2464_vm0, %v2543_v45, %v2547_v40  ;;  %v1811_v53 = vld [vmem:[#allocation2 + $0x78] sm:$0xf] }
  0xe2   : > { %v1133_v15 = vshrl.u32 %v14852_v3, 16  ;;  %1647 = vst.msk [vmem:[#allocation2 + $0x94] sm:$0xf] %vm1561_vm3, %v1122_v12  ;;  %1650 = vst [vmem:[#allocation2 + $0x98] sm:$0x1] %v1649_v13  ;;  %v1127_v20 = vrot.slane %v1125_v9, 7  ;;  %v687_v22 = vadd.f32 %v17793_v11, %v617_v17  ;;  %v688_v29 = vadd.f32 %v17793_v11, %v618_v63 }
  0xe3   : > { %v1136_v21 = vshll.u32 %v14852_v3, 16  ;;  %5846 = vmatpush1.bf16.msra.mxu0 %v16118_v61  ;;  %v2559_v26 = vrot.slane %v2557_v55, 1  ;;  %v2564_v27 = vshll.u32 %v17769_v51, 16  ;;  %v2555_v30 = vor.u32 %v2554_v4, %v2550_v50  ;;  %v1812_v55 = vld [vmem:[#allocation2 + $0x7c] sm:$0xf] }
  0xe4   : > { %v1135_v28 = vrot.slane %v1133_v15, 7  ;;  %5847 = vmatprep.subr.bf16.mxu0 %v20988_v0  ;;  %v1130_v31 = vor.u32 %v1128_v14, %v1127_v20  ;;  %v1131_v33 = vrot.slane %v1127_v20, 4  ;;  %v14853_v34 = vpack.c.bf16 %v687_v22, %v687_v22  ;;  %v16095_v17 = vld [vmem:[#allocation2 + $0x74] ss:$0 sps:$4 sm:$0x11]  }
  0xe5   : > { %v2562_v42 = vshrl.u32 %v17769_v51, 16  ;;  %v17802_v35 = vcombine.low %v1809_v5, %v1810_v8  ;;  %v619_v39 = vmul.f32 %v17775_v60, %v547_v23  ;;  %v14854_v43 = vpack.c.bf16 %v688_v29, %v688_v29  ;;  %v1662_v12 = vld [vmem:[#allocation2 + $0xb0] sm:$0x1]  ;;  %v1665_v29 = vld [vmem:[#allocation2 + $0xb4] sm:$0xf] }
  0xe6   : > { %5611 = vmatmul.mubr.bf16.gmra.mrb[20].mxu0 %v17700_v59  ;;  %v1138_v36 = vor.u32 %v1136_v21, %v1135_v28  ;;  %v1140_v40 = vrot.slane %v1135_v28, 4  ;;  %v1652_v41 = vsel %vm17560_vm7, %v1130_v31, %v1651_v18  ;;  %v1142_v44 = vshrl.u32 %v14853_v34, 16 }
  0xe7   : > { %5618 = vmatprep.mubr.bf16.mxu0 %v2548_v19  ;;  %5848 = vmatpush1.bf16.msra.mxu0 %v16123_v25  ;;  %v2566_v16 = vrot.slane %v2564_v27, 1  ;;  %v2569_v59 = vshll.u32 %v17782_v7, 16  ;;  %1653 = vst [vmem:[#allocation2 + $0x9c] sm:$0xf] %v1652_v41  ;;  %v1145_v46 = vshll.u32 %v14853_v34, 16  ;;  %v1150_v50 = vshrl.u32 %v14854_v43, 16 }
  0xe8   : > { %v1139_v45 = vsel %vm17552_vm6, %v1131_v33, %v1138_v36  ;;  %5849 = vmatprep.subr.bf16.mxu0 %v20988_v0  ;;  %v1656_v48 = vsel %vm17568_vm8, %v1140_v40, %v1655_v37  ;;  %v1144_v49 = vrot.slane %v1142_v44, 7  ;;  %v1153_v52 = vshll.u32 %v14854_v43, 16  ;;  %v16128_v19 = vld [vmem:[#allocation6 + $0xd8] sm:$0xff]   ;;  %v551_v25 = vld [vmem:[%s17390_s26 + $0x100] sm:$0xff]  ;;  %v1669_v36 = vld [vmem:[#allocation2 + $0xbc] sm:$0x1] }
  0xe9   : > { %1654 = vst.msk [vmem:[#allocation2 + $0xa0] sm:$0xf] %vm1561_vm3, %v1139_v45  ;;  %1657 = vst [vmem:[#allocation2 + $0xa4] sm:$0x1] %v1656_v48  ;;  %v620_v56 = vmul.f32 %v17775_v60, %v548_v38  ;;  %v689_v57 = vadd.f32 %v17793_v11, %v619_v39  ;;  %v2576_v63 = vshll.u32 %v17802_v35, 16  ;;  %v1152_v1 = vrot.slane %v1150_v50, 7 }
  0xea   : > { %v1147_v61 = vor.u32 %v1145_v46, %v1144_v49  ;;  %v1148_v62 = vrot.slane %v1144_v49, 4  ;;  %v2560_v2 = vsel %vm2464_vm0, %v2555_v30, %v2559_v26  ;;  %v2571_v3 = vrot.slane %v2569_v59, 1  ;;  %v16097_v30 = vld [vmem:[#allocation2 + $0x80] ss:$0 sps:$4 sm:$0x11]   ;;  %v552_v37 = vld [vmem:[%s17390_s26 + $0x108] sm:$0xff] }
  0xeb   : > { %v690_v4 = vadd.f32 %v17793_v11, %v620_v56  ;;  %v14855_v5 = vpack.c.bf16 %v689_v57, %v689_v57  ;;  %v2567_v6 = vor.u32 %v2566_v16, %v2562_v42  ;;  %v2574_v9 = vshrl.u32 %v17802_v35, 16  ;;  %5850 = vmatpush1.bf16.msra.mxu0 %v16128_v19  ;;  %v553_v40 = vld [vmem:[%s17390_s26 + $0x110] sm:$0xff]  ;;  %v554_v41 = vld [vmem:[%s17390_s26 + $0x118] sm:$0xff] }
  0xec   : > { %v17821_v7 = vcombine.low %v1811_v53, %v1812_v55  ;;  %v1155_v8 = vor.u32 %v1153_v52, %v1152_v1  ;;  %v1157_v13 = vrot.slane %v1152_v1, 4  ;;  %v1659_v14 = vsel %vm17560_vm7, %v1147_v61, %v1658_v10  ;;  %5851 = vmatprep.subr.bf16.mxu0 %v20988_v0  ;;  %v1813_v49 = vld [vmem:[#allocation2 + $0x84] sm:$0xf]  ;;  %v1814_v50 = vld [vmem:[#allocation2 + $0x88] sm:$0xf] }
  0xed   : > { %v14856_v15 = vpack.c.bf16 %v690_v4, %v690_v4  ;;  %v1159_v18 = vshrl.u32 %v14855_v5, 16  ;;  %v2578_v20 = vrot.slane %v2576_v63, 1  ;;  %v2581_v21 = vshll.u32 %v16095_v17, 16  ;;  %1660 = vst [vmem:[#allocation2 + $0xa8] sm:$0xf] %v1659_v14 }
  0xee   : > { %5619 = vmatmul.mubr.bf16.gmra.mrb[24].mxu0 %v17722_v32  ;;  %v1156_v22 = vsel %vm17552_vm6, %v1148_v62, %v1155_v8  ;;  %v1162_v23 = vshll.u32 %v14855_v5, 16  ;;  %v1663_v32 = vsel %vm17568_vm8, %v1157_v13, %v1662_v12  ;;  %v2588_v31 = vshll.u32 %v17821_v7, 16  ;;  %v16100_v61 = vld [vmem:[#allocation2 + $0x8c] ss:$0 sps:$4 sm:$0x11]  }
  0xef   : > { %5626 = vmatprep.mubr.bf16.mxu0 %v2560_v2  ;;  %1661 = vst.msk [vmem:[#allocation2 + $0xac] sm:$0xf] %vm1561_vm3, %v1156_v22  ;;  %v1161_v26 = vrot.slane %v1159_v18, 7  ;;  %v1167_v27 = vshrl.u32 %v14856_v15, 16  ;;  %v1170_v28 = vshll.u32 %v14856_v15, 16  ;;  %v623_v38 = vmul.f32 %v17775_v60, %v551_v25  ;;  %v555_v25 = vld [vmem:[%s17390_s26 + $0x120] sm:$0xff] }
  0xf0   : > { %1664 = vst [vmem:[#allocation2 + $0xb0] sm:$0x1] %v1663_v32  ;;  %v2572_v39 = vsel %vm2464_vm0, %v2567_v6, %v2571_v3  ;;  %v2583_v43 = vrot.slane %v2581_v21, 1  ;;  %v2579_v45 = vor.u32 %v2578_v20, %v2574_v9  ;;  %v2586_v46 = vshrl.u32 %v17821_v7, 16  ;;  %v1815_v9 = vld [vmem:[#allocation2 + $0x90] sm:$0xf] }
  0xf1   : > { %v1164_v33 = vor.u32 %v1162_v23, %v1161_v26  ;;  %v1165_v34 = vrot.slane %v1161_v26, 4  ;;  %v1169_v42 = vrot.slane %v1167_v27, 7  ;;  %v2593_v48 = vshll.u32 %v16097_v30, 16  ;;  %v1816_v8 = vld [vmem:[#allocation2 + $0x94] sm:$0xf]  ;;  %v556_v30 = vld [vmem:[%s17390_s26 + $0x128] sm:$0xff] }
  0xf2   : > { %v624_v52 = vmul.f32 %v17775_v60, %v552_v37  ;;  %v2590_v10 = vrot.slane %v2588_v31, 1  ;;  %v693_v56 = vadd.f32 %v17793_v11, %v623_v38  ;;  %v625_v17 = vmul.f32 %v17775_v60, %v553_v40  ;;  %v1679_v22 = vld [vmem:[#allocation2 + $0xe4] sm:$0xf]  ;;  %v1686_v40 = vld [vmem:[#allocation2 + $0xf0] sm:$0xf] }
  0xf3   : > { %v1172_v44 = vor.u32 %v1170_v28, %v1169_v42  ;;  %v1174_v16 = vrot.slane %v1169_v42, 4  ;;  %v1666_v59 = vsel %vm17560_vm7, %v1164_v33, %v1665_v29  ;;  %v626_v63 = vmul.f32 %v17775_v60, %v554_v41  ;;  %v1683_v28 = vld [vmem:[#allocation2 + $0xec] sm:$0x1] }
  0xf4   : > { %1667 = vst [vmem:[#allocation2 + $0xb4] sm:$0xf] %v1666_v59  ;;  %v694_v57 = vadd.f32 %v17793_v11, %v624_v52  ;;  %v14859_v62 = vpack.c.bf16 %v693_v56, %v693_v56  ;;  %v695_v2 = vadd.f32 %v17793_v11, %v625_v17  ;;  %v2584_v4 = vsel %vm2464_vm0, %v2579_v45, %v2583_v43  ;;  %v557_v43 = vld [vmem:[%s17390_s26 + $0x130] sm:$0xff]  ;;  %v1690_v45 = vld [vmem:[#allocation2 + $0xf8] sm:$0x1]  ;;  %v559_v17 = vld [vmem:[%s17390_s26 + $0x140] sm:$0xff] }
  0xf5   : > { %v1173_v53 = vsel %vm17552_vm6, %v1165_v34, %v1172_v44  ;;  %v1670_v55 = vsel %vm17568_vm8, %v1174_v16, %v1669_v36  ;;  %v696_v3 = vadd.f32 %v17793_v11, %v626_v63  ;;  %v2591_v5 = vor.u32 %v2590_v10, %v2586_v46  ;;  %v17865_v36 = vld [vmem:[#allocation2 + $0x98] ss:$0 sps:$4 sm:$0x11]   ;;  %v16133_v44 = vld [vmem:[#allocation6 + $0xe0] sm:$0xff]   ;;  %v558_v10 = vld [vmem:[%s17390_s26 + $0x138] sm:$0xff] }
  0xf6   : > { %5627 = vmatmul.mubr.bf16.gmra.mrb[28].mxu0 %v17750_v24  ;;  %1668 = vst.msk [vmem:[#allocation2 + $0xb8] sm:$0xf] %vm1561_vm3, %v1173_v53  ;;  %1671 = vst [vmem:[#allocation2 + $0xbc] sm:$0x1] %v1670_v55  ;;  %v17853_v24 = vcombine.low %v1813_v49, %v1814_v50  ;;  %v14860_v1 = vpack.c.bf16 %v694_v57, %v694_v57  ;;  %v2595_v6 = vrot.slane %v2593_v48, 1  ;;  %v1193_v12 = vshrl.u32 %v14859_v62, 16 }
  0xf7   : > { %5634 = vmatprep.mubr.bf16.mxu0 %v2572_v39  ;;  %v1196_v13 = vshll.u32 %v14859_v62, 16  ;;  %v14861_v18 = vpack.c.bf16 %v695_v2, %v695_v2  ;;  %v14862_v23 = vpack.c.bf16 %v696_v3, %v696_v3  ;;  %v2605_v32 = vshll.u32 %v16100_v61, 16  ;;  %5852 = vmatpush1.bf16.msra.mxu0 %v16133_v44  ;;  %v560_v63 = vld [vmem:[%s17390_s26 + $0x148] sm:$0xff] }
  0xf8   : > { %v1201_v14 = vshrl.u32 %v14860_v1, 16  ;;  %v1204_v15 = vshll.u32 %v14860_v1, 16  ;;  %v2598_v19 = vshrl.u32 %v17853_v24, 16  ;;  %v2600_v20 = vshll.u32 %v17853_v24, 16  ;;  %5853 = vmatprep.subr.bf16.mxu0 %v20988_v0  ;;  %v1817_v1 = vld [vmem:[#allocation2 + $0x9c] sm:$0xf] }
  0xf9   : > { %v1195_v21 = vrot.slane %v1193_v12, 7  ;;  %v17861_v26 = vcombine.low %v1815_v9, %v1816_v8  ;;  %v1210_v29 = vshrl.u32 %v14861_v18, 16  ;;  %v1213_v34 = vshll.u32 %v14861_v18, 16 }
  0xfa   : > { %v1203_v27 = vrot.slane %v1201_v14, 7  ;;  %v1218_v42 = vshrl.u32 %v14862_v23, 16  ;;  %v627_v41 = vmul.f32 %v17775_v60, %v555_v25  ;;  %v1221_v59 = vshll.u32 %v14862_v23, 16 }
  0xfb   : > { %v1198_v31 = vor.u32 %v1196_v13, %v1195_v21  ;;  %v1199_v33 = vrot.slane %v1195_v21, 4  ;;  %v1212_v39 = vrot.slane %v1210_v29, 7  ;;  %v628_v46 = vmul.f32 %v17775_v60, %v556_v30  ;;  %v1818_v13 = vld [vmem:[#allocation2 + $0xa0] sm:$0xf]  ;;  %v1693_v29 = vld [vmem:[#allocation2 + $0xfc] sm:$0xf] }
  0xfc   : > { %v1206_v37 = vor.u32 %v1204_v15, %v1203_v27  ;;  %v1208_v38 = vrot.slane %v1203_v27, 4  ;;  %v2602_v48 = vrot.slane %v2600_v20, 1  ;;  %v2607_v49 = vrot.slane %v2605_v32, 1 }
  0xfd   : > { %v1680_v16 = vsel %vm17560_vm7, %v1198_v31, %v1679_v22  ;;  %v2612_v50 = vshll.u32 %v17861_v26, 16  ;;  %v1215_v55 = vor.u32 %v1213_v34, %v1212_v39  ;;  %v1216_v56 = vrot.slane %v1212_v39, 4  ;;  %v16745_v54 = vld [vmem:[#allocation2 + $0xbc] ss:$0 sps:$4 sm:$0x11]  }
  0xfe   : > { %5635 = vmatmul.mubr.bf16.gmra.mrb[32].mxu0 %v17769_v51  ;;  %v1220_v51 = vrot.slane %v1218_v42, 7  ;;  %v1207_v52 = vsel %vm17552_vm6, %v1199_v33, %v1206_v37  ;;  %1681 = vst [vmem:[#allocation2 + $0xe4] sm:$0xf] %v1680_v16  ;;  %v1684_v53 = vsel %vm17568_vm8, %v1208_v38, %v1683_v28  ;;  %v2596_v61 = vsel %vm2464_vm0, %v2591_v5, %v2595_v6 }
  0xff   : > { %5642 = vmatprep.mubr.bf16.mxu0 %v2584_v4  ;;  %1682 = vst.msk [vmem:[#allocation2 + $0xe8] sm:$0xf] %vm1561_vm3, %v1207_v52  ;;  %v2617_v62 = vshll.u32 %v17865_v36, 16  ;;  %1685 = vst [vmem:[#allocation2 + $0xec] sm:$0x1] %v1684_v53  ;;  %v697_v3 = vadd.f32 %v17793_v11, %v627_v41  ;;  %v1687_v9 = vsel %vm17560_vm7, %v1215_v55, %v1686_v40  ;;  %v2610_v31 = vshrl.u32 %v17861_v26, 16 }
 0x100   : > { %v1223_v57 = vor.u32 %v1221_v59, %v1220_v51  ;;  %v1225_v2 = vrot.slane %v1220_v51, 4  ;;  %v698_v8 = vadd.f32 %v17793_v11, %v628_v46  ;;  %v629_v12 = vmul.f32 %v17775_v60, %v557_v43  ;;  %1688 = vst [vmem:[#allocation2 + $0xf0] sm:$0xf] %v1687_v9  ;;  %v16105_v36 = vld [vmem:[#allocation2 + $0xa4] ss:$0 sps:$4 sm:$0x11]  }
 0x101   : > { %v14863_v6 = vpack.c.bf16 %v697_v3, %v697_v3  ;;  %v630_v14 = vmul.f32 %v17775_v60, %v558_v10  ;;  %v631_v20 = vmul.f32 %v17775_v60, %v559_v17  ;;  %v632_v21 = vmul.f32 %v17775_v60, %v560_v63  ;;  %v561_v10 = vld [vmem:[%s17390_s26 + $0x150] sm:$0xff]  ;;  %v562_v53 = vld [vmem:[%s17390_s26 + $0x158] sm:$0xff]  ;;  %v16138_v63 = vld [vmem:[#allocation6 + $0xe8] sm:$0xff]  }
 0x102   : > { %v1224_v4 = vsel %vm17552_vm6, %v1216_v56, %v1223_v57  ;;  %v1691_v5 = vsel %vm17568_vm8, %v1225_v2, %v1690_v45  ;;  %v14864_v15 = vpack.c.bf16 %v698_v8, %v698_v8  ;;  %v699_v18 = vadd.f32 %v17793_v11, %v629_v12  ;;  %v1697_v45 = vld [vmem:[#allocation2 + $0x104] sm:$0x1]  ;;  %v1700_v17 = vld [vmem:[#allocation2 + $0x108] sm:$0xf]  ;;  %5854 = vmatpush1.bf16.msra.mxu0 %v16138_v63  ;;  %v1714_v63 = vld [vmem:[#allocation2 + $0x120] sm:$0xf] }
 0x103   : > { %1689 = vst.msk [vmem:[#allocation2 + $0xf4] sm:$0xf] %vm1561_vm3, %v1224_v4  ;;  %1692 = vst [vmem:[#allocation2 + $0xf8] sm:$0x1] %v1691_v5  ;;  %v2603_v22 = vor.u32 %v2602_v48, %v2598_v19  ;;  %v1227_v23 = vshrl.u32 %v14863_v6, 16  ;;  %v1230_v25 = vshll.u32 %v14863_v6, 16  ;;  %v700_v32 = vadd.f32 %v17793_v11, %v630_v14  ;;  %5855 = vmatprep.subr.bf16.mxu0 %v20988_v0 }
 0x104   : > { %v17902_v27 = vcombine.low %v1817_v1, %v1818_v13  ;;  %v1235_v28 = vshrl.u32 %v14864_v15, 16  ;;  %v14865_v30 = vpack.c.bf16 %v699_v18, %v699_v18  ;;  %v2614_v33 = vrot.slane %v2612_v50, 1 }
 0x105   : > { %v1229_v34 = vrot.slane %v1227_v23, 7  ;;  %v701_v42 = vadd.f32 %v17793_v11, %v631_v20  ;;  %v14866_v19 = vpack.c.bf16 %v700_v32, %v700_v32  ;;  %v702_v38 = vadd.f32 %v17793_v11, %v632_v21  ;;  %v1704_v20 = vld [vmem:[#allocation2 + $0x110] sm:$0x1] }
 0x106   : > { %5643 = vmatmul.mubr.bf16.gmra.mrb[36].mxu0 %v17802_v35  ;;  %v1238_v35 = vshll.u32 %v14864_v15, 16  ;;  %v1237_v37 = vrot.slane %v1235_v28, 7  ;;  %v1244_v41 = vshrl.u32 %v14865_v30, 16  ;;  %v1247_v43 = vshll.u32 %v14865_v30, 16  ;;  %v563_v23 = vld [vmem:[%s17390_s26 + $0x160] sm:$0xff] }
 0x107   : > { %5650 = vmatprep.mubr.bf16.mxu0 %v2596_v61  ;;  %v1232_v39 = vor.u32 %v1230_v25, %v1229_v34  ;;  %v1233_v40 = vrot.slane %v1229_v34, 4  ;;  %v2608_v44 = vsel %vm2464_vm0, %v2603_v22, %v2607_v49  ;;  %v2619_v16 = vrot.slane %v2617_v62, 1  ;;  %v1819_v61 = vld [vmem:[#allocation2 + $0xa8] sm:$0xf]  ;;  %v1820_v62 = vld [vmem:[#allocation2 + $0xac] sm:$0xf] }
 0x108   : > { %v2624_v51 = vshll.u32 %v17902_v27, 16  ;;  %v1240_v59 = vor.u32 %v1238_v35, %v1237_v37  ;;  %v1242_v46 = vrot.slane %v1237_v37, 4  ;;  %v1246_v50 = vrot.slane %v1244_v41, 7  ;;  %v1707_v22 = vld [vmem:[#allocation2 + $0x114] sm:$0xf] }
 0x109   : > { %v1694_v48 = vsel %vm17560_vm7, %v1232_v39, %v1693_v29  ;;  %v14867_v52 = vpack.c.bf16 %v701_v42, %v701_v42  ;;  %v2615_v55 = vor.u32 %v2614_v33, %v2610_v31  ;;  %v2622_v56 = vshrl.u32 %v17902_v27, 16  ;;  %v564_v29 = vld [vmem:[%s17390_s26 + $0x168] sm:$0xff]  ;;  %v1821_v41 = vld [vmem:[#allocation2 + $0xb4] sm:$0xf] }
 0x10a   : > { %v2629_v57 = vshll.u32 %v16105_v36, 16  ;;  %v1241_v49 = vsel %vm17552_vm6, %v1233_v40, %v1240_v59  ;;  %1695 = vst [vmem:[#allocation2 + $0xfc] sm:$0xf] %v1694_v48  ;;  %v1698_v1 = vsel %vm17568_vm8, %v1242_v46, %v1697_v45  ;;  %v1249_v2 = vor.u32 %v1247_v43, %v1246_v50  ;;  %v1823_v36 = vld [vmem:[#allocation2 + $0xd8] sm:$0xf] }
 0x10b   : > { %1696 = vst.msk [vmem:[#allocation2 + $0x100] sm:$0xf] %vm1561_vm3, %v1241_v49  ;;  %v14868_v3 = vpack.c.bf16 %v702_v38, %v702_v38  ;;  %v2626_v4 = vrot.slane %v2624_v51, 1  ;;  %1699 = vst [vmem:[#allocation2 + $0x104] sm:$0x1] %v1698_v1  ;;  %v1250_v9 = vrot.slane %v1246_v50, 4  ;;  %v633_v8 = vmul.f32 %v17775_v60, %v561_v10 }
 0x10c   : > { %v634_v12 = vmul.f32 %v17775_v60, %v562_v53  ;;  %v1255_v5 = vshll.u32 %v14866_v19, 16  ;;  %v1701_v6 = vsel %vm17560_vm7, %v1249_v2, %v1700_v17  ;;  %v1261_v14 = vshrl.u32 %v14867_v52, 16  ;;  %v1824_v37 = vld [vmem:[#allocation2 + $0xdc] sm:$0xf]  ;;  %v1822_v43 = vld [vmem:[#allocation2 + $0xb8] sm:$0xf] }
 0x10d   : > { %v2620_v15 = vsel %vm2464_vm0, %v2615_v55, %v2619_v16  ;;  %v17926_v18 = vcombine.low %v1819_v61, %v1820_v62  ;;  %1702 = vst [vmem:[#allocation2 + $0x108] sm:$0xf] %v1701_v6  ;;  %v1264_v21 = vshll.u32 %v14867_v52, 16  ;;  %v1269_v35 = vshrl.u32 %v14868_v3, 16  ;;  %v1711_v40 = vld [vmem:[#allocation2 + $0x11c] sm:$0x1] }
 0x10e   : > { %5651 = vmatmul.mubr.bf16.gmra.mrb[40].mxu0 %v17821_v7  ;;  %v1252_v7 = vshrl.u32 %v14866_v19, 16  ;;  %v1263_v28 = vrot.slane %v1261_v14, 7  ;;  %v2631_v30 = vrot.slane %v2629_v57, 1  ;;  %v1272_v31 = vshll.u32 %v14868_v3, 16  ;;  %v565_v3 = vld [vmem:[%s17390_s26 + $0x170] sm:$0xff] }
 0x10f   : > { %5658 = vmatprep.mubr.bf16.mxu0 %v2608_v44  ;;  %v703_v33 = vadd.f32 %v17793_v11, %v633_v8  ;;  %v704_v34 = vadd.f32 %v17793_v11, %v634_v12  ;;  %v2627_v42 = vor.u32 %v2626_v4, %v2622_v56  ;;  %v1271_v16 = vrot.slane %v1269_v35, 7  ;;  %v16107_v45 = vld [vmem:[#allocation2 + $0xb0] ss:$0 sps:$4 sm:$0x11]  }
 0x110   : > { %v1254_v13 = vrot.slane %v1252_v7, 7  ;;  %v1266_v39 = vor.u32 %v1264_v21, %v1263_v28  ;;  %v1267_v44 = vrot.slane %v1263_v28, 4  ;;  %v2636_v46 = vshll.u32 %v17926_v18, 16  ;;  %v1718_v7 = vld [vmem:[#allocation2 + $0x128] sm:$0x1] }
 0x111   : > { %v14869_v51 = vpack.c.bf16 %v703_v33, %v703_v33  ;;  %v14870_v59 = vpack.c.bf16 %v704_v34, %v704_v34  ;;  %v635_v50 = vmul.f32 %v17775_v60, %v563_v23  ;;  %v1274_v52 = vor.u32 %v1272_v31, %v1271_v16  ;;  %v16112_v31 = vld [vmem:[#allocation2 + $0xe0] ss:$0 sps:$4 sm:$0x11]  }
 0x112   : > { %v1257_v25 = vor.u32 %v1255_v5, %v1254_v13  ;;  %v1259_v32 = vrot.slane %v1254_v13, 4  ;;  %v1708_v48 = vsel %vm17560_vm7, %v1266_v39, %v1707_v22  ;;  %v1276_v10 = vrot.slane %v1271_v16, 4  ;;  %v566_v13 = vld [vmem:[%s17390_s26 + $0x178] sm:$0xff] }
 0x113   : > { %1709 = vst [vmem:[#allocation2 + $0x114] sm:$0xf] %v1708_v48  ;;  %v1278_v53 = vshrl.u32 %v14869_v51, 16  ;;  %v1281_v55 = vshll.u32 %v14869_v51, 16  ;;  %v2632_v56 = vsel %vm2464_vm0, %v2627_v42, %v2631_v30  ;;  %v17944_v57 = vcombine.low %v1821_v41, %v1822_v43  ;;  %v16143_v30 = vld [vmem:[#allocation6 + $0xf0] sm:$0xff]  }
 0x114   : > { %v1258_v19 = vsel %vm17552_vm6, %v1250_v9, %v1257_v25  ;;  %v1705_v38 = vsel %vm17568_vm8, %v1259_v32, %v1704_v20  ;;  %v17946_v49 = vcombine.low %v1823_v36, %v1824_v37  ;;  %v1286_v17 = vshrl.u32 %v14870_v59, 16  ;;  %v16110_v25 = vld [vmem:[#allocation2 + $0xbc] ss:$0 sps:$4 sm:$0x11]   ;;  %5856 = vmatpush1.bf16.msra.mxu0 %v16143_v30 }
 0x115   : > { %1703 = vst.msk [vmem:[#allocation2 + $0x10c] sm:$0xf] %vm1561_vm3, %v1258_v19  ;;  %1706 = vst [vmem:[#allocation2 + $0x110] sm:$0x1] %v1705_v38  ;;  %v1275_v61 = vsel %vm17552_vm6, %v1267_v44, %v1274_v52  ;;  %v1712_v62 = vsel %vm17568_vm8, %v1276_v10, %v1711_v40  ;;  %v1280_v1 = vrot.slane %v1278_v53, 7  ;;  %v1289_v2 = vshll.u32 %v14870_v59, 16  ;;  %5857 = vmatprep.subr.bf16.mxu0 %v20988_v0 }
 0x116   : > { %5659 = vmatmul.mubr.bf16.gmra.mrb[44].mxu0 %v17853_v24  ;;  %v636_v24 = vmul.f32 %v17775_v60, %v564_v29  ;;  %v2634_v4 = vshrl.u32 %v17926_v18, 16  ;;  %v2641_v9 = vshll.u32 %v16107_v45, 16  ;;  %1710 = vst.msk [vmem:[#allocation2 + $0x118] sm:$0xf] %vm1561_vm3, %v1275_v61  ;;  %1713 = vst [vmem:[#allocation2 + $0x11c] sm:$0x1] %v1712_v62  ;;  %v705_v12 = vadd.f32 %v17793_v11, %v635_v50 }
 0x117   : > { %5666 = vmatprep.mubr.bf16.mxu0 %v2620_v15  ;;  %v1288_v8 = vrot.slane %v1286_v17, 7  ;;  %v2638_v5 = vrot.slane %v2636_v46, 1  ;;  %v1283_v6 = vor.u32 %v1281_v55, %v1280_v1  ;;  %v1284_v14 = vrot.slane %v1280_v1, 4  ;;  %v567_v38 = vld [vmem:[%s17390_s26 + $0x180] sm:$0xff]  ;;  %v568_v45 = vld [vmem:[%s17390_s26 + $0x188] sm:$0xff] }
 0x118   : > { %v706_v15 = vadd.f32 %v17793_v11, %v636_v24  ;;  %v14871_v22 = vpack.c.bf16 %v705_v12, %v705_v12  ;;  %v637_v23 = vmul.f32 %v17775_v60, %v565_v3  ;;  %v2648_v32 = vshll.u32 %v17944_v57, 16  ;;  %v1721_v24 = vld [vmem:[#allocation2 + $0x12c] sm:$0xf]  ;;  %v1725_v52 = vld [vmem:[#allocation2 + $0x134] sm:$0x1] }
 0x119   : > { %v1291_v20 = vor.u32 %v1289_v2, %v1288_v8  ;;  %v1293_v21 = vrot.slane %v1288_v8, 4  ;;  %v1715_v28 = vsel %vm17560_vm7, %v1283_v6, %v1714_v63  ;;  %v638_v29 = vmul.f32 %v17775_v60, %v566_v13  ;;  %v1825_v63 = vld [vmem:[#allocation2 + $0xe4] sm:$0xf]  ;;  %v1826_v61 = vld [vmem:[#allocation2 + $0xe8] sm:$0xf] }
 0x11a   : > { %v14872_v35 = vpack.c.bf16 %v706_v15, %v706_v15  ;;  %1716 = vst [vmem:[#allocation2 + $0x120] sm:$0xf] %v1715_v28  ;;  %v1295_v34 = vshrl.u32 %v14871_v22, 16  ;;  %v2639_v42 = vor.u32 %v2638_v5, %v2634_v4  ;;  %v2643_v36 = vrot.slane %v2641_v9, 1 }
 0x11b   : > { %v1292_v33 = vsel %vm17552_vm6, %v1284_v14, %v1291_v20  ;;  %v2660_v37 = vshll.u32 %v17946_v49, 16  ;;  %v1298_v19 = vshll.u32 %v14871_v22, 16  ;;  %v707_v43 = vadd.f32 %v17793_v11, %v637_v23  ;;  %v1728_v20 = vld [vmem:[#allocation2 + $0x138] sm:$0xf] }
 0x11c   : > { %1717 = vst.msk [vmem:[#allocation2 + $0x124] sm:$0xf] %vm1561_vm3, %v1292_v33  ;;  %v1297_v39 = vrot.slane %v1295_v34, 7  ;;  %v1303_v40 = vshrl.u32 %v14872_v35, 16  ;;  %v1306_v41 = vshll.u32 %v14872_v35, 16  ;;  %v2646_v44 = vshrl.u32 %v17944_v57, 16 }
 0x11d   : > { %v2650_v16 = vrot.slane %v2648_v32, 1  ;;  %v2653_v51 = vshll.u32 %v16110_v25, 16  ;;  %v708_v59 = vadd.f32 %v17793_v11, %v638_v29  ;;  %v639_v10 = vmul.f32 %v17775_v60, %v567_v38  ;;  %v569_v25 = vld [vmem:[%s17390_s26 + $0x190] sm:$0xff]  ;;  %v16115_v28 = vld [vmem:[#allocation2 + $0xec] ss:$0 sps:$4 sm:$0x11]  }
 0x11e   : > { %5667 = vmatmul.mubr.bf16.gmra.mrb[48].mxu0 %v17861_v26  ;;  %v1719_v26 = vsel %vm17568_vm8, %v1293_v21, %v1718_v7  ;;  %v1300_v46 = vor.u32 %v1298_v19, %v1297_v39  ;;  %v1301_v48 = vrot.slane %v1297_v39, 4  ;;  %v1305_v50 = vrot.slane %v1303_v40, 7  ;;  %v1732_v29 = vld [vmem:[#allocation2 + $0x140] sm:$0x1] }
 0x11f   : > { %5674 = vmatprep.mubr.bf16.mxu0 %v2632_v56  ;;  %1720 = vst [vmem:[#allocation2 + $0x128] sm:$0x1] %v1719_v26  ;;  %v2644_v53 = vsel %vm2464_vm0, %v2639_v42, %v2643_v36  ;;  %v2658_v55 = vshrl.u32 %v17946_v49, 16  ;;  %v14873_v56 = vpack.c.bf16 %v707_v43, %v707_v43  ;;  %v2665_v17 = vshll.u32 %v16112_v31, 16  ;;  %v1827_v43 = vld [vmem:[#allocation2 + $0xf0] sm:$0xf] }
 0x120   : > { %v1308_v62 = vor.u32 %v1306_v41, %v1305_v50  ;;  %v14874_v1 = vpack.c.bf16 %v708_v59, %v708_v59  ;;  %v640_v2 = vmul.f32 %v17775_v60, %v568_v45  ;;  %v2662_v7 = vrot.slane %v2660_v37, 1  ;;  %v570_v37 = vld [vmem:[%s17390_s26 + $0x198] sm:$0xff] }
 0x121   : > { %v1310_v3 = vrot.slane %v1305_v50, 4  ;;  %v1722_v4 = vsel %vm17560_vm7, %v1300_v46, %v1721_v24  ;;  %v1312_v9 = vshrl.u32 %v14873_v56, 16  ;;  %v2651_v8 = vor.u32 %v2650_v16, %v2646_v44  ;;  %v16148_v45 = vld [vmem:[#allocation6 + $0xf8] sm:$0xff]   ;;  %v1828_v46 = vld [vmem:[#allocation2 + $0xf4] sm:$0xf] }
 0x122   : > { %v2655_v12 = vrot.slane %v2653_v51, 1  ;;  %v1309_v13 = vsel %vm17552_vm6, %v1301_v48, %v1308_v62  ;;  %1723 = vst [vmem:[#allocation2 + $0x12c] sm:$0xf] %v1722_v4  ;;  %v709_v5 = vadd.f32 %v17793_v11, %v639_v10  ;;  %v17986_v6 = vcombine.low %v1825_v63, %v1826_v61  ;;  %v1735_v51 = vld [vmem:[#allocation2 + $0x144] sm:$0xf]  ;;  %v571_v10 = vld [vmem:[%s17390_s26 + $0x1a0] sm:$0xff]  ;;  %5858 = vmatpush1.bf16.msra.mxu0 %v16148_v45 }
 0x123   : > { %1724 = vst.msk [vmem:[#allocation2 + $0x130] sm:$0xf] %vm1561_vm3, %v1309_v13  ;;  %v1314_v14 = vrot.slane %v1312_v9, 7  ;;  %v1315_v15 = vshll.u32 %v14873_v56, 16  ;;  %v1320_v21 = vshrl.u32 %v14874_v1, 16  ;;  %v1323_v22 = vshll.u32 %v14874_v1, 16  ;;  %6116 = vmatprep.subr.bf16.mxu0 %v20988_v0 }
 0x124   : > { %v710_v23 = vadd.f32 %v17793_v11, %v640_v2  ;;  %v2667_v32 = vrot.slane %v2665_v17, 1  ;;  %v14875_v33 = vpack.c.bf16 %v709_v5, %v709_v5  ;;  %v2656_v26 = vsel %vm2464_vm0, %v2651_v8, %v2655_v12  ;;  %v572_v63 = vld [vmem:[%s17390_s26 + $0x1a8] sm:$0xff]  ;;  %v1739_v4 = vld [vmem:[#allocation2 + $0x14c] sm:$0x1] }
 0x125   : > { %v1317_v35 = vor.u32 %v1315_v15, %v1314_v14  ;;  %v1318_v30 = vrot.slane %v1314_v14, 4  ;;  %v1322_v31 = vrot.slane %v1320_v21, 7  ;;  %v2672_v34 = vshll.u32 %v17986_v6, 16  ;;  %v1830_v15 = vld [vmem:[#allocation2 + $0x100] sm:$0xf] }
 0x126   : > { %5675 = vmatmul.mubr.bf16.gmra.mrb[52].mxu0 %v17902_v27  ;;  %v1726_v27 = vsel %vm17568_vm8, %v1310_v3, %v1725_v52  ;;  %v14876_v36 = vpack.c.bf16 %v710_v23, %v710_v23  ;;  %v1329_v39 = vshrl.u32 %v14875_v33, 16  ;;  %v1332_v40 = vshll.u32 %v14875_v33, 16 }
 0x127   : > { %5682 = vmatprep.mubr.bf16.mxu0 %v2644_v53  ;;  %1727 = vst [vmem:[#allocation2 + $0x134] sm:$0x1] %v1726_v27  ;;  %v1729_v42 = vsel %vm17560_vm7, %v1317_v35, %v1728_v20  ;;  %v1325_v19 = vor.u32 %v1323_v22, %v1322_v31  ;;  %v1327_v38 = vrot.slane %v1322_v31, 4  ;;  %v2677_v41 = vshll.u32 %v16115_v28, 16  ;;  %v573_v27 = vld [vmem:[%s17390_s26 + $0x1b0] sm:$0xff]  ;;  %v574_v35 = vld [vmem:[%s17390_s26 + $0x1b8] sm:$0xff] }
 0x128   : > { %1730 = vst [vmem:[#allocation2 + $0x138] sm:$0xf] %v1729_v42  ;;  %v1337_v44 = vshrl.u32 %v14876_v36, 16  ;;  %v1340_v16 = vshll.u32 %v14876_v36, 16  ;;  %v641_v59 = vmul.f32 %v17775_v60, %v569_v25  ;;  %v1331_v24 = vrot.slane %v1329_v39, 7 }
 0x129   : > { %v1326_v48 = vsel %vm17552_vm6, %v1318_v30, %v1325_v19  ;;  %v1733_v50 = vsel %vm17568_vm8, %v1327_v38, %v1732_v29  ;;  %v2663_v60 = vor.u32 %v2662_v7, %v2658_v55  ;;  %v2670_v53 = vshrl.u32 %v17986_v6, 16  ;;  %v18038_v31 = vld [vmem:[%s20976_s4] ss:$0 sm:$0xff]  ;;  %v1746_v19 = vld [vmem:[#allocation2 + $0x158] sm:$0x1] }
 0x12a   : > { %1731 = vst.msk [vmem:[#allocation2 + $0x13c] sm:$0xf] %vm1561_vm3, %v1326_v48  ;;  %1734 = vst [vmem:[#allocation2 + $0x140] sm:$0x1] %v1733_v50  ;;  %v1339_v56 = vrot.slane %v1337_v44, 7  ;;  %v711_v17 = vadd.f32 %v17793_v11, %v641_v59  ;;  %v2674_v61 = vrot.slane %v2672_v34, 1  ;;  %v1334_v62 = vor.u32 %v1332_v40, %v1331_v24 }
 0x12b   : > { %v1335_v1 = vrot.slane %v1331_v24, 4  ;;  %v2679_v3 = vrot.slane %v2677_v41, 1  ;;  %v18019_v55 = vcombine.low %v1827_v43, %v1828_v46  ;;  %v2668_v14 = vsel %vm2464_vm0, %v2663_v60, %v2667_v32  ;;  %v16117_v32 = vld [vmem:[#allocation2 + $0xf8] ss:$0 sps:$4 sm:$0x11]  }
 0x12c   : > { %v1342_v7 = vor.u32 %v1340_v16, %v1339_v56  ;;  %v1344_v8 = vrot.slane %v1339_v56, 4  ;;  %v1736_v12 = vsel %vm17560_vm7, %v1334_v62, %v1735_v51  ;;  %v14877_v13 = vpack.c.bf16 %v711_v17, %v711_v17  ;;  %v16120_v50 = vld [vmem:[#allocation2 + $0x104] ss:$0 sps:$4 sm:$0x11]   ;;  %v1831_v62 = vld [vmem:[#allocation2 + $0x108] sm:$0xf] }
 0x12d   : > { %1737 = vst [vmem:[#allocation2 + $0x144] sm:$0xf] %v1736_v12  ;;  %v2684_v29 = vshll.u32 %v18019_v55, 16  ;;  %v2675_v34 = vor.u32 %v2674_v61, %v2670_v53  ;;  %v2682_v59 = vshrl.u32 %v18019_v55, 16  ;;  %v2689_v46 = vshll.u32 %v16117_v32, 16 }
 0x12e   : > { %5683 = vmatmul.mubr.bf16.gmra.mrb[56].mxu0 %v17926_v18  ;;  %v18007_v18 = vld [vmem:[%s20975_s3] ss:$0 sm:$0xff]  ;;  %v1343_v20 = vsel %vm17552_vm6, %v1335_v1, %v1342_v7  ;;  %v1740_v22 = vsel %vm17568_vm8, %v1344_v8, %v1739_v4  ;;  %v1346_v23 = vshrl.u32 %v14877_v13, 16  ;;  %v1349_v25 = vshll.u32 %v14877_v13, 16 }
 0x12f   : > { %5690 = vmatprep.mubr.bf16.mxu0 %v2656_v26  ;;  %v642_v52 = vmul.f32 %v18007_v18, %v570_v37  ;;  %v643_v9 = vmul.f32 %v18007_v18, %v571_v10  ;;  %v644_v21 = vmul.f32 %v18007_v18, %v572_v63  ;;  %1738 = vst.msk [vmem:[#allocation2 + $0x148] sm:$0xf] %vm1561_vm3, %v1343_v20  ;;  %1741 = vst [vmem:[#allocation2 + $0x14c] sm:$0x1] %v1740_v22  ;;  %v1742_v37 = vld [vmem:[#allocation2 + $0x150] sm:$0xf] }
 0x130   : > { %v1348_v36 = vrot.slane %v1346_v23, 7  ;;  %v645_v40 = vmul.f32 %v18007_v18, %v573_v27  ;;  %v646_v41 = vmul.f32 %v18007_v18, %v574_v35  ;;  %v2686_v45 = vrot.slane %v2684_v29, 1  ;;  %v1749_v63 = vld [vmem:[#allocation2 + $0x15c] sm:$0xf]  ;;  %v1753_v27 = vld [vmem:[#allocation2 + $0x164] sm:$0x1] }
 0x131   : > { %v712_v2 = vadd.f32 %v17793_v11, %v642_v52  ;;  %v1829_v11 = vld [vmem:[#allocation2 + $0xfc] sm:$0xf]  ;;  %v713_v33 = vadd.f32 %v18038_v31, %v643_v9  ;;  %v714_v26 = vadd.f32 %v18038_v31, %v644_v21  ;;  %v2680_v53 = vsel %vm2464_vm0, %v2675_v34, %v2679_v3  ;;  %v1832_v3 = vld [vmem:[#allocation2 + $0x10c] sm:$0xf]  ;;  %v577_v23 = vld [vmem:[%s17390_s26 + $0x1d0] sm:$0xff] }
 0x132   : > { %v18042_v42 = vcombine.low %v1829_v11, %v1830_v15  ;;  %v1351_v43 = vor.u32 %v1349_v25, %v1348_v36  ;;  %v1352_v44 = vrot.slane %v1348_v36, 4  ;;  %v716_v7 = vadd.f32 %v18038_v31, %v646_v41  ;;  %v575_v11 = vld [vmem:[%s17390_s26 + $0x1c0] sm:$0xff]  ;;  %v576_v22 = vld [vmem:[%s17390_s26 + $0x1c8] sm:$0xff]  ;;  %v578_v29 = vld [vmem:[%s17390_s26 + $0x1d8] sm:$0xff] }
 0x133   : > { %v14878_v5 = vpack.c.bf16 %v712_v2, %v712_v2  ;;  %v14879_v38 = vpack.c.bf16 %v713_v33, %v713_v33  ;;  %v14880_v39 = vpack.c.bf16 %v714_v26, %v714_v26  ;;  %v715_v2 = vadd.f32 %v18038_v31, %v645_v40  ;;  %v1834_v41 = vld [vmem:[#allocation2 + $0x118] sm:$0xf] }
 0x134   : > { %v1743_v52 = vsel %vm17560_vm7, %v1351_v43, %v1742_v37  ;;  %v2696_v61 = vshll.u32 %v18042_v42, 16  ;;  %v2687_v12 = vor.u32 %v2686_v45, %v2682_v59  ;;  %v2691_v13 = vrot.slane %v2689_v46, 1 }
 0x135   : > { %v1354_v28 = vshrl.u32 %v14878_v5, 16  ;;  %v1357_v30 = vshll.u32 %v14878_v5, 16  ;;  %v1363_v48 = vshrl.u32 %v14879_v38, 16  ;;  %v1366_v60 = vshll.u32 %v14879_v38, 16  ;;  %1744 = vst [vmem:[#allocation2 + $0x150] sm:$0xf] %v1743_v52 }
 0x136   : > { %5691 = vmatmul.mubr.bf16.gmra.mrb[60].mxu0 %v17944_v57  ;;  %v1371_v17 = vshrl.u32 %v14880_v39, 16  ;;  %v1374_v1 = vshll.u32 %v14880_v39, 16  ;;  %v2701_v5 = vshll.u32 %v16120_v50, 16  ;;  %v2694_v15 = vshrl.u32 %v18042_v42, 16  ;;  %v1756_v38 = vld [vmem:[#allocation2 + $0x168] sm:$0xf] }
 0x137   : > { %5698 = vmatprep.mubr.bf16.mxu0 %v2668_v14  ;;  %v1356_v57 = vrot.slane %v1354_v28, 7  ;;  %v1365_v56 = vrot.slane %v1363_v48, 7  ;;  %v14881_v14 = vpack.c.bf16 %v715_v2, %v715_v2  ;;  %v2698_v25 = vrot.slane %v2696_v61, 1 }
 0x138   : > { %v1373_v8 = vrot.slane %v1371_v17, 7  ;;  %v18065_v28 = vcombine.low %v1831_v62, %v1832_v3  ;;  %v14882_v35 = vpack.c.bf16 %v716_v7, %v716_v7  ;;  %v647_v36 = vmul.f32 %v18007_v18, %v575_v11  ;;  %v1760_v62 = vld [vmem:[#allocation2 + $0x170] sm:$0x1] }
 0x139   : > { %v1359_v16 = vor.u32 %v1357_v30, %v1356_v57  ;;  %v1361_v51 = vrot.slane %v1356_v57, 4  ;;  %v1368_v4 = vor.u32 %v1366_v60, %v1365_v56  ;;  %v1369_v9 = vrot.slane %v1365_v56, 4  ;;  %v16122_v30 = vld [vmem:[#allocation2 + $0x110] ss:$0 sps:$4 sm:$0x11]  }
 0x13a   : > { %v1376_v20 = vor.u32 %v1374_v1, %v1373_v8  ;;  %v1378_v21 = vrot.slane %v1373_v8, 4  ;;  %v1380_v32 = vshrl.u32 %v14881_v14, 16  ;;  %v1383_v34 = vshll.u32 %v14881_v14, 16 }
 0x13b   : > { %v1360_v24 = vsel %vm17552_vm6, %v1352_v44, %v1359_v16  ;;  %v1747_v10 = vsel %vm17568_vm8, %v1361_v51, %v1746_v19  ;;  %v2692_v57 = vsel %vm2464_vm0, %v2687_v12, %v2691_v13  ;;  %v2703_v37 = vrot.slane %v2701_v5, 1  ;;  %v1833_v19 = vld [vmem:[#allocation2 + $0x114] sm:$0xf]  ;;  %v16125_v5 = vld [vmem:[#allocation2 + $0x11c] ss:$0 sps:$4 sm:$0x11]  }
 0x13c   : > { %1745 = vst.msk [vmem:[#allocation2 + $0x154] sm:$0xf] %vm1561_vm3, %v1360_v24  ;;  %1748 = vst [vmem:[#allocation2 + $0x158] sm:$0x1] %v1747_v10  ;;  %v1377_v33 = vsel %vm17552_vm6, %v1369_v9, %v1376_v20  ;;  %v1754_v26 = vsel %vm17568_vm8, %v1378_v21, %v1753_v27  ;;  %v648_v39 = vmul.f32 %v18007_v18, %v576_v22  ;;  %v1382_v43 = vrot.slane %v1380_v32, 7 }
 0x13d   : > { %1752 = vst.msk [vmem:[#allocation2 + $0x160] sm:$0xf] %vm1561_vm3, %v1377_v33  ;;  %1755 = vst [vmem:[#allocation2 + $0x164] sm:$0x1] %v1754_v26  ;;  %v649_v40 = vmul.f32 %v18007_v18, %v577_v23  ;;  %v1388_v44 = vshrl.u32 %v14882_v35, 16  ;;  %v1391_v16 = vshll.u32 %v14882_v35, 16  ;;  %v650_v51 = vmul.f32 %v18007_v18, %v578_v29 }
 0x13e   : > { %5699 = vmatmul.mubr.bf16.gmra.mrb[64].mxu0 %v17946_v49  ;;  %v1750_v49 = vsel %vm17560_vm7, %v1368_v4, %v1749_v63  ;;  %v2699_v59 = vor.u32 %v2698_v25, %v2694_v15  ;;  %v717_v45 = vadd.f32 %v18038_v31, %v647_v36  ;;  %v718_v46 = vadd.f32 %v18038_v31, %v648_v39  ;;  %v1763_v12 = vld [vmem:[#allocation2 + $0x174] sm:$0xf]  ;;  %v1767_v35 = vld [vmem:[#allocation2 + $0x17c] sm:$0x1] }
 0x13f   : > { %5706 = vmatprep.mubr.bf16.mxu0 %v2680_v53  ;;  %1751 = vst [vmem:[#allocation2 + $0x15c] sm:$0xf] %v1750_v49  ;;  %v2706_v48 = vshrl.u32 %v18065_v28, 16  ;;  %v2708_v50 = vshll.u32 %v18065_v28, 16  ;;  %v1385_v24 = vor.u32 %v1383_v34, %v1382_v43  ;;  %v719_v52 = vadd.f32 %v18038_v31, %v649_v40  ;;  %v579_v26 = vld [vmem:[%s17390_s26 + $0x1e0] sm:$0xff] }
 0x140   : > { %v1386_v10 = vrot.slane %v1382_v43, 4  ;;  %v1390_v60 = vrot.slane %v1388_v44, 7  ;;  %v14883_v53 = vpack.c.bf16 %v717_v45, %v717_v45  ;;  %v14884_v56 = vpack.c.bf16 %v718_v46, %v718_v46  ;;  %v1835_v40 = vld [vmem:[#allocation2 + $0x120] sm:$0xf] }
 0x141   : > { %v2713_v17 = vshll.u32 %v16122_v30, 16  ;;  %v18084_v63 = vcombine.low %v1833_v19, %v1834_v41  ;;  %v1757_v61 = vsel %vm17560_vm7, %v1385_v24, %v1756_v38  ;;  %v2710_v4 = vrot.slane %v2708_v50, 1  ;;  %v1770_v19 = vld [vmem:[#allocation2 + $0x180] sm:$0xf]  ;;  %v580_v38 = vld [vmem:[%s17390_s26 + $0x1e8] sm:$0xff] }
 0x142   : > { %v1393_v1 = vor.u32 %v1391_v16, %v1390_v60  ;;  %v1395_v2 = vrot.slane %v1390_v60, 4  ;;  %1758 = vst [vmem:[#allocation2 + $0x168] sm:$0xf] %v1757_v61  ;;  %v1397_v7 = vshrl.u32 %v14883_v53, 16  ;;  %v1400_v3 = vshll.u32 %v14883_v53, 16 }
 0x143   : > { %v1405_v9 = vshrl.u32 %v14884_v56, 16  ;;  %v1408_v8 = vshll.u32 %v14884_v56, 16  ;;  %v14885_v13 = vpack.c.bf16 %v719_v52, %v719_v52  ;;  %v2704_v15 = vsel %vm2464_vm0, %v2699_v59, %v2703_v37  ;;  %v1836_v41 = vld [vmem:[#allocation2 + $0x124] sm:$0xf] }
 0x144   : > { %v1394_v27 = vsel %vm17552_vm6, %v1386_v10, %v1393_v1  ;;  %v1761_v14 = vsel %vm17568_vm8, %v1395_v2, %v1760_v62  ;;  %v1399_v11 = vrot.slane %v1397_v7, 7  ;;  %v2715_v22 = vrot.slane %v2713_v17, 1  ;;  %v1774_v17 = vld [vmem:[#allocation2 + $0x188] sm:$0x1] }
 0x145   : > { %1759 = vst.msk [vmem:[#allocation2 + $0x16c] sm:$0xf] %vm1561_vm3, %v1394_v27  ;;  %1762 = vst [vmem:[#allocation2 + $0x170] sm:$0x1] %v1761_v14  ;;  %v1407_v20 = vrot.slane %v1405_v9, 7  ;;  %v1414_v49 = vshrl.u32 %v14885_v13, 16  ;;  %v2711_v34 = vor.u32 %v2710_v4, %v2706_v48  ;;  %v651_v45 = vmul.f32 %v18007_v18, %v579_v26 }
 0x146   : > { %5707 = vmatmul.mubr.bf16.gmra.mrb[68].mxu0 %v17986_v6  ;;  %v720_v6 = vadd.f32 %v18038_v31, %v650_v51  ;;  %v2720_v23 = vshll.u32 %v18084_v63, 16  ;;  %v1402_v25 = vor.u32 %v1400_v3, %v1399_v11  ;;  %v1403_v32 = vrot.slane %v1399_v11, 4  ;;  %v16127_v2 = vld [vmem:[#allocation2 + $0x128] ss:$0 sps:$4 sm:$0x11]  }
 0x147   : > { %5714 = vmatprep.mubr.bf16.mxu0 %v2692_v57  ;;  %v1410_v29 = vor.u32 %v1408_v8, %v1407_v20  ;;  %v1412_v30 = vrot.slane %v1407_v20, 4  ;;  %v1416_v33 = vrot.slane %v1414_v49, 7  ;;  %v2718_v36 = vshrl.u32 %v18084_v63, 16 }
 0x148   : > { %v14886_v21 = vpack.c.bf16 %v720_v6, %v720_v6  ;;  %v1764_v57 = vsel %vm17560_vm7, %v1402_v25, %v1763_v12  ;;  %v1417_v37 = vshll.u32 %v14885_v13, 16  ;;  %v2725_v39 = vshll.u32 %v16125_v5, 16  ;;  %v1837_v13 = vld [vmem:[#allocation2 + $0x12c] sm:$0xf] }
 0x149   : > { %1765 = vst [vmem:[#allocation2 + $0x174] sm:$0xf] %v1764_v57  ;;  %v1768_v43 = vsel %vm17568_vm8, %v1412_v30, %v1767_v35  ;;  %v2722_v16 = vrot.slane %v2720_v23, 1  ;;  %v1420_v46 = vrot.slane %v1416_v33, 4  ;;  %v652_v50 = vmul.f32 %v18007_v18, %v580_v38 }
 0x14a   : > { %v1422_v44 = vshrl.u32 %v14886_v21, 16  ;;  %1769 = vst [vmem:[#allocation2 + $0x17c] sm:$0x1] %v1768_v43  ;;  %v1419_v51 = vor.u32 %v1417_v37, %v1416_v33  ;;  %v1425_v59 = vshll.u32 %v14886_v21, 16  ;;  %v2716_v24 = vsel %vm2464_vm0, %v2711_v34, %v2715_v22  ;;  %v1839_v34 = vld [vmem:[#allocation2 + $0x138] sm:$0xf] }
 0x14b   : > { %v721_v10 = vadd.f32 %v18038_v31, %v651_v45  ;;  %v18113_v60 = vcombine.low %v1835_v40, %v1836_v41  ;;  %v722_v61 = vadd.f32 %v18038_v31, %v652_v50  ;;  %v2723_v6 = vor.u32 %v2722_v16, %v2718_v36  ;;  %v1840_v36 = vld [vmem:[#allocation2 + $0x13c] sm:$0xf]  ;;  %v16130_v37 = vld [vmem:[#allocation2 + $0x134] ss:$0 sps:$4 sm:$0x11]  }
 0x14c   : > { %v1424_v48 = vrot.slane %v1422_v44, 7  ;;  %v1771_v52 = vsel %vm17560_vm7, %v1419_v51, %v1770_v19  ;;  %v2727_v1 = vrot.slane %v2725_v39, 1  ;;  %v2737_v14 = vshll.u32 %v16127_v2, 16  ;;  %v16132_v44 = vld [vmem:[#allocation2 + $0x140] ss:$0 sps:$4 sm:$0x11]  }
 0x14d   : > { %1772 = vst [vmem:[#allocation2 + $0x180] sm:$0xf] %v1771_v52  ;;  %v14887_v62 = vpack.c.bf16 %v721_v10, %v721_v10  ;;  %v14888_v4 = vpack.c.bf16 %v722_v61, %v722_v61  ;;  %v2732_v12 = vshll.u32 %v18113_v60, 16  ;;  %v2730_v21 = vshrl.u32 %v18113_v60, 16  ;;  %v1841_v51 = vld [vmem:[#allocation2 + $0x144] sm:$0xf] }
 0x14e   : > { %5715 = vmatmul.mubr.bf16.gmra.mrb[72].mxu0 %v18019_v55  ;;  %v1411_v55 = vsel %vm17552_vm6, %v1403_v32, %v1410_v29  ;;  %v1427_v53 = vor.u32 %v1425_v59, %v1424_v48  ;;  %v1429_v56 = vrot.slane %v1424_v48, 4  ;;  %v2728_v20 = vsel %vm2464_vm0, %v2723_v6, %v2727_v1  ;;  %v1781_v29 = vld [vmem:[#allocation2 + $0x194] sm:$0x1]  ;;  %v1842_v59 = vld [vmem:[#allocation2 + $0x148] sm:$0xf] }
 0x14f   : > { %5722 = vmatprep.mubr.bf16.mxu0 %v2704_v15  ;;  %1766 = vst.msk [vmem:[#allocation2 + $0x178] sm:$0xf] %vm1561_vm3, %v1411_v55  ;;  %v1431_v9 = vshrl.u32 %v14887_v62, 16  ;;  %v1434_v8 = vshll.u32 %v14887_v62, 16  ;;  %v1439_v27 = vshrl.u32 %v14888_v4, 16  ;;  %v1442_v11 = vshll.u32 %v14888_v4, 16 }
 0x150   : > { %v1428_v7 = vsel %vm17552_vm6, %v1420_v46, %v1427_v53  ;;  %v1775_v3 = vsel %vm17568_vm8, %v1429_v56, %v1774_v17  ;;  %v1777_v15 = vld [vmem:[#allocation2 + $0x18c] sm:$0xf]  ;;  %v2734_v22 = vrot.slane %v2732_v12, 1  ;;  %v2739_v30 = vrot.slane %v2737_v14, 1  ;;  %v1844_v62 = vld [vmem:[#allocation2 + $0x154] sm:$0xf] }
 0x151   : > { %1773 = vst.msk [vmem:[#allocation2 + $0x184] sm:$0xf] %vm1561_vm3, %v1428_v7  ;;  %1776 = vst [vmem:[#allocation2 + $0x188] sm:$0x1] %v1775_v3  ;;  %v1433_v5 = vrot.slane %v1431_v9, 7  ;;  %v1441_v35 = vrot.slane %v1439_v27, 7 }
 0x152   : > { %v2735_v57 = vor.u32 %v2734_v22, %v2730_v21  ;;  %v2749_v43 = vshll.u32 %v16130_v37, 16  ;;  %v16135_v48 = vld [vmem:[#allocation2 + $0x14c] ss:$0 sps:$4 sm:$0x11]   ;;  %v2761_v50 = vshll.u32 %v16132_v44, 16 }
 0x153   : > { %v1436_v49 = vor.u32 %v1434_v8, %v1433_v5  ;;  %v1437_v25 = vrot.slane %v1433_v5, 4  ;;  %v1444_v33 = vor.u32 %v1442_v11, %v1441_v35  ;;  %v1446_v26 = vrot.slane %v1441_v35, 4  ;;  %v16137_v9 = vld [vmem:[#allocation2 + $0x158] ss:$0 sps:$4 sm:$0x11]  }
 0x154   : > { %v2740_v40 = vsel %vm2464_vm0, %v2735_v57, %v2739_v30  ;;  %v2751_v46 = vrot.slane %v2749_v43, 1  ;;  %v2763_v56 = vrot.slane %v2761_v50, 1  ;;  %v2773_v61 = vshll.u32 %v16135_v48, 16  ;;  %v1845_v12 = vld [vmem:[#allocation2 + $0x15c] sm:$0xf] }
 0x155   : > { %v1778_v32 = vsel %vm17560_vm7, %v1436_v49, %v1777_v15  ;;  %v1445_v38 = vsel %vm17552_vm6, %v1437_v25, %v1444_v33  ;;  %v1782_v39 = vsel %vm17568_vm8, %v1446_v26, %v1781_v29  ;;  %v2785_v14 = vshll.u32 %v16137_v9, 16  ;;  %v1847_v22 = vld [vmem:[#allocation2 + $0x168] sm:$0xf]  ;;  %v16142_v26 = vld [vmem:[#allocation2 + $0x170] ss:$0 sps:$4 sm:$0x11]  }
 0x156   : > { %5723 = vmatmul.mubr.bf16.gmra.mrb[76].mxu0 %v18042_v42  ;;  %v1838_v42 = vld [vmem:[#allocation2 + $0x130] sm:$0xf]  ;;  %1779 = vst [vmem:[#allocation2 + $0x18c] sm:$0xf] %v1778_v32  ;;  %1780 = vst.msk [vmem:[#allocation2 + $0x190] sm:$0xf] %vm1561_vm3, %v1445_v38 }
 0x157   : > { %5730 = vmatprep.mubr.bf16.mxu0 %v2716_v24  ;;  %v14053_v23 = vcombine.low %v1837_v13, %v1838_v42  ;;  %1783 = vst [vmem:[#allocation2 + $0x194] sm:$0x1] %v1782_v39  ;;  %v14055_v24 = vcombine.low %v1841_v51, %v1842_v59  ;;  %v2775_v7 = vrot.slane %v2773_v61, 1  ;;  %v1846_v13 = vld [vmem:[#allocation2 + $0x160] sm:$0xf] }
 0x158   : > { %v16140_v42 = vld [vmem:[#allocation2 + $0x164] ss:$0 sps:$4 sm:$0x11]   ;;  %v14057_v11 = vcombine.low %v1845_v12, %v1846_v13  ;;  %v1850_v57 = vld [vmem:[#allocation2 + $0x178] sm:$0xf] }
 0x159   : > { %v2744_v19 = vshll.u32 %v14053_v23, 16  ;;  %v2742_v41 = vshrl.u32 %v14053_v23, 16  ;;  %v2768_v17 = vshll.u32 %v14055_v24, 16  ;;  %v2766_v1 = vshrl.u32 %v14055_v24, 16  ;;  %v1852_v51 = vld [vmem:[#allocation2 + $0x184] sm:$0xf] }
 0x15a   : > { %v2792_v21 = vshll.u32 %v14057_v11, 16  ;;  %v2797_v49 = vshll.u32 %v16140_v42, 16  ;;  %v2790_v35 = vshrl.u32 %v14057_v11, 16 }
 0x15b   : > { %v2746_v55 = vrot.slane %v2744_v19, 1  ;;  %v2770_v2 = vrot.slane %v2768_v17, 1  ;;  %v16145_v19 = vld [vmem:[#allocation2 + $0x17c] ss:$0 sps:$4 sm:$0x11]  }
 0x15c   : > { %v2794_v32 = vrot.slane %v2792_v21, 1  ;;  %v2799_v29 = vrot.slane %v2797_v49, 1  ;;  %v2821_v44 = vshll.u32 %v16145_v19, 16  ;;  %v18167_v19 = vld [vmem:[#allocation2 + $0x10] sm:$0xf] }
 0x15d   : > { %v2747_v45 = vor.u32 %v2746_v55, %v2742_v41 }
 0x15e   : > { %5731 = vmatmul.mubr.bf16.gmra.mrb[80].mxu0 %v18065_v28  ;;  %v14054_v28 = vcombine.low %v1839_v34, %v1840_v36  ;;  %v1849_v36 = vld [vmem:[#allocation2 + $0x174] sm:$0xf]  ;;  %v2795_v37 = vor.u32 %v2794_v32, %v2790_v35  ;;  %v2823_v48 = vrot.slane %v2821_v44, 1  ;;  %v18172_v44 = vld [vmem:[#allocation2 + $0x1c] sm:$0xf] }
 0x15f   : > { %5738 = vmatprep.mubr.bf16.mxu0 %v2728_v20  ;;  %v2752_v53 = vsel %vm2464_vm0, %v2747_v45, %v2751_v46  ;;  %v2787_v20 = vrot.slane %v2785_v14, 1 }
 0x160   : > { %v2756_v16 = vshll.u32 %v14054_v28, 16  ;;  %v2754_v52 = vshrl.u32 %v14054_v28, 16  ;;  %v2800_v41 = vsel %vm2464_vm0, %v2795_v37, %v2799_v29  ;;  %v1919_v37 = vld [vmem:[#allocation2 + $0xc] sm:$0xf] }
 0x162   : > { %v2758_v10 = vrot.slane %v2756_v16, 1  ;;  %v1851_v16 = vld [vmem:[#allocation2 + $0x180] sm:$0xf] }
 0x163   : > { %v14060_v50 = vcombine.low %v1851_v16, %v1852_v51  ;;  %v1888_v51 = vld [vmem:[#allocation2 + $0xc] sm:$0xe] }
 0x164   : > { %v2759_v6 = vor.u32 %v2758_v10, %v2754_v52  ;;  %v16147_v52 = vld [vmem:[#allocation2 + $0x188] ss:$0 sps:$4 sm:$0x11]  }
 0x165   : > { %v2828_v10 = vshll.u32 %v14060_v50, 16  ;;  %v2826_v61 = vshrl.u32 %v14060_v50, 16 }
 0x166   : > { %5739 = vmatmul.mubr.bf16.gmra.mrb[84].mxu0 %v18084_v63  ;;  %v1843_v63 = vld [vmem:[#allocation2 + $0x150] sm:$0xf]  ;;  %v2764_v4 = vsel %vm2464_vm0, %v2759_v6, %v2763_v56 }
 0x167   : > { %5746 = vmatprep.mubr.bf16.mxu0 %v2740_v40  ;;  %v14056_v3 = vcombine.low %v1843_v63, %v1844_v62  ;;  %v14059_v40 = vcombine.low %v1849_v36, %v1850_v57  ;;  %v1854_v56 = vld [vmem:[#allocation2 + $0x190] sm:$0xf]  ;;  %v2830_v63 = vrot.slane %v2828_v10, 1  ;;  %v2833_v62 = vshll.u32 %v16147_v52, 16  ;;  %v18179_v52 = vld [vmem:[#allocation2 + $0x28] sm:$0xf] }
 0x168   : > { %v1889_v10 = vld [vmem:[#allocation2 + $0x18] sm:$0xe] }
 0x169   : > { %v2780_v8 = vshll.u32 %v14056_v3, 16  ;;  %v2778_v5 = vshrl.u32 %v14056_v3, 16  ;;  %v2816_v43 = vshll.u32 %v14059_v40, 16  ;;  %v2814_v45 = vshrl.u32 %v14059_v40, 16 }
 0x16a   : > { %v2835_v13 = vrot.slane %v2833_v62, 1 }
 0x16b   : > { %v2782_v27 = vrot.slane %v2780_v8, 1  ;;  %v2818_v46 = vrot.slane %v2816_v43, 1  ;;  %v18151_v8 = vld [vmem:[%s20975_s3] ss:$0 sm:$0xff]  ;;  %v1921_v43 = vld [vmem:[#allocation2 + $0x18] sm:$0xf] }
 0x16d   : > { %v2783_v25 = vor.u32 %v2782_v27, %v2778_v5  ;;  %v2819_v17 = vor.u32 %v2818_v46, %v2814_v45  ;;  %v18177_v46 = vcombine.low %v1921_v43, %v18172_v44 }
 0x16e   : > { %5747 = vmatmul.mubr.bf16.gmra.mrb[88].mxu0 %v18113_v60  ;;  %v2771_v60 = vor.u32 %v2770_v2, %v2766_v1  ;;  %v549_v2 = vld [vmem:[%s17390_s26 + $0xf0] sm:$0xff] }
 0x16f   : > { %5754 = vmatprep.mubr.bf16.mxu0 %v2752_v53  ;;  %v2788_v33 = vsel %vm2464_vm0, %v2783_v25, %v2787_v20  ;;  %v1853_v53 = vld [vmem:[#allocation2 + $0x18c] sm:$0xf]  ;;  %v2824_v1 = vsel %vm2464_vm0, %v2819_v17, %v2823_v48  ;;  %v621_v9 = vmul.f32 %v18007_v18, %v549_v2  ;;  %v16715_v48 = vld [vmem:[#allocation2 + $0x10] sm:$0xf]  ;;  %v16158_v2 = vld [vmem:[#allocation6 + $0x110] sm:$0xff]  }
 0x170   : > { %v2776_v15 = vsel %vm2464_vm0, %v2771_v60, %v2775_v7  ;;  %v14061_v6 = vcombine.low %v1853_v53, %v1854_v56  ;;  %v550_v7 = vld [vmem:[%s17390_s26 + $0xf8] sm:$0xff]  ;;  %v2831_v60 = vor.u32 %v2830_v63, %v2826_v61  ;;  %v16716_v56 = vld [vmem:[#allocation2 + $0x14] ss:$0 sps:$4 sm:$0x11]   ;;  %v16155_v61 = vld [vmem:[#allocation6 + $0x108] sm:$0xff]  }
 0x171   : > { %v622_v12 = vmul.f32 %v18151_v8, %v550_v7  ;;  %v691_v42 = vadd.f32 %v18038_v31, %v621_v9  ;;  %v2982_v17 = vrot.slane %v16716_v56, 1 }
 0x172   : > { %v2838_v27 = vshrl.u32 %v14061_v6, 16  ;;  %v2836_v20 = vsel %vm2464_vm0, %v2831_v60, %v2835_v13  ;;  %v1925_v13 = vld [vmem:[#allocation2 + $0x30] sm:$0xf]  ;;  %v18189_v60 = vld [vmem:[#allocation2 + $0x34] sm:$0xf] }
 0x173   : > { %v692_v5 = vadd.f32 %v18038_v31, %v622_v12  ;;  %v16161_v12 = vld [vmem:[#allocation6 + $0x118] sm:$0xff]  }
 0x175   : > { %v14858_v18 = vpack.c.bf16 %v692_v5, %v692_v5 }
 0x176   : > { %5755 = vmatmul.mubr.bf16.gmra.mrb[92].mxu0 %v14053_v23  ;;  %v1848_v23 = vld [vmem:[#allocation2 + $0x16c] sm:$0xf] }
 0x177   : > { %5762 = vmatprep.mubr.bf16.mxu0 %v2764_v4  ;;  %v14058_v30 = vcombine.low %v1847_v22, %v1848_v23  ;;  %v2840_v4 = vshll.u32 %v14061_v6, 16  ;;  %v1184_v49 = vshrl.u32 %v14858_v18, 16  ;;  %v1187_v35 = vshll.u32 %v14858_v18, 16 }
 0x179   : > { %v2804_v34 = vshll.u32 %v14058_v30, 16  ;;  %v2802_v38 = vshrl.u32 %v14058_v30, 16  ;;  %v2842_v14 = vrot.slane %v2840_v4, 1  ;;  %v18158_v25 = vrot.slane %v1184_v49, 7  ;;  %v16167_v49 = vld [vmem:[#allocation6 + $0x128] sm:$0xff]  }
 0x17a   : > { %v16718_v4 = vld [vmem:[#allocation2 + $0x20] ss:$0 sps:$4 sm:$0x11]  }
 0x17b   : > { %v2806_v39 = vrot.slane %v2804_v34, 1  ;;  %v2843_v32 = vor.u32 %v2842_v14, %v2838_v27  ;;  %v2985_v9 = vrot.slane %v16718_v4, 1  ;;  %v18194_v27 = vcombine.low %v1925_v13, %v18189_v60  ;;  %v16719_v14 = vld [vmem:[#allocation2 + $0x28] sm:$0xf]  ;;  %v18225_v4 = vld [vmem:[#allocation2 + $0x64] sm:$0xf] }
 0x17d   : > { %v2807_v59 = vor.u32 %v2806_v39, %v2802_v38  ;;  %v1887_v38 = vld [vmem:[#allocation2] sm:$0xe]  ;;  %v18170_v39 = vcombine.low %v1919_v37, %v18167_v19  ;;  %v1929_v37 = vld [vmem:[#allocation2 + $0x48] sm:$0xf] }
 0x17e   : > { %5763 = vmatmul.mubr.bf16.gmra.mrb[96].mxu0 %v14054_v28  ;;  %v2809_v28 = vshll.u32 %v16142_v26, 16  ;;  %v1672_v26 = vld [vmem:[#allocation2 + $0xc0] sm:$0xf] }
 0x17f   : > { %5770 = vmatprep.mubr.bf16.mxu0 %v2776_v15  ;;  %v14857_v15 = vpack.c.bf16 %v691_v42, %v691_v42  ;;  %v1890_v42 = vld [vmem:[#allocation2 + $0x24] sm:$0xe] }
 0x180   : > { %v2811_v55 = vrot.slane %v2809_v28, 1  ;;  %v16713_v28 = vld [vmem:[#allocation2 + $0x4] sm:$0xf] }
 0x181   : > { %v1176_v21 = vshrl.u32 %v14857_v15, 16  ;;  %v1179_v23 = vshll.u32 %v14857_v15, 16  ;;  %v16164_v15 = vld [vmem:[#allocation6 + $0x120] sm:$0xff]  }
 0x183   : > { %v1178_v22 = vrot.slane %v1176_v21, 7 }
 0x185   : > { %v1181_v31 = vor.u32 %v1179_v23, %v1178_v22  ;;  %v18198_v23 = vld [vmem:[#allocation2 + $0x40] sm:$0xf] }
 0x186   : > { %5771 = vmatmul.mubr.bf16.gmra.mrb[100].mxu0 %v14055_v24  ;;  %v2812_v24 = vsel %vm2464_vm0, %v2807_v59, %v2811_v55  ;;  %v16152_v59 = vld [vmem:[#allocation6 + $0x100] sm:$0xff]  }
 0x187   : > { %5778 = vmatprep.mubr.bf16.mxu0 %v2788_v33  ;;  %v1189_v33 = vor.u32 %v1187_v35, %v18158_v25  ;;  %v1673_v34 = vsel %vm17560_vm7, %v1181_v31, %v1672_v26  ;;  %v1891_v35 = vld [vmem:[#allocation2 + $0x30] sm:$0xe]  ;;  %v16721_v31 = vld [vmem:[#allocation2 + $0x34] sm:$0xf] }
 0x188   : > { %1674 = vst [vmem:[#allocation2 + $0xc0] sm:$0xf] %v1673_v34  ;;  %v16722_v34 = vld [vmem:[#allocation2 + $0x38] ss:$0 sps:$4 sm:$0x11]  }
 0x18e   : > { %5779 = vmatmul.mubr.bf16.gmra.mrb[104].mxu0 %v14056_v3  ;;  %v18145_v3 = vld [vmem:[#allocation2 + $0x194] ss:$0 sps:$4 sm:$0x11]  }
 0x18f   : > { %5786 = vmatprep.mubr.bf16.mxu0 %v2800_v41  ;;  %v16714_v41 = vld [vmem:[#allocation2 + $0x8] ss:$0 sps:$4 sm:$0x11]  }
 0x190   : > { %v2979_v55 = vrot.slane %v16714_v41, 1 }
 0x196   : > { %5787 = vmatmul.mubr.bf16.gmra.mrb[108].mxu0 %v14057_v11  ;;  %v2845_v11 = vshll.u32 %v18145_v3, 16 }
 0x197   : > { %5794 = vmatprep.mubr.bf16.mxu0 %v2812_v24  ;;  %v1923_v24 = vld [vmem:[#allocation2 + $0x24] sm:$0xf] }
 0x198   : > { %v2847_v29 = vrot.slane %v2845_v11, 1  ;;  %v18185_v62 = vcombine.low %v1923_v24, %v18179_v52  ;;  %v14097_v11 = vcombine.low %v1890_v42, %v16719_v14  ;;  %v18216_v24 = vld [vmem:[#allocation2 + $0x58] sm:$0xf]  ;;  %v16185_v14 = vld [vmem:[#allocation6 + $0x158] sm:$0xff]  }
 0x199   : > { %v16727_v42 = vld [vmem:[#allocation2 + $0x58] sm:$0xf] }
 0x19a   : > { %v2848_v57 = vsel %vm2464_vm0, %v2843_v32, %v2847_v29  ;;  %v2987_v18 = vrot.slane %v14097_v11, 1 }
 0x19e   : > { %5795 = vmatmul.mubr.bf16.gmra.mrb[112].mxu0 %v14058_v30  ;;  %v1182_v30 = vrot.slane %v1178_v22, 4  ;;  %v1927_v22 = vld [vmem:[#allocation2 + $0x3c] sm:$0xf] }
 0x19f   : > { %5802 = vmatprep.mubr.bf16.mxu0 %v2824_v1  ;;  %v18203_v29 = vcombine.low %v1927_v22, %v18198_v23 }
 0x1a0   : > { %v1190_v36 = vsel %vm17552_vm6, %v1182_v30, %v1189_v33  ;;  %v14098_v30 = vcombine.low %v1891_v35, %v16721_v31  ;;  %v16170_v33 = vld [vmem:[#allocation6 + $0x130] sm:$0xff]  }
 0x1a1   : > { %1675 = vst.msk [vmem:[#allocation2 + $0xc4] sm:$0xf] %vm1561_vm3, %v1190_v36  ;;  %v2991_v36 = vrot.slane %v16722_v34, 1  ;;  %v1937_v34 = vld [vmem:[#allocation2 + $0x78] sm:$0xf] }
 0x1a2   : > { %v2990_v26 = vrot.slane %v14098_v30, 1 }
 0x1a6   : > { %5803 = vmatmul.mubr.bf16.gmra.mrb[116].mxu0 %v14059_v40  ;;  %v14094_v40 = vcombine.low %v1887_v38, %v16713_v28  ;;  %v18207_v38 = vld [vmem:[#allocation2 + $0x4c] sm:$0xf]  ;;  %v1892_v28 = vld [vmem:[#allocation2 + $0x3c] sm:$0xe] }
 0x1a7   : > { %5810 = vmatprep.mubr.bf16.mxu0 %v2836_v20  ;;  %v16720_v20 = vld [vmem:[#allocation2 + $0x2c] ss:$0 sps:$4 sm:$0x11]   ;;  %v18212_v41 = vcombine.low %v1929_v37, %v18207_v38 }
 0x1a8   : > { %v2978_v16 = vrot.slane %v14094_v40, 1  ;;  %v2988_v21 = vrot.slane %v16720_v20, 1  ;;  %v2992_v40 = vsel %vm2977_vm9, %v2990_v26, %v2991_v36  ;;  %v1935_v20 = vld [vmem:[#allocation2 + $0x6c] sm:$0xf]  ;;  %v18241_v36 = vld [vmem:[#allocation2 + $0x7c] sm:$0xf] }
 0x1aa   : > { %v2980_v45 = vsel %vm2977_vm9, %v2978_v16, %v2979_v55  ;;  %v2989_v32 = vsel %vm2977_vm9, %v2987_v18, %v2988_v21  ;;  %v16723_v55 = vld [vmem:[#allocation2 + $0x40] sm:$0xf]  ;;  %v16176_v16 = vld [vmem:[#allocation6 + $0x140] sm:$0xff]  }
 0x1ab   : > { %v14099_v43 = vcombine.low %v1892_v28, %v16723_v55  ;;  %v18233_v21 = vld [vmem:[#allocation2 + $0x70] sm:$0xf]  ;;  %v18245_v28 = vcombine.low %v1937_v34, %v18241_v36 }
 0x1ac   : > { %v18238_v35 = vcombine.low %v1935_v20, %v18233_v21 }
 0x1ae   : > { %5811 = vmatmul.mubr.bf16.gmra.mrb[120].mxu0 %v14060_v50  ;;  %v14095_v50 = vcombine.low %v1888_v51, %v16715_v48  ;;  %v2993_v51 = vrot.slane %v14099_v43, 1  ;;  %v16179_v48 = vld [vmem:[#allocation6 + $0x148] sm:$0xff]   ;;  %v16188_v43 = vld [vmem:[#allocation6 + $0x160] sm:$0xff]  }
 0x1af   : > { %5818 = vmatprep.mubr.bf16.mxu0 %v2848_v57  ;;  %v16173_v57 = vld [vmem:[#allocation6 + $0x138] sm:$0xff]  }
 0x1b0   : > { %v2981_v53 = vrot.slane %v14095_v50, 1  ;;  %v1931_v50 = vld [vmem:[#allocation2 + $0x54] sm:$0xf] }
 0x1b1   : > { %v18221_v56 = vcombine.low %v1931_v50, %v18216_v24  ;;  %v1897_v50 = vld [vmem:[#allocation2 + $0x78] sm:$0xe] }
 0x1b2   : > { %v2983_v63 = vsel %vm2977_vm9, %v2981_v53, %v2982_v17  ;;  %v16725_v17 = vld [vmem:[#allocation2 + $0x4c] sm:$0xf] }
 0x1b6   : > { %5819 = vmatmul.mubr.bf16.gmra.mrb[124].mxu0 %v14061_v6  ;;  %v16717_v6 = vld [vmem:[#allocation2 + $0x1c] sm:$0xf] }
 0x1b7   : > { %5859 = vmatprep.mubr.bf16.mxu0 %v18170_v39  ;;  %v14096_v1 = vcombine.low %v1889_v10, %v16717_v6  ;;  %v1893_v10 = vld [vmem:[#allocation2 + $0x48] sm:$0xe] }
 0x1b9   : > { %v2984_v7 = vrot.slane %v14096_v1, 1  ;;  %v16726_v1 = vld [vmem:[#allocation2 + $0x50] ss:$0 sps:$4 sm:$0x11]  }
 0x1bb   : > { %v2986_v5 = vsel %vm2977_vm9, %v2984_v7, %v2985_v9  ;;  %v1933_v7 = vld [vmem:[#allocation2 + $0x60] sm:$0xf]  ;;  %v1894_v9 = vld [vmem:[#allocation2 + $0x54] sm:$0xe] }
 0x1bc   : > { %v18230_v13 = vcombine.low %v1933_v7, %v18225_v4  ;;  %v18256_v7 = vld [vmem:[#allocation2 + $0x94] sm:$0xf] }
 0x1be   : > { %5860 = vmatmul.mubr.bf16.vlgmr.msra.gmra.mrb[0].mxu0 %v2980_v45 }
 0x1bf   : > { %6117 = vmatpush1.bf16.msra.mxu0 %v16152_v59  ;;  %5867 = vmatprep.mubr.bf16.mxu0 %v18177_v46  ;;  %v16724_v59 = vld [vmem:[#allocation2 + $0x44] ss:$0 sps:$4 sm:$0x11]  }
 0x1c0   : > { %6118 = vmatprep.subr.bf16.mxu0 %v20988_v0  ;;  %v2994_v45 = vrot.slane %v16724_v59, 1 }
 0x1c2   : > { %v2995_v53 = vsel %vm2977_vm9, %v2993_v51, %v2994_v45  ;;  %v16732_v51 = vld [vmem:[#allocation2 + $0x74] ss:$0 sps:$4 sm:$0x11]   ;;  %v1939_v45 = vld [vmem:[#allocation2 + $0x84] sm:$0xf] }
 0x1c3   : > { %6119 = vmatpush1.bf16.msra.mxu0 %v16155_v61  ;;  %v14100_v61 = vcombine.low %v1893_v10, %v16725_v17  ;;  %v3006_v59 = vrot.slane %v16732_v51, 1  ;;  %v16733_v17 = vld [vmem:[#allocation2 + $0x7c] sm:$0xf] }
 0x1c4   : > { %6120 = vmatprep.subr.bf16.mxu0 %v20988_v0 }
 0x1c5   : > { %v2996_v6 = vrot.slane %v14100_v61, 1  ;;  %v14104_v61 = vcombine.low %v1897_v50, %v16733_v17  ;;  %v581_v50 = vld [vmem:[%s17390_s26 + $0x1f0] sm:$0xff] }
 0x1c6   : > { %5868 = vmatmul.mubr.bf16.gmra.mrb[4].mxu0 %v2983_v63  ;;  %v16182_v63 = vld [vmem:[#allocation6 + $0x150] sm:$0xff]  }
 0x1c7   : > { %5875 = vmatprep.mubr.bf16.mxu0 %v18185_v62  ;;  %6121 = vmatpush1.bf16.msra.mxu0 %v16158_v2  ;;  %v2997_v2 = vrot.slane %v16726_v1, 1  ;;  %v16194_v17 = vld [vmem:[#allocation6 + $0x170] sm:$0xff]  }
 0x1c8   : > { %6122 = vmatprep.subr.bf16.mxu0 %v20988_v0 }
 0x1cb   : > { %6123 = vmatpush1.bf16.msra.mxu0 %v16161_v12  ;;  %v2998_v12 = vsel %vm2977_vm9, %v2996_v6, %v2997_v2  ;;  %v16734_v6 = vld [vmem:[#allocation2 + $0x80] ss:$0 sps:$4 sm:$0x11]   ;;  %v1941_v2 = vld [vmem:[#allocation2 + $0x90] sm:$0xf] }
 0x1cc   : > { %6124 = vmatprep.subr.bf16.mxu0 %v20988_v0  ;;  %v3009_v1 = vrot.slane %v16734_v6, 1 }
 0x1ce   : > { %5876 = vmatmul.mubr.bf16.gmra.mrb[8].mxu0 %v2986_v5  ;;  %v14101_v5 = vcombine.low %v1894_v9, %v16727_v42  ;;  %v1898_v9 = vld [vmem:[#allocation2 + $0x84] sm:$0xe]  ;;  %v18260_v42 = vcombine.low %v1941_v2, %v18256_v7 }
 0x1cf   : > { %5883 = vmatprep.mubr.bf16.mxu0 %v18194_v27  ;;  %6125 = vmatpush1.bf16.msra.mxu0 %v16164_v15  ;;  %v16728_v15 = vld [vmem:[#allocation2 + $0x5c] ss:$0 sps:$4 sm:$0x11]  }
 0x1d0   : > { %6126 = vmatprep.subr.bf16.mxu0 %v20988_v0  ;;  %v2999_v11 = vrot.slane %v14101_v5, 1  ;;  %v3000_v18 = vrot.slane %v16728_v15, 1  ;;  %v16735_v5 = vld [vmem:[#allocation2 + $0x88] sm:$0xf] }
 0x1d2   : > { %v3001_v22 = vsel %vm2977_vm9, %v2999_v11, %v3000_v18  ;;  %v16191_v11 = vld [vmem:[#allocation6 + $0x168] sm:$0xff]   ;;  %v16736_v18 = vld [vmem:[#allocation2 + $0x8c] ss:$0 sps:$4 sm:$0x11]  }
 0x1d3   : > { %6127 = vmatpush1.bf16.msra.mxu0 %v16167_v49  ;;  %v1895_v49 = vld [vmem:[#allocation2 + $0x60] sm:$0xe]  ;;  %v3012_v20 = vrot.slane %v16736_v18, 1 }
 0x1d4   : > { %6128 = vmatprep.subr.bf16.mxu0 %v20988_v0 }
 0x1d6   : > { %5884 = vmatmul.mubr.bf16.gmra.mrb[12].mxu0 %v2989_v32  ;;  %v16729_v32 = vld [vmem:[#allocation2 + $0x64] sm:$0xf] }
 0x1d7   : > { %5891 = vmatprep.mubr.bf16.mxu0 %v18203_v29  ;;  %6129 = vmatpush1.bf16.msra.mxu0 %v16170_v33  ;;  %v14102_v31 = vcombine.low %v1895_v49, %v16729_v32  ;;  %v16730_v33 = vld [vmem:[#allocation2 + $0x68] ss:$0 sps:$4 sm:$0x11]   ;;  %v1943_v49 = vld [vmem:[#allocation2 + $0x9c] sm:$0xf] }
 0x1d8   : > { %6130 = vmatprep.subr.bf16.mxu0 %v20988_v0  ;;  %v3003_v26 = vrot.slane %v16730_v33, 1  ;;  %v1899_v32 = vld [vmem:[#allocation2 + $0x90] sm:$0xe]  ;;  %v16737_v33 = vld [vmem:[#allocation2 + $0x94] sm:$0xf] }
 0x1d9   : > { %v3002_v30 = vrot.slane %v14102_v31, 1 }
 0x1db   : > { %6131 = vmatpush1.bf16.msra.mxu0 %v16173_v57  ;;  %v1896_v57 = vld [vmem:[#allocation2 + $0x6c] sm:$0xe]  ;;  %v3004_v37 = vsel %vm2977_vm9, %v3002_v30, %v3003_v26  ;;  %v14106_v26 = vcombine.low %v1899_v32, %v16737_v33 }
 0x1dc   : > { %6132 = vmatprep.subr.bf16.mxu0 %v20988_v0  ;;  %v16742_v32 = vld [vmem:[#allocation2 + $0xac] sm:$0xf] }
 0x1dd   : > { %v3014_v34 = vrot.slane %v14106_v26, 1 }
 0x1de   : > { %5892 = vmatmul.mubr.bf16.gmra.mrb[16].mxu0 %v2992_v40  ;;  %v16731_v40 = vld [vmem:[#allocation2 + $0x70] sm:$0xf] }
 0x1df   : > { %5899 = vmatprep.mubr.bf16.mxu0 %v18212_v41  ;;  %6133 = vmatpush1.bf16.msra.mxu0 %v16176_v16  ;;  %v14103_v55 = vcombine.low %v1896_v57, %v16731_v40  ;;  %v16738_v57 = vld [vmem:[#allocation2 + $0x98] ss:$0 sps:$4 sm:$0x11]   ;;  %v1945_v40 = vld [vmem:[#allocation2 + $0xa8] sm:$0xf] }
 0x1e0   : > { %6134 = vmatprep.subr.bf16.mxu0 %v20988_v0 }
 0x1e1   : > { %v3005_v16 = vrot.slane %v14103_v55, 1  ;;  %v18271_v55 = vld [vmem:[#allocation2 + $0xac] sm:$0xf] }
 0x1e2   : > { %v18275_v51 = vcombine.low %v1945_v40, %v18271_v55  ;;  %v16743_v40 = vld [vmem:[#allocation2 + $0xb0] ss:$0 sps:$4 sm:$0x11]  }
 0x1e3   : > { %6135 = vmatpush1.bf16.msra.mxu0 %v16179_v48  ;;  %v18248_v48 = vld [vmem:[#allocation2 + $0x88] sm:$0xf]  ;;  %v3007_v10 = vsel %vm2977_vm9, %v3005_v16, %v3006_v59  ;;  %v16739_v59 = vld [vmem:[#allocation2 + $0xa0] sm:$0xf] }
 0x1e4   : > { %6136 = vmatprep.subr.bf16.mxu0 %v20988_v0 }
 0x1e6   : > { %5900 = vmatmul.mubr.bf16.gmra.mrb[20].mxu0 %v2995_v53  ;;  %v18253_v53 = vcombine.low %v1939_v45, %v18248_v48 }
 0x1e7   : > { %5907 = vmatprep.mubr.bf16.mxu0 %v18221_v56  ;;  %6137 = vmatpush1.bf16.msra.mxu0 %v16182_v63  ;;  %v3008_v63 = vrot.slane %v14104_v61, 1  ;;  %v653_v61 = vmul.f32 %v18151_v8, %v581_v50  ;;  %v1949_v50 = vld [vmem:[#allocation2 + $0xc0] sm:$0xf] }
 0x1e8   : > { %6138 = vmatprep.subr.bf16.mxu0 %v20988_v0 }
 0x1eb   : > { %6139 = vmatpush1.bf16.msra.mxu0 %v16185_v14  ;;  %v14105_v14 = vcombine.low %v1898_v9, %v16735_v5  ;;  %v1947_v9 = vld [vmem:[#allocation2 + $0xb4] sm:$0xf]  ;;  %v1901_v5 = vld [vmem:[#allocation2 + $0xa8] sm:$0xe] }
 0x1ec   : > { %6140 = vmatprep.subr.bf16.mxu0 %v20988_v0 }
 0x1ed   : > { %v3011_v15 = vrot.slane %v14105_v14, 1  ;;  %v16741_v14 = vld [vmem:[%s20976_s4] ss:$0 sm:$0xff] }
 0x1ee   : > { %5908 = vmatmul.mubr.bf16.gmra.mrb[24].mxu0 %v2998_v12  ;;  %v3010_v12 = vsel %vm2977_vm9, %v3008_v63, %v3009_v1  ;;  %v16740_v1 = vld [vmem:[#allocation2 + $0xa4] ss:$0 sps:$4 sm:$0x11]  }
 0x1ef   : > { %5915 = vmatprep.mubr.bf16.mxu0 %v18230_v13  ;;  %6141 = vmatpush1.bf16.msra.mxu0 %v16188_v43  ;;  %v3013_v31 = vsel %vm2977_vm9, %v3011_v15, %v3012_v20  ;;  %v1900_v43 = vld [vmem:[#allocation2 + $0x9c] sm:$0xe]  ;;  %v3018_v2 = vrot.slane %v16740_v1, 1 }
 0x1f0   : > { %6142 = vmatprep.subr.bf16.mxu0 %v20988_v0  ;;  %v14107_v45 = vcombine.low %v1900_v43, %v16739_v59  ;;  %v3021_v43 = vrot.slane %v16743_v40, 1  ;;  %v16747_v40 = vld [vmem:[#allocation2 + $0xe0] ss:$0 sps:$4 sm:$0x11]  }
 0x1f2   : > { %v3017_v6 = vrot.slane %v14107_v45, 1 }
 0x1f3   : > { %6143 = vmatpush1.bf16.msra.mxu0 %v16191_v11  ;;  %v723_v11 = vadd.f32 %v16741_v14, %v653_v61 }
 0x1f4   : > { %6144 = vmatprep.subr.bf16.mxu0 %v20988_v0  ;;  %v3019_v20 = vsel %vm2977_vm9, %v3017_v6, %v3018_v2  ;;  %v1784_v6 = vld [vmem:[#allocation2 + $0x198] sm:$0xf] }
 0x1f5   : > { %v14889_v18 = vpack.c.bf16 %v723_v11, %v723_v11 }
 0x1f6   : > { %5916 = vmatmul.mubr.bf16.gmra.mrb[28].mxu0 %v3001_v22  ;;  %v18263_v22 = vld [vmem:[#allocation2 + $0xa0] sm:$0xf] }
 0x1f7   : > { %5923 = vmatprep.mubr.bf16.mxu0 %v18238_v35  ;;  %v18268_v30 = vcombine.low %v1943_v49, %v18263_v22  ;;  %6145 = vmatpush1.bf16.msra.mxu0 %v16194_v17  ;;  %v1448_v33 = vshrl.u32 %v14889_v18, 16 }
 0x1f8   : > { %6146 = vmatprep.subr.bf16.mxu0 %v20988_v0 }
 0x1fe   : > { %5924 = vmatmul.mubr.bf16.gmra.mrb[32].mxu0 %v3004_v37  ;;  %v3015_v37 = vrot.slane %v16738_v57, 1  ;;  %v1451_v57 = vshll.u32 %v14889_v18, 16 }
 0x1ff   : > { %5931 = vmatprep.mubr.bf16.mxu0 %v18245_v28 }
 0x200   : > { %v3016_v16 = vsel %vm2977_vm9, %v3014_v34, %v3015_v37  ;;  %v1450_v34 = vrot.slane %v1448_v33, 7 }
 0x202   : > { %v1453_v17 = vor.u32 %v1451_v57, %v1450_v34  ;;  %v1454_v61 = vrot.slane %v1450_v34, 4  ;;  %v16746_v34 = vld [vmem:[#allocation2 + $0xdc] sm:$0xf] }
 0x204   : > { %v1785_v1 = vsel %vm17560_vm7, %v1453_v17, %v1784_v6 }
 0x205   : > { %1786 = vst [vmem:[#allocation2 + $0x198] sm:$0xf] %v1785_v1 }
 0x206   : > { %5932 = vmatmul.mubr.bf16.gmra.mrb[36].mxu0 %v3007_v10  ;;  %v582_v10 = vld [vmem:[%s17390_s26 + $0x1f8] sm:$0xff] }
 0x207   : > { %5939 = vmatprep.mubr.bf16.mxu0 %v18253_v53  ;;  %v654_v63 = vmul.f32 %v18151_v8, %v582_v10  ;;  %v18295_v10 = vld [vmem:[#allocation2 + $0xc4] sm:$0xf] }
 0x209   : > { %v724_v15 = vadd.f32 %v16741_v14, %v654_v63 }
 0x20b   : > { %v14890_v8 = vpack.c.bf16 %v724_v15, %v724_v15  ;;  %v16197_v15 = vld [vmem:[#allocation6 + $0x178] sm:$0xff]  }
 0x20c   : > { %6147 = vmatpush1.bf16.msra.mxu0 %v16197_v15  ;;  %v1905_v15 = vld [vmem:[#allocation2 + $0xf0] sm:$0xe] }
 0x20d   : > { %v1456_v26 = vshrl.u32 %v14890_v8, 16  ;;  %v1459_v45 = vshll.u32 %v14890_v8, 16  ;;  %v3024_v8 = vrot.slane %v16745_v54, 1  ;;  %6405 = vmatprep.subr.bf16.mxu0 %v20988_v0 }
 0x20e   : > { %5940 = vmatmul.mubr.bf16.gmra.mrb[40].mxu0 %v3010_v12  ;;  %v18282_v12 = vld [vmem:[#allocation2 + $0xb8] sm:$0xf] }
 0x20f   : > { %5947 = vmatprep.mubr.bf16.mxu0 %v18260_v42  ;;  %v18290_v49 = vcombine.low %v1947_v9, %v18282_v12  ;;  %v18293_v59 = vrot.slane %v1456_v26, 7  ;;  %v18302_v9 = vcombine.low %v1949_v50, %v18295_v10  ;;  %v1904_v50 = vld [vmem:[#allocation2 + $0xe4] sm:$0xe] }
 0x211   : > { %v1461_v63 = vor.u32 %v1459_v45, %v18293_v59  ;;  %v18316_v45 = vld [vmem:[#allocation2 + $0xf4] sm:$0xf] }
 0x213   : > { %v1462_v11 = vsel %vm17552_vm6, %v1454_v61, %v1461_v63  ;;  %v16748_v63 = vld [vmem:[#allocation2 + $0xe8] sm:$0xf] }
 0x214   : > { %1787 = vst.msk [vmem:[#allocation2 + $0x19c] sm:$0xf] %vm1561_vm3, %v1462_v11  ;;  %v14111_v6 = vcombine.low %v1904_v50, %v16748_v63  ;;  %v18323_v11 = vld [vmem:[#allocation2 + $0x100] sm:$0xf] }
 0x215   : > { %v16752_v50 = vld [vmem:[#allocation2 + $0x100] sm:$0xf] }
 0x216   : > { %5948 = vmatmul.mubr.bf16.gmra.mrb[44].mxu0 %v3013_v31  ;;  %v14108_v31 = vcombine.low %v1901_v5, %v16742_v32  ;;  %v16744_v5 = vld [vmem:[#allocation2 + $0xb8] sm:$0xf]  ;;  %v18308_v32 = vld [vmem:[#allocation2 + $0xe8] sm:$0xf]  ;;  %v3029_v1 = vrot.slane %v14111_v6, 1 }
 0x217   : > { %5955 = vmatprep.mubr.bf16.mxu0 %v18268_v30  ;;  %v16753_v6 = vld [vmem:[#allocation2 + $0x104] ss:$0 sps:$4 sm:$0x11]  }
 0x218   : > { %v3020_v37 = vrot.slane %v14108_v31, 1  ;;  %v1903_v31 = vld [vmem:[#allocation2 + $0xd8] sm:$0xe] }
 0x219   : > { %v14110_v57 = vcombine.low %v1903_v31, %v16746_v34 }
 0x21a   : > { %v3022_v2 = vsel %vm2977_vm9, %v3020_v37, %v3021_v43  ;;  %v3027_v43 = vrot.slane %v16747_v40, 1  ;;  %v1906_v40 = vld [vmem:[#allocation2 + $0xfc] sm:$0xe] }
 0x21b   : > { %v3026_v37 = vrot.slane %v14110_v57, 1  ;;  %v1957_v57 = vld [vmem:[#allocation2 + $0x108] sm:$0xf] }
 0x21d   : > { %v3028_v17 = vsel %vm2977_vm9, %v3026_v37, %v3027_v43  ;;  %v1958_v37 = vld [vmem:[#allocation2 + $0x10c] sm:$0xf] }
 0x21e   : > { %5956 = vmatmul.mubr.bf16.gmra.mrb[48].mxu0 %v3016_v16  ;;  %v1902_v16 = vld [vmem:[#allocation2 + $0xb4] sm:$0xe] }
 0x21f   : > { %5963 = vmatprep.mubr.bf16.mxu0 %v18275_v51  ;;  %v14109_v14 = vcombine.low %v1902_v16, %v16744_v5  ;;  %v1953_v16 = vld [vmem:[#allocation2 + $0xf0] sm:$0xf] }
 0x220   : > { %v18320_v61 = vcombine.low %v1953_v16, %v18316_v45  ;;  %v18331_v16 = vcombine.low %v1957_v57, %v1958_v37  ;;  %v1961_v57 = vld [vmem:[#allocation2 + $0x120] sm:$0xf]  ;;  %v1962_v37 = vld [vmem:[#allocation2 + $0x124] sm:$0xf] }
 0x221   : > { %v3023_v18 = vrot.slane %v14109_v14, 1  ;;  %v1955_v14 = vld [vmem:[#allocation2 + $0xfc] sm:$0xf] }
 0x222   : > { %v18327_v54 = vcombine.low %v1955_v14, %v18323_v11  ;;  %v1907_v14 = vld [vmem:[#allocation2 + $0x108] sm:$0xe] }
 0x223   : > { %v3025_v33 = vsel %vm2977_vm9, %v3023_v18, %v3024_v8  ;;  %v16750_v8 = vld [vmem:[#allocation2 + $0xf4] sm:$0xf] }
 0x226   : > { %5964 = vmatmul.mubr.bf16.gmra.mrb[52].mxu0 %v3019_v20  ;;  %v1951_v20 = vld [vmem:[#allocation2 + $0xe4] sm:$0xf] }
 0x227   : > { %5971 = vmatprep.mubr.bf16.mxu0 %v18290_v49  ;;  %v18313_v26 = vcombine.low %v1951_v20, %v18308_v32  ;;  %v14112_v20 = vcombine.low %v1905_v15, %v16750_v8  ;;  %v16754_v8 = vld [vmem:[#allocation2 + $0x10c] sm:$0xf] }
 0x229   : > { %v3032_v31 = vrot.slane %v14112_v20, 1  ;;  %v14114_v20 = vcombine.low %v1907_v14, %v16754_v8  ;;  %v1964_v14 = vld [vmem:[#allocation2 + $0x130] sm:$0xf] }
 0x22e   : > { %5972 = vmatmul.mubr.bf16.gmra.mrb[56].mxu0 %v3022_v2  ;;  %v16749_v2 = vld [vmem:[#allocation2 + $0xec] ss:$0 sps:$4 sm:$0x11]  }
 0x22f   : > { %5979 = vmatprep.mubr.bf16.mxu0 %v18302_v9  ;;  %v3030_v5 = vrot.slane %v16749_v2, 1  ;;  %v1959_v2 = vld [vmem:[#allocation2 + $0x114] sm:$0xf] }
 0x231   : > { %v3031_v18 = vsel %vm2977_vm9, %v3029_v1, %v3030_v5  ;;  %v3036_v1 = vrot.slane %v16753_v6, 1  ;;  %v1960_v5 = vld [vmem:[#allocation2 + $0x118] sm:$0xf] }
 0x236   : > { %5980 = vmatmul.mubr.bf16.gmra.mrb[60].mxu0 %v3025_v33  ;;  %v16751_v33 = vld [vmem:[#allocation2 + $0xf8] ss:$0 sps:$4 sm:$0x11]  }
 0x237   : > { %5987 = vmatprep.mubr.bf16.mxu0 %v18313_v26  ;;  %v3033_v34 = vrot.slane %v16751_v33, 1  ;;  %v16755_v33 = vld [vmem:[#allocation2 + $0x110] ss:$0 sps:$4 sm:$0x11]  }
 0x239   : > { %v3034_v43 = vsel %vm2977_vm9, %v3032_v31, %v3033_v34  ;;  %v3038_v31 = vrot.slane %v14114_v20, 1  ;;  %v3039_v34 = vrot.slane %v16755_v33, 1  ;;  %v16758_v33 = vld [vmem:[#allocation2 + $0x124] sm:$0xf] }
 0x23e   : > { %5988 = vmatmul.mubr.bf16.gmra.mrb[64].mxu0 %v3028_v17  ;;  %v14113_v17 = vcombine.low %v1906_v40, %v16752_v50  ;;  %v1908_v40 = vld [vmem:[#allocation2 + $0x114] sm:$0xe]  ;;  %v18339_v50 = vcombine.low %v1961_v57, %v1962_v37  ;;  %v1965_v37 = vld [vmem:[#allocation2 + $0x138] sm:$0xf] }
 0x23f   : > { %5995 = vmatprep.mubr.bf16.mxu0 %v18320_v61 }
 0x240   : > { %v3035_v63 = vrot.slane %v14113_v17, 1  ;;  %v16756_v17 = vld [vmem:[#allocation2 + $0x118] sm:$0xf] }
 0x241   : > { %v14115_v6 = vcombine.low %v1908_v40, %v16756_v17  ;;  %v1966_v40 = vld [vmem:[#allocation2 + $0x13c] sm:$0xf] }
 0x242   : > { %v3037_v15 = vsel %vm2977_vm9, %v3035_v63, %v3036_v1  ;;  %v16757_v1 = vld [vmem:[#allocation2 + $0x11c] ss:$0 sps:$4 sm:$0x11]  }
 0x243   : > { %v3041_v63 = vrot.slane %v14115_v6, 1  ;;  %v18347_v6 = vcombine.low %v1965_v37, %v1966_v40  ;;  %v1969_v40 = vld [vmem:[#allocation2 + $0x150] sm:$0xf] }
 0x245   : > { %21056 = vst [vmem:[#allocation17_spill] sm:$0xff] %v18347_v6 }
 0x246   : > { %5996 = vmatmul.mubr.bf16.gmra.mrb[68].mxu0 %v3031_v18  ;;  %v18335_v18 = vcombine.low %v1959_v2, %v1960_v5  ;;  %v3042_v2 = vrot.slane %v16757_v1, 1  ;;  %v1963_v5 = vld [vmem:[#allocation2 + $0x12c] sm:$0xf]  ;;  %v16760_v1 = vld [vmem:[#allocation2 + $0x130] sm:$0xf] }
 0x247   : > { %6003 = vmatprep.mubr.bf16.mxu0 %v18327_v54  ;;  %v18343_v20 = vcombine.low %v1963_v5, %v1964_v14  ;;  %v1967_v14 = vld [vmem:[#allocation2 + $0x144] sm:$0xf] }
 0x248   : > { %v3043_v8 = vsel %vm2977_vm9, %v3041_v63, %v3042_v2  ;;  %v16761_v2 = vld [vmem:[#allocation2 + $0x134] ss:$0 sps:$4 sm:$0x11]  }
 0x249   : > { %21055 = vst [vmem:[#allocation16_spill] sm:$0xff] %v18343_v20  ;;  %v3048_v5 = vrot.slane %v16761_v2, 1  ;;  %v16764_v2 = vld [vmem:[#allocation2 + $0x148] sm:$0xf] }
 0x24e   : > { %6004 = vmatmul.mubr.bf16.gmra.mrb[72].mxu0 %v3034_v43  ;;  %v3040_v43 = vsel %vm2977_vm9, %v3038_v31, %v3039_v34  ;;  %v16759_v34 = vld [vmem:[#allocation2 + $0x128] ss:$0 sps:$4 sm:$0x11]  }
 0x24f   : > { %6011 = vmatprep.mubr.bf16.mxu0 %v18331_v16  ;;  %v3045_v57 = vrot.slane %v16759_v34, 1  ;;  %v16762_v34 = vld [vmem:[#allocation2 + $0x13c] sm:$0xf] }
 0x256   : > { %6012 = vmatmul.mubr.bf16.gmra.mrb[76].mxu0 %v3037_v15  ;;  %v1909_v15 = vld [vmem:[#allocation2 + $0x120] sm:$0xe] }
 0x257   : > { %6019 = vmatprep.mubr.bf16.mxu0 %v18335_v18  ;;  %v14116_v0 = vcombine.low %v1909_v15, %v16758_v33  ;;  %v1968_v15 = vld [vmem:[#allocation2 + $0x148] sm:$0xf] }
 0x258   : > { %v18351_v33 = vcombine.low %v1967_v14, %v1968_v15  ;;  %v1971_v15 = vld [vmem:[#allocation2 + $0x15c] sm:$0xf] }
 0x259   : > { %v3044_v31 = vrot.slane %v14116_v0, 1  ;;  %v1911_v0 = vld [vmem:[#allocation2 + $0x138] sm:$0xe] }
 0x25a   : > { %21057 = vst [vmem:[#allocation18_spill] sm:$0xff] %v18351_v33 }
 0x25b   : > { %v3046_v17 = vsel %vm2977_vm9, %v3044_v31, %v3045_v57  ;;  %v16763_v57 = vld [vmem:[#allocation2 + $0x140] ss:$0 sps:$4 sm:$0x11]  }
 0x25c   : > { %v3051_v37 = vrot.slane %v16763_v57, 1  ;;  %v16766_v57 = vld [vmem:[#allocation2 + $0x154] sm:$0xf] }
 0x25e   : > { %6020 = vmatmul.mubr.bf16.gmra.mrb[80].mxu0 %v3040_v43  ;;  %v1910_v43 = vld [vmem:[#allocation2 + $0x12c] sm:$0xe] }
 0x25f   : > { %6027 = vmatprep.mubr.bf16.mxu0 %v18339_v50  ;;  %v14117_v47 = vcombine.low %v1910_v43, %v16760_v1  ;;  %v1970_v43 = vld [vmem:[#allocation2 + $0x154] sm:$0xf] }
 0x260   : > { %v18355_v1 = vcombine.low %v1969_v40, %v1970_v43  ;;  %v1973_v43 = vld [vmem:[#allocation2 + $0x168] sm:$0xf] }
 0x261   : > { %v3047_v63 = vrot.slane %v14117_v47, 1  ;;  %v1912_v47 = vld [vmem:[#allocation2 + $0x144] sm:$0xe] }
 0x262   : > { %21058 = vst [vmem:[#allocation19_spill] sm:$0xff] %v18355_v1 }
 0x266   : > { %6028 = vmatmul.mubr.bf16.gmra.mrb[84].mxu0 %v3043_v8  ;;  %v3049_v8 = vsel %vm2977_vm9, %v3047_v63, %v3048_v5  ;;  %v16765_v5 = vld [vmem:[#allocation2 + $0x14c] ss:$0 sps:$4 sm:$0x11]  }
 0x267   : > { %6035 = vmatprep.mubr.bf16.mxu0 %v18343_v20  ;;  %v14118_v20 = vcombine.low %v1911_v0, %v16762_v34  ;;  %v3054_v14 = vrot.slane %v16765_v5, 1  ;;  %v1972_v0 = vld [vmem:[#allocation2 + $0x160] sm:$0xf] }
 0x268   : > { %v18359_v34 = vcombine.low %v1971_v15, %v1972_v0  ;;  %v16768_v5 = vld [vmem:[#allocation2 + $0x160] sm:$0xf]  ;;  %v1975_v0 = vld [vmem:[#allocation2 + $0x174] sm:$0xf] }
 0x269   : > { %v3050_v31 = vrot.slane %v14118_v20, 1  ;;  %v1913_v20 = vld [vmem:[#allocation2 + $0x150] sm:$0xe] }
 0x26a   : > { %21059 = vst [vmem:[#allocation20_spill] sm:$0xff] %v18359_v34 }
 0x26e   : > { %6036 = vmatmul.mubr.bf16.gmra.mrb[88].mxu0 %v3046_v17  ;;  %v3052_v17 = vsel %vm2977_vm9, %v3050_v31, %v3051_v37  ;;  %v16767_v37 = vld [vmem:[#allocation2 + $0x158] ss:$0 sps:$4 sm:$0x11]  }
 0x26f   : > { %6043 = vmatprep.mubr.bf16.mxu0 %v18347_v6  ;;  %v14119_v6 = vcombine.low %v1912_v47, %v16764_v2  ;;  %v3057_v40 = vrot.slane %v16767_v37, 1  ;;  %v1974_v47 = vld [vmem:[#allocation2 + $0x16c] sm:$0xf] }
 0x270   : > { %v18363_v2 = vcombine.low %v1973_v43, %v1974_v47  ;;  %v16770_v37 = vld [vmem:[#allocation2 + $0x16c] sm:$0xf]  ;;  %v1977_v47 = vld [vmem:[#allocation2 + $0x180] sm:$0xf] }
 0x271   : > { %v3053_v63 = vrot.slane %v14119_v6, 1  ;;  %v1914_v6 = vld [vmem:[#allocation2 + $0x15c] sm:$0xe] }
 0x272   : > { %21060 = vst [vmem:[#allocation21_spill] sm:$0xff] %v18363_v2 }
 0x276   : > { %6044 = vmatmul.mubr.bf16.gmra.mrb[92].mxu0 %v3049_v8  ;;  %v3055_v8 = vsel %vm2977_vm9, %v3053_v63, %v3054_v14  ;;  %v16769_v14 = vld [vmem:[#allocation2 + $0x164] ss:$0 sps:$4 sm:$0x11]  }
 0x277   : > { %6051 = vmatprep.mubr.bf16.mxu0 %v18351_v33  ;;  %v14120_v33 = vcombine.low %v1913_v20, %v16766_v57  ;;  %v3060_v15 = vrot.slane %v16769_v14, 1  ;;  %v1976_v20 = vld [vmem:[#allocation2 + $0x178] sm:$0xf] }
 0x278   : > { %v18367_v57 = vcombine.low %v1975_v0, %v1976_v20  ;;  %v16772_v14 = vld [vmem:[#allocation2 + $0x178] sm:$0xf]  ;;  %v1979_v20 = vld [vmem:[#allocation2 + $0x18c] sm:$0xf] }
 0x279   : > { %v3056_v31 = vrot.slane %v14120_v33, 1  ;;  %v1915_v33 = vld [vmem:[#allocation2 + $0x168] sm:$0xe] }
 0x27a   : > { %21061 = vst [vmem:[#allocation22_spill] sm:$0xff] %v18367_v57 }
 0x27e   : > { %6052 = vmatmul.mubr.bf16.gmra.mrb[96].mxu0 %v3052_v17  ;;  %v3058_v17 = vsel %vm2977_vm9, %v3056_v31, %v3057_v40  ;;  %v16771_v40 = vld [vmem:[#allocation2 + $0x170] ss:$0 sps:$4 sm:$0x11]  }
 0x27f   : > { %6059 = vmatprep.mubr.bf16.mxu0 %v18355_v1  ;;  %v14121_v1 = vcombine.low %v1914_v6, %v16768_v5  ;;  %v3063_v43 = vrot.slane %v16771_v40, 1  ;;  %v1978_v6 = vld [vmem:[#allocation2 + $0x184] sm:$0xf] }
 0x280   : > { %v18371_v5 = vcombine.low %v1977_v47, %v1978_v6  ;;  %v16774_v40 = vld [vmem:[#allocation2 + $0x184] sm:$0xf]  ;;  %v16775_v47 = vld [vmem:[#allocation2 + $0x188] ss:$0 sps:$4 sm:$0x11]  }
 0x281   : > { %v3059_v63 = vrot.slane %v14121_v1, 1  ;;  %v1916_v1 = vld [vmem:[#allocation2 + $0x174] sm:$0xe]  ;;  %v3069_v6 = vrot.slane %v16775_v47, 1  ;;  %v3072_v47 = vrot.slane %v18145_v3, 1 }
 0x286   : > { %6060 = vmatmul.mubr.bf16.gmra.mrb[100].mxu0 %v3055_v8  ;;  %v3061_v8 = vsel %vm2977_vm9, %v3059_v63, %v3060_v15  ;;  %v16773_v15 = vld [vmem:[#allocation2 + $0x17c] ss:$0 sps:$4 sm:$0x11]  }
 0x287   : > { %6067 = vmatprep.mubr.bf16.mxu0 %v18359_v34  ;;  %v14122_v34 = vcombine.low %v1915_v33, %v16770_v37  ;;  %v3066_v0 = vrot.slane %v16773_v15, 1  ;;  %v1980_v33 = vld [vmem:[#allocation2 + $0x190] sm:$0xf] }
 0x288   : > { %v18375_v37 = vcombine.low %v1979_v20, %v1980_v33 }
 0x289   : > { %v3062_v31 = vrot.slane %v14122_v34, 1  ;;  %v1917_v34 = vld [vmem:[#allocation2 + $0x180] sm:$0xe] }
 0x28e   : > { %6068 = vmatmul.mubr.bf16.gmra.mrb[104].mxu0 %v3058_v17  ;;  %v3064_v17 = vsel %vm2977_vm9, %v3062_v31, %v3063_v43  ;;  %v1191_v31 = vrot.slane %v18158_v25, 4  ;;  %v16776_v25 = vld [vmem:[#allocation2 + $0x190] sm:$0xf] }
 0x28f   : > { %6075 = vmatprep.mubr.bf16.mxu0 %v18363_v2  ;;  %v14123_v2 = vcombine.low %v1916_v1, %v16772_v14  ;;  %v1981_v1 = vld [vmem:[#allocation2 + $0x198] sm:$0xf]  ;;  %v1918_v14 = vld [vmem:[#allocation2 + $0x18c] sm:$0xe] }
 0x290   : > { %v14125_v33 = vcombine.low %v1918_v14, %v16776_v25 }
 0x291   : > { %v3065_v63 = vrot.slane %v14123_v2, 1  ;;  %v1676_v2 = vld [vmem:[#allocation2 + $0xc8] sm:$0x1] }
 0x292   : > { %v1677_v15 = vsel %vm17568_vm8, %v1191_v31, %v1676_v2 }
 0x293   : > { %1678 = vst [vmem:[#allocation2 + $0xc8] sm:$0x1] %v1677_v15  ;;  %v2016_v15 = vld [vmem:[#allocation2 + $0x18] sm:$0xe] }
 0x296   : > { %6076 = vmatmul.mubr.bf16.gmra.mrb[108].mxu0 %v3061_v8  ;;  %v3067_v8 = vsel %vm2977_vm9, %v3065_v63, %v3066_v0  ;;  %v2015_v63 = vld [vmem:[#allocation2 + $0xc] sm:$0xe] }
 0x297   : > { %6083 = vmatprep.mubr.bf16.mxu0 %v18367_v57  ;;  %v14124_v57 = vcombine.low %v1917_v34, %v16774_v40  ;;  %v16199_v34 = vld [vmem:[#allocation2 + $0x14] ss:$0 sps:$4 sm:$0x11]   ;;  %v3071_v40 = vrot.slane %v14125_v33, 1 }
 0x298   : > { %v3907_v2 = vrot.slane %v16199_v34, 1 }
 0x299   : > { %v3068_v43 = vrot.slane %v14124_v57, 1  ;;  %v14190_v57 = vcombine.low %v2015_v63, %v18167_v19  ;;  %v16201_v19 = vld [vmem:[#allocation2 + $0x20] ss:$0 sps:$4 sm:$0x11]   ;;  %v14191_v63 = vcombine.low %v2016_v15, %v18172_v44  ;;  %v3421_v15 = vshll.u32 %v18185_v62, 16 }
 0x29b   : > { %v3070_v0 = vsel %vm2977_vm9, %v3068_v43, %v3069_v6  ;;  %v3906_v31 = vrot.slane %v14190_v57, 1  ;;  %v3395_v43 = vshrl.u32 %v18170_v39, 16  ;;  %v3909_v33 = vrot.slane %v14191_v63, 1 }
 0x29c   : > { %v3910_v57 = vrot.slane %v16201_v19, 1  ;;  %v21063_v63 = vmov 0  }
 0x29d   : > { %v3908_v14 = vsel %vm2977_vm9, %v3906_v31, %v3907_v2  ;;  %v16202_v2 = vld [vmem:[#allocation2 + $0x2c] ss:$0 sps:$4 sm:$0x11]  }
 0x29e   : > { %6084 = vmatmul.mubr.bf16.gmra.mrb[112].mxu0 %v3064_v17  ;;  %v1982_v17 = vld [vmem:[#allocation2 + $0x19c] sm:$0xf]  ;;  %v3911_v31 = vsel %vm2977_vm9, %v3909_v33, %v3910_v57  ;;  %v16204_v33 = vld [vmem:[#allocation2 + $0x38] ss:$0 sps:$4 sm:$0x11]  }
 0x29f   : > { %6091 = vmatprep.mubr.bf16.mxu0 %v18371_v5  ;;  %v18382_v20 = vcombine.low %v1981_v1, %v1982_v17  ;;  %v3073_v1 = vsel %vm2977_vm9, %v3071_v40, %v3072_v47  ;;  %v3402_v17 = vshll.u32 %v16199_v34, 16  ;;  %v3407_v40 = vshrl.u32 %v18177_v46, 16 }
 0x2a0   : > { %v3414_v47 = vshll.u32 %v16201_v19, 16 }
 0x2a1   : > { %21062 = vst [vmem:[#allocation23_spill] sm:$0xff] %v18382_v20  ;;  %v3404_v3 = vrot.slane %v3402_v17, 1 }
 0x2a6   : > { %6092 = vmatmul.mubr.bf16.gmra.mrb[116].mxu0 %v3067_v8  ;;  %v3397_v8 = vshll.u32 %v18170_v39, 16 }
 0x2a7   : > { %6099 = vmatprep.mubr.bf16.mxu0 %v18375_v37 }
 0x2a8   : > { %v3399_v6 = vrot.slane %v3397_v8, 1  ;;  %v16200_v8 = vld [vmem:[#allocation6 + $0x180] sm:$0xff]  }
 0x2aa   : > { %v3400_v25 = vor.u32 %v3399_v6, %v3395_v43  ;;  %v3416_v6 = vrot.slane %v3414_v47, 1  ;;  %v3916_v47 = vrot.slane %v16204_v33, 1 }
 0x2ac   : > { %v3405_v39 = vsel %vm2464_vm0, %v3400_v25, %v3404_v3  ;;  %v3423_v25 = vrot.slane %v3421_v15, 1  ;;  %v3426_v3 = vshll.u32 %v16202_v2, 16  ;;  %v3438_v15 = vshll.u32 %v16204_v33, 16 }
 0x2ae   : > { %6100 = vmatmul.mubr.bf16.gmra.mrb[120].mxu0 %v3070_v0  ;;  %v3409_v0 = vshll.u32 %v18177_v46, 16  ;;  %v2018_v46 = vld [vmem:[#allocation2 + $0x30] sm:$0xe] }
 0x2af   : > { %6107 = vmatprep.mubr.bf16.mxu0 %v18382_v20  ;;  %v2017_v20 = vld [vmem:[#allocation2 + $0x24] sm:$0xe]  ;;  %v14193_v57 = vcombine.low %v2018_v46, %v18189_v60 }
 0x2b0   : > { %v3411_v34 = vrot.slane %v3409_v0, 1  ;;  %v14192_v44 = vcombine.low %v2017_v20, %v18179_v52  ;;  %v3419_v0 = vshrl.u32 %v18185_v62, 16  ;;  %v16206_v52 = vld [vmem:[#allocation6 + $0x190] sm:$0xff]  }
 0x2b1   : > { %v3915_v62 = vrot.slane %v14193_v57, 1  ;;  %v16218_v57 = vld [vmem:[#allocation6 + $0x1b0] sm:$0xff]  }
 0x2b2   : > { %v3412_v43 = vor.u32 %v3411_v34, %v3407_v40  ;;  %v3912_v17 = vrot.slane %v14192_v44, 1  ;;  %v3428_v40 = vrot.slane %v3426_v3, 1  ;;  %v16209_v34 = vld [vmem:[#allocation6 + $0x198] sm:$0xff]   ;;  %v3431_v44 = vshrl.u32 %v18194_v27, 16 }
 0x2b3   : > { %v2020_v3 = vld [vmem:[#allocation2 + $0x48] sm:$0xe] }
 0x2b4   : > { %v3417_v19 = vsel %vm2464_vm0, %v3412_v43, %v3416_v6  ;;  %v16212_v43 = vld [vmem:[#allocation6 + $0x1a0] sm:$0xff]   ;;  %v3917_v6 = vsel %vm2977_vm9, %v3915_v62, %v3916_v47 }
 0x2b6   : > { %6108 = vmatmul.mubr.bf16.gmra.mrb[124].mxu0 %v3073_v1  ;;  %v16203_v1 = vld [vmem:[#allocation6 + $0x188] sm:$0xff]  }
 0x2b7   : > { %6148 = vmatprep.mubr.bf16.mxu0 %v3908_v14  ;;  %v3913_v14 = vrot.slane %v16202_v2, 1 }
 0x2b9   : > { %v3914_v20 = vsel %vm2977_vm9, %v3912_v17, %v3913_v14  ;;  %v3445_v14 = vshll.u32 %v18203_v29, 16 }
 0x2be   : > { %6149 = vmatmul.mubr.bf16.vlgmr.msra.gmra.mrb[0].mxu0 %v3405_v39  ;;  %v3433_v39 = vshll.u32 %v18194_v27, 16 }
 0x2bf   : > { %6406 = vmatpush1.bf16.msra.mxu0 %v16200_v8  ;;  %6156 = vmatprep.mubr.bf16.mxu0 %v3911_v31  ;;  %v3424_v8 = vor.u32 %v3423_v25, %v3419_v0  ;;  %v2019_v31 = vld [vmem:[#allocation2 + $0x3c] sm:$0xe] }
 0x2c0   : > { %6407 = vmatprep.subr.bf16.mxu0 %v21063_v63  ;;  %v3435_v60 = vrot.slane %v3433_v39, 1  ;;  %v14194_v17 = vcombine.low %v2019_v31, %v18198_v23  ;;  %v16215_v0 = vld [vmem:[#allocation6 + $0x1a8] sm:$0xff]   ;;  %v3447_v23 = vrot.slane %v3445_v14, 1  ;;  %v16221_v31 = vld [vmem:[#allocation6 + $0x1b8] sm:$0xff]  }
 0x2c1   : > { %v3429_v2 = vsel %vm2464_vm0, %v3424_v8, %v3428_v40  ;;  %v16207_v8 = vld [vmem:[#allocation2 + $0x50] ss:$0 sps:$4 sm:$0x11]   ;;  %v14195_v40 = vcombine.low %v2020_v3, %v18207_v38  ;;  %v2022_v3 = vld [vmem:[#allocation2 + $0x60] sm:$0xe] }
 0x2c2   : > { %v3436_v46 = vor.u32 %v3435_v60, %v3431_v44  ;;  %v3918_v27 = vrot.slane %v14194_v17, 1  ;;  %v2021_v44 = vld [vmem:[#allocation2 + $0x54] sm:$0xe]  ;;  %v16208_v17 = vld [vmem:[#allocation2 + $0x5c] ss:$0 sps:$4 sm:$0x11]  }
 0x2c3   : > { %6408 = vmatpush1.bf16.msra.mxu0 %v16203_v1  ;;  %v16205_v1 = vld [vmem:[#allocation2 + $0x44] ss:$0 sps:$4 sm:$0x11]   ;;  %v14196_v14 = vcombine.low %v2021_v44, %v18216_v24 }
 0x2c4   : > { %6409 = vmatprep.subr.bf16.mxu0 %v21063_v63  ;;  %v3919_v25 = vrot.slane %v16205_v1, 1  ;;  %v3450_v33 = vshll.u32 %v16205_v1, 16 }
 0x2c6   : > { %6157 = vmatmul.mubr.bf16.gmra.mrb[4].mxu0 %v3417_v19  ;;  %v3440_v19 = vrot.slane %v3438_v15, 1  ;;  %v3920_v39 = vsel %vm2977_vm9, %v3918_v27, %v3919_v25  ;;  %v3452_v47 = vrot.slane %v3450_v33, 1  ;;  %v3455_v15 = vshrl.u32 %v18212_v41, 16  ;;  %v16227_v27 = vld [vmem:[#allocation6 + $0x1c8] sm:$0xff]   ;;  %v16230_v33 = vld [vmem:[#allocation6 + $0x1d0] sm:$0xff]  }
 0x2c7   : > { %6164 = vmatprep.mubr.bf16.mxu0 %v3914_v20  ;;  %6410 = vmatpush1.bf16.msra.mxu0 %v16206_v52  ;;  %v3443_v20 = vshrl.u32 %v18203_v29, 16  ;;  %v3921_v29 = vrot.slane %v14195_v40, 1  ;;  %v3925_v25 = vrot.slane %v16208_v17, 1  ;;  %v3481_v40 = vshll.u32 %v18230_v13, 16 }
 0x2c8   : > { %6411 = vmatprep.subr.bf16.mxu0 %v21063_v63  ;;  %v3441_v52 = vsel %vm2464_vm0, %v3436_v46, %v3440_v19  ;;  %v3469_v46 = vshll.u32 %v18221_v56, 16 }
 0x2c9   : > { %v3448_v62 = vor.u32 %v3447_v23, %v3443_v20  ;;  %v3467_v20 = vshrl.u32 %v18221_v56, 16  ;;  %v3474_v23 = vshll.u32 %v16208_v17, 16  ;;  %v3483_v44 = vrot.slane %v3481_v40, 1 }
 0x2ca   : > { %v3471_v24 = vrot.slane %v3469_v46, 1 }
 0x2cb   : > { %6412 = vmatpush1.bf16.msra.mxu0 %v16209_v34  ;;  %v3457_v34 = vshll.u32 %v18212_v41, 16  ;;  %v3453_v60 = vsel %vm2464_vm0, %v3448_v62, %v3452_v47  ;;  %v3924_v41 = vrot.slane %v14196_v14, 1  ;;  %v3476_v62 = vrot.slane %v3474_v23, 1 }
 0x2cc   : > { %6413 = vmatprep.subr.bf16.mxu0 %v21063_v63 }
 0x2cd   : > { %v3459_v38 = vrot.slane %v3457_v34, 1  ;;  %v3472_v34 = vor.u32 %v3471_v24, %v3467_v20 }
 0x2ce   : > { %6165 = vmatmul.mubr.bf16.gmra.mrb[8].mxu0 %v3429_v2  ;;  %v3922_v2 = vrot.slane %v16207_v8, 1 }
 0x2cf   : > { %6172 = vmatprep.mubr.bf16.mxu0 %v3917_v6  ;;  %6414 = vmatpush1.bf16.msra.mxu0 %v16212_v43  ;;  %v3462_v43 = vshll.u32 %v16207_v8, 16  ;;  %v16224_v6 = vld [vmem:[#allocation6 + $0x1c0] sm:$0xff]   ;;  %v3460_v19 = vor.u32 %v3459_v38, %v3455_v15  ;;  %v14197_v8 = vcombine.low %v2022_v3, %v18225_v4 }
 0x2d0   : > { %6415 = vmatprep.subr.bf16.mxu0 %v21063_v63  ;;  %v3923_v1 = vsel %vm2977_vm9, %v3921_v29, %v3922_v2  ;;  %v3477_v29 = vsel %vm2464_vm0, %v3472_v34, %v3476_v62  ;;  %v3479_v2 = vshrl.u32 %v18230_v13, 16  ;;  %v16211_v15 = vld [vmem:[#allocation2 + $0x74] ss:$0 sps:$4 sm:$0x11]  }
 0x2d1   : > { %v3927_v47 = vrot.slane %v14197_v8, 1  ;;  %v3931_v46 = vrot.slane %v16211_v15, 1  ;;  %v16214_v62 = vld [vmem:[#allocation2 + $0x8c] ss:$0 sps:$4 sm:$0x11]  }
 0x2d3   : > { %6416 = vmatpush1.bf16.msra.mxu0 %v16215_v0  ;;  %v3464_v0 = vrot.slane %v3462_v43, 1  ;;  %v16233_v43 = vld [vmem:[#allocation6 + $0x1d8] sm:$0xff]  }
 0x2d4   : > { %6417 = vmatprep.subr.bf16.mxu0 %v21063_v63 }
 0x2d6   : > { %6173 = vmatmul.mubr.bf16.gmra.mrb[12].mxu0 %v3441_v52  ;;  %v3465_v52 = vsel %vm2464_vm0, %v3460_v19, %v3464_v0  ;;  %v2024_v19 = vld [vmem:[#allocation2 + $0x78] sm:$0xe]  ;;  %v3491_v0 = vshrl.u32 %v18238_v35, 16 }
 0x2d7   : > { %6180 = vmatprep.mubr.bf16.mxu0 %v3920_v39  ;;  %6418 = vmatpush1.bf16.msra.mxu0 %v16218_v57  ;;  %v3926_v57 = vsel %vm2977_vm9, %v3924_v41, %v3925_v25  ;;  %v16210_v39 = vld [vmem:[#allocation2 + $0x68] ss:$0 sps:$4 sm:$0x11]   ;;  %v3498_v41 = vshll.u32 %v16211_v15, 16  ;;  %v14199_v3 = vcombine.low %v2024_v19, %v18241_v36 }
 0x2d8   : > { %6419 = vmatprep.subr.bf16.mxu0 %v21063_v63  ;;  %v3928_v56 = vrot.slane %v16210_v39, 1  ;;  %v3486_v4 = vshll.u32 %v16210_v39, 16  ;;  %v16213_v25 = vld [vmem:[#allocation2 + $0x80] ss:$0 sps:$4 sm:$0x11]  }
 0x2d9   : > { %v3500_v24 = vrot.slane %v3498_v41, 1  ;;  %v3933_v23 = vrot.slane %v14199_v3, 1  ;;  %v3510_v40 = vshll.u32 %v16213_v25, 16  ;;  %v16239_v3 = vld [vmem:[#allocation6 + $0x1e8] sm:$0xff]  }
 0x2da   : > { %v3488_v17 = vrot.slane %v3486_v4, 1  ;;  %v2026_v4 = vld [vmem:[#allocation2 + $0x90] sm:$0xe] }
 0x2db   : > { %6420 = vmatpush1.bf16.msra.mxu0 %v16221_v31  ;;  %v2023_v31 = vld [vmem:[#allocation2 + $0x6c] sm:$0xe] }
 0x2dc   : > { %6421 = vmatprep.subr.bf16.mxu0 %v21063_v63  ;;  %v14198_v38 = vcombine.low %v2023_v31, %v18233_v21 }
 0x2de   : > { %6181 = vmatmul.mubr.bf16.gmra.mrb[16].mxu0 %v3453_v60  ;;  %v3929_v60 = vsel %vm2977_vm9, %v3927_v47, %v3928_v56  ;;  %v3930_v14 = vrot.slane %v14198_v38, 1  ;;  %v16236_v47 = vld [vmem:[#allocation6 + $0x1e0] sm:$0xff]   ;;  %v3517_v56 = vshll.u32 %v18253_v53, 16  ;;  %v3522_v38 = vshll.u32 %v16214_v62, 16 }
 0x2df   : > { %6188 = vmatprep.mubr.bf16.mxu0 %v3923_v1  ;;  %6422 = vmatpush1.bf16.msra.mxu0 %v16224_v6  ;;  %v3493_v6 = vshll.u32 %v18238_v35, 16  ;;  %v3484_v1 = vor.u32 %v3483_v44, %v3479_v2  ;;  %v3503_v35 = vshrl.u32 %v18245_v28, 16  ;;  %v3937_v44 = vrot.slane %v16214_v62, 1  ;;  %v16241_v62 = vld [vmem:[#allocation6 + $0x200] sm:$0xff]  }
 0x2e0   : > { %6423 = vmatprep.subr.bf16.mxu0 %v21063_v63  ;;  %v3932_v21 = vsel %vm2977_vm9, %v3930_v14, %v3931_v46  ;;  %v3519_v15 = vrot.slane %v3517_v56, 1  ;;  %v3524_v14 = vrot.slane %v3522_v38, 1  ;;  %15037 = vmatprep.subr.bf16.mxu1 %v16241_v62  ;;  %v16244_v38 = vld [vmem:[#allocation6 + $0x208] sm:$0xff]  }
 0x2e1   : > { %v3489_v13 = vsel %vm2464_vm0, %v3484_v1, %v3488_v17  ;;  %v3529_v1 = vshll.u32 %v18260_v42, 16  ;;  %15038 = vmatpush3.bf16.msra.mxu1 %v16241_v62  ;;  %v16252_v62 = vld [vmem:[#allocation6 + $0x230] sm:$0xff]  }
 0x2e2   : > { %15039 = vmatprep.subr.bf16.mxu1 %v16244_v38 }
 0x2e3   : > { %6424 = vmatpush1.bf16.msra.mxu0 %v16227_v27  ;;  %v3495_v27 = vrot.slane %v3493_v6, 1  ;;  %v14201_v6 = vcombine.low %v2026_v4, %v18256_v7 }
 0x2e4   : > { %6425 = vmatprep.subr.bf16.mxu0 %v21063_v63 }
 0x2e5   : > { %v3496_v20 = vor.u32 %v3495_v27, %v3491_v0  ;;  %v3939_v46 = vrot.slane %v14201_v6, 1  ;;  %v3531_v27 = vrot.slane %v3529_v1, 1  ;;  %v3565_v6 = vshll.u32 %v18290_v49, 16  ;;  %15040 = vmatpush3.bf16.msra.mxu1 %v16244_v38  ;;  %v18492_v38 = vld [vmem:[#allocation2 + $0x20] ss:$0 sps:$4 sm:$0x11]  }
 0x2e6   : > { %6189 = vmatmul.mubr.bf16.gmra.mrb[20].mxu0 %v3465_v52  ;;  %v3505_v52 = vshll.u32 %v18245_v28, 16 }
 0x2e7   : > { %6196 = vmatprep.mubr.bf16.mxu0 %v3926_v57  ;;  %6426 = vmatpush1.bf16.msra.mxu0 %v16230_v33  ;;  %v3934_v33 = vrot.slane %v16213_v25, 1  ;;  %v2025_v57 = vld [vmem:[#allocation2 + $0x84] sm:$0xe]  ;;  %v3501_v39 = vsel %vm2464_vm0, %v3496_v20, %v3500_v24  ;;  %v16217_v25 = vld [vmem:[#allocation2 + $0xa4] ss:$0 sps:$4 sm:$0x11]  }
 0x2e8   : > { %6427 = vmatprep.subr.bf16.mxu0 %v21063_v63  ;;  %v3507_v8 = vrot.slane %v3505_v52, 1  ;;  %v14200_v36 = vcombine.low %v2025_v57, %v18248_v48  ;;  %v3541_v52 = vshll.u32 %v18268_v30, 16  ;;  %v2028_v57 = vld [vmem:[#allocation2 + $0xa8] sm:$0xe] }
 0x2e9   : > { %v3935_v34 = vsel %vm2977_vm9, %v3933_v23, %v3934_v33  ;;  %v3943_v33 = vrot.slane %v16217_v25, 1 }
 0x2ea   : > { %v3508_v31 = vor.u32 %v3507_v8, %v3503_v35  ;;  %v3936_v2 = vrot.slane %v14200_v36, 1  ;;  %v3543_v35 = vrot.slane %v3541_v52, 1  ;;  %v3546_v8 = vshll.u32 %v16217_v25, 16 }
 0x2eb   : > { %6428 = vmatpush1.bf16.msra.mxu0 %v16233_v43  ;;  %v16216_v43 = vld [vmem:[#allocation2 + $0x98] ss:$0 sps:$4 sm:$0x11]   ;;  %v3553_v36 = vshll.u32 %v18275_v51, 16  ;;  %v1463_v25 = vrot.slane %v18293_v59, 4 }
 0x2ec   : > { %6429 = vmatprep.subr.bf16.mxu0 %v21063_v63  ;;  %v3938_v48 = vsel %vm2977_vm9, %v3936_v2, %v3937_v44  ;;  %v3940_v19 = vrot.slane %v16216_v43, 1  ;;  %v3534_v41 = vshll.u32 %v16216_v43, 16  ;;  %v3548_v56 = vrot.slane %v3546_v8, 1  ;;  %v2029_v2 = vld [vmem:[#allocation2 + $0xb4] sm:$0xe]  ;;  %v16245_v43 = vld [vmem:[#allocation6 + $0x210] sm:$0xff]  }
 0x2ed   : > { %v3551_v44 = vshrl.u32 %v18275_v51, 16  ;;  %v3555_v4 = vrot.slane %v3553_v36, 1  ;;  %15041 = vmatprep.subr.bf16.mxu1 %v16245_v43  ;;  %v16223_v8 = vld [vmem:[#allocation2 + $0xec] ss:$0 sps:$4 sm:$0x11]  }
 0x2ee   : > { %6197 = vmatmul.mubr.bf16.gmra.mrb[24].mxu0 %v3477_v29  ;;  %v3512_v29 = vrot.slane %v3510_v40, 1  ;;  %v3536_v24 = vrot.slane %v3534_v41, 1  ;;  %v16219_v40 = vld [vmem:[#allocation2 + $0xb0] ss:$0 sps:$4 sm:$0x11]   ;;  %15042 = vmatpush3.bf16.msra.mxu1 %v16245_v43 }
 0x2ef   : > { %6204 = vmatprep.mubr.bf16.mxu0 %v3929_v60  ;;  %6430 = vmatpush1.bf16.msra.mxu0 %v16236_v47  ;;  %v3515_v60 = vshrl.u32 %v18253_v53, 16  ;;  %v3527_v53 = vshrl.u32 %v18260_v42, 16  ;;  %v3556_v1 = vor.u32 %v3555_v4, %v3551_v44  ;;  %v18488_v4 = vld [vmem:[#allocation2 + $0x1c] sm:$0xf]  ;;  %v18495_v43 = vld [vmem:[#allocation2 + $0x28] sm:$0xf] }
 0x2f0   : > { %6431 = vmatprep.subr.bf16.mxu0 %v21063_v63  ;;  %v3513_v28 = vsel %vm2464_vm0, %v3508_v31, %v3512_v29  ;;  %v3946_v29 = vrot.slane %v16219_v40, 1 }
 0x2f1   : > { %v3520_v17 = vor.u32 %v3519_v15, %v3515_v60  ;;  %v3532_v20 = vor.u32 %v3531_v27, %v3527_v53  ;;  %v16220_v60 = vld [vmem:[#allocation2 + $0xbc] ss:$0 sps:$4 sm:$0x11]   ;;  %v14204_v15 = vcombine.low %v2029_v2, %v18282_v12  ;;  %v16222_v27 = vld [vmem:[#allocation2 + $0xc8] ss:$0 sps:$4 sm:$0x11]  }
 0x2f2   : > { %v3949_v51 = vrot.slane %v16220_v60, 1  ;;  %v2032_v2 = vld [vmem:[#allocation2 + $0xf0] sm:$0xe] }
 0x2f3   : > { %v3525_v0 = vsel %vm2464_vm0, %v3520_v17, %v3524_v14  ;;  %6432 = vmatpush1.bf16.msra.mxu0 %v16239_v3  ;;  %v3537_v42 = vsel %vm2464_vm0, %v3532_v20, %v3536_v24  ;;  %v3948_v14 = vrot.slane %v14204_v15, 1  ;;  %v3577_v3 = vshll.u32 %v18302_v9, 16  ;;  %v16255_v15 = vld [vmem:[#allocation6 + $0x238] sm:$0xff]  }
 0x2f4   : > { %6433 = vmatprep.subr.bf16.mxu0 %v21063_v63 }
 0x2f5   : > { %v3950_v53 = vsel %vm2977_vm9, %v3948_v14, %v3949_v51  ;;  %v4835_v14 = vrot.slane %v18492_v38, 1 }
 0x2f6   : > { %6205 = vmatmul.mubr.bf16.gmra.mrb[28].mxu0 %v3489_v13  ;;  %v2027_v13 = vld [vmem:[#allocation2 + $0x9c] sm:$0xe] }
 0x2f7   : > { %6212 = vmatprep.mubr.bf16.mxu0 %v3932_v21  ;;  %v3941_v21 = vsel %vm2977_vm9, %v3939_v46, %v3940_v19  ;;  %v14202_v7 = vcombine.low %v2027_v13, %v18263_v22  ;;  %v2030_v46 = vld [vmem:[#allocation2 + $0xc0] sm:$0xe]  ;;  %v3563_v19 = vshrl.u32 %v18290_v49, 16  ;;  %v3567_v13 = vrot.slane %v3565_v6, 1  ;;  %v1788_v49 = vld [vmem:[#allocation2 + $0x1a0] sm:$0x1] }
 0x2f8   : > { %v14205_v41 = vcombine.low %v2030_v46, %v18295_v10  ;;  %v2031_v10 = vld [vmem:[#allocation2 + $0xe4] sm:$0xe]  ;;  %v3601_v46 = vshll.u32 %v18320_v61, 16 }
 0x2f9   : > { %v3942_v23 = vrot.slane %v14202_v7, 1  ;;  %v16248_v7 = vld [vmem:[#allocation6 + $0x220] sm:$0xff]   ;;  %v3568_v52 = vor.u32 %v3567_v13, %v3563_v19  ;;  %v2145_v6 = vld [vmem:[#allocation2 + $0x24] sm:$0xe] }
 0x2fa   : > { %v3951_v24 = vrot.slane %v14205_v41, 1  ;;  %v14287_v51 = vcombine.low %v2145_v6, %v18495_v43 }
 0x2fb   : > { %v3944_v22 = vsel %vm2977_vm9, %v3942_v23, %v3943_v33  ;;  %v3952_v23 = vrot.slane %v16222_v27, 1  ;;  %v1789_v33 = vsel %vm17568_vm8, %v1463_v25, %v1788_v49  ;;  %v3603_v25 = vrot.slane %v3601_v46, 1  ;;  %v16229_v46 = vld [vmem:[#allocation2 + $0x11c] ss:$0 sps:$4 sm:$0x11]  }
 0x2fc   : > { %1790 = vst [vmem:[#allocation2 + $0x1a0] sm:$0x1] %v1789_v33 }
 0x2fe   : > { %6213 = vmatmul.mubr.bf16.gmra.mrb[32].mxu0 %v3501_v39  ;;  %v3539_v39 = vshrl.u32 %v18268_v30, 16 }
 0x2ff   : > { %6220 = vmatprep.mubr.bf16.mxu0 %v3935_v34  ;;  %v14203_v34 = vcombine.low %v2028_v57, %v18271_v55  ;;  %v3575_v57 = vshrl.u32 %v18302_v9, 16 }
 0x300   : > { %v3544_v47 = vor.u32 %v3543_v35, %v3539_v39  ;;  %v3582_v39 = vshll.u32 %v16222_v27, 16  ;;  %v3953_v35 = vsel %vm2977_vm9, %v3951_v24, %v3952_v23  ;;  %v3613_v24 = vshll.u32 %v18327_v54, 16 }
 0x301   : > { %v3945_v31 = vrot.slane %v14203_v34, 1  ;;  %v3589_v34 = vshll.u32 %v18313_v26, 16 }
 0x302   : > { %v3549_v30 = vsel %vm2464_vm0, %v3544_v47, %v3548_v56  ;;  %v3584_v47 = vrot.slane %v3582_v39, 1  ;;  %v3955_v56 = vrot.slane %v16223_v8, 1 }
 0x303   : > { %v3947_v55 = vsel %vm2977_vm9, %v3945_v31, %v3946_v29  ;;  %v3587_v31 = vshrl.u32 %v18313_v26, 16  ;;  %v3591_v29 = vrot.slane %v3589_v34, 1  ;;  %v16777_v34 = vld [vmem:[#allocation2 + $0x10c] sm:$0xf] }
 0x305   : > { %v3592_v26 = vor.u32 %v3591_v29, %v3587_v31 }
 0x306   : > { %6221 = vmatmul.mubr.bf16.gmra.mrb[36].mxu0 %v3513_v28  ;;  %v3558_v28 = vshll.u32 %v16219_v40, 16  ;;  %v16251_v40 = vld [vmem:[#allocation6 + $0x228] sm:$0xff]  }
 0x307   : > { %6228 = vmatprep.mubr.bf16.mxu0 %v3938_v48  ;;  %v16243_v48 = vld [vmem:[#allocation6 + $0x1f0] sm:$0xff]  }
 0x308   : > { %v3560_v17 = vrot.slane %v3558_v28, 1  ;;  %6434 = vmatpush1.bf16.msra.mxu0 %v16243_v48  ;;  %v2144_v28 = vld [vmem:[#allocation2 + $0x18] sm:$0xe] }
 0x309   : > { %6435 = vmatprep.subr.bf16.mxu0 %v21063_v63  ;;  %v14286_v48 = vcombine.low %v2144_v28, %v18488_v4 }
 0x30a   : > { %v3561_v12 = vsel %vm2464_vm0, %v3556_v1, %v3560_v17 }
 0x30b   : > { %v4834_v17 = vrot.slane %v14286_v48, 1  ;;  %v2035_v48 = vld [vmem:[#allocation2 + $0x114] sm:$0xe] }
 0x30c   : > { %6436 = vmatpush1.bf16.msra.mxu0 %v16250_v58 }
 0x30d   : > { %v4836_v13 = vsel %vm2977_vm9, %v4834_v17, %v4835_v14 }
 0x30e   : > { %6229 = vmatmul.mubr.bf16.gmra.mrb[40].mxu0 %v3525_v0  ;;  %v3570_v0 = vshll.u32 %v16220_v60, 16  ;;  %v14207_v60 = vcombine.low %v2032_v2, %v18316_v45  ;;  %v18500_v45 = vld [vmem:[#allocation2 + $0x2c] ss:$0 sps:$4 sm:$0x11]   ;;  %15053 = vmatprep.mubr.bf16.mxu1 %v4836_v13  ;;  %v3625_v2 = vshll.u32 %v18331_v16, 16  ;;  %v3637_v13 = vshll.u32 %v18335_v18, 16 }
 0x30f   : > { %6236 = vmatprep.mubr.bf16.mxu0 %v3941_v21  ;;  %v16247_v21 = vld [vmem:[#allocation6 + $0x218] sm:$0xff]   ;;  %v4838_v27 = vrot.slane %v18500_v45, 1 }
 0x310   : > { %15043 = vmatprep.subr.bf16.mxu1 %v16247_v21  ;;  %v3572_v20 = vrot.slane %v3570_v0, 1  ;;  %v4837_v0 = vrot.slane %v14287_v51, 1  ;;  %v3627_v17 = vrot.slane %v3625_v2, 1 }
 0x311   : > { %15044 = vmatpush3.bf16.msra.mxu1 %v16247_v21  ;;  %v3599_v21 = vshrl.u32 %v18320_v61, 16  ;;  %v3611_v61 = vshrl.u32 %v18327_v54, 16  ;;  %v18521_v54 = vld [vmem:[#allocation2 + $0x44] ss:$0 sps:$4 sm:$0x11]  }
 0x312   : > { %15045 = vmatprep.subr.bf16.mxu1 %v16248_v7  ;;  %v3573_v59 = vsel %vm2464_vm0, %v3568_v52, %v3572_v20  ;;  %v16226_v20 = vld [vmem:[#allocation2 + $0x104] ss:$0 sps:$4 sm:$0x11]  }
 0x313   : > { %v3604_v23 = vor.u32 %v3603_v25, %v3599_v21  ;;  %v2036_v21 = vld [vmem:[#allocation2 + $0x120] sm:$0xe]  ;;  %v3635_v25 = vshrl.u32 %v18335_v18, 16  ;;  %v18543_v18 = vld [vmem:[#allocation2 + $0x5c] ss:$0 sps:$4 sm:$0x11]  }
 0x315   : > { %15046 = vmatpush3.bf16.msra.mxu1 %v16248_v7 }
 0x316   : > { %6237 = vmatmul.mubr.bf16.gmra.mrb[44].mxu0 %v3537_v42  ;;  %v3579_v42 = vrot.slane %v3577_v3, 1  ;;  %15047 = vmatprep.subr.bf16.mxu1 %v16251_v40  ;;  %v4839_v3 = vsel %vm2977_vm9, %v4837_v0, %v4838_v27 }
 0x317   : > { %6244 = vmatprep.mubr.bf16.mxu0 %v3944_v22  ;;  %v14206_v22 = vcombine.low %v2031_v10, %v18308_v32  ;;  %v3594_v32 = vshll.u32 %v16223_v8, 16  ;;  %v3618_v8 = vshll.u32 %v16226_v20, 16 }
 0x318   : > { %v3580_v36 = vor.u32 %v3579_v42, %v3575_v57  ;;  %v2034_v57 = vld [vmem:[#allocation2 + $0x108] sm:$0xe]  ;;  %v16228_v42 = vld [vmem:[#allocation2 + $0x110] ss:$0 sps:$4 sm:$0x11]  }
 0x319   : > { %15048 = vmatpush3.bf16.msra.mxu1 %v16251_v40  ;;  %v3954_v9 = vrot.slane %v14206_v22, 1  ;;  %v3596_v1 = vrot.slane %v3594_v32, 1  ;;  %v18513_v22 = vld [vmem:[#allocation2 + $0x34] sm:$0xf]  ;;  %v14209_v58 = vcombine.low %v2034_v57, %v16777_v34  ;;  %v3630_v14 = vshll.u32 %v16228_v42, 16 }
 0x31a   : > { %15049 = vmatprep.subr.bf16.mxu1 %v16252_v62  ;;  %v3585_v44 = vsel %vm2464_vm0, %v3580_v36, %v3584_v47  ;;  %v18519_v47 = vld [vmem:[#allocation2 + $0x40] sm:$0xf]  ;;  %v18541_v57 = vld [vmem:[#allocation2 + $0x58] sm:$0xf]  ;;  %v4850_v34 = vrot.slane %v18543_v18, 1 }
 0x31b   : > { %v3597_v41 = vsel %vm2464_vm0, %v3592_v26, %v3596_v1  ;;  %v3963_v28 = vrot.slane %v14209_v58, 1  ;;  %v3623_v1 = vshrl.u32 %v18331_v16, 16  ;;  %v16231_v16 = vld [vmem:[#allocation2 + $0x128] ss:$0 sps:$4 sm:$0x11]  }
 0x31d   : > { %15050 = vmatpush3.bf16.msra.mxu1 %v16252_v62  ;;  %v18516_v62 = vld [vmem:[#allocation2 + $0x38] ss:$0 sps:$4 sm:$0x11]   ;;  %v3628_v0 = vor.u32 %v3627_v17, %v3623_v1 }
 0x31e   : > { %6245 = vmatmul.mubr.bf16.gmra.mrb[48].mxu0 %v3549_v30  ;;  %v16225_v30 = vld [vmem:[#allocation2 + $0xf8] ss:$0 sps:$4 sm:$0x11]   ;;  %15051 = vmatprep.subr.bf16.mxu1 %v16255_v15  ;;  %v4841_v31 = vrot.slane %v18516_v62, 1 }
 0x31f   : > { %6252 = vmatprep.mubr.bf16.mxu0 %v3947_v55  ;;  %v3956_v55 = vsel %vm2977_vm9, %v3954_v9, %v3955_v56  ;;  %v3958_v19 = vrot.slane %v16225_v30, 1  ;;  %v3606_v7 = vshll.u32 %v16225_v30, 16  ;;  %v2147_v9 = vld [vmem:[#allocation2 + $0x3c] sm:$0xe]  ;;  %v3620_v30 = vrot.slane %v3618_v8, 1 }
 0x320   : > { %v14289_v29 = vcombine.low %v2147_v9, %v18519_v47  ;;  %v3649_v8 = vshll.u32 %v18339_v50, 16 }
 0x321   : > { %15052 = vmatpush3.bf16.msra.mxu1 %v16255_v15  ;;  %v3608_v33 = vrot.slane %v3606_v7, 1 }
 0x322   : > { %12127 = vmatprep.subr.bf16.mxu1 %v21063_v63  ;;  %v4843_v15 = vrot.slane %v14289_v29, 1 }
 0x323   : > { %v3609_v39 = vsel %vm2464_vm0, %v3604_v23, %v3608_v33  ;;  %v16779_v23 = vld [vmem:[#allocation2 + $0x124] sm:$0xf] }
 0x324   : > { %15054 = vmatmul.mubr.bf16.vlgmr.msra.gmra.mrb[0].mxu1 %v4839_v3  ;;  %v3639_v3 = vrot.slane %v3637_v13, 1  ;;  %v14211_v33 = vcombine.low %v2036_v21, %v16779_v23 }
 0x326   : > { %6253 = vmatmul.mubr.bf16.gmra.mrb[52].mxu0 %v3561_v12  ;;  %v3957_v12 = vrot.slane %v14207_v60, 1  ;;  %v3969_v58 = vrot.slane %v14211_v33, 1  ;;  %v21065_v33 = vld [vmem:[#allocation17_spill] sm:$0xff] }
 0x327   : > { %6260 = vmatprep.mubr.bf16.mxu0 %v3950_v53  ;;  %v2033_v53 = vld [vmem:[#allocation2 + $0xfc] sm:$0xe] }
 0x328   : > { %v3959_v52 = vsel %vm2977_vm9, %v3957_v12, %v3958_v19  ;;  %v14208_v49 = vcombine.low %v2033_v53, %v18323_v11  ;;  %v2146_v11 = vld [vmem:[#allocation2 + $0x30] sm:$0xe]  ;;  %v16778_v12 = vld [vmem:[#allocation2 + $0x118] sm:$0xf]  ;;  %v3632_v53 = vrot.slane %v3630_v14, 1 }
 0x329   : > { %v14288_v36 = vcombine.low %v2146_v11, %v18513_v22  ;;  %v14210_v19 = vcombine.low %v2035_v48, %v16778_v12  ;;  %v3640_v11 = vor.u32 %v3639_v3, %v3635_v25  ;;  %v21064_v48 = vld [vmem:[#allocation16_spill] sm:$0xff]  ;;  %v18560_v25 = vld [vmem:[#allocation2 + $0x68] ss:$0 sps:$4 sm:$0x11]   ;;  %v2151_v3 = vld [vmem:[#allocation2 + $0x6c] sm:$0xe] }
 0x32a   : > { %v3960_v10 = vrot.slane %v14208_v49, 1  ;;  %v3633_v7 = vsel %vm2464_vm0, %v3628_v0, %v3632_v53  ;;  %v2148_v49 = vld [vmem:[#allocation2 + $0x48] sm:$0xe]  ;;  %v18557_v0 = vld [vmem:[#allocation2 + $0x64] sm:$0xf] }
 0x32b   : > { %v4840_v56 = vrot.slane %v14288_v36, 1  ;;  %v3966_v27 = vrot.slane %v14210_v19, 1  ;;  %v3970_v36 = vrot.slane %v16231_v16, 1  ;;  %v2150_v53 = vld [vmem:[#allocation2 + $0x60] sm:$0xe] }
 0x32d   : > { %v4842_v60 = vsel %vm2977_vm9, %v4840_v56, %v4841_v31  ;;  %v2037_v31 = vld [vmem:[#allocation2 + $0x12c] sm:$0xe] }
 0x32e   : > { %6261 = vmatmul.mubr.bf16.gmra.mrb[56].mxu0 %v3573_v59  ;;  %v3961_v59 = vrot.slane %v16226_v20, 1  ;;  %15057 = vmatprep.mubr.bf16.mxu1 %v4842_v60  ;;  %v18535_v20 = vld [vmem:[#allocation2 + $0x4c] sm:$0xf]  ;;  %v16780_v60 = vld [vmem:[#allocation2 + $0x130] sm:$0xf] }
 0x32f   : > { %6268 = vmatprep.mubr.bf16.mxu0 %v3953_v35  ;;  %v3615_v35 = vrot.slane %v3613_v24, 1 }
 0x330   : > { %v3962_v40 = vsel %vm2977_vm9, %v3960_v10, %v3961_v59  ;;  %v18538_v10 = vld [vmem:[#allocation2 + $0x50] ss:$0 sps:$4 sm:$0x11]   ;;  %v14290_v59 = vcombine.low %v2148_v49, %v18535_v20 }
 0x331   : > { %v3616_v32 = vor.u32 %v3615_v35, %v3611_v61  ;;  %v2149_v61 = vld [vmem:[#allocation2 + $0x54] sm:$0xe] }
 0x332   : > { %v14291_v35 = vcombine.low %v2149_v61, %v18541_v57 }
 0x333   : > { %v3621_v6 = vsel %vm2464_vm0, %v3616_v32, %v3620_v30  ;;  %v3647_v32 = vshrl.u32 %v18339_v50, 16  ;;  %v3651_v30 = vrot.slane %v3649_v8, 1  ;;  %v16234_v50 = vld [vmem:[#allocation2 + $0x140] ss:$0 sps:$4 sm:$0x11]  }
 0x334   : > { %v4849_v56 = vrot.slane %v14291_v35, 1  ;;  %v3976_v8 = vrot.slane %v16234_v50, 1 }
 0x336   : > { %6269 = vmatmul.mubr.bf16.gmra.mrb[60].mxu0 %v3585_v44  ;;  %v4844_v44 = vrot.slane %v18521_v54, 1  ;;  %v4851_v29 = vsel %vm2977_vm9, %v4849_v56, %v4850_v34  ;;  %v2039_v34 = vld [vmem:[#allocation2 + $0x144] sm:$0xe] }
 0x337   : > { %6276 = vmatprep.mubr.bf16.mxu0 %v3956_v55  ;;  %v3964_v55 = vrot.slane %v16228_v42, 1  ;;  %v4846_v42 = vrot.slane %v14290_v59, 1  ;;  %v3673_v59 = vshll.u32 %v21065_v33, 16 }
 0x338   : > { %v4845_v26 = vsel %vm2977_vm9, %v4843_v15, %v4844_v44  ;;  %v3654_v44 = vshll.u32 %v16231_v16, 16  ;;  %v14212_v15 = vcombine.low %v2037_v31, %v16780_v60  ;;  %v14292_v16 = vcombine.low %v2150_v53, %v18557_v0  ;;  %v18582_v53 = vld [vmem:[#allocation2 + $0x80] ss:$0 sps:$4 sm:$0x11]  }
 0x339   : > { %15058 = vmatmul.mubr.bf16.gmra.mrb[4].mxu1 %v4845_v26  ;;  %v3965_v51 = vsel %vm2977_vm9, %v3963_v28, %v3964_v55  ;;  %v3971_v28 = vsel %vm2977_vm9, %v3969_v58, %v3970_v36  ;;  %v16232_v55 = vld [vmem:[#allocation2 + $0x134] ss:$0 sps:$4 sm:$0x11]   ;;  %v3661_v26 = vshll.u32 %v21064_v48, 16  ;;  %v3675_v56 = vrot.slane %v3673_v59, 1 }
 0x33a   : > { %v3656_v1 = vrot.slane %v3654_v44, 1  ;;  %v3972_v17 = vrot.slane %v14212_v15, 1  ;;  %v3973_v14 = vrot.slane %v16232_v55, 1  ;;  %v3666_v13 = vshll.u32 %v16232_v55, 16  ;;  %v21066_v44 = vld [vmem:[#allocation18_spill] sm:$0xff] }
 0x33b   : > { %v3663_v19 = vrot.slane %v3661_v26, 1  ;;  %v4852_v49 = vrot.slane %v14292_v16, 1  ;;  %v3678_v31 = vshll.u32 %v16234_v50, 16  ;;  %v2040_v26 = vld [vmem:[#allocation2 + $0x150] sm:$0xe] }
 0x33c   : > { %v2152_v50 = vld [vmem:[#allocation2 + $0x78] sm:$0xe]  ;;  %v18587_v16 = vld [vmem:[#allocation2 + $0x8c] ss:$0 sps:$4 sm:$0x11]  }
 0x33d   : > { %v3680_v60 = vrot.slane %v3678_v31, 1 }
 0x33e   : > { %6277 = vmatmul.mubr.bf16.gmra.mrb[64].mxu0 %v3597_v41  ;;  %v3967_v41 = vrot.slane %v16229_v46, 1 }
 0x33f   : > { %6284 = vmatprep.mubr.bf16.mxu0 %v3959_v52  ;;  %v3642_v52 = vshll.u32 %v16229_v46, 16  ;;  %v3659_v46 = vshrl.u32 %v21064_v48, 16 }
 0x340   : > { %v3968_v24 = vsel %vm2977_vm9, %v3966_v27, %v3967_v41  ;;  %v3974_v27 = vsel %vm2977_vm9, %v3972_v17, %v3973_v14  ;;  %v16781_v41 = vld [vmem:[#allocation2 + $0x13c] sm:$0xf] }
 0x341   : > { %v3664_v61 = vor.u32 %v3663_v19, %v3659_v46  ;;  %v18579_v46 = vld [vmem:[#allocation2 + $0x7c] sm:$0xf]  ;;  %v16783_v19 = vld [vmem:[#allocation2 + $0x154] sm:$0xf] }
 0x346   : > { %6285 = vmatmul.mubr.bf16.gmra.mrb[68].mxu0 %v3609_v39  ;;  %v4847_v39 = vrot.slane %v18538_v10, 1 }
 0x347   : > { %6292 = vmatprep.mubr.bf16.mxu0 %v3962_v40  ;;  %v3644_v40 = vrot.slane %v3642_v52, 1  ;;  %v18565_v52 = vld [vmem:[#allocation2 + $0x74] ss:$0 sps:$4 sm:$0x11]  }
 0x348   : > { %v4848_v9 = vsel %vm2977_vm9, %v4846_v42, %v4847_v39  ;;  %v3668_v42 = vrot.slane %v3666_v13, 1  ;;  %v4856_v39 = vrot.slane %v18565_v52, 1  ;;  %v14215_v13 = vcombine.low %v2040_v26, %v16783_v19  ;;  %v16785_v19 = vld [vmem:[#allocation2 + $0x16c] sm:$0xf] }
 0x349   : > { %15061 = vmatprep.mubr.bf16.mxu1 %v4848_v9  ;;  %v3645_v2 = vsel %vm2464_vm0, %v3640_v11, %v3644_v40  ;;  %v3671_v9 = vshrl.u32 %v21065_v33, 16 }
 0x34a   : > { %15062 = vmatmul.mubr.bf16.gmra.mrb[8].mxu1 %v4851_v29  ;;  %v3669_v36 = vsel %vm2464_vm0, %v3664_v61, %v3668_v42  ;;  %v4862_v42 = vrot.slane %v18587_v16, 1 }
 0x34b   : > { %v3676_v55 = vor.u32 %v3675_v56, %v3671_v9 }
 0x34d   : > { %v3681_v17 = vsel %vm2464_vm0, %v3676_v55, %v3680_v60 }
 0x34e   : > { %6293 = vmatmul.mubr.bf16.gmra.mrb[72].mxu0 %v3621_v6  ;;  %v3652_v6 = vor.u32 %v3651_v30, %v3647_v32  ;;  %v16782_v32 = vld [vmem:[#allocation2 + $0x148] sm:$0xf] }
 0x34f   : > { %6300 = vmatprep.mubr.bf16.mxu0 %v3965_v51  ;;  %v2038_v51 = vld [vmem:[#allocation2 + $0x138] sm:$0xe]  ;;  %v14214_v30 = vcombine.low %v2039_v34, %v16782_v32 }
 0x350   : > { %v3657_v12 = vsel %vm2464_vm0, %v3652_v6, %v3656_v1  ;;  %v14213_v21 = vcombine.low %v2038_v51, %v16781_v41  ;;  %v3683_v6 = vshrl.u32 %v21066_v44, 16  ;;  %v16237_v1 = vld [vmem:[#allocation2 + $0x158] ss:$0 sps:$4 sm:$0x11]   ;;  %v18585_v41 = vld [vmem:[#allocation2 + $0x88] sm:$0xf] }
 0x351   : > { %v3978_v15 = vrot.slane %v14214_v30, 1  ;;  %v3702_v56 = vshll.u32 %v16237_v1, 16  ;;  %v21068_v30 = vld [vmem:[#allocation20_spill] sm:$0xff] }
 0x352   : > { %v3975_v35 = vrot.slane %v14213_v21, 1  ;;  %v2153_v21 = vld [vmem:[#allocation2 + $0x84] sm:$0xe]  ;;  %v3707_v26 = vshrl.u32 %v21068_v30, 16 }
 0x353   : > { %v3704_v55 = vrot.slane %v3702_v56, 1 }
 0x354   : > { %v3977_v29 = vsel %vm2977_vm9, %v3975_v35, %v3976_v8  ;;  %v3982_v35 = vrot.slane %v16237_v1, 1 }
 0x356   : > { %6301 = vmatmul.mubr.bf16.gmra.mrb[76].mxu0 %v3633_v7  ;;  %v18563_v7 = vld [vmem:[#allocation2 + $0x70] sm:$0xf] }
 0x357   : > { %6308 = vmatprep.mubr.bf16.mxu0 %v3968_v24  ;;  %v4853_v24 = vrot.slane %v18560_v25, 1  ;;  %v14293_v23 = vcombine.low %v2151_v3, %v18563_v7 }
 0x359   : > { %v4854_v11 = vsel %vm2977_vm9, %v4852_v49, %v4853_v24  ;;  %v4855_v40 = vrot.slane %v14293_v23, 1  ;;  %v4859_v49 = vrot.slane %v18582_v53, 1  ;;  %v14295_v24 = vcombine.low %v2153_v21, %v18585_v41  ;;  %v21067_v23 = vld [vmem:[#allocation19_spill] sm:$0xff] }
 0x35a   : > { %15065 = vmatprep.mubr.bf16.mxu1 %v4854_v11  ;;  %v3697_v33 = vshll.u32 %v21067_v23, 16 }
 0x35b   : > { %v4857_v58 = vsel %vm2977_vm9, %v4855_v40, %v4856_v39  ;;  %v3981_v39 = vrot.slane %v14215_v13, 1  ;;  %v4861_v11 = vrot.slane %v14295_v24, 1  ;;  %v2041_v40 = vld [vmem:[#allocation2 + $0x15c] sm:$0xe] }
 0x35c   : > { %15066 = vmatmul.mubr.bf16.gmra.mrb[12].mxu1 %v4857_v58  ;;  %v3699_v9 = vrot.slane %v3697_v33, 1  ;;  %v18609_v24 = vld [vmem:[#allocation2 + $0xa4] ss:$0 sps:$4 sm:$0x11]  }
 0x35d   : > { %v4863_v34 = vsel %vm2977_vm9, %v4861_v11, %v4862_v42  ;;  %v3983_v31 = vsel %vm2977_vm9, %v3981_v39, %v3982_v35 }
 0x35e   : > { %6309 = vmatmul.mubr.bf16.gmra.mrb[80].mxu0 %v3645_v2  ;;  %v16235_v2 = vld [vmem:[#allocation2 + $0x14c] ss:$0 sps:$4 sm:$0x11]  }
 0x35f   : > { %6316 = vmatprep.mubr.bf16.mxu0 %v3971_v28  ;;  %v3685_v28 = vshll.u32 %v21066_v44, 16  ;;  %v3979_v48 = vrot.slane %v16235_v2, 1  ;;  %v3690_v51 = vshll.u32 %v16235_v2, 16  ;;  %v16784_v2 = vld [vmem:[#allocation2 + $0x160] sm:$0xf]  ;;  %v3709_v44 = vshll.u32 %v21068_v30, 16 }
 0x360   : > { %v14216_v32 = vcombine.low %v2041_v40, %v16784_v2  ;;  %v16242_v30 = vld [vmem:[#allocation2 + $0x17c] ss:$0 sps:$4 sm:$0x11]  }
 0x361   : > { %v3687_v14 = vrot.slane %v3685_v28, 1  ;;  %v3692_v61 = vrot.slane %v3690_v51, 1  ;;  %v18601_v51 = vld [vmem:[#allocation2 + $0x94] sm:$0xf] }
 0x362   : > { %v3984_v60 = vrot.slane %v14216_v32, 1 }
 0x363   : > { %v3688_v59 = vor.u32 %v3687_v14, %v3683_v6  ;;  %v16240_v6 = vld [vmem:[#allocation2 + $0x170] ss:$0 sps:$4 sm:$0x11]  }
 0x364   : > { %v3988_v40 = vrot.slane %v16240_v6, 1  ;;  %v3726_v2 = vshll.u32 %v16240_v6, 16 }
 0x365   : > { %v3693_v58 = vsel %vm2464_vm0, %v3688_v59, %v3692_v61  ;;  %v21069_v61 = vld [vmem:[#allocation21_spill] sm:$0xff] }
 0x366   : > { %6317 = vmatmul.mubr.bf16.gmra.mrb[84].mxu0 %v3657_v12  ;;  %v3980_v12 = vsel %vm2977_vm9, %v3978_v15, %v3979_v48  ;;  %v2042_v48 = vld [vmem:[#allocation2 + $0x168] sm:$0xe]  ;;  %v3721_v42 = vshll.u32 %v21069_v61, 16 }
 0x367   : > { %6324 = vmatprep.mubr.bf16.mxu0 %v3974_v27  ;;  %v14294_v27 = vcombine.low %v2152_v50, %v18579_v46  ;;  %v2154_v50 = vld [vmem:[#allocation2 + $0x90] sm:$0xe]  ;;  %v14217_v13 = vcombine.low %v2042_v48, %v16785_v19  ;;  %v3728_v48 = vrot.slane %v3726_v2, 1  ;;  %v3738_v19 = vshll.u32 %v16242_v30, 16 }
 0x368   : > { %v14296_v21 = vcombine.low %v2154_v50, %v18601_v51  ;;  %v16246_v50 = vld [vmem:[#allocation2 + $0x188] ss:$0 sps:$4 sm:$0x11]  }
 0x369   : > { %v4858_v3 = vrot.slane %v14294_v27, 1  ;;  %v18604_v27 = vld [vmem:[#allocation2 + $0x98] ss:$0 sps:$4 sm:$0x11]   ;;  %v3987_v11 = vrot.slane %v14217_v13, 1 }
 0x36a   : > { %v4865_v33 = vrot.slane %v18604_v27, 1  ;;  %v18623_v13 = vld [vmem:[#allocation2 + $0xac] sm:$0xf] }
 0x36b   : > { %v4860_v8 = vsel %vm2977_vm9, %v4858_v3, %v4859_v49  ;;  %v18607_v3 = vld [vmem:[#allocation2 + $0xa0] sm:$0xf]  ;;  %v2155_v49 = vld [vmem:[#allocation2 + $0x9c] sm:$0xe]  ;;  %v3989_v32 = vsel %vm2977_vm9, %v3987_v11, %v3988_v40 }
 0x36c   : > { %15069 = vmatprep.mubr.bf16.mxu1 %v4860_v8  ;;  %v14297_v59 = vcombine.low %v2155_v49, %v18607_v3  ;;  %v4868_v8 = vrot.slane %v18609_v24, 1 }
 0x36d   : > { %15070 = vmatmul.mubr.bf16.gmra.mrb[16].mxu1 %v4863_v34 }
 0x36e   : > { %6325 = vmatmul.mubr.bf16.gmra.mrb[88].mxu0 %v3669_v36  ;;  %v3695_v36 = vshrl.u32 %v21067_v23, 16  ;;  %v4864_v23 = vrot.slane %v14296_v21, 1  ;;  %v2156_v21 = vld [vmem:[#allocation2 + $0xa8] sm:$0xe] }
 0x36f   : > { %6332 = vmatprep.mubr.bf16.mxu0 %v3977_v29  ;;  %v16238_v29 = vld [vmem:[#allocation2 + $0x164] ss:$0 sps:$4 sm:$0x11]  }
 0x370   : > { %v3700_v28 = vor.u32 %v3699_v9, %v3695_v36  ;;  %v3985_v15 = vrot.slane %v16238_v29, 1  ;;  %v3714_v14 = vshll.u32 %v16238_v29, 16  ;;  %v4866_v34 = vsel %vm2977_vm9, %v4864_v23, %v4865_v33  ;;  %v2043_v36 = vld [vmem:[#allocation2 + $0x174] sm:$0xe]  ;;  %v16787_v23 = vld [vmem:[#allocation2 + $0x184] sm:$0xf] }
 0x371   : > { %15073 = vmatprep.mubr.bf16.mxu1 %v4866_v34  ;;  %v3723_v29 = vrot.slane %v3721_v42, 1  ;;  %v18629_v42 = vld [vmem:[#allocation2 + $0xb8] sm:$0xf]  ;;  %v3745_v34 = vshll.u32 %v18371_v5, 16 }
 0x372   : > { %v3705_v1 = vsel %vm2464_vm0, %v3700_v28, %v3704_v55  ;;  %v3716_v35 = vrot.slane %v3714_v14, 1  ;;  %v21070_v55 = vld [vmem:[#allocation22_spill] sm:$0xff] }
 0x373   : > { %v3731_v14 = vshrl.u32 %v21070_v55, 16 }
 0x376   : > { %6333 = vmatmul.mubr.bf16.gmra.mrb[92].mxu0 %v3681_v17  ;;  %v3711_v17 = vrot.slane %v3709_v44, 1  ;;  %v16786_v44 = vld [vmem:[#allocation2 + $0x178] sm:$0xf] }
 0x377   : > { %6340 = vmatprep.mubr.bf16.mxu0 %v3980_v12  ;;  %v3986_v12 = vsel %vm2977_vm9, %v3984_v60, %v3985_v15  ;;  %v14218_v28 = vcombine.low %v2043_v36, %v16786_v44  ;;  %v3733_v60 = vshll.u32 %v21070_v55, 16  ;;  %v3740_v36 = vrot.slane %v3738_v19, 1 }
 0x378   : > { %v3712_v39 = vor.u32 %v3711_v17, %v3707_v26  ;;  %v2044_v17 = vld [vmem:[#allocation2 + $0x180] sm:$0xe]  ;;  %v3747_v55 = vrot.slane %v3745_v34, 1 }
 0x379   : > { %v3990_v26 = vrot.slane %v14218_v28, 1  ;;  %v14219_v33 = vcombine.low %v2044_v17, %v16787_v23  ;;  %v3743_v28 = vshrl.u32 %v18371_v5, 16  ;;  %v3757_v17 = vshll.u32 %v18375_v37, 16  ;;  %v2048_v23 = vld [vmem:[#allocation2 + $0x18] sm:$0xf] }
 0x37a   : > { %v3717_v56 = vsel %vm2464_vm0, %v3712_v39, %v3716_v35  ;;  %v2157_v39 = vld [vmem:[#allocation2 + $0xb4] sm:$0xe]  ;;  %v18631_v35 = vld [vmem:[#allocation2 + $0xbc] ss:$0 sps:$4 sm:$0x11]  }
 0x37b   : > { %v14299_v40 = vcombine.low %v2157_v39, %v18629_v42  ;;  %v3759_v5 = vrot.slane %v3757_v17, 1  ;;  %v16789_v39 = vld [vmem:[#allocation2 + $0x19c] sm:$0xf] }
 0x37d   : > { %v4873_v2 = vrot.slane %v14299_v40, 1  ;;  %v2158_v40 = vld [vmem:[#allocation2 + $0xc0] sm:$0xe] }
 0x37e   : > { %6341 = vmatmul.mubr.bf16.gmra.mrb[96].mxu0 %v3693_v58  ;;  %v4867_v58 = vrot.slane %v14297_v59, 1  ;;  %v18626_v59 = vld [vmem:[#allocation2 + $0xb0] ss:$0 sps:$4 sm:$0x11]  }
 0x37f   : > { %6348 = vmatprep.mubr.bf16.mxu0 %v3983_v31  ;;  %v3719_v31 = vshrl.u32 %v21069_v61, 16  ;;  %v14298_v61 = vcombine.low %v2156_v21, %v18623_v13  ;;  %v4871_v11 = vrot.slane %v18626_v59, 1  ;;  %v2046_v21 = vld [vmem:[#allocation2 + $0x198] sm:$0xe] }
 0x380   : > { %v4869_v9 = vsel %vm2977_vm9, %v4867_v58, %v4868_v8 }
 0x381   : > { %15074 = vmatmul.mubr.bf16.gmra.mrb[20].mxu1 %v4869_v9  ;;  %v3724_v15 = vor.u32 %v3723_v29, %v3719_v31  ;;  %v4870_v8 = vrot.slane %v14298_v61, 1  ;;  %v4874_v9 = vrot.slane %v18631_v35, 1  ;;  %v3994_v31 = vrot.slane %v16246_v50, 1 }
 0x383   : > { %v3729_v6 = vsel %vm2464_vm0, %v3724_v15, %v3728_v48  ;;  %v4872_v29 = vsel %vm2977_vm9, %v4870_v8, %v4871_v11  ;;  %v16249_v48 = vld [vmem:[#allocation2 + $0x194] ss:$0 sps:$4 sm:$0x11]   ;;  %v14221_v8 = vcombine.low %v2046_v21, %v16789_v39  ;;  %v18645_v11 = vld [vmem:[#allocation2 + $0xc4] sm:$0xf] }
 0x384   : > { %15077 = vmatprep.mubr.bf16.mxu1 %v4872_v29  ;;  %v3997_v19 = vrot.slane %v16249_v48, 1  ;;  %v16302_v29 = vld [vmem:[#allocation2 + $0xd4] ss:$0 sps:$4 sm:$0x11]  }
 0x386   : > { %6349 = vmatmul.mubr.bf16.gmra.mrb[100].mxu0 %v3705_v1  ;;  %v3991_v1 = vrot.slane %v16242_v30, 1  ;;  %v4875_v30 = vsel %vm2977_vm9, %v4873_v2, %v4874_v9  ;;  %v2079_v9 = vld [vmem:[#allocation2 + $0xd0] sm:$0xf] }
 0x387   : > { %6356 = vmatprep.mubr.bf16.mxu0 %v3986_v12  ;;  %v3735_v12 = vrot.slane %v3733_v60, 1  ;;  %v3750_v60 = vshll.u32 %v16246_v50, 16  ;;  %v3762_v50 = vshll.u32 %v16249_v48, 16 }
 0x388   : > { %v3992_v49 = vsel %vm2977_vm9, %v3990_v26, %v3991_v1  ;;  %v16788_v26 = vld [vmem:[#allocation2 + $0x190] sm:$0xf] }
 0x389   : > { %v3736_v58 = vor.u32 %v3735_v12, %v3731_v14  ;;  %15078 = vmatmul.mubr.bf16.gmra.mrb[24].mxu1 %v4875_v30  ;;  %v3748_v14 = vor.u32 %v3747_v55, %v3743_v28  ;;  %v3764_v2 = vrot.slane %v3762_v50, 1  ;;  %v21071_v28 = vld [vmem:[#allocation23_spill] sm:$0xff] }
 0x38a   : > { %v3769_v55 = vshll.u32 %v21071_v28, 16  ;;  %v3767_v21 = vshrl.u32 %v21071_v28, 16 }
 0x38b   : > { %v3741_v44 = vsel %vm2464_vm0, %v3736_v58, %v3740_v36  ;;  %v18649_v58 = vcombine.low %v2048_v23, %v18488_v4  ;;  %v18651_v36 = vld [vmem:[#allocation2 + $0xc8] ss:$0 sps:$4 sm:$0x11]   ;;  %v2078_v4 = vld [vmem:[#allocation2 + $0xcc] sm:$0xf] }
 0x38c   : > { %v4877_v30 = vrot.slane %v18651_v36, 1 }
 0x38e   : > { %6357 = vmatmul.mubr.bf16.gmra.mrb[104].mxu0 %v3717_v56  ;;  %v3993_v56 = vrot.slane %v14219_v33, 1  ;;  %v16253_v33 = vld [vmem:[#allocation2 + $0x1a0] ss:$0 sps:$4 sm:$0x11]  }
 0x38f   : > { %6364 = vmatprep.mubr.bf16.mxu0 %v3989_v32  ;;  %v2045_v32 = vld [vmem:[#allocation2 + $0x18c] sm:$0xe]  ;;  %v4000_v48 = vrot.slane %v16253_v33, 1 }
 0x390   : > { %v3995_v15 = vsel %vm2977_vm9, %v3993_v56, %v3994_v31  ;;  %v14220_v1 = vcombine.low %v2045_v32, %v16788_v26  ;;  %v2159_v31 = vld [vmem:[#allocation2 + $0xcc] sm:$0xe]  ;;  %v2050_v26 = vld [vmem:[#allocation2 + $0x24] sm:$0xf] }
 0x391   : > { %v18664_v23 = vcombine.low %v2050_v26, %v18495_v43 }
 0x392   : > { %v3996_v12 = vrot.slane %v14220_v1, 1  ;;  %v4325_v1 = vshll.u32 %v18649_v58, 16 }
 0x393   : > { %v4337_v43 = vshll.u32 %v18664_v23, 16 }
 0x394   : > { %v3998_v34 = vsel %vm2977_vm9, %v3996_v12, %v3997_v19  ;;  %v18659_v12 = vcombine.low %v2078_v4, %v2079_v9  ;;  %v4327_v39 = vrot.slane %v4325_v1, 1  ;;  %v18676_v4 = vld [vmem:[#allocation2 + $0xf4] sm:$0xf] }
 0x396   : > { %6365 = vmatmul.mubr.bf16.gmra.mrb[108].mxu0 %v3729_v6  ;;  %v3752_v6 = vrot.slane %v3750_v60, 1  ;;  %v3999_v60 = vrot.slane %v14221_v8, 1  ;;  %v4330_v8 = vshll.u32 %v18492_v38, 16  ;;  %v4335_v38 = vshrl.u32 %v18664_v23, 16 }
 0x397   : > { %6372 = vmatprep.mubr.bf16.mxu0 %v3992_v49  ;;  %v3755_v49 = vshrl.u32 %v18375_v37, 16  ;;  %v14300_v37 = vcombine.low %v2158_v40, %v18645_v11  ;;  %v16304_v40 = vld [vmem:[#allocation8] sm:$0xff]  }
 0x398   : > { %v3753_v61 = vsel %vm2464_vm0, %v3748_v14, %v3752_v6  ;;  %v4001_v50 = vsel %vm2977_vm9, %v3999_v60, %v4000_v48  ;;  %12128 = vmatpush1.bf16.msra.mxu1 %v16304_v40  ;;  %v4339_v60 = vrot.slane %v4337_v43, 1 }
 0x399   : > { %v3760_v56 = vor.u32 %v3759_v5, %v3755_v49  ;;  %v4876_v32 = vrot.slane %v14300_v37, 1  ;;  %v3771_v49 = vrot.slane %v3769_v55, 1  ;;  %v3774_v5 = vshll.u32 %v16253_v33, 16  ;;  %12129 = vmatprep.subr.bf16.mxu1 %v21063_v63 }
 0x39a   : > { %v4505_v37 = vshll.u32 %v18659_v12, 16 }
 0x39b   : > { %v4878_v17 = vsel %vm2977_vm9, %v4876_v32, %v4877_v30  ;;  %v3765_v6 = vsel %vm2464_vm0, %v3760_v56, %v3764_v2  ;;  %v3772_v33 = vor.u32 %v3771_v49, %v3767_v21  ;;  %v3776_v56 = vrot.slane %v3774_v5, 1  ;;  %v18690_v21 = vld [vmem:[#allocation2 + $0x104] ss:$0 sps:$4 sm:$0x11]  }
 0x39c   : > { %15081 = vmatprep.mubr.bf16.mxu1 %v4878_v17  ;;  %v4332_v2 = vrot.slane %v4330_v8, 1  ;;  %v4507_v32 = vrot.slane %v4505_v37, 1  ;;  %v18685_v17 = vld [vmem:[#allocation2 + $0xf8] ss:$0 sps:$4 sm:$0x11]  }
 0x39d   : > { %v3777_v55 = vsel %vm2464_vm0, %v3772_v33, %v3776_v56  ;;  %v4883_v5 = vrot.slane %v18685_v17, 1  ;;  %v2054_v37 = vld [vmem:[#allocation2 + $0x3c] sm:$0xf] }
 0x39e   : > { %6373 = vmatmul.mubr.bf16.gmra.mrb[112].mxu0 %v3741_v44  ;;  %v14301_v44 = vcombine.low %v2159_v31, %v2079_v9  ;;  %v4510_v9 = vshll.u32 %v16302_v29, 16  ;;  %v18701_v56 = vcombine.low %v2054_v37, %v18519_v47 }
 0x39f   : > { %6380 = vmatprep.mubr.bf16.mxu0 %v3995_v15  ;;  %v4880_v15 = vrot.slane %v16302_v29, 1  ;;  %v4342_v29 = vshll.u32 %v18500_v45, 16  ;;  %v16305_v45 = vld [vmem:[#allocation8 + $0x8] sm:$0xff]  }
 0x3a0   : > { %v4879_v14 = vrot.slane %v14301_v44, 1  ;;  %v4512_v30 = vrot.slane %v4510_v9, 1  ;;  %v2052_v44 = vld [vmem:[#allocation2 + $0x30] sm:$0xf]  ;;  %12130 = vmatpush1.bf16.msra.mxu1 %v16305_v45  ;;  %v4359_v47 = vshrl.u32 %v18701_v56, 16 }
 0x3a1   : > { %v18680_v26 = vcombine.low %v2052_v44, %v18513_v22  ;;  %12131 = vmatprep.subr.bf16.mxu1 %v21063_v63  ;;  %v2163_v45 = vld [vmem:[#allocation2 + $0x114] sm:$0xe] }
 0x3a2   : > { %v4881_v19 = vsel %vm2977_vm9, %v4879_v14, %v4880_v15  ;;  %v2160_v15 = vld [vmem:[#allocation2 + $0xf0] sm:$0xe] }
 0x3a3   : > { %15082 = vmatmul.mubr.bf16.gmra.mrb[28].mxu1 %v4881_v19  ;;  %v14302_v14 = vcombine.low %v2160_v15, %v18676_v4  ;;  %v2161_v19 = vld [vmem:[#allocation2 + $0xfc] sm:$0xe]  ;;  %v4349_v8 = vshll.u32 %v18680_v26, 16  ;;  %v4347_v43 = vshrl.u32 %v18680_v26, 16 }
 0x3a5   : > { %v4882_v49 = vrot.slane %v14302_v14, 1 }
 0x3a6   : > { %6381 = vmatmul.mubr.bf16.gmra.mrb[116].mxu0 %v3753_v61  ;;  %v4323_v61 = vshrl.u32 %v18649_v58, 16 }
 0x3a7   : > { %6388 = vmatprep.mubr.bf16.mxu0 %v3998_v34  ;;  %v4503_v34 = vshrl.u32 %v18659_v12, 16  ;;  %v4884_v40 = vsel %vm2977_vm9, %v4882_v49, %v4883_v5  ;;  %v18721_v49 = vld [vmem:[#allocation2 + $0x11c] ss:$0 sps:$4 sm:$0x11]  }
 0x3a8   : > { %v4328_v31 = vor.u32 %v4327_v39, %v4323_v61  ;;  %v4344_v61 = vrot.slane %v4342_v29, 1  ;;  %v4886_v39 = vrot.slane %v18690_v21, 1  ;;  %15085 = vmatprep.mubr.bf16.mxu1 %v4884_v40  ;;  %v2162_v29 = vld [vmem:[#allocation2 + $0x108] sm:$0xe] }
 0x3a9   : > { %v4508_v28 = vor.u32 %v4507_v32, %v4503_v34  ;;  %v16312_v32 = vld [vmem:[#allocation8 + $0x10] sm:$0xff]  }
 0x3aa   : > { %v4333_v48 = vsel %vm2464_vm0, %v4328_v31, %v4332_v2  ;;  %v4351_v31 = vrot.slane %v4349_v8, 1  ;;  %v4354_v2 = vshll.u32 %v18516_v62, 16  ;;  %12132 = vmatpush1.bf16.msra.mxu1 %v16312_v32  ;;  %v2058_v8 = vld [vmem:[#allocation2 + $0x54] sm:$0xf] }
 0x3ab   : > { %v18683_v1 = vsel %vm2464_vm0, %v4508_v28, %v4512_v30  ;;  %v2056_v28 = vld [vmem:[#allocation2 + $0x48] sm:$0xf]  ;;  %12133 = vmatprep.subr.bf16.mxu1 %v21063_v63  ;;  %v16320_v32 = vld [vmem:[#allocation8 + $0x20] sm:$0xff]  }
 0x3ac   : > { %v4352_v30 = vor.u32 %v4351_v31, %v4347_v43  ;;  %v4356_v44 = vrot.slane %v4354_v2, 1  ;;  %v18714_v15 = vcombine.low %v2056_v28, %v18535_v20  ;;  %v4378_v2 = vshll.u32 %v18538_v10, 16  ;;  %v2060_v28 = vld [vmem:[#allocation2 + $0x60] sm:$0xf] }
 0x3ad   : > { %v2164_v10 = vld [vmem:[#allocation2 + $0x120] sm:$0xe] }
 0x3ae   : > { %6389 = vmatmul.mubr.bf16.gmra.mrb[120].mxu0 %v3765_v6  ;;  %v18688_v6 = vld [vmem:[#allocation2 + $0x100] sm:$0xf]  ;;  %v4357_v62 = vsel %vm2464_vm0, %v4352_v30, %v4356_v44  ;;  %v4373_v40 = vshll.u32 %v18714_v15, 16  ;;  %v4371_v43 = vshrl.u32 %v18714_v15, 16 }
 0x3af   : > { %6396 = vmatprep.mubr.bf16.mxu0 %v4001_v50  ;;  %v14303_v22 = vcombine.low %v2161_v19, %v18688_v6  ;;  %v4340_v50 = vor.u32 %v4339_v60, %v4335_v38  ;;  %v4361_v38 = vshll.u32 %v18701_v56, 16  ;;  %v18710_v60 = vld [vmem:[#allocation2 + $0x10c] sm:$0xf]  ;;  %v18719_v19 = vld [vmem:[#allocation2 + $0x118] sm:$0xf] }
 0x3b0   : > { %v14304_v14 = vcombine.low %v2162_v29, %v18710_v60  ;;  %v4375_v31 = vrot.slane %v4373_v40, 1  ;;  %v18742_v29 = vld [vmem:[#allocation2 + $0x124] sm:$0xf] }
 0x3b1   : > { %v4885_v34 = vrot.slane %v14303_v22, 1  ;;  %v4345_v33 = vsel %vm2464_vm0, %v4340_v50, %v4344_v61  ;;  %v14305_v50 = vcombine.low %v2163_v45, %v18719_v19  ;;  %v4892_v61 = vrot.slane %v18721_v49, 1  ;;  %v18751_v45 = vld [vmem:[#allocation2 + $0x130] sm:$0xf] }
 0x3b2   : > { %v4888_v5 = vrot.slane %v14304_v14, 1  ;;  %v4376_v44 = vor.u32 %v4375_v31, %v4371_v43  ;;  %v14306_v14 = vcombine.low %v2164_v10, %v18742_v29 }
 0x3b3   : > { %v4887_v9 = vsel %vm2977_vm9, %v4885_v34, %v4886_v39  ;;  %v4891_v37 = vrot.slane %v14305_v50, 1 }
 0x3b4   : > { %15086 = vmatmul.mubr.bf16.gmra.mrb[32].mxu1 %v4887_v9  ;;  %v18732_v9 = vcombine.low %v2058_v8, %v18541_v57 }
 0x3b6   : > { %6397 = vmatmul.mubr.bf16.gmra.mrb[124].mxu0 %v3777_v55  ;;  %v4366_v55 = vshll.u32 %v18521_v54, 16  ;;  %v16313_v54 = vld [vmem:[#allocation8 + $0x18] sm:$0xff]   ;;  %v4385_v30 = vshll.u32 %v18732_v9, 16  ;;  %v4383_v57 = vshrl.u32 %v18732_v9, 16 }
 0x3b7   : > { %6437 = vmatprep.mubr.bf16.mxu0 %v4333_v48  ;;  %v18716_v48 = vld [vmem:[#allocation2 + $0x110] ss:$0 sps:$4 sm:$0x11]   ;;  %12134 = vmatpush1.bf16.msra.mxu1 %v16313_v54  ;;  %v2165_v54 = vld [vmem:[#allocation2 + $0x12c] sm:$0xe] }
 0x3b8   : > { %v4889_v22 = vrot.slane %v18716_v48, 1  ;;  %v4368_v20 = vrot.slane %v4366_v55, 1  ;;  %12135 = vmatprep.subr.bf16.mxu1 %v21063_v63  ;;  %v4390_v55 = vshll.u32 %v18543_v18, 16  ;;  %v16321_v18 = vld [vmem:[#allocation8 + $0x28] sm:$0xff]  }
 0x3ba   : > { %v4890_v34 = vsel %vm2977_vm9, %v4888_v5, %v4889_v22  ;;  %v18753_v5 = vld [vmem:[#allocation2 + $0x134] ss:$0 sps:$4 sm:$0x11]   ;;  %v4894_v22 = vrot.slane %v14306_v14, 1 }
 0x3bb   : > { %15089 = vmatprep.mubr.bf16.mxu1 %v4890_v34  ;;  %12136 = vmatpush1.bf16.msra.mxu1 %v16320_v32  ;;  %v16328_v32 = vld [vmem:[#allocation8 + $0x30] sm:$0xff]  }
 0x3bc   : > { %12137 = vmatprep.subr.bf16.mxu1 %v21063_v63 }
 0x3be   : > { %6438 = vmatmul.mubr.bf16.vlgmr.msra.gmra.mrb[0].mxu0 %v18649_v58  ;;  %v4363_v58 = vrot.slane %v4361_v38, 1  ;;  %v4380_v38 = vrot.slane %v4378_v2, 1  ;;  %v4402_v2 = vshll.u32 %v18560_v25, 16 }
 0x3bf   : > { %6445 = vmatprep.mubr.bf16.mxu0 %v4345_v33  ;;  %12138 = vmatpush1.bf16.msra.mxu1 %v16321_v18  ;;  %v2167_v18 = vld [vmem:[#allocation2 + $0x144] sm:$0xe] }
 0x3c0   : > { %v4364_v39 = vor.u32 %v4363_v58, %v4359_v47  ;;  %v4387_v47 = vrot.slane %v4385_v30, 1  ;;  %v18748_v58 = vld [vmem:[#allocation2 + $0x128] ss:$0 sps:$4 sm:$0x11]   ;;  %12139 = vmatprep.subr.bf16.mxu1 %v21063_v63 }
 0x3c1   : > { %v4895_v50 = vrot.slane %v18748_v58, 1 }
 0x3c2   : > { %v4369_v33 = vsel %vm2464_vm0, %v4364_v39, %v4368_v20  ;;  %v14307_v20 = vcombine.low %v2165_v54, %v18751_v45  ;;  %v4898_v39 = vrot.slane %v18753_v5, 1  ;;  %v18783_v54 = vld [vmem:[#allocation2 + $0x148] sm:$0xf] }
 0x3c3   : > { %v4896_v40 = vsel %vm2977_vm9, %v4894_v22, %v4895_v50  ;;  %12140 = vmatpush1.bf16.msra.mxu1 %v16328_v32  ;;  %v18785_v22 = vld [vmem:[#allocation2 + $0x14c] ss:$0 sps:$4 sm:$0x11]   ;;  %v16336_v32 = vld [vmem:[#allocation8 + $0x40] sm:$0xff]  }
 0x3c4   : > { %v4897_v34 = vrot.slane %v14307_v20, 1  ;;  %12141 = vmatprep.subr.bf16.mxu1 %v21063_v63 }
 0x3c6   : > { %6446 = vmatmul.mubr.bf16.gmra.mrb[4].mxu0 %v18664_v23  ;;  %v4893_v23 = vsel %vm2977_vm9, %v4891_v37, %v4892_v61  ;;  %v4392_v61 = vrot.slane %v4390_v55, 1  ;;  %v2062_v37 = vld [vmem:[#allocation2 + $0x6c] sm:$0xf]  ;;  %v2166_v55 = vld [vmem:[#allocation2 + $0x138] sm:$0xe] }
 0x3c7   : > { %6453 = vmatprep.mubr.bf16.mxu0 %v4357_v62  ;;  %15090 = vmatmul.mubr.bf16.gmra.mrb[36].mxu1 %v4893_v23  ;;  %v18746_v62 = vcombine.low %v2060_v28, %v18557_v0  ;;  %v4388_v0 = vor.u32 %v4387_v47, %v4383_v57  ;;  %v2064_v28 = vld [vmem:[#allocation2 + $0x78] sm:$0xf]  ;;  %v4414_v57 = vshll.u32 %v18565_v52, 16  ;;  %v18774_v47 = vld [vmem:[#allocation2 + $0x13c] sm:$0xf]  ;;  %v16329_v52 = vld [vmem:[#allocation8 + $0x38] sm:$0xff]  }
 0x3c8   : > { %15093 = vmatprep.mubr.bf16.mxu1 %v4896_v40  ;;  %v18778_v10 = vcombine.low %v2064_v28, %v18579_v46  ;;  %v14308_v14 = vcombine.low %v2166_v55, %v18774_v47  ;;  %12142 = vmatpush1.bf16.msra.mxu1 %v16329_v52  ;;  %v2068_v28 = vld [vmem:[#allocation2 + $0x90] sm:$0xf]  ;;  %v18806_v55 = vld [vmem:[#allocation2 + $0x154] sm:$0xf]  ;;  %v2169_v52 = vld [vmem:[#allocation2 + $0x15c] sm:$0xe] }
 0x3c9   : > { %v4397_v8 = vshll.u32 %v18746_v62, 16  ;;  %v4393_v23 = vsel %vm2464_vm0, %v4388_v0, %v4392_v61  ;;  %v4395_v43 = vshrl.u32 %v18746_v62, 16  ;;  %v14309_v0 = vcombine.low %v2167_v18, %v18783_v54  ;;  %12143 = vmatprep.subr.bf16.mxu1 %v21063_v63  ;;  %v18815_v18 = vld [vmem:[#allocation2 + $0x160] sm:$0xf] }
 0x3ca   : > { %v4900_v50 = vrot.slane %v14308_v14, 1  ;;  %v4416_v46 = vrot.slane %v4414_v57, 1  ;;  %v4904_v61 = vrot.slane %v18785_v22, 1  ;;  %v4421_v40 = vshll.u32 %v18778_v10, 16 }
 0x3cb   : > { %v4399_v31 = vrot.slane %v4397_v8, 1  ;;  %v2066_v8 = vld [vmem:[#allocation2 + $0x84] sm:$0xf]  ;;  %v4438_v57 = vshll.u32 %v18587_v16, 16  ;;  %v16337_v16 = vld [vmem:[#allocation8 + $0x48] sm:$0xff]  }
 0x3cc   : > { %12144 = vmatpush1.bf16.msra.mxu1 %v16336_v32  ;;  %v16344_v32 = vld [vmem:[#allocation8 + $0x50] sm:$0xff]  }
 0x3cd   : > { %v4400_v30 = vor.u32 %v4399_v31, %v4395_v43  ;;  %v4419_v43 = vshrl.u32 %v18778_v10, 16  ;;  %v4423_v31 = vrot.slane %v4421_v40, 1  ;;  %12145 = vmatprep.subr.bf16.mxu1 %v21063_v63 }
 0x3ce   : > { %6454 = vmatmul.mubr.bf16.gmra.mrb[8].mxu0 %v18680_v26  ;;  %v4381_v26 = vsel %vm2464_vm0, %v4376_v44, %v4380_v38  ;;  %v4404_v44 = vrot.slane %v4402_v2, 1  ;;  %v4426_v2 = vshll.u32 %v18582_v53, 16  ;;  %v2168_v53 = vld [vmem:[#allocation2 + $0x150] sm:$0xe] }
 0x3cf   : > { %6461 = vmatprep.mubr.bf16.mxu0 %v4369_v33  ;;  %v18765_v33 = vcombine.low %v2062_v37, %v18563_v7  ;;  %v4903_v37 = vrot.slane %v14309_v0, 1  ;;  %v14310_v14 = vcombine.low %v2168_v53, %v18806_v55 }
 0x3d0   : > { %v4405_v25 = vsel %vm2464_vm0, %v4400_v30, %v4404_v44  ;;  %v4424_v44 = vor.u32 %v4423_v31, %v4419_v43  ;;  %12146 = vmatpush1.bf16.msra.mxu1 %v16337_v16  ;;  %v2171_v16 = vld [vmem:[#allocation2 + $0x174] sm:$0xe] }
 0x3d1   : > { %v4409_v38 = vshll.u32 %v18765_v33, 16  ;;  %v4407_v7 = vshrl.u32 %v18765_v33, 16  ;;  %12147 = vmatprep.subr.bf16.mxu1 %v21063_v63 }
 0x3d4   : > { %12148 = vmatpush1.bf16.msra.mxu1 %v16344_v32 }
 0x3d5   : > { %12149 = vmatprep.subr.bf16.mxu1 %v21063_v63 }
 0x3d6   : > { %6462 = vmatmul.mubr.bf16.gmra.mrb[12].mxu0 %v18701_v56  ;;  %v4899_v56 = vsel %vm2977_vm9, %v4897_v34, %v4898_v39 }
 0x3d7   : > { %6469 = vmatprep.mubr.bf16.mxu0 %v4381_v26  ;;  %15094 = vmatmul.mubr.bf16.gmra.mrb[40].mxu1 %v4899_v56  ;;  %v18780_v26 = vld [vmem:[#allocation2 + $0x140] ss:$0 sps:$4 sm:$0x11]   ;;  %v18796_v56 = vcombine.low %v2066_v8, %v18585_v41 }
 0x3d8   : > { %v4901_v20 = vrot.slane %v18780_v26, 1 }
 0x3d9   : > { %v4433_v30 = vshll.u32 %v18796_v56, 16  ;;  %v4431_v41 = vshrl.u32 %v18796_v56, 16 }
 0x3da   : > { %v4902_v34 = vsel %vm2977_vm9, %v4900_v50, %v4901_v20  ;;  %v18817_v50 = vld [vmem:[#allocation2 + $0x164] ss:$0 sps:$4 sm:$0x11]   ;;  %v4906_v20 = vrot.slane %v14310_v14, 1 }
 0x3db   : > { %15097 = vmatprep.mubr.bf16.mxu1 %v4902_v34 }
 0x3de   : > { %6470 = vmatmul.mubr.bf16.gmra.mrb[16].mxu0 %v18714_v15  ;;  %v4411_v15 = vrot.slane %v4409_v38, 1  ;;  %v4428_v38 = vrot.slane %v4426_v2, 1  ;;  %v4450_v2 = vshll.u32 %v18604_v27, 16 }
 0x3df   : > { %6477 = vmatprep.mubr.bf16.mxu0 %v4393_v23 }
 0x3e0   : > { %v4412_v39 = vor.u32 %v4411_v15, %v4407_v7  ;;  %v4435_v7 = vrot.slane %v4433_v30, 1  ;;  %v18812_v15 = vld [vmem:[#allocation2 + $0x158] ss:$0 sps:$4 sm:$0x11]  }
 0x3e1   : > { %v4907_v0 = vrot.slane %v18812_v15, 1 }
 0x3e2   : > { %v4417_v23 = vsel %vm2464_vm0, %v4412_v39, %v4416_v46  ;;  %v14311_v46 = vcombine.low %v2169_v52, %v18815_v18  ;;  %v4910_v39 = vrot.slane %v18817_v50, 1  ;;  %v18847_v52 = vld [vmem:[#allocation2 + $0x178] sm:$0xf] }
 0x3e3   : > { %v4908_v40 = vsel %vm2977_vm9, %v4906_v20, %v4907_v0  ;;  %v18849_v20 = vld [vmem:[#allocation2 + $0x17c] ss:$0 sps:$4 sm:$0x11]  }
 0x3e4   : > { %v4909_v34 = vrot.slane %v14311_v46, 1 }
 0x3e6   : > { %6478 = vmatmul.mubr.bf16.gmra.mrb[20].mxu0 %v18732_v9  ;;  %v4905_v9 = vsel %vm2977_vm9, %v4903_v37, %v4904_v61  ;;  %v4440_v61 = vrot.slane %v4438_v57, 1  ;;  %v2070_v37 = vld [vmem:[#allocation2 + $0x9c] sm:$0xf]  ;;  %v2170_v57 = vld [vmem:[#allocation2 + $0x168] sm:$0xe] }
 0x3e7   : > { %6485 = vmatprep.mubr.bf16.mxu0 %v4405_v25  ;;  %15098 = vmatmul.mubr.bf16.gmra.mrb[44].mxu1 %v4905_v9  ;;  %v18810_v25 = vcombine.low %v2068_v28, %v18601_v51  ;;  %v4436_v51 = vor.u32 %v4435_v7, %v4431_v41  ;;  %v2072_v28 = vld [vmem:[#allocation2 + $0xa8] sm:$0xf]  ;;  %v4462_v41 = vshll.u32 %v18609_v24, 16  ;;  %v18838_v7 = vld [vmem:[#allocation2 + $0x16c] sm:$0xf] }
 0x3e8   : > { %15101 = vmatprep.mubr.bf16.mxu1 %v4908_v40  ;;  %v18842_v53 = vcombine.low %v2072_v28, %v18623_v13  ;;  %v14312_v14 = vcombine.low %v2170_v57, %v18838_v7  ;;  %v16345_v24 = vld [vmem:[#allocation8 + $0x58] sm:$0xff]  }
 0x3e9   : > { %v4445_v8 = vshll.u32 %v18810_v25, 16  ;;  %v4441_v9 = vsel %vm2464_vm0, %v4436_v51, %v4440_v61  ;;  %v4443_v43 = vshrl.u32 %v18810_v25, 16  ;;  %v14313_v51 = vcombine.low %v2171_v16, %v18847_v52  ;;  %12150 = vmatpush1.bf16.msra.mxu1 %v16345_v24  ;;  %v18883_v24 = vld [vmem:[#allocation2 + $0x188] ss:$0 sps:$4 sm:$0x11]  }
 0x3ea   : > { %v4912_v0 = vrot.slane %v14312_v14, 1  ;;  %v4464_v13 = vrot.slane %v4462_v41, 1  ;;  %v4916_v61 = vrot.slane %v18849_v20, 1  ;;  %v4469_v40 = vshll.u32 %v18842_v53, 16  ;;  %12151 = vmatprep.subr.bf16.mxu1 %v21063_v63 }
 0x3eb   : > { %v4447_v31 = vrot.slane %v4445_v8, 1  ;;  %v2074_v8 = vld [vmem:[#allocation2 + $0xb4] sm:$0xf] }
 0x3ed   : > { %v4448_v30 = vor.u32 %v4447_v31, %v4443_v43  ;;  %v4467_v43 = vshrl.u32 %v18842_v53, 16  ;;  %v4471_v31 = vrot.slane %v4469_v40, 1 }
 0x3ee   : > { %6486 = vmatmul.mubr.bf16.gmra.mrb[24].mxu0 %v18746_v62  ;;  %v4429_v62 = vsel %vm2464_vm0, %v4424_v44, %v4428_v38  ;;  %v4452_v44 = vrot.slane %v4450_v2, 1  ;;  %v4474_v2 = vshll.u32 %v18626_v59, 16  ;;  %v4486_v59 = vshll.u32 %v18631_v35, 16 }
 0x3ef   : > { %6493 = vmatprep.mubr.bf16.mxu0 %v4417_v23  ;;  %v18829_v23 = vcombine.low %v2070_v37, %v18607_v3  ;;  %v4915_v37 = vrot.slane %v14313_v51, 1  ;;  %v2173_v51 = vld [vmem:[#allocation2 + $0x18c] sm:$0xe]  ;;  %v4919_v35 = vrot.slane %v18883_v24, 1 }
 0x3f0   : > { %v4453_v27 = vsel %vm2464_vm0, %v4448_v30, %v4452_v44  ;;  %v4472_v44 = vor.u32 %v4471_v31, %v4467_v43 }
 0x3f1   : > { %v4457_v38 = vshll.u32 %v18829_v23, 16  ;;  %v4455_v3 = vshrl.u32 %v18829_v23, 16 }
 0x3f6   : > { %6494 = vmatmul.mubr.bf16.gmra.mrb[28].mxu0 %v18765_v33  ;;  %v4911_v33 = vsel %vm2977_vm9, %v4909_v34, %v4910_v39 }
 0x3f7   : > { %6501 = vmatprep.mubr.bf16.mxu0 %v4429_v62  ;;  %15102 = vmatmul.mubr.bf16.gmra.mrb[48].mxu1 %v4911_v33  ;;  %v18844_v62 = vld [vmem:[#allocation2 + $0x170] ss:$0 sps:$4 sm:$0x11]   ;;  %v18860_v33 = vcombine.low %v2074_v8, %v18629_v42  ;;  %v18867_v30 = vpop.f32.mrb[0].mxu1  ;;  %v2076_v42 = vld [vmem:[#allocation2 + $0xc0] sm:$0xf] }
 0x3f8   : > { %v4913_v46 = vrot.slane %v18844_v62, 1  ;;  %v18869_v28 = vpop.f32.mrb[1].mxu1  ;;  %v18881_v16 = vcombine.low %v2076_v42, %v18645_v11  ;;  %v4488_v11 = vrot.slane %v4486_v59, 1 }
 0x3f9   : > { %v4481_v32 = vshll.u32 %v18860_v33, 16  ;;  %v4479_v41 = vshrl.u32 %v18860_v33, 16 }
 0x3fa   : > { %v4914_v34 = vsel %vm2977_vm9, %v4912_v0, %v4913_v46  ;;  %v18886_v46 = vld [vmem:[#allocation2 + $0x190] sm:$0xf]  ;;  %v4493_v40 = vshll.u32 %v18881_v16, 16  ;;  %v4491_v31 = vshrl.u32 %v18881_v16, 16 }
 0x3fb   : > { %15105 = vmatprep.mubr.bf16.mxu1 %v4914_v34 }
 0x3fe   : > { %6502 = vmatmul.mubr.bf16.gmra.mrb[32].mxu0 %v18778_v10  ;;  %v4459_v10 = vrot.slane %v4457_v38, 1  ;;  %v4476_v38 = vrot.slane %v4474_v2, 1  ;;  %v4495_v2 = vrot.slane %v4493_v40, 1 }
 0x3ff   : > { %6509 = vmatprep.mubr.bf16.mxu0 %v4441_v9 }
 0x400   : > { %v4460_v39 = vor.u32 %v4459_v10, %v4455_v3  ;;  %v18871_v3 = vpop.f32.mrb[2].mxu1  ;;  %v2172_v10 = vld [vmem:[#allocation2 + $0x180] sm:$0xe]  ;;  %v4477_v14 = vsel %vm2464_vm0, %v4472_v44, %v4476_v38  ;;  %v16352_v38 = vld [vmem:[#allocation8 + $0x60] sm:$0xff]  }
 0x401   : > { %v18874_v57 = vpop.f32.mrb[3].mxu1  ;;  %12152 = vmatpush1.bf16.msra.mxu1 %v16352_v38  ;;  %v2082_v38 = vld [vmem:[#allocation2 + $0xfc] sm:$0xf] }
 0x402   : > { %v4465_v9 = vsel %vm2464_vm0, %v4460_v39, %v4464_v13  ;;  %v14315_v39 = vcombine.low %v2173_v51, %v18886_v46  ;;  %12153 = vmatprep.subr.bf16.mxu1 %v21063_v63 }
 0x406   : > { %6510 = vmatmul.mubr.bf16.gmra.mrb[36].mxu0 %v18796_v56  ;;  %v4917_v56 = vsel %vm2977_vm9, %v4915_v37, %v4916_v61  ;;  %v18890_v61 = vld [vmem:[#allocation2 + $0x194] ss:$0 sps:$4 sm:$0x11]   ;;  %v4921_v37 = vrot.slane %v14315_v39, 1  ;;  %v16353_v39 = vld [vmem:[#allocation8 + $0x68] sm:$0xff]  }
 0x407   : > { %6517 = vmatprep.mubr.bf16.mxu0 %v4453_v27  ;;  %15106 = vmatmul.mubr.bf16.gmra.mrb[52].mxu1 %v4917_v56  ;;  %v4483_v27 = vrot.slane %v4481_v32, 1  ;;  %v4922_v56 = vrot.slane %v18890_v61, 1 }
 0x408   : > { %12154 = vmatpush1.bf16.msra.mxu1 %v16353_v39 }
 0x409   : > { %v4484_v8 = vor.u32 %v4483_v27, %v4479_v41  ;;  %v18905_v41 = vld [vmem:[#allocation2 + $0x19c] sm:$0xf]  ;;  %v4496_v27 = vor.u32 %v4495_v2, %v4491_v31  ;;  %12155 = vmatprep.subr.bf16.mxu1 %v21063_v63  ;;  %v8383_v31 = vld [vmem:[#allocation2] sm:$0xf]  ;;  %v8384_v2 = vld [vmem:[#allocation2 + $0x4] sm:$0xf] }
 0x40b   : > { %v4489_v43 = vsel %vm2464_vm0, %v4484_v8, %v4488_v11  ;;  %v2175_v8 = vld [vmem:[#allocation2 + $0x1a4] sm:$0xe] }
 0x40c   : > { %v18901_v32 = vpop.f32.mrb[4].mxu1 }
 0x40d   : > { %v18903_v42 = vpop.f32.mrb[5].mxu1 }
 0x40e   : > { %6518 = vmatmul.mubr.bf16.gmra.mrb[40].mxu0 %v18810_v25  ;;  %v18877_v25 = vld [vmem:[#allocation2 + $0x184] sm:$0xf]  ;;  %v18907_v59 = vpop.f32.mrb[6].mxu1 }
 0x40f   : > { %6525 = vmatprep.mubr.bf16.mxu0 %v4465_v9  ;;  %v14314_v0 = vcombine.low %v2172_v10, %v18877_v25  ;;  %v4498_v9 = vshll.u32 %v18651_v36, 16  ;;  %v2174_v36 = vld [vmem:[#allocation2 + $0x198] sm:$0xe]  ;;  %v18909_v10 = vld [vmem:[#allocation2 + $0x1a0] ss:$0 sps:$4 sm:$0x11]  }
 0x410   : > { %v14316_v51 = vcombine.low %v2174_v36, %v18905_v41  ;;  %v16360_v36 = vld [vmem:[#allocation8 + $0x70] sm:$0xff]  }
 0x411   : > { %v4918_v13 = vrot.slane %v14314_v0, 1  ;;  %v4500_v44 = vrot.slane %v4498_v9, 1  ;;  %v18911_v0 = vpop.f32.mrb[7].mxu1  ;;  %12156 = vmatpush1.bf16.msra.mxu1 %v16360_v36 }
 0x412   : > { %12157 = vmatprep.subr.bf16.mxu1 %v21063_v63 }
 0x413   : > { %v4920_v34 = vsel %vm2977_vm9, %v4918_v13, %v4919_v35  ;;  %v4925_v13 = vrot.slane %v18909_v10, 1  ;;  %v2111_v35 = vld [vmem:[#allocation2 + $0x1a8] sm:$0xf]  ;;  %v4501_v11 = vsel %vm2464_vm0, %v4496_v27, %v4500_v44  ;;  %v14457_v44 = vcombine.low %v8383_v31, %v8384_v2 }
 0x414   : > { %15109 = vmatprep.mubr.bf16.mxu1 %v4920_v34  ;;  %v4924_v34 = vrot.slane %v14316_v51, 1 }
 0x415   : > { %v9058_v51 = vshll.u32 %v14457_v44, 16 }
 0x416   : > { %6526 = vmatmul.mubr.bf16.gmra.mrb[44].mxu0 %v18829_v23  ;;  %v4923_v23 = vsel %vm2977_vm9, %v4921_v37, %v4922_v56  ;;  %v14317_v37 = vcombine.low %v2175_v8, %v2111_v35  ;;  %v18920_v56 = vld [vmem:[#allocation2 + $0x1ac] ss:$0 sps:$4 sm:$0x11]   ;;  %v4522_v8 = vshll.u32 %v18685_v17, 16 }
 0x417   : > { %6533 = vmatprep.mubr.bf16.mxu0 %v4477_v14  ;;  %15110 = vmatmul.mubr.bf16.gmra.mrb[56].mxu1 %v4923_v23  ;;  %v2080_v14 = vld [vmem:[#allocation2 + $0xf0] sm:$0xf]  ;;  %v4926_v23 = vsel %vm2977_vm9, %v4924_v34, %v4925_v13  ;;  %v18929_v13 = vcombine.low %v2082_v38, %v18688_v6 }
 0x418   : > { %v18918_v40 = vcombine.low %v2080_v14, %v18676_v4  ;;  %v4927_v9 = vrot.slane %v14317_v37, 1  ;;  %15113 = vmatprep.mubr.bf16.mxu1 %v4926_v23  ;;  %v4928_v4 = vrot.slane %v18920_v56, 1  ;;  %v16370_v14 = vld [vmem:[#allocation8 + $0x210] sm:$0xff]   ;;  %v16369_v23 = vld [vmem:[#allocation8 + $0x78] sm:$0xff]  }
 0x419   : > { %v2110_v37 = vld [vmem:[#allocation2 + $0x1a4] sm:$0xf]  ;;  %12158 = vmatpush1.bf16.msra.mxu1 %v16369_v23  ;;  %v4529_v38 = vshll.u32 %v18929_v13, 16  ;;  %v4527_v23 = vshrl.u32 %v18929_v13, 16 }
 0x41a   : > { %v4517_v27 = vshll.u32 %v18918_v40, 16  ;;  %v4515_v39 = vshrl.u32 %v18918_v40, 16  ;;  %v18934_v31 = vcombine.low %v2110_v37, %v2111_v35  ;;  %12416 = vmatprep.subr.bf16.mxu1 %v21063_v63  ;;  %v4702_v37 = vshll.u32 %v18920_v56, 16 }
 0x41c   : > { %v4519_v34 = vrot.slane %v4517_v27, 1  ;;  %v4697_v35 = vshll.u32 %v18934_v31, 16 }
 0x41d   : > { %v18937_v6 = vpop.f32.mrb[8].mxu1 }
 0x41e   : > { %6534 = vmatmul.mubr.bf16.gmra.mrb[48].mxu0 %v18842_v53  ;;  %v16361_v53 = vld [vmem:[#allocation8 + $0x200] sm:$0xff]   ;;  %v18941_v27 = vpop.f32.mrb[9].mxu1  ;;  %v4520_v36 = vor.u32 %v4519_v34, %v4515_v39  ;;  %v4531_v39 = vrot.slane %v4529_v38, 1 }
 0x41f   : > { %6541 = vmatprep.mubr.bf16.mxu0 %v4489_v43  ;;  %15117 = vmatprep.subr.bf16.mxu0 %v16361_v53  ;;  %v16368_v43 = vld [vmem:[#allocation8 + $0x208] sm:$0xff]  }
 0x420   : > { %15118 = vmatpush3.bf16.msra.mxu0 %v16361_v53  ;;  %v16372_v53 = vld [vmem:[#allocation2 + $0x8] ss:$0 sps:$4 sm:$0x11]   ;;  %v4532_v56 = vor.u32 %v4531_v39, %v4527_v23  ;;  %v16379_v23 = vld [vmem:[#allocation8 + $0x230] sm:$0xff]  }
 0x421   : > { %15119 = vmatprep.subr.bf16.mxu0 %v16368_v43 }
 0x424   : > { %15120 = vmatpush3.bf16.msra.mxu0 %v16368_v43  ;;  %v9063_v43 = vshll.u32 %v16372_v53, 16  ;;  %v2084_v53 = vld [vmem:[#allocation2 + $0x108] sm:$0xf] }
 0x425   : > { %15121 = vmatprep.subr.bf16.mxu0 %v16370_v14 }
 0x426   : > { %6542 = vmatmul.mubr.bf16.gmra.mrb[52].mxu0 %v18860_v33  ;;  %v4929_v33 = vsel %vm2977_vm9, %v4927_v9, %v4928_v4  ;;  %v9060_v9 = vrot.slane %v9058_v51, 1  ;;  %v9065_v17 = vrot.slane %v9063_v43, 1  ;;  %v16373_v4 = vld [vmem:[#allocation8 + $0x218] sm:$0xff]   ;;  %v4704_v43 = vrot.slane %v4702_v37, 1  ;;  %v2088_v37 = vld [vmem:[#allocation2 + $0x120] sm:$0xf] }
 0x427   : > { %6549 = vmatprep.mubr.bf16.mxu0 %v4501_v11  ;;  %15114 = vmatmul.mubr.bf16.gmra.mrb[60].mxu1 %v4929_v33  ;;  %v9056_v11 = vshrl.u32 %v14457_v44, 16  ;;  %v4524_v33 = vrot.slane %v4522_v8, 1  ;;  %v4534_v8 = vshll.u32 %v18690_v21, 16 }
 0x428   : > { %15122 = vmatpush3.bf16.msra.mxu0 %v16370_v14  ;;  %v18946_v14 = vpop.f32.mrb[10].mxu1 }
 0x429   : > { %v9061_v2 = vor.u32 %v9060_v9, %v9056_v11  ;;  %15123 = vmatprep.subr.bf16.mxu0 %v16373_v4  ;;  %v18948_v51 = vpop.f32.mrb[11].mxu1  ;;  %v4699_v11 = vrot.slane %v4697_v35, 1  ;;  %v16375_v9 = vld [vmem:[#allocation8 + $0x220] sm:$0xff]   ;;  %v4536_v35 = vrot.slane %v4534_v8, 1 }
 0x42b   : > { %v4537_v21 = vsel %vm2464_vm0, %v4532_v56, %v4536_v35  ;;  %v2090_v35 = vld [vmem:[#allocation2 + $0x12c] sm:$0xf] }
 0x42c   : > { %15124 = vmatpush3.bf16.msra.mxu0 %v16373_v4 }
 0x42d   : > { %15125 = vmatprep.subr.bf16.mxu0 %v16375_v9 }
 0x42e   : > { %6550 = vmatmul.mubr.bf16.gmra.mrb[56].mxu0 %v18881_v16  ;;  %v9066_v16 = vsel %vm2464_vm0, %v9061_v2, %v9065_v17  ;;  %v4525_v2 = vsel %vm2464_vm0, %v4520_v36, %v4524_v33  ;;  %v14240_v17 = vcombine.low %v2084_v53, %v18710_v60  ;;  %v4546_v60 = vshll.u32 %v18716_v48, 16  ;;  %v16378_v33 = vld [vmem:[#allocation8 + $0x228] sm:$0xff]  }
 0x42f   : > { %6557 = vmatprep.mubr.bf16.mxu0 %v18683_v1  ;;  %12159 = vmatprep.mubr.bf16.mxu1 %v9066_v16  ;;  %v4695_v1 = vshrl.u32 %v18934_v31, 16  ;;  %v2086_v16 = vld [vmem:[#allocation2 + $0x114] sm:$0xf]  ;;  %v4558_v48 = vshll.u32 %v18721_v49, 16  ;;  %v4570_v49 = vshll.u32 %v18748_v58, 16 }
 0x430   : > { %12160 = vmatmul.mubr.bf16.vlgmr.msra.gmra.mrb[64].mxu1 %v14457_v44  ;;  %15126 = vmatpush3.bf16.msra.mxu0 %v16375_v9  ;;  %v4541_v38 = vshll.u32 %v14240_v17, 16  ;;  %v14241_v44 = vcombine.low %v2086_v16, %v18719_v19  ;;  %v14242_v9 = vcombine.low %v2088_v37, %v18742_v29 }
 0x431   : > { %v4700_v34 = vor.u32 %v4699_v11, %v4695_v1  ;;  %v4539_v1 = vshrl.u32 %v14240_v17, 16  ;;  %15127 = vmatprep.subr.bf16.mxu0 %v16378_v33  ;;  %v4560_v29 = vrot.slane %v4558_v48, 1  ;;  %v2094_v48 = vld [vmem:[#allocation2 + $0x144] sm:$0xf] }
 0x432   : > { %v4543_v36 = vrot.slane %v4541_v38, 1  ;;  %v4553_v11 = vshll.u32 %v14241_v44, 16  ;;  %v4551_v39 = vshrl.u32 %v14241_v44, 16  ;;  %v16385_v38 = vld [vmem:[#allocation8 + $0x238] sm:$0xff]   ;;  %v4563_v16 = vshrl.u32 %v14242_v9, 16 }
 0x433   : > { %v18957_v4 = vsel %vm2464_vm0, %v4700_v34, %v4704_v43  ;;  %v16374_v34 = vld [vmem:[#allocation8 + $0x80] sm:$0xff]   ;;  %v18968_v43 = vpop.f32.mrb[12].mxu1 }
 0x434   : > { %v4544_v53 = vor.u32 %v4543_v36, %v4539_v1  ;;  %15128 = vmatpush3.bf16.msra.mxu0 %v16378_v33  ;;  %v4555_v8 = vrot.slane %v4553_v11, 1  ;;  %12417 = vmatpush1.bf16.msra.mxu1 %v16374_v34  ;;  %v18971_v56 = vpop.f32.mrb[13].mxu1  ;;  %v2092_v11 = vld [vmem:[#allocation2 + $0x138] sm:$0xf] }
 0x435   : > { %15129 = vmatprep.subr.bf16.mxu0 %v16379_v23  ;;  %12418 = vmatprep.subr.bf16.mxu1 %v21063_v63  ;;  %v18976_v36 = vpop.f32.mrb[14].mxu1 }
 0x436   : > { %6558 = vmatmul.mubr.bf16.gmra.mrb[60].mxu0 %v18659_v12  ;;  %v4548_v12 = vrot.slane %v4546_v60, 1  ;;  %v18978_v60 = vpop.f32.mrb[15].mxu1 }
 0x437   : > { %6565 = vmatprep.mubr.bf16.mxu0 %v4525_v2  ;;  %v4556_v2 = vor.u32 %v4555_v8, %v4551_v39 }
 0x438   : > { %v4549_v19 = vsel %vm2464_vm0, %v4544_v53, %v4548_v12  ;;  %15130 = vmatpush3.bf16.msra.mxu0 %v16379_v23  ;;  %v4572_v53 = vrot.slane %v4570_v49, 1 }
 0x439   : > { %v4561_v1 = vsel %vm2464_vm0, %v4556_v2, %v4560_v29  ;;  %15131 = vmatprep.subr.bf16.mxu0 %v16385_v38 }
 0x43c   : > { %15132 = vmatpush3.bf16.msra.mxu0 %v16385_v38 }
 0x43e   : > { %6566 = vmatmul.mubr.bf16.gmra.mrb[64].mxu0 %v18918_v40  ;;  %v4565_v40 = vshll.u32 %v14242_v9, 16 }
 0x43f   : > { %6573 = vmatprep.mubr.bf16.mxu0 %v4537_v21 }
 0x440   : > { %v4567_v21 = vrot.slane %v4565_v40, 1  ;;  %v14245_v40 = vcombine.low %v2094_v48, %v18783_v54  ;;  %v18984_v2 = vpop.f32.mrb[16].mxu1  ;;  %v2096_v54 = vld [vmem:[#allocation2 + $0x150] sm:$0xf] }
 0x442   : > { %v4568_v33 = vor.u32 %v4567_v21, %v4563_v16  ;;  %v18988_v16 = vpop.f32.mrb[17].mxu1 }
 0x443   : > { %v18991_v49 = vpop.f32.mrb[18].mxu1 }
 0x444   : > { %v4573_v37 = vsel %vm2464_vm0, %v4568_v33, %v4572_v53  ;;  %v4599_v33 = vshrl.u32 %v14245_v40, 16 }
 0x446   : > { %6574 = vmatmul.mubr.bf16.gmra.mrb[68].mxu0 %v18929_v13  ;;  %v14243_v13 = vcombine.low %v2090_v35, %v18751_v45  ;;  %v14244_v45 = vcombine.low %v2092_v11, %v18774_v47  ;;  %v4601_v47 = vshll.u32 %v14245_v40, 16  ;;  %v14246_v11 = vcombine.low %v2096_v54, %v18806_v55 }
 0x447   : > { %6581 = vmatprep.mubr.bf16.mxu0 %v4549_v19  ;;  %v4582_v19 = vshll.u32 %v18753_v5, 16  ;;  %v4594_v5 = vshll.u32 %v18780_v26, 16 }
 0x448   : > { %v4577_v12 = vshll.u32 %v14243_v13, 16  ;;  %v4575_v23 = vshrl.u32 %v14243_v13, 16  ;;  %v4589_v34 = vshll.u32 %v14244_v45, 16  ;;  %v4587_v35 = vshrl.u32 %v14244_v45, 16 }
 0x449   : > { %v4584_v8 = vrot.slane %v4582_v19, 1  ;;  %v4596_v21 = vrot.slane %v4594_v5, 1  ;;  %v4603_v53 = vrot.slane %v4601_v47, 1 }
 0x44a   : > { %v4579_v58 = vrot.slane %v4577_v12, 1  ;;  %v4591_v38 = vrot.slane %v4589_v34, 1  ;;  %v4606_v12 = vshll.u32 %v18785_v22, 16  ;;  %v4618_v34 = vshll.u32 %v18812_v15, 16 }
 0x44c   : > { %v4580_v39 = vor.u32 %v4579_v58, %v4575_v23  ;;  %v4613_v23 = vshll.u32 %v14246_v11, 16  ;;  %v2098_v58 = vld [vmem:[#allocation2 + $0x15c] sm:$0xf]  ;;  %v4620_v55 = vrot.slane %v4618_v34, 1 }
 0x44e   : > { %6582 = vmatmul.mubr.bf16.gmra.mrb[72].mxu0 %v14240_v17  ;;  %v16386_v17 = vld [vmem:[#allocation8 + $0x88] sm:$0xff]   ;;  %v4585_v29 = vsel %vm2464_vm0, %v4580_v39, %v4584_v8  ;;  %v14247_v39 = vcombine.low %v2098_v58, %v18815_v18  ;;  %v4611_v8 = vshrl.u32 %v14246_v11, 16  ;;  %v4615_v48 = vrot.slane %v4613_v23, 1 }
 0x44f   : > { %6589 = vmatprep.mubr.bf16.mxu0 %v4561_v1  ;;  %12419 = vmatpush1.bf16.msra.mxu1 %v16386_v17  ;;  %v18993_v1 = vpop.f32.mrb[19].mxu1  ;;  %v16396_v17 = vld [vmem:[#allocation8 + $0x90] sm:$0xff]  }
 0x450   : > { %12420 = vmatprep.subr.bf16.mxu1 %v21063_v63  ;;  %v4616_v22 = vor.u32 %v4615_v48, %v4611_v8  ;;  %v4623_v47 = vshrl.u32 %v14247_v39, 16  ;;  %v2104_v8 = vld [vmem:[#allocation2 + $0x180] sm:$0xf] }
 0x452   : > { %v4621_v5 = vsel %vm2464_vm0, %v4616_v22, %v4620_v55  ;;  %v19020_v22 = vcombine.low %v2104_v8, %v18877_v25  ;;  %v16418_v8 = vld [vmem:[#allocation8 + $0xa0] sm:$0xff]  }
 0x453   : > { %12421 = vmatpush1.bf16.msra.mxu1 %v16396_v17 }
 0x454   : > { %12422 = vmatprep.subr.bf16.mxu1 %v21063_v63 }
 0x456   : > { %6590 = vmatmul.mubr.bf16.gmra.mrb[76].mxu0 %v14241_v44  ;;  %v4592_v44 = vor.u32 %v4591_v38, %v4587_v35  ;;  %v19002_v35 = vpop.f32.mrb[20].mxu1 }
 0x457   : > { %6597 = vmatprep.mubr.bf16.mxu0 %v4573_v37  ;;  %v4608_v37 = vrot.slane %v4606_v12, 1  ;;  %v19004_v38 = vpop.f32.mrb[21].mxu1  ;;  %v2102_v12 = vld [vmem:[#allocation2 + $0x174] sm:$0xf] }
 0x458   : > { %v4597_v26 = vsel %vm2464_vm0, %v4592_v44, %v4596_v21  ;;  %v19009_v44 = vpop.f32.mrb[22].mxu1  ;;  %v14249_v23 = vcombine.low %v2102_v12, %v18847_v52 }
 0x459   : > { %v19011_v21 = vpop.f32.mrb[23].mxu1 }
 0x45a   : > { %v4647_v34 = vshrl.u32 %v14249_v23, 16 }
 0x45c   : > { %v19022_v52 = vpop.f32.mrb[24].mxu1 }
 0x45e   : > { %6598 = vmatmul.mubr.bf16.gmra.mrb[80].mxu0 %v14242_v9  ;;  %v4604_v9 = vor.u32 %v4603_v53, %v4599_v33 }
 0x45f   : > { %6605 = vmatprep.mubr.bf16.mxu0 %v4585_v29  ;;  %v2100_v29 = vld [vmem:[#allocation2 + $0x168] sm:$0xf] }
 0x460   : > { %v4609_v19 = vsel %vm2464_vm0, %v4604_v9, %v4608_v37  ;;  %v14248_v18 = vcombine.low %v2100_v29, %v18838_v7  ;;  %v4642_v7 = vshll.u32 %v18844_v62, 16  ;;  %v4654_v62 = vshll.u32 %v18849_v20, 16  ;;  %v2106_v29 = vld [vmem:[#allocation2 + $0x18c] sm:$0xf] }
 0x461   : > { %v19032_v20 = vcombine.low %v2106_v29, %v18886_v46  ;;  %v19041_v46 = vld [vmem:[%s20977_s5] ss:$0 sm:$0xff] }
 0x462   : > { %v4637_v54 = vshll.u32 %v14248_v18, 16  ;;  %v4644_v58 = vrot.slane %v4642_v7, 1 }
 0x464   : > { %v4639_v9 = vrot.slane %v4637_v54, 1 }
 0x466   : > { %6606 = vmatmul.mubr.bf16.gmra.mrb[84].mxu0 %v14243_v13  ;;  %v4625_v13 = vshll.u32 %v14247_v39, 16 }
 0x467   : > { %6613 = vmatprep.mubr.bf16.mxu0 %v4597_v26  ;;  %v4635_v26 = vshrl.u32 %v14248_v18, 16 }
 0x468   : > { %v4627_v15 = vrot.slane %v4625_v13, 1  ;;  %v4656_v13 = vrot.slane %v4654_v62, 1  ;;  %v19060_v62 = vld [vmem:[%s20979_s7] ss:$0 sm:$0xff] }
 0x46a   : > { %v4628_v33 = vor.u32 %v4627_v15, %v4623_v47 }
 0x46e   : > { %6614 = vmatmul.mubr.bf16.gmra.mrb[88].mxu0 %v14244_v45  ;;  %v4630_v45 = vshll.u32 %v18817_v50, 16  ;;  %v4640_v50 = vor.u32 %v4639_v9, %v4635_v26  ;;  %v2108_v26 = vld [vmem:[#allocation2 + $0x198] sm:$0xf] }
 0x46f   : > { %6621 = vmatprep.mubr.bf16.mxu0 %v4609_v19  ;;  %v4649_v19 = vshll.u32 %v14249_v23, 16 }
 0x470   : > { %v4632_v53 = vrot.slane %v4630_v45, 1  ;;  %v4645_v48 = vsel %vm2464_vm0, %v4640_v50, %v4644_v58  ;;  %v4659_v45 = vshrl.u32 %v19020_v22, 16  ;;  %v4671_v50 = vshrl.u32 %v19032_v20, 16 }
 0x471   : > { %v4651_v17 = vrot.slane %v4649_v19, 1  ;;  %v19052_v19 = vcombine.low %v2108_v26, %v18905_v41 }
 0x472   : > { %v4633_v37 = vsel %vm2464_vm0, %v4628_v33, %v4632_v53  ;;  %v4673_v33 = vshll.u32 %v19032_v20, 16 }
 0x473   : > { %v4652_v55 = vor.u32 %v4651_v17, %v4647_v34 }
 0x474   : > { %v4675_v58 = vrot.slane %v4673_v33, 1 }
 0x475   : > { %v4657_v25 = vsel %vm2464_vm0, %v4652_v55, %v4656_v13 }
 0x476   : > { %6622 = vmatmul.mubr.bf16.gmra.mrb[92].mxu0 %v14245_v40  ;;  %v16407_v40 = vld [vmem:[#allocation8 + $0x98] sm:$0xff]   ;;  %v4676_v41 = vor.u32 %v4675_v58, %v4671_v50 }
 0x477   : > { %6629 = vmatprep.mubr.bf16.mxu0 %v4621_v5  ;;  %12423 = vmatpush1.bf16.msra.mxu1 %v16407_v40  ;;  %v4661_v5 = vshll.u32 %v19020_v22, 16  ;;  %v4678_v40 = vshll.u32 %v18890_v61, 16 }
 0x478   : > { %12424 = vmatprep.subr.bf16.mxu1 %v21063_v63 }
 0x479   : > { %v4663_v54 = vrot.slane %v4661_v5, 1  ;;  %v4680_v13 = vrot.slane %v4678_v40, 1 }
 0x47b   : > { %v4664_v53 = vor.u32 %v4663_v54, %v4659_v45  ;;  %12425 = vmatpush1.bf16.msra.mxu1 %v16418_v8  ;;  %v4690_v8 = vshll.u32 %v18909_v10, 16 }
 0x47c   : > { %12426 = vmatprep.subr.bf16.mxu1 %v21063_v63 }
 0x47e   : > { %6630 = vmatmul.mubr.bf16.gmra.mrb[96].mxu0 %v14246_v11  ;;  %v19024_v11 = vpop.f32.mrb[25].mxu1 }
 0x47f   : > { %6637 = vmatprep.mubr.bf16.mxu0 %v4633_v37  ;;  %v19027_v47 = vpop.f32.mrb[26].mxu1  ;;  %v19047_v37 = vld [vmem:[%s20978_s6] ss:$0 sm:$0xff] }
 0x480   : > { %v19029_v15 = vpop.f32.mrb[27].mxu1 }
 0x486   : > { %6638 = vmatmul.mubr.bf16.gmra.mrb[100].mxu0 %v14247_v39  ;;  %v4666_v39 = vshll.u32 %v18883_v24, 16 }
 0x487   : > { %6645 = vmatprep.mubr.bf16.mxu0 %v4645_v48 }
 0x488   : > { %v4668_v12 = vrot.slane %v4666_v39, 1 }
 0x48a   : > { %v4669_v17 = vsel %vm2464_vm0, %v4664_v53, %v4668_v12 }
 0x48e   : > { %6646 = vmatmul.mubr.bf16.gmra.mrb[104].mxu0 %v14248_v18 }
 0x48f   : > { %6653 = vmatprep.mubr.bf16.mxu0 %v4657_v25  ;;  %v19068_v25 = vpop.f32.mrb[28].mxu1 }
 0x490   : > { %v19070_v54 = vpop.f32.mrb[29].mxu1 }
 0x491   : > { %v6439_v9 = vpop.f32.mrb[0].mxu0 }
 0x492   : > { %v6729_v7 = vadd.f32 %v18869_v28, %v6439_v9  ;;  %v6441_v24 = vpop.f32.mrb[1].mxu0  ;;  %v4681_v9 = vsel %vm2464_vm0, %v4676_v41, %v4680_v13 }
 0x493   : > { %v6442_v18 = vpop.f32.mrb[2].mxu0 }
 0x494   : > { %v6990_v48 = vmul.f32 %v19041_v46, %v6729_v7  ;;  %v6732_v28 = vadd.f32 %v18874_v57, %v6442_v18  ;;  %v6444_v34 = vpop.f32.mrb[3].mxu0  ;;  %v4685_v57 = vshll.u32 %v19052_v19, 16  ;;  %v4683_v7 = vshrl.u32 %v19052_v19, 16 }
 0x496   : > { %v7061_v55 = vadd.f32 %v19047_v37, %v6990_v48  ;;  %v6991_v61 = vmul.f32 %v19041_v46, %v6732_v28  ;;  %6654 = vmatmul.mubr.bf16.gmra.mrb[108].mxu0 %v14249_v23  ;;  %v4687_v24 = vrot.slane %v4685_v57, 1  ;;  %v19079_v48 = vpop.f32.mrb[30].mxu1 }
 0x497   : > { %6661 = vmatprep.mubr.bf16.mxu0 %v4669_v17  ;;  %v19081_v34 = vpop.f32.mrb[31].mxu1 }
 0x498   : > { %vm7125_vm10 = vcmp.ge.f32.partialorder %v7061_v55, 0.0  ;;  %v7196_v29 = vmul.f32 %v19060_v62, %v7061_v55  ;;  %v7062_v5 = vadd.f32 %v19047_v37, %v6991_v61  ;;  %v4688_v13 = vor.u32 %v4687_v24, %v4683_v7 }
 0x499   : > { %v6447_v45 = vpop.f32.mrb[4].mxu0 }
 0x49a   : > { %v7260_v39 = vsel %vm7125_vm10, %v7061_v55, %v7196_v29  ;;  %vm7126_vm11 = vcmp.ge.f32.partialorder %v7062_v5, 0.0  ;;  %v7197_v23 = vmul.f32 %v19060_v62, %v7062_v5  ;;  %v6737_v33 = vadd.f32 %v18867_v30, %v6447_v45  ;;  %v6449_v53 = vpop.f32.mrb[5].mxu0 }
 0x49b   : > { %v14891_v12 = vpack.c.bf16 %v7260_v39, %v7260_v39  ;;  %v6450_v26 = vpop.f32.mrb[6].mxu0 }
 0x49c   : > { %v7261_v18 = vsel %vm7126_vm11, %v7062_v5, %v7197_v23  ;;  %v6992_v50 = vmul.f32 %v19041_v46, %v6737_v33  ;;  %v6740_v58 = vadd.f32 %v18871_v3, %v6450_v26  ;;  %v6452_v40 = vpop.f32.mrb[7].mxu0  ;;  %v4692_v5 = vrot.slane %v4690_v8, 1 }
 0x49d   : > { %v7517_v28 = vshrl.u32 %v14891_v12, 16  ;;  %v14892_v30 = vpack.c.bf16 %v7261_v18, %v7261_v18  ;;  %v7520_v41 = vshll.u32 %v14891_v12, 16  ;;  %v8163_v12 = vld [vmem:[#allocation2 + $0x14] sm:$0x1]  ;;  %v16790_v18 = vld [vmem:[#allocation2 + $0xc] sm:$0xf] }
 0x49e   : > { %v7063_v17 = vadd.f32 %v19047_v37, %v6992_v50  ;;  %v6993_v55 = vmul.f32 %v19041_v46, %v6740_v58  ;;  %6662 = vmatmul.mubr.bf16.gmra.mrb[112].mxu0 %v19020_v22 }
 0x49f   : > { %v7519_v61 = vrot.slane %v7517_v28, 7  ;;  %v7525_v3 = vshrl.u32 %v14892_v30, 16  ;;  %6669 = vmatprep.mubr.bf16.mxu0 %v4681_v9  ;;  %v7528_v22 = vshll.u32 %v14892_v30, 16 }
 0x4a0   : > { %vm7127_vm15 = vcmp.ge.f32.partialorder %v7063_v17, 0.0  ;;  %v7198_v57 = vmul.f32 %v19060_v62, %v7063_v17  ;;  %v7064_v29 = vadd.f32 %v19047_v37, %v6993_v55 }
 0x4a1   : > { %v7522_v45 = vor.u32 %v7520_v41, %v7519_v61  ;;  %v7523_v39 = vrot.slane %v7519_v61, 4  ;;  %v7527_v23 = vrot.slane %v7525_v3, 7  ;;  %v6455_v33 = vpop.f32.mrb[8].mxu0  ;;  %v4693_v41 = vsel %vm2464_vm0, %v4688_v13, %v4692_v5  ;;  %v16429_v13 = vld [vmem:[#allocation8 + $0xa8] sm:$0xff]  }
 0x4a2   : > { %v7262_v26 = vsel %vm7127_vm15, %v7063_v17, %v7198_v57  ;;  %vm7128_vm3 = vcmp.ge.f32.partialorder %v7064_v29, 0.0  ;;  %v7199_v9 = vmul.f32 %v19060_v62, %v7064_v29  ;;  %v6745_v7 = vadd.f32 %v18903_v42, %v6455_v33  ;;  %v6457_v24 = vpop.f32.mrb[9].mxu0  ;;  %v8166_v5 = vld [vmem:[#allocation2 + $0x18] sm:$0xf]  ;;  %12427 = vmatpush1.bf16.msra.mxu1 %v16429_v13 }
 0x4a3   : > { %v8158_v50 = vsel %vm19087_vm14, %v7522_v45, %v16790_v18  ;;  %v7530_v58 = vor.u32 %v7528_v22, %v7527_v23  ;;  %v7532_v40 = vrot.slane %v7527_v23, 4  ;;  %v14893_v8 = vpack.c.bf16 %v7262_v26, %v7262_v26  ;;  %v6458_v28 = vpop.f32.mrb[10].mxu0  ;;  %12428 = vmatprep.subr.bf16.mxu1 %v21063_v63 }
 0x4a4   : > { %8159 = vst [vmem:[#allocation2 + $0xc] sm:$0xf] %v8158_v50  ;;  %v7263_v30 = vsel %vm7128_vm3, %v7064_v29, %v7199_v9  ;;  %v6994_v55 = vmul.f32 %v19041_v46, %v6745_v7  ;;  %v6748_v17 = vadd.f32 %v18911_v0, %v6458_v28  ;;  %v6460_v61 = vpop.f32.mrb[11].mxu0  ;;  %v8170_v28 = vld [vmem:[#allocation2 + $0x20] sm:$0x1] }
 0x4a5   : > { %v7531_v42 = vsel %vm17552_vm6, %v7523_v39, %v7530_v58  ;;  %v8164_v57 = vsel %vm19095_vm2, %v7532_v40, %v8163_v12  ;;  %v7534_v45 = vshrl.u32 %v14893_v8, 16  ;;  %v14894_v23 = vpack.c.bf16 %v7263_v30, %v7263_v30 }
 0x4a6   : > { %8160 = vst [vmem:[#allocation2 + $0x10] sm:$0xf] %v7531_v42  ;;  %8165 = vst [vmem:[#allocation2 + $0x14] sm:$0x1] %v8164_v57  ;;  %v7065_v22 = vadd.f32 %v19047_v37, %v6994_v55  ;;  %v6995_v29 = vmul.f32 %v19041_v46, %v6748_v17  ;;  %6670 = vmatmul.mubr.bf16.gmra.mrb[116].mxu0 %v19032_v20  ;;  %v7537_v33 = vshll.u32 %v14893_v8, 16 }
 0x4a7   : > { %v7536_v0 = vrot.slane %v7534_v45, 7  ;;  %6677 = vmatprep.mubr.bf16.mxu0 %v4693_v41  ;;  %v7542_v26 = vshrl.u32 %v14894_v23, 16  ;;  %v7545_v9 = vshll.u32 %v14894_v23, 16  ;;  %v19122_v45 = vpop.f32.mrb[32].mxu1 }
 0x4a8   : > { %vm7129_vm1 = vcmp.ge.f32.partialorder %v7065_v22, 0.0  ;;  %v7200_v39 = vmul.f32 %v19060_v62, %v7065_v22  ;;  %v7066_v7 = vadd.f32 %v19047_v37, %v6995_v29 }
 0x4a9   : > { %v7539_v12 = vor.u32 %v7537_v33, %v7536_v0  ;;  %v6463_v24 = vpop.f32.mrb[12].mxu0  ;;  %v7540_v18 = vrot.slane %v7536_v0, 4  ;;  %v7544_v50 = vrot.slane %v7542_v26, 7 }
 0x4aa   : > { %v7264_v58 = vsel %vm7129_vm1, %v7065_v22, %v7200_v39  ;;  %v6753_v20 = vadd.f32 %v18901_v32, %v6463_v24  ;;  %v6465_v40 = vpop.f32.mrb[13].mxu0  ;;  %vm7130_vm4 = vcmp.ge.f32.partialorder %v7066_v7, 0.0  ;;  %v7201_v55 = vmul.f32 %v19060_v62, %v7066_v7  ;;  %v19130_v39 = vpop.f32.mrb[33].mxu1  ;;  %v8173_v24 = vld [vmem:[#allocation2 + $0x24] sm:$0xf] }
 0x4ab   : > { %v8167_v8 = vsel %vm19087_vm14, %v7539_v12, %v8166_v5  ;;  %v14895_v30 = vpack.c.bf16 %v7264_v58, %v7264_v58  ;;  %v6466_v17 = vpop.f32.mrb[14].mxu0  ;;  %v7547_v61 = vor.u32 %v7545_v9, %v7544_v50  ;;  %v7549_v41 = vrot.slane %v7544_v50, 4  ;;  %v8385_v26 = vld [vmem:[#allocation2 + $0xc] sm:$0xf]  ;;  %v19137_v58 = vpop.f32.mrb[34].mxu1 }
 0x4ac   : > { %8168 = vst [vmem:[#allocation2 + $0x18] sm:$0xf] %v8167_v8  ;;  %v6996_v42 = vmul.f32 %v19041_v46, %v6753_v20  ;;  %v6756_v57 = vadd.f32 %v18907_v59, %v6466_v17  ;;  %v6468_v32 = vpop.f32.mrb[15].mxu0  ;;  %v7265_v22 = vsel %vm7130_vm4, %v7066_v7, %v7201_v55  ;;  %v8177_v17 = vld [vmem:[#allocation2 + $0x2c] sm:$0x1] }
 0x4ad   : > { %v7551_v23 = vshrl.u32 %v14895_v30, 16  ;;  %v8386_v29 = vld [vmem:[#allocation2 + $0x10] sm:$0xf]  ;;  %v7548_v0 = vsel %vm17552_vm6, %v7540_v18, %v7547_v61  ;;  %v8171_v33 = vsel %vm19095_vm2, %v7549_v41, %v8170_v28  ;;  %v14896_v13 = vpack.c.bf16 %v7265_v22, %v7265_v22 }
 0x4ae   : > { %v7067_v5 = vadd.f32 %v19047_v37, %v6996_v42  ;;  %6678 = vmatmul.mubr.bf16.gmra.mrb[120].mxu0 %v19052_v19  ;;  %8169 = vst [vmem:[#allocation2 + $0x1c] sm:$0xf] %v7548_v0  ;;  %8172 = vst [vmem:[#allocation2 + $0x20] sm:$0x1] %v8171_v33  ;;  %v7554_v12 = vshll.u32 %v14895_v30, 16  ;;  %v6997_v9 = vmul.f32 %v19041_v46, %v6756_v57  ;;  %v19140_v30 = vpop.f32.mrb[35].mxu1 }
 0x4af   : > { %v7553_v59 = vrot.slane %v7551_v23, 7  ;;  %6685 = vmatprep.mubr.bf16.mxu0 %v18957_v4  ;;  %v19134_v7 = vcombine.low %v8385_v26, %v8386_v29  ;;  %v7559_v18 = vshrl.u32 %v14896_v13, 16  ;;  %v7562_v40 = vshll.u32 %v14896_v13, 16  ;;  %v16377_v29 = vld [vmem:[#allocation2 + $0x14] ss:$0 sps:$4 sm:$0x11]  }
 0x4b0   : > { %vm7131_vm5 = vcmp.ge.f32.partialorder %v7067_v5, 0.0  ;;  %v7202_v50 = vmul.f32 %v19060_v62, %v7067_v5  ;;  %v7068_v8 = vadd.f32 %v19047_v37, %v6997_v9 }
 0x4b1   : > { %v7556_v19 = vor.u32 %v7554_v12, %v7553_v59  ;;  %v7557_v20 = vrot.slane %v7553_v59, 4  ;;  %v6471_v28 = vpop.f32.mrb[16].mxu0  ;;  %v7561_v55 = vrot.slane %v7559_v18, 7  ;;  %v9070_v42 = vshll.u32 %v19134_v7, 16 }
 0x4b2   : > { %v7266_v4 = vsel %vm7131_vm5, %v7067_v5, %v7202_v50  ;;  %v6761_v61 = vadd.f32 %v18941_v27, %v6471_v28  ;;  %v6473_v41 = vpop.f32.mrb[17].mxu0  ;;  %vm7132_vm7 = vcmp.ge.f32.partialorder %v7068_v8, 0.0  ;;  %v7203_v23 = vmul.f32 %v19060_v62, %v7068_v8 }
 0x4b3   : > { %v8174_v57 = vsel %vm19087_vm14, %v7556_v19, %v8173_v24  ;;  %v14897_v32 = vpack.c.bf16 %v7266_v4, %v7266_v4  ;;  %v6474_v22 = vpop.f32.mrb[18].mxu0  ;;  %v7564_v0 = vor.u32 %v7562_v40, %v7561_v55  ;;  %v7566_v33 = vrot.slane %v7561_v55, 4  ;;  %v8180_v55 = vld [vmem:[#allocation2 + $0x30] sm:$0xf] }
 0x4b4   : > { %8175 = vst [vmem:[#allocation2 + $0x24] sm:$0xf] %v8174_v57  ;;  %v6998_v13 = vmul.f32 %v19041_v46, %v6761_v61  ;;  %v6764_v5 = vadd.f32 %v18948_v51, %v6474_v22  ;;  %v6476_v27 = vpop.f32.mrb[19].mxu0  ;;  %v7267_v59 = vsel %vm7132_vm7, %v7068_v8, %v7203_v23  ;;  %v9068_v12 = vshrl.u32 %v19134_v7, 16  ;;  %v8184_v57 = vld [vmem:[#allocation2 + $0x38] sm:$0x1] }
 0x4b5   : > { %v7568_v26 = vshrl.u32 %v14897_v32, 16  ;;  %v9072_v9 = vrot.slane %v9070_v42, 1  ;;  %v7565_v24 = vsel %vm17552_vm6, %v7557_v20, %v7564_v0  ;;  %v8178_v18 = vsel %vm19095_vm2, %v7566_v33, %v8177_v17 }
 0x4b6   : > { %v14898_v50 = vpack.c.bf16 %v7267_v59, %v7267_v59  ;;  %v7069_v19 = vadd.f32 %v19047_v37, %v6998_v13  ;;  %6686 = vmatmul.mubr.bf16.gmra.mrb[124].mxu0 %v18934_v31  ;;  %8176 = vst [vmem:[#allocation2 + $0x28] sm:$0xf] %v7565_v24  ;;  %8179 = vst [vmem:[#allocation2 + $0x2c] sm:$0x1] %v8178_v18  ;;  %v7571_v40 = vshll.u32 %v14897_v32, 16  ;;  %v9075_v28 = vshll.u32 %v16377_v29, 16 }
 0x4b7   : > { %v7570_v51 = vrot.slane %v7568_v26, 7  ;;  %v6999_v8 = vmul.f32 %v19041_v46, %v6764_v5  ;;  %v9073_v61 = vor.u32 %v9072_v9, %v9068_v12  ;;  %v16381_v59 = vld [vmem:[#allocation2 + $0x20] ss:$0 sps:$4 sm:$0x11]  }
 0x4b8   : > { %v7576_v4 = vshrl.u32 %v14898_v50, 16  ;;  %vm7133_vm8 = vcmp.ge.f32.partialorder %v7069_v19, 0.0  ;;  %v7204_v20 = vmul.f32 %v19060_v62, %v7069_v19  ;;  %v7579_v42 = vshll.u32 %v14898_v50, 16  ;;  %v8640_v50 = vld [vmem:[#allocation2 + $0x1c] sm:$0xf] }
 0x4b9   : > { %v7573_v41 = vor.u32 %v7571_v40, %v7570_v51  ;;  %v7574_v17 = vrot.slane %v7570_v51, 4  ;;  %v7070_v23 = vadd.f32 %v19047_v37, %v6999_v8  ;;  %v6479_v31 = vpop.f32.mrb[20].mxu0  ;;  %v9077_v33 = vrot.slane %v9075_v28, 1 }
 0x4ba   : > { %v7578_v22 = vrot.slane %v7576_v4, 7  ;;  %v7268_v0 = vsel %vm7133_vm8, %v7069_v19, %v7204_v20  ;;  %v6769_v32 = vadd.f32 %v18937_v6, %v6479_v31  ;;  %v6481_v13 = vpop.f32.mrb[21].mxu0  ;;  %v16440_v6 = vld [vmem:[#allocation8 + $0xb0] sm:$0xff]  }
 0x4bb   : > { %v8181_v29 = vsel %vm19087_vm14, %v7573_v41, %v8180_v55  ;;  %v14899_v5 = vpack.c.bf16 %v7268_v0, %v7268_v0  ;;  %vm7134_vm10 = vcmp.ge.f32.partialorder %v7070_v23, 0.0  ;;  %v7205_v27 = vmul.f32 %v19060_v62, %v7070_v23  ;;  %v6482_v26 = vpop.f32.mrb[22].mxu0  ;;  %v8735_v55 = vld [vmem:[#allocation2 + $0x18] sm:$0xe]  ;;  %12429 = vmatpush1.bf16.msra.mxu1 %v16440_v6  ;;  %v19174_v13 = vpop.f32.mrb[36].mxu1 }
 0x4bc   : > { %8182 = vst [vmem:[#allocation2 + $0x30] sm:$0xf] %v8181_v29  ;;  %v7581_v12 = vor.u32 %v7579_v42, %v7578_v22  ;;  %v7583_v9 = vrot.slane %v7578_v22, 4  ;;  %v9078_v24 = vsel %vm2464_vm0, %v9073_v61, %v9077_v33  ;;  %v7000_v18 = vmul.f32 %v19041_v46, %v6769_v32  ;;  %v6484_v19 = vpop.f32.mrb[23].mxu0  ;;  %v8388_v33 = vld [vmem:[#allocation2 + $0x1c] sm:$0xf]  ;;  %12430 = vmatprep.subr.bf16.mxu1 %v21063_v63 }
 0x4bd   : > { %v7585_v51 = vshrl.u32 %v14899_v5, 16  ;;  %v7588_v40 = vshll.u32 %v14899_v5, 16  ;;  %v7269_v8 = vsel %vm7134_vm10, %v7070_v23, %v7205_v27  ;;  %12167 = vmatprep.mubr.bf16.mxu1 %v9078_v24  ;;  %v6772_v28 = vadd.f32 %v18946_v14, %v6482_v26  ;;  %v16384_v42 = vld [vmem:[#allocation2 + $0x20] ss:$0 sps:$4 sm:$0x11]   ;;  %21077 = vst [vmem:[#allocation16_spill] sm:$0xff] %v19174_v13 }
 0x4be   : > { %v7582_v4 = vsel %vm17552_vm6, %v7574_v17, %v7581_v12  ;;  %v8185_v20 = vsel %vm19095_vm2, %v7583_v9, %v8184_v57  ;;  %v14900_v41 = vpack.c.bf16 %v7269_v8, %v7269_v8  ;;  %12168 = vmatmul.mubr.bf16.gmra.mrb[68].mxu1 %v19134_v7  ;;  %v7071_v61 = vadd.f32 %v19047_v37, %v7000_v18  ;;  %v8187_v23 = vld [vmem:[#allocation2 + $0x3c] sm:$0xf]  ;;  %v8387_v26 = vld [vmem:[#allocation2 + $0x18] sm:$0xf]  ;;  %v19180_v6 = vpop.f32.mrb[37].mxu1 }
 0x4bf   : > { %8183 = vst [vmem:[#allocation2 + $0x34] sm:$0xf] %v7582_v4  ;;  %8186 = vst [vmem:[#allocation2 + $0x38] sm:$0x1] %v8185_v20  ;;  %v7587_v31 = vrot.slane %v7585_v51, 7  ;;  %v7001_v22 = vmul.f32 %v19041_v46, %v6772_v28  ;;  %v14713_v14 = vcombine.low %v8735_v55, %v8640_v50  ;;  %v11424_v0 = vrot.slane %v16381_v59, 1 }
 0x4c0   : > { %v7593_v17 = vshrl.u32 %v14900_v41, 16  ;;  %v7596_v32 = vshll.u32 %v14900_v41, 16  ;;  %vm7135_vm11 = vcmp.ge.f32.partialorder %v7071_v61, 0.0  ;;  %v7206_v57 = vmul.f32 %v19060_v62, %v7071_v61  ;;  %v8191_v59 = vld [vmem:[#allocation2 + $0x44] sm:$0x1] }
 0x4c1   : > { %v7590_v7 = vor.u32 %v7588_v40, %v7587_v31  ;;  %v7591_v29 = vrot.slane %v7587_v31, 4  ;;  %v7072_v5 = vadd.f32 %v19047_v37, %v7001_v22  ;;  %v11423_v27 = vrot.slane %v14713_v14, 1  ;;  %v6487_v12 = vpop.f32.mrb[24].mxu0  ;;  %v16387_v55 = vld [vmem:[#allocation2 + $0x2c] ss:$0 sps:$4 sm:$0x11]  }
 0x4c2   : > { %v7595_v9 = vrot.slane %v7593_v17, 7  ;;  %v7270_v24 = vsel %vm7135_vm11, %v7071_v61, %v7206_v57  ;;  %v19178_v18 = vcombine.low %v8387_v26, %v8388_v33  ;;  %v9087_v50 = vshll.u32 %v16384_v42, 16  ;;  %v6489_v19 = vpop.f32.mrb[25].mxu0  ;;  %v8642_v42 = vld [vmem:[#allocation2 + $0x28] sm:$0xf]  ;;  %v19187_v22 = vpop.f32.mrb[38].mxu1 }
 0x4c3   : > { %v8188_v51 = vsel %vm19087_vm14, %v7590_v7, %v8187_v23  ;;  %v14901_v8 = vpack.c.bf16 %v7270_v24, %v7270_v24  ;;  %vm7136_vm12 = vcmp.ge.f32.partialorder %v7072_v5, 0.0  ;;  %v7207_v40 = vmul.f32 %v19060_v62, %v7072_v5  ;;  %v6490_v28 = vpop.f32.mrb[26].mxu0  ;;  %21078 = vst [vmem:[#allocation17_spill] sm:$0xff] %v19187_v22  ;;  %v8736_v57 = vld [vmem:[#allocation2 + $0x24] sm:$0xe]  ;;  %v19190_v7 = vpop.f32.mrb[39].mxu1 }
 0x4c4   : > { %8189 = vst [vmem:[#allocation2 + $0x3c] sm:$0xf] %v8188_v51  ;;  %v7598_v4 = vor.u32 %v7596_v32, %v7595_v9  ;;  %v7600_v20 = vrot.slane %v7595_v9, 4  ;;  %v11425_v41 = vsel %vm2977_vm9, %v11423_v27, %v11424_v0  ;;  %v9080_v61 = vshrl.u32 %v19178_v18, 16  ;;  %v6492_v31 = vpop.f32.mrb[27].mxu0 }
 0x4c5   : > { %v7602_v14 = vshrl.u32 %v14901_v8, 16  ;;  %v7605_v33 = vshll.u32 %v14901_v8, 16  ;;  %v7271_v23 = vsel %vm7136_vm12, %v7072_v5, %v7207_v40  ;;  %15133 = vmatprep.mubr.bf16.mxu0 %v11425_v41  ;;  %v9082_v17 = vshll.u32 %v19178_v18, 16  ;;  %v8390_v9 = vld [vmem:[#allocation2 + $0x28] sm:$0xf] }
 0x4c6   : > { %v7599_v32 = vsel %vm17552_vm6, %v7591_v29, %v7598_v4  ;;  %v8192_v0 = vsel %vm19095_vm2, %v7600_v20, %v8191_v59  ;;  %v14902_v27 = vpack.c.bf16 %v7271_v23, %v7271_v23  ;;  %v9089_v26 = vrot.slane %v9087_v50, 1  ;;  %v16390_v8 = vld [vmem:[#allocation2 + $0x2c] ss:$0 sps:$4 sm:$0x11]   ;;  %v8194_v40 = vld [vmem:[#allocation2 + $0x48] sm:$0xf] }
 0x4c7   : > { %8190 = vst [vmem:[#allocation2 + $0x40] sm:$0xf] %v7599_v32  ;;  %8193 = vst [vmem:[#allocation2 + $0x44] sm:$0x1] %v8192_v0  ;;  %v7604_v24 = vrot.slane %v7602_v14, 7  ;;  %v9084_v19 = vrot.slane %v9082_v17, 1  ;;  %v6777_v5 = vadd.f32 %v18971_v56, %v6487_v12  ;;  %v6780_v51 = vadd.f32 %v18978_v60, %v6490_v28 }
 0x4c8   : > { %v7610_v41 = vshrl.u32 %v14902_v27, 16  ;;  %v7613_v31 = vshll.u32 %v14902_v27, 16  ;;  %v14714_v22 = vcombine.low %v8736_v57, %v8642_v42  ;;  %v11427_v29 = vrot.slane %v16387_v55, 1  ;;  %v8389_v20 = vld [vmem:[#allocation2 + $0x24] sm:$0xf] }
 0x4c9   : > { %v7607_v4 = vor.u32 %v7605_v33, %v7604_v24  ;;  %v7608_v13 = vrot.slane %v7604_v24, 4  ;;  %v9085_v59 = vor.u32 %v9084_v19, %v9080_v61  ;;  %v7002_v50 = vmul.f32 %v19041_v46, %v6777_v5  ;;  %v6495_v23 = vpop.f32.mrb[28].mxu0  ;;  %v8198_v28 = vld [vmem:[#allocation2 + $0x50] sm:$0x1]  ;;  %v8644_v19 = vld [vmem:[#allocation2 + $0x34] sm:$0xf] }
 0x4ca   : > { %v7612_v32 = vrot.slane %v7610_v41, 7  ;;  %v7003_v14 = vmul.f32 %v19041_v46, %v6780_v51  ;;  %v11426_v17 = vrot.slane %v14714_v22, 1  ;;  %v19200_v56 = vcombine.low %v8389_v20, %v8390_v9  ;;  %v6497_v60 = vpop.f32.mrb[29].mxu0 }
 0x4cb   : > { %v8195_v12 = vsel %vm19087_vm14, %v7607_v4, %v8194_v40  ;;  %v9090_v55 = vsel %vm2464_vm0, %v9085_v59, %v9089_v26  ;;  %v7073_v42 = vadd.f32 %v19047_v37, %v7002_v50  ;;  %v9099_v61 = vshll.u32 %v16390_v8, 16  ;;  %v6498_v33 = vpop.f32.mrb[30].mxu0  ;;  %v16392_v40 = vld [vmem:[#allocation2 + $0x38] ss:$0 sps:$4 sm:$0x11]   ;;  %v16451_v4 = vld [vmem:[#allocation8 + $0xb8] sm:$0xff]  }
 0x4cc   : > { %8196 = vst [vmem:[#allocation2 + $0x48] sm:$0xf] %v8195_v12  ;;  %v7615_v57 = vor.u32 %v7613_v31, %v7612_v32  ;;  %v7617_v0 = vrot.slane %v7612_v32, 4  ;;  %12175 = vmatprep.mubr.bf16.mxu1 %v9090_v55  ;;  %v7074_v27 = vadd.f32 %v19047_v37, %v7003_v14  ;;  %v11428_v22 = vsel %vm2977_vm9, %v11426_v17, %v11427_v29  ;;  %v6500_v9 = vpop.f32.mrb[31].mxu0  ;;  %v8737_v32 = vld [vmem:[#allocation2 + $0x30] sm:$0xe] }
 0x4cd   : > { %12176 = vmatmul.mubr.bf16.gmra.mrb[72].mxu1 %v19178_v18  ;;  %vm7137_vm13 = vcmp.ge.f32.partialorder %v7073_v42, 0.0  ;;  %v7208_v24 = vmul.f32 %v19060_v62, %v7073_v42  ;;  %15134 = vmatmul.mubr.bf16.vlgmr.msra.gmra.mrb[128].mxu0 %v11428_v22  ;;  %v9094_v26 = vshll.u32 %v19200_v56, 16  ;;  %v9092_v41 = vshrl.u32 %v19200_v56, 16  ;;  %v16395_v55 = vld [vmem:[#allocation2 + $0x38] ss:$0 sps:$4 sm:$0x11]  }
 0x4ce   : > { %v7616_v5 = vsel %vm17552_vm6, %v7608_v13, %v7615_v57  ;;  %v8199_v51 = vsel %vm19095_vm2, %v7617_v0, %v8198_v28  ;;  %vm7138_vm15 = vcmp.ge.f32.partialorder %v7074_v27, 0.0  ;;  %v7209_v8 = vmul.f32 %v19060_v62, %v7074_v27  ;;  %v8392_v28 = vld [vmem:[#allocation2 + $0x34] sm:$0xf]  ;;  %12431 = vmatpush1.bf16.msra.mxu1 %v16451_v4  ;;  %v8391_v9 = vld [vmem:[#allocation2 + $0x30] sm:$0xf] }
 0x4cf   : > { %8197 = vst [vmem:[#allocation2 + $0x4c] sm:$0xf] %v7616_v5  ;;  %8200 = vst [vmem:[#allocation2 + $0x50] sm:$0x1] %v8199_v51  ;;  %v7272_v18 = vsel %vm7137_vm13, %v7073_v42, %v7208_v24  ;;  %v9096_v31 = vrot.slane %v9094_v26, 1  ;;  %v6785_v29 = vadd.f32 %v18968_v43, %v6495_v23  ;;  %v9101_v20 = vrot.slane %v9099_v61, 1  ;;  %12432 = vmatprep.subr.bf16.mxu1 %v21063_v63 }
 0x4d0   : > { %v14903_v59 = vpack.c.bf16 %v7272_v18, %v7272_v18  ;;  %v7273_v50 = vsel %vm7138_vm15, %v7074_v27, %v7209_v8  ;;  %v6788_v13 = vadd.f32 %v18976_v36, %v6498_v33  ;;  %v14715_v12 = vcombine.low %v8737_v32, %v8644_v19  ;;  %v8201_v18 = vld [vmem:[#allocation2 + $0x54] sm:$0xf] }
 0x4d1   : > { %v14904_v14 = vpack.c.bf16 %v7273_v50, %v7273_v50  ;;  %v9097_v17 = vor.u32 %v9096_v31, %v9092_v41  ;;  %v7004_v60 = vmul.f32 %v19041_v46, %v6785_v29  ;;  %v6503_v42 = vpop.f32.mrb[32].mxu0  ;;  %v11430_v23 = vrot.slane %v16392_v40, 1  ;;  %v19227_v40 = vpop.f32.mrb[40].mxu1 }
 0x4d2   : > { %v7619_v57 = vshrl.u32 %v14903_v59, 16  ;;  %v7622_v0 = vshll.u32 %v14903_v59, 16  ;;  %v7005_v43 = vmul.f32 %v19041_v46, %v6788_v13  ;;  %v6505_v22 = vpop.f32.mrb[33].mxu0  ;;  %v11429_v5 = vrot.slane %v14715_v12, 1  ;;  %v19231_v4 = vpop.f32.mrb[41].mxu1 }
 0x4d3   : > { %v7627_v61 = vshrl.u32 %v14904_v14, 16  ;;  %v7630_v36 = vshll.u32 %v14904_v14, 16  ;;  %v9102_v33 = vsel %vm2464_vm0, %v9097_v17, %v9101_v20  ;;  %v7075_v27 = vadd.f32 %v19047_v37, %v7004_v60  ;;  %v6506_v24 = vpop.f32.mrb[34].mxu0  ;;  %v8205_v20 = vld [vmem:[#allocation2 + $0x5c] sm:$0x1] }
 0x4d4   : > { %v7621_v26 = vrot.slane %v7619_v57, 7  ;;  %12183 = vmatprep.mubr.bf16.mxu1 %v9102_v33  ;;  %v7076_v19 = vadd.f32 %v19047_v37, %v7005_v43  ;;  %v19225_v51 = vcombine.low %v8391_v9, %v8392_v28  ;;  %v6508_v8 = vpop.f32.mrb[35].mxu0  ;;  %v9111_v29 = vshll.u32 %v16395_v55, 16  ;;  %v8646_v55 = vld [vmem:[#allocation2 + $0x40] sm:$0xf] }
 0x4d5   : > { %v7629_v41 = vrot.slane %v7627_v61, 7  ;;  %12184 = vmatmul.mubr.bf16.gmra.mrb[76].mxu1 %v19200_v56  ;;  %vm7139_vm3 = vcmp.ge.f32.partialorder %v7075_v27, 0.0  ;;  %v7210_v31 = vmul.f32 %v19060_v62, %v7075_v27  ;;  %v11431_v60 = vsel %vm2977_vm9, %v11429_v5, %v11430_v23  ;;  %v16398_v61 = vld [vmem:[#allocation2 + $0x44] ss:$0 sps:$4 sm:$0x11]   ;;  %v19242_v23 = vpop.f32.mrb[42].mxu1 }
 0x4d6   : > { %v7624_v59 = vor.u32 %v7622_v0, %v7621_v26  ;;  %v7625_v50 = vrot.slane %v7621_v26, 4  ;;  %vm7140_vm1 = vcmp.ge.f32.partialorder %v7076_v19, 0.0  ;;  %v7211_v13 = vmul.f32 %v19060_v62, %v7076_v19  ;;  %15137 = vmatprep.mubr.bf16.mxu0 %v11431_v60  ;;  %v19246_v5 = vpop.f32.mrb[43].mxu1 }
 0x4d7   : > { %v7632_v32 = vor.u32 %v7630_v36, %v7629_v41  ;;  %v7634_v14 = vrot.slane %v7629_v41, 4  ;;  %v7274_v17 = vsel %vm7139_vm3, %v7075_v27, %v7210_v31  ;;  %v9106_v22 = vshll.u32 %v19225_v51, 16 }
 0x4d8   : > { %v8202_v56 = vsel %vm19087_vm14, %v7624_v59, %v8201_v18  ;;  %v14905_v12 = vpack.c.bf16 %v7274_v17, %v7274_v17  ;;  %v7275_v28 = vsel %vm7140_vm1, %v7076_v19, %v7211_v13  ;;  %v9104_v9 = vshrl.u32 %v19225_v51, 16  ;;  %v8738_v59 = vld [vmem:[#allocation2 + $0x3c] sm:$0xe]  ;;  %v8208_v13 = vld [vmem:[#allocation2 + $0x60] sm:$0xf] }
 0x4d9   : > { %8203 = vst [vmem:[#allocation2 + $0x54] sm:$0xf] %v8202_v56  ;;  %v7633_v57 = vsel %vm17552_vm6, %v7625_v50, %v7632_v32  ;;  %v8206_v0 = vsel %vm19095_vm2, %v7634_v14, %v8205_v20  ;;  %v14906_v43 = vpack.c.bf16 %v7275_v28, %v7275_v28  ;;  %v6511_v36 = vpop.f32.mrb[36].mxu0  ;;  %v6793_v26 = vadd.f32 %v18988_v16, %v6503_v42 }
 0x4da   : > { %8204 = vst [vmem:[#allocation2 + $0x58] sm:$0xf] %v7633_v57  ;;  %8207 = vst [vmem:[#allocation2 + $0x5c] sm:$0x1] %v8206_v0  ;;  %v7636_v33 = vshrl.u32 %v14905_v12, 16  ;;  %v7639_v27 = vshll.u32 %v14905_v12, 16  ;;  %v6796_v31 = vadd.f32 %v18993_v1, %v6506_v24  ;;  %v14716_v17 = vcombine.low %v8738_v59, %v8646_v55 }
 0x4db   : > { %v6513_v19 = vpop.f32.mrb[37].mxu0  ;;  %v7644_v8 = vshrl.u32 %v14906_v43, 16  ;;  %v9108_v18 = vrot.slane %v9106_v22, 1  ;;  %v9113_v41 = vrot.slane %v9111_v29, 1  ;;  %v7647_v32 = vshll.u32 %v14906_v43, 16 }
 0x4dc   : > { %v6514_v50 = vpop.f32.mrb[38].mxu0  ;;  %v7638_v20 = vrot.slane %v7636_v33, 7  ;;  %v7006_v14 = vmul.f32 %v19041_v46, %v6793_v26  ;;  %v8212_v12 = vld [vmem:[#allocation2 + $0x68] sm:$0x1]  ;;  %v7007_v42 = vmul.f32 %v19041_v46, %v6796_v31  ;;  %v11433_v28 = vrot.slane %v16398_v61, 1 }
 0x4dd   : > { %v6516_v60 = vpop.f32.mrb[39].mxu0  ;;  %v7646_v56 = vrot.slane %v7644_v8, 7  ;;  %v9109_v16 = vor.u32 %v9108_v18, %v9104_v9  ;;  %v8394_v57 = vld [vmem:[#allocation2 + $0x40] sm:$0xf]  ;;  %v11432_v24 = vrot.slane %v14716_v17, 1 }
 0x4de   : > { %v7641_v0 = vor.u32 %v7639_v27, %v7638_v20  ;;  %v7642_v29 = vrot.slane %v7638_v20, 4  ;;  %v7077_v1 = vadd.f32 %v19047_v37, %v7006_v14  ;;  %v16401_v22 = vld [vmem:[#allocation2 + $0x44] ss:$0 sps:$4 sm:$0x11]   ;;  %v7078_v55 = vadd.f32 %v19047_v37, %v7007_v42  ;;  %v8648_v14 = vld [vmem:[#allocation2 + $0x4c] sm:$0xf] }
 0x4df   : > { %v7649_v33 = vor.u32 %v7647_v32, %v7646_v56  ;;  %v7651_v19 = vrot.slane %v7646_v56, 4  ;;  %v9114_v43 = vsel %vm2464_vm0, %v9109_v16, %v9113_v41  ;;  %v11434_v27 = vsel %vm2977_vm9, %v11432_v24, %v11433_v28  ;;  %v8393_v41 = vld [vmem:[#allocation2 + $0x3c] sm:$0xf]  ;;  %v16462_v42 = vld [vmem:[#allocation8 + $0xc0] sm:$0xff]  }
 0x4e0   : > { %v8209_v26 = vsel %vm19087_vm14, %v7641_v0, %v8208_v13  ;;  %12191 = vmatprep.mubr.bf16.mxu1 %v9114_v43  ;;  %vm7141_vm4 = vcmp.ge.f32.partialorder %v7077_v1, 0.0  ;;  %v7212_v61 = vmul.f32 %v19060_v62, %v7077_v1  ;;  %vm7142_vm5 = vcmp.ge.f32.partialorder %v7078_v55, 0.0  ;;  %15138 = vmatmul.mubr.bf16.gmra.mrb[132].mxu0 %v11434_v27 }
 0x4e1   : > { %8210 = vst [vmem:[#allocation2 + $0x60] sm:$0xf] %v8209_v26  ;;  %v7650_v9 = vsel %vm17552_vm6, %v7642_v29, %v7649_v33  ;;  %v8213_v8 = vsel %vm19095_vm2, %v7651_v19, %v8212_v12  ;;  %12192 = vmatmul.mubr.bf16.gmra.mrb[80].mxu1 %v19225_v51  ;;  %v7213_v18 = vmul.f32 %v19060_v62, %v7078_v55  ;;  %v19264_v31 = vpop.f32.mrb[40].mxu0  ;;  %v9123_v13 = vshll.u32 %v16401_v22, 16  ;;  %v8739_v33 = vld [vmem:[#allocation2 + $0x48] sm:$0xe] }
 0x4e2   : > { %8211 = vst [vmem:[#allocation2 + $0x64] sm:$0xf] %v7650_v9  ;;  %8214 = vst [vmem:[#allocation2 + $0x68] sm:$0x1] %v8213_v8  ;;  %v7276_v59 = vsel %vm7141_vm4, %v7077_v1, %v7212_v61  ;;  %v19266_v20 = vcombine.low %v8393_v41, %v8394_v57  ;;  %v6801_v32 = vadd.f32 %v18984_v2, %v6511_v36  ;;  %v6521_v17 = vpop.f32.mrb[41].mxu0  ;;  %12433 = vmatpush1.bf16.msra.mxu1 %v16462_v42  ;;  %v19276_v26 = vpop.f32.mrb[44].mxu1 }
 0x4e3   : > { %v14907_v60 = vpack.c.bf16 %v7276_v59, %v7276_v59  ;;  %v7277_v56 = vsel %vm7142_vm5, %v7078_v55, %v7213_v18  ;;  %v6804_v51 = vadd.f32 %v18991_v49, %v6514_v50  ;;  %v16403_v12 = vld [vmem:[#allocation2 + $0x50] ss:$0 sps:$4 sm:$0x11]   ;;  %v19270_v16 = vpop.f32.mrb[42].mxu0  ;;  %v9125_v57 = vrot.slane %v9123_v13, 1  ;;  %12434 = vmatprep.subr.bf16.mxu1 %v21063_v63  ;;  %v19281_v41 = vpop.f32.mrb[45].mxu1 }
 0x4e4   : > { %v14908_v28 = vpack.c.bf16 %v7277_v56, %v7277_v56  ;;  %v9116_v0 = vshrl.u32 %v19266_v20, 16  ;;  %v9118_v29 = vshll.u32 %v19266_v20, 16  ;;  %v6524_v1 = vpop.f32.mrb[43].mxu0  ;;  %v7008_v2 = vmul.f32 %v19041_v46, %v6801_v32  ;;  %v8396_v19 = vld [vmem:[#allocation2 + $0x4c] sm:$0xf] }
 0x4e5   : > { %v7653_v24 = vshrl.u32 %v14907_v60, 16  ;;  %v7656_v22 = vshll.u32 %v14907_v60, 16  ;;  %v7009_v36 = vmul.f32 %v19041_v46, %v6804_v51  ;;  %v14717_v55 = vcombine.low %v8739_v33, %v8648_v14  ;;  %v8395_v18 = vld [vmem:[#allocation2 + $0x48] sm:$0xf]  ;;  %v8215_v46 = vld [vmem:[#allocation2 + $0x6c] sm:$0xf] }
 0x4e6   : > { %v7661_v49 = vshrl.u32 %v14908_v28, 16  ;;  %v7664_v50 = vshll.u32 %v14908_v28, 16  ;;  %v9120_v43 = vrot.slane %v9118_v29, 1  ;;  %v7079_v27 = vadd.f32 %v19047_v37, %v7008_v2  ;;  %v8219_v13 = vld [vmem:[#allocation2 + $0x74] sm:$0x1] }
 0x4e7   : > { %v7655_v61 = vrot.slane %v7653_v24, 7  ;;  %v7080_v9 = vadd.f32 %v19047_v37, %v7009_v36  ;;  %v11436_v8 = vrot.slane %v16403_v12, 1  ;;  %v11435_v17 = vrot.slane %v14717_v55, 1  ;;  %v16406_v42 = vld [vmem:[#allocation2 + $0x50] ss:$0 sps:$4 sm:$0x11]  }
 0x4e8   : > { %v7663_v59 = vrot.slane %v7661_v49, 7  ;;  %v9121_v32 = vor.u32 %v9120_v43, %v9116_v0  ;;  %v19283_v60 = vcombine.low %v8395_v18, %v8396_v19  ;;  %vm7143_vm7 = vcmp.ge.f32.partialorder %v7079_v27, 0.0 }
 0x4e9   : > { %v7658_v14 = vor.u32 %v7656_v22, %v7655_v61  ;;  %v7659_v56 = vrot.slane %v7655_v61, 4  ;;  %v7214_v51 = vmul.f32 %v19060_v62, %v7079_v27  ;;  %v19286_v28 = vpop.f32.mrb[44].mxu0  ;;  %vm7144_vm8 = vcmp.ge.f32.partialorder %v7080_v9, 0.0  ;;  %v19294_v22 = vld [vmem:[%s20979_s7] ss:$0 sm:$0xff] }
 0x4ea   : > { %v7666_v37 = vor.u32 %v7664_v50, %v7663_v59  ;;  %v7668_v12 = vrot.slane %v7663_v59, 4  ;;  %v9126_v29 = vsel %vm2464_vm0, %v9121_v32, %v9125_v57  ;;  %v6529_v1 = vpop.f32.mrb[45].mxu0  ;;  %v7215_v62 = vmul.f32 %v19294_v22, %v7080_v9 }
 0x4eb   : > { %v8216_v0 = vsel %vm19087_vm14, %v7658_v14, %v8215_v46  ;;  %12199 = vmatprep.mubr.bf16.mxu1 %v9126_v29  ;;  %v7278_v24 = vsel %vm7143_vm7, %v7079_v27, %v7214_v51  ;;  %v11437_v2 = vsel %vm2977_vm9, %v11435_v17, %v11436_v8  ;;  %v19298_v36 = vpop.f32.mrb[46].mxu0  ;;  %v9130_v43 = vshll.u32 %v19283_v60, 16  ;;  %v16409_v27 = vld [vmem:[#allocation2 + $0x5c] ss:$0 sps:$4 sm:$0x11]   ;;  %v19309_v8 = vpop.f32.mrb[46].mxu1 }
 0x4ec   : > { %8217 = vst [vmem:[#allocation2 + $0x6c] sm:$0xf] %v8216_v0  ;;  %v7667_v57 = vsel %vm17552_vm6, %v7659_v56, %v7666_v37  ;;  %v8220_v33 = vsel %vm19095_vm2, %v7668_v12, %v8219_v13  ;;  %12200 = vmatmul.mubr.bf16.gmra.mrb[84].mxu1 %v19266_v20  ;;  %v14909_v19 = vpack.c.bf16 %v7278_v24, %v7278_v24  ;;  %v6532_v49 = vpop.f32.mrb[47].mxu0  ;;  %v9135_v55 = vshll.u32 %v16406_v42, 16  ;;  %v8650_v13 = vld [vmem:[#allocation2 + $0x58] sm:$0xf] }
 0x4ed   : > { %15141 = vmatprep.mubr.bf16.mxu0 %v11437_v2  ;;  %8218 = vst [vmem:[#allocation2 + $0x70] sm:$0xf] %v7667_v57  ;;  %8221 = vst [vmem:[#allocation2 + $0x74] sm:$0x1] %v8220_v33  ;;  %v7279_v50 = vsel %vm7144_vm8, %v7080_v9, %v7215_v62  ;;  %v6809_v61 = vadd.f32 %v19004_v38, %v19264_v31  ;;  %v9128_v20 = vshrl.u32 %v19283_v60, 16  ;;  %v9132_v9 = vrot.slane %v9130_v43, 1 }
 0x4ee   : > { %v7670_v18 = vshrl.u32 %v14909_v19, 16  ;;  %v14910_v46 = vpack.c.bf16 %v7279_v50, %v7279_v50  ;;  %v6812_v59 = vadd.f32 %v19011_v21, %v19270_v16  ;;  %v7673_v32 = vshll.u32 %v14909_v19, 16  ;;  %v8222_v17 = vld [vmem:[#allocation2 + $0x78] sm:$0xf]  ;;  %v19317_v56 = vld [vmem:[%s20977_s5] ss:$0 sm:$0xff] }
 0x4ef   : > { %v9137_v14 = vrot.slane %v9135_v55, 1  ;;  %v7010_v38 = vmul.f32 %v19317_v56, %v6809_v61  ;;  %v8740_v31 = vld [vmem:[#allocation2 + $0x54] sm:$0xe]  ;;  %v19320_v51 = vpop.f32.mrb[47].mxu1  ;;  %v9133_v16 = vor.u32 %v9132_v9, %v9128_v20  ;;  %v19326_v29 = vld [vmem:[%s20978_s6] ss:$0 sm:$0xff] }
 0x4f0   : > { %v7672_v42 = vrot.slane %v7670_v18, 7  ;;  %v7678_v37 = vshrl.u32 %v14910_v46, 16  ;;  %v7681_v12 = vshll.u32 %v14910_v46, 16  ;;  %v7011_v21 = vmul.f32 %v19317_v56, %v6812_v59  ;;  %v8398_v62 = vld [vmem:[#allocation2 + $0x58] sm:$0xf] }
 0x4f1   : > { %v7081_v1 = vadd.f32 %v19326_v29, %v7010_v38  ;;  %v14718_v0 = vcombine.low %v8740_v31, %v8650_v13  ;;  %v11439_v24 = vrot.slane %v16409_v27, 1  ;;  %v19329_v2 = vpop.f32.mrb[48].mxu0  ;;  %v16412_v50 = vld [vmem:[#allocation2 + $0x5c] ss:$0 sps:$4 sm:$0x11]   ;;  %v9138_v61 = vsel %vm2464_vm0, %v9133_v16, %v9137_v14 }
 0x4f2   : > { %v7675_v57 = vor.u32 %v7673_v32, %v7672_v42  ;;  %v7676_v33 = vrot.slane %v7672_v42, 4  ;;  %v7680_v19 = vrot.slane %v7678_v37, 7  ;;  %v7082_v49 = vadd.f32 %v19326_v29, %v7011_v21  ;;  %v6537_v43 = vpop.f32.mrb[49].mxu0  ;;  %v8226_v55 = vld [vmem:[#allocation2 + $0x80] sm:$0x1]  ;;  %12207 = vmatprep.mubr.bf16.mxu1 %v9138_v61 }
 0x4f3   : > { %vm7145_vm10 = vcmp.ge.f32.partialorder %v7081_v1, 0.0  ;;  %v7216_v18 = vmul.f32 %v19294_v22, %v7081_v1  ;;  %v11438_v46 = vrot.slane %v14718_v0, 1  ;;  %v19334_v20 = vpop.f32.mrb[50].mxu0  ;;  %v8397_v32 = vld [vmem:[#allocation2 + $0x54] sm:$0xf]  ;;  %v9147_v21 = vshll.u32 %v16412_v50, 16 }
 0x4f4   : > { %v8223_v27 = vsel %vm19087_vm14, %v7675_v57, %v8222_v17  ;;  %v7683_v59 = vor.u32 %v7681_v12, %v7680_v19  ;;  %v7685_v13 = vrot.slane %v7680_v19, 4  ;;  %vm7146_vm11 = vcmp.ge.f32.partialorder %v7082_v49, 0.0  ;;  %12208 = vmatmul.mubr.bf16.gmra.mrb[88].mxu1 %v19283_v60  ;;  %v6540_v42 = vpop.f32.mrb[51].mxu0  ;;  %v8652_v16 = vld [vmem:[#allocation2 + $0x64] sm:$0xf] }
 0x4f5   : > { %8224 = vst [vmem:[#allocation2 + $0x78] sm:$0xf] %v8223_v27  ;;  %v7280_v9 = vsel %vm7145_vm10, %v7081_v1, %v7216_v18  ;;  %v7217_v14 = vmul.f32 %v19294_v22, %v7082_v49  ;;  %v11440_v38 = vsel %vm2977_vm9, %v11438_v46, %v11439_v24  ;;  %v14464_v31 = vcombine.low %v8397_v32, %v8398_v62  ;;  %v16414_v24 = vld [vmem:[#allocation2 + $0x68] ss:$0 sps:$4 sm:$0x11]  }
 0x4f6   : > { %v7684_v37 = vsel %vm17552_vm6, %v7676_v33, %v7683_v59  ;;  %v8227_v17 = vsel %vm19095_vm2, %v7685_v13, %v8226_v55  ;;  %v14911_v12 = vpack.c.bf16 %v7280_v9, %v7280_v9  ;;  %15142 = vmatmul.mubr.bf16.gmra.mrb[136].mxu0 %v11440_v38  ;;  %v6817_v0 = vadd.f32 %v19002_v35, %v19286_v28  ;;  %v8229_v43 = vld [vmem:[#allocation2 + $0x84] sm:$0xf]  ;;  %v8741_v46 = vld [vmem:[#allocation2 + $0x60] sm:$0xe] }
 0x4f7   : > { %8225 = vst [vmem:[#allocation2 + $0x7c] sm:$0xf] %v7684_v37  ;;  %8228 = vst [vmem:[#allocation2 + $0x80] sm:$0x1] %v8227_v17  ;;  %v7281_v60 = vsel %vm7146_vm11, %v7082_v49, %v7217_v14  ;;  %v9142_v1 = vshll.u32 %v14464_v31, 16  ;;  %v9140_v33 = vshrl.u32 %v14464_v31, 16  ;;  %v6820_v50 = vadd.f32 %v19009_v44, %v19298_v36 }
 0x4f8   : > { %v7687_v62 = vshrl.u32 %v14911_v12, 16  ;;  %v7690_v57 = vshll.u32 %v14911_v12, 16  ;;  %v14912_v19 = vpack.c.bf16 %v7281_v60, %v7281_v60  ;;  %v9149_v55 = vrot.slane %v9147_v21, 1  ;;  %v16473_v49 = vld [vmem:[#allocation8 + $0xc8] sm:$0xff]   ;;  %v8400_v60 = vld [vmem:[#allocation2 + $0x64] sm:$0xf] }
 0x4f9   : > { %v9144_v61 = vrot.slane %v9142_v1, 1  ;;  %v7012_v18 = vmul.f32 %v19317_v56, %v6817_v0  ;;  %v19351_v27 = vpop.f32.mrb[52].mxu0  ;;  %v14719_v28 = vcombine.low %v8741_v46, %v8652_v16  ;;  %v7013_v38 = vmul.f32 %v19317_v56, %v6820_v50  ;;  %v16417_v37 = vld [vmem:[#allocation2 + $0x68] ss:$0 sps:$4 sm:$0x11]   ;;  %12435 = vmatpush1.bf16.msra.mxu1 %v16473_v49 }
 0x4fa   : > { %v7689_v59 = vrot.slane %v7687_v62, 7  ;;  %v7695_v13 = vshrl.u32 %v14912_v19, 16  ;;  %v7698_v35 = vshll.u32 %v14912_v19, 16  ;;  %v6545_v32 = vpop.f32.mrb[53].mxu0  ;;  %v11442_v42 = vrot.slane %v16414_v24, 1  ;;  %12436 = vmatprep.subr.bf16.mxu1 %v21063_v63  ;;  %v19361_v19 = vpop.f32.mrb[48].mxu1 }
 0x4fb   : > { %v9145_v9 = vor.u32 %v9144_v61, %v9140_v33  ;;  %v7083_v14 = vadd.f32 %v19326_v29, %v7012_v18  ;;  %v19355_v17 = vpop.f32.mrb[54].mxu0  ;;  %v11441_v21 = vrot.slane %v14719_v28, 1  ;;  %v8233_v16 = vld [vmem:[#allocation2 + $0x8c] sm:$0x1]  ;;  %v7084_v24 = vadd.f32 %v19326_v29, %v7013_v38  ;;  %v8399_v50 = vld [vmem:[#allocation2 + $0x60] sm:$0xf] }
 0x4fc   : > { %v7692_v44 = vor.u32 %v7690_v57, %v7689_v59  ;;  %v7693_v36 = vrot.slane %v7689_v59, 4  ;;  %v7697_v12 = vrot.slane %v7695_v13, 7  ;;  %v6548_v1 = vpop.f32.mrb[55].mxu0  ;;  %v19366_v46 = vpop.f32.mrb[49].mxu1  ;;  %v14465_v59 = vcombine.low %v8399_v50, %v8400_v60  ;;  %v8654_v32 = vld [vmem:[#allocation2 + $0x70] sm:$0xf] }
 0x4fd   : > { %v9150_v0 = vsel %vm2464_vm0, %v9145_v9, %v9149_v55  ;;  %vm7147_vm12 = vcmp.ge.f32.partialorder %v7083_v14, 0.0  ;;  %v7218_v62 = vmul.f32 %v19294_v22, %v7083_v14  ;;  %v11443_v18 = vsel %vm2977_vm9, %v11441_v21, %v11442_v42  ;;  %v16420_v42 = vld [vmem:[#allocation2 + $0x74] ss:$0 sps:$4 sm:$0x11]  }
 0x4fe   : > { %v8230_v57 = vsel %vm19087_vm14, %v7692_v44, %v8229_v43  ;;  %v7700_v33 = vor.u32 %v7698_v35, %v7697_v12  ;;  %v7702_v61 = vrot.slane %v7697_v12, 4  ;;  %12215 = vmatprep.mubr.bf16.mxu1 %v9150_v0  ;;  %vm7148_vm13 = vcmp.ge.f32.partialorder %v7084_v24, 0.0  ;;  %15145 = vmatprep.mubr.bf16.mxu0 %v11443_v18  ;;  %v19377_v12 = vpop.f32.mrb[50].mxu1 }
 0x4ff   : > { %8231 = vst [vmem:[#allocation2 + $0x84] sm:$0xf] %v8230_v57  ;;  %12216 = vmatmul.mubr.bf16.gmra.mrb[92].mxu1 %v14464_v31  ;;  %v7282_v55 = vsel %vm7147_vm12, %v7083_v14, %v7218_v62  ;;  %v7219_v49 = vmul.f32 %v19294_v22, %v7084_v24  ;;  %v9159_v28 = vshll.u32 %v16417_v37, 16  ;;  %v9154_v38 = vshll.u32 %v14465_v59, 16  ;;  %v8742_v14 = vld [vmem:[#allocation2 + $0x6c] sm:$0xe] }
 0x500   : > { %v7701_v13 = vsel %vm17552_vm6, %v7693_v36, %v7700_v33  ;;  %v8234_v43 = vsel %vm19095_vm2, %v7702_v61, %v8233_v16  ;;  %v14913_v35 = vpack.c.bf16 %v7282_v55, %v7282_v55  ;;  %v6825_v31 = vadd.f32 %v19024_v11, %v19329_v2  ;;  %v19379_v37 = vpop.f32.mrb[51].mxu1  ;;  %v8236_v55 = vld [vmem:[#allocation2 + $0x90] sm:$0xf] }
 0x501   : > { %8232 = vst [vmem:[#allocation2 + $0x88] sm:$0xf] %v7701_v13  ;;  %8235 = vst [vmem:[#allocation2 + $0x8c] sm:$0x1] %v8234_v43  ;;  %v7283_v9 = vsel %vm7148_vm13, %v7084_v24, %v7219_v49  ;;  %v19375_v44 = vpop.f32.mrb[56].mxu0  ;;  %v9152_v1 = vshrl.u32 %v14465_v59, 16  ;;  %v6828_v11 = vadd.f32 %v19029_v15, %v19334_v20  ;;  %v14720_v18 = vcombine.low %v8742_v14, %v8654_v32 }
 0x502   : > { %v7704_v36 = vshrl.u32 %v14913_v35, 16  ;;  %v7707_v21 = vshll.u32 %v14913_v35, 16  ;;  %v14914_v60 = vpack.c.bf16 %v7283_v9, %v7283_v9  ;;  %v6553_v16 = vpop.f32.mrb[57].mxu0  ;;  %v9156_v0 = vrot.slane %v9154_v38, 1  ;;  %v8240_v20 = vld [vmem:[#allocation2 + $0x98] sm:$0x1] }
 0x503   : > { %v9161_v62 = vrot.slane %v9159_v28, 1  ;;  %v7014_v24 = vmul.f32 %v19317_v56, %v6825_v31  ;;  %v19384_v2 = vpop.f32.mrb[58].mxu0  ;;  %v7015_v43 = vmul.f32 %v19317_v56, %v6828_v11  ;;  %v11445_v35 = vrot.slane %v16420_v42, 1  ;;  %v8402_v28 = vld [vmem:[#allocation2 + $0x70] sm:$0xf] }
 0x504   : > { %v7706_v57 = vrot.slane %v7704_v36, 7  ;;  %v7712_v33 = vshrl.u32 %v14914_v60, 16  ;;  %v7715_v61 = vshll.u32 %v14914_v60, 16  ;;  %v6556_v50 = vpop.f32.mrb[59].mxu0  ;;  %v9157_v49 = vor.u32 %v9156_v0, %v9152_v1 }
 0x505   : > { %v7085_v13 = vadd.f32 %v19326_v29, %v7014_v24  ;;  %v11444_v16 = vrot.slane %v14720_v18, 1  ;;  %v16423_v15 = vld [vmem:[#allocation2 + $0x74] ss:$0 sps:$4 sm:$0x11]   ;;  %v7086_v14 = vadd.f32 %v19326_v29, %v7015_v43  ;;  %v8656_v50 = vld [vmem:[#allocation2 + $0x7c] sm:$0xf] }
 0x506   : > { %v7709_v9 = vor.u32 %v7707_v21, %v7706_v57  ;;  %v7710_v38 = vrot.slane %v7706_v57, 4  ;;  %v7714_v31 = vrot.slane %v7712_v33, 7  ;;  %v9162_v36 = vsel %vm2464_vm0, %v9157_v49, %v9161_v62  ;;  %v8401_v21 = vld [vmem:[#allocation2 + $0x6c] sm:$0xf] }
 0x507   : > { %vm7149_vm15 = vcmp.ge.f32.partialorder %v7085_v13, 0.0  ;;  %v7220_v32 = vmul.f32 %v19294_v22, %v7085_v13  ;;  %12223 = vmatprep.mubr.bf16.mxu1 %v9162_v36  ;;  %v11446_v42 = vsel %vm2977_vm9, %v11444_v16, %v11445_v35  ;;  %vm7150_vm3 = vcmp.ge.f32.partialorder %v7086_v14, 0.0  ;;  %v16484_v35 = vld [vmem:[#allocation8 + $0xd0] sm:$0xff]  }
 0x508   : > { %v8237_v60 = vsel %vm19087_vm14, %v7709_v9, %v8236_v55  ;;  %v7717_v1 = vor.u32 %v7715_v61, %v7714_v31  ;;  %v7719_v0 = vrot.slane %v7714_v31, 4  ;;  %12224 = vmatmul.mubr.bf16.gmra.mrb[96].mxu1 %v14465_v59  ;;  %v7221_v62 = vmul.f32 %v19294_v22, %v7086_v14  ;;  %15146 = vmatmul.mubr.bf16.gmra.mrb[140].mxu0 %v11446_v42 }
 0x509   : > { %8238 = vst [vmem:[#allocation2 + $0x90] sm:$0xf] %v8237_v60  ;;  %v7284_v24 = vsel %vm7149_vm15, %v7085_v13, %v7220_v32  ;;  %v14466_v11 = vcombine.low %v8401_v21, %v8402_v28  ;;  %v9171_v18 = vshll.u32 %v16423_v15, 16  ;;  %v6833_v59 = vadd.f32 %v19022_v52, %v19351_v27  ;;  %v16425_v13 = vld [vmem:[#allocation2 + $0x80] ss:$0 sps:$4 sm:$0x11]   ;;  %12437 = vmatpush1.bf16.msra.mxu1 %v16484_v35 }
 0x50a   : > { %v7718_v57 = vsel %vm17552_vm6, %v7710_v38, %v7717_v1  ;;  %v8241_v33 = vsel %vm19095_vm2, %v7719_v0, %v8240_v20  ;;  %v14915_v61 = vpack.c.bf16 %v7284_v24, %v7284_v24  ;;  %v7285_v55 = vsel %vm7150_vm3, %v7086_v14, %v7221_v62  ;;  %v19401_v43 = vpop.f32.mrb[60].mxu0  ;;  %v8743_v14 = vld [vmem:[#allocation2 + $0x78] sm:$0xe]  ;;  %12438 = vmatprep.subr.bf16.mxu1 %v21063_v63  ;;  %v8243_v21 = vld [vmem:[#allocation2 + $0x9c] sm:$0xf] }
 0x50b   : > { %8239 = vst [vmem:[#allocation2 + $0x94] sm:$0xf] %v7718_v57  ;;  %8242 = vst [vmem:[#allocation2 + $0x98] sm:$0x1] %v8241_v33  ;;  %v9166_v49 = vshll.u32 %v14466_v11, 16  ;;  %v14916_v38 = vpack.c.bf16 %v7285_v55, %v7285_v55  ;;  %v9164_v31 = vshrl.u32 %v14466_v11, 16  ;;  %v7016_v15 = vmul.f32 %v19317_v56, %v6833_v59 }
 0x50c   : > { %v7721_v28 = vshrl.u32 %v14915_v61, 16  ;;  %v7724_v9 = vshll.u32 %v14915_v61, 16  ;;  %v6561_v16 = vpop.f32.mrb[61].mxu0  ;;  %v9173_v36 = vrot.slane %v9171_v18, 1  ;;  %v6836_v32 = vadd.f32 %v19027_v47, %v19355_v17  ;;  %v19411_v59 = vpop.f32.mrb[52].mxu1 }
 0x50d   : > { %v9168_v20 = vrot.slane %v9166_v49, 1  ;;  %v19406_v60 = vpop.f32.mrb[62].mxu0  ;;  %v7729_v27 = vshrl.u32 %v14916_v38, 16  ;;  %v7732_v1 = vshll.u32 %v14916_v38, 16  ;;  %v14721_v0 = vcombine.low %v8743_v14, %v8656_v50  ;;  %v8404_v49 = vld [vmem:[#allocation2 + $0x7c] sm:$0xf] }
 0x50e   : > { %v7723_v52 = vrot.slane %v7721_v28, 7  ;;  %v6564_v42 = vpop.f32.mrb[63].mxu0  ;;  %v7087_v62 = vadd.f32 %v19326_v29, %v7016_v15  ;;  %v7017_v57 = vmul.f32 %v19317_v56, %v6836_v32  ;;  %v11448_v33 = vrot.slane %v16425_v13, 1  ;;  %v16428_v61 = vld [vmem:[#allocation2 + $0x80] ss:$0 sps:$4 sm:$0x11]  }
 0x50f   : > { %v9169_v24 = vor.u32 %v9168_v20, %v9164_v31  ;;  %v7731_v18 = vrot.slane %v7729_v27, 7  ;;  %v11447_v55 = vrot.slane %v14721_v0, 1  ;;  %v8247_v35 = vld [vmem:[#allocation2 + $0xa4] sm:$0x1]  ;;  %v8403_v15 = vld [vmem:[#allocation2 + $0x78] sm:$0xf] }
 0x510   : > { %v7726_v47 = vor.u32 %v7724_v9, %v7723_v52  ;;  %v7727_v17 = vrot.slane %v7723_v52, 4  ;;  %vm7151_vm1 = vcmp.ge.f32.partialorder %v7087_v62, 0.0  ;;  %v7222_v28 = vmul.f32 %v19294_v22, %v7087_v62 }
 0x511   : > { %v9174_v50 = vsel %vm2464_vm0, %v9169_v24, %v9173_v36  ;;  %v7088_v38 = vadd.f32 %v19326_v29, %v7017_v57  ;;  %v19416_v31 = vpop.f32.mrb[64].mxu0  ;;  %v7734_v9 = vor.u32 %v7732_v1, %v7731_v18  ;;  %v7736_v16 = vrot.slane %v7731_v18, 4  ;;  %v19430_v18 = vpop.f32.mrb[53].mxu1 }
 0x512   : > { %v8244_v13 = vsel %vm19087_vm14, %v7726_v47, %v8243_v21  ;;  %12231 = vmatprep.mubr.bf16.mxu1 %v9174_v50  ;;  %v11449_v20 = vsel %vm2977_vm9, %v11447_v55, %v11448_v33  ;;  %v6569_v32 = vpop.f32.mrb[65].mxu0  ;;  %v7286_v36 = vsel %vm7151_vm1, %v7087_v62, %v7222_v28  ;;  %v14467_v52 = vcombine.low %v8403_v15, %v8404_v49  ;;  %v8658_v21 = vld [vmem:[#allocation2 + $0x88] sm:$0xf]  ;;  %v8744_v62 = vld [vmem:[#allocation2 + $0x84] sm:$0xe] }
 0x513   : > { %8245 = vst [vmem:[#allocation2 + $0x9c] sm:$0xf] %v8244_v13  ;;  %12232 = vmatmul.mubr.bf16.gmra.mrb[100].mxu1 %v14466_v11  ;;  %vm7152_vm4 = vcmp.ge.f32.partialorder %v7088_v38, 0.0  ;;  %v7223_v14 = vmul.f32 %v19294_v22, %v7088_v38  ;;  %15149 = vmatprep.mubr.bf16.mxu0 %v11449_v20  ;;  %v7735_v27 = vsel %vm17552_vm6, %v7727_v17, %v7734_v9  ;;  %v9183_v42 = vshll.u32 %v16428_v61, 16  ;;  %v19428_v47 = vpop.f32.mrb[66].mxu0  ;;  %v19432_v61 = vpop.f32.mrb[54].mxu1 }
 0x514   : > { %v8248_v1 = vsel %vm19095_vm2, %v7736_v16, %v8247_v35  ;;  %v14917_v0 = vpack.c.bf16 %v7286_v36, %v7286_v36  ;;  %8246 = vst [vmem:[#allocation2 + $0xa0] sm:$0xf] %v7735_v27  ;;  %v9178_v57 = vshll.u32 %v14467_v52, 16  ;;  %v6841_v11 = vadd.f32 %v19070_v54, %v19375_v44  ;;  %v16431_v33 = vld [vmem:[#allocation2 + $0x8c] ss:$0 sps:$4 sm:$0x11]  }
 0x515   : > { %8249 = vst [vmem:[#allocation2 + $0xa4] sm:$0x1] %v8248_v1  ;;  %v7287_v24 = vsel %vm7152_vm4, %v7088_v38, %v7223_v14  ;;  %v9176_v35 = vshrl.u32 %v14467_v52, 16  ;;  %v6572_v50 = vpop.f32.mrb[67].mxu0  ;;  %21079 = vst [vmem:[#allocation18_spill] sm:$0xff] %v19432_v61  ;;  %v9185_v13 = vrot.slane %v9183_v42, 1  ;;  %v6844_v54 = vadd.f32 %v19081_v34, %v19384_v2 }
 0x516   : > { %v7738_v17 = vshrl.u32 %v14917_v0, 16  ;;  %v7741_v55 = vshll.u32 %v14917_v0, 16  ;;  %v14918_v49 = vpack.c.bf16 %v7287_v24, %v7287_v24  ;;  %v9180_v28 = vrot.slane %v9178_v57, 1  ;;  %v19437_v44 = vpop.f32.mrb[55].mxu1  ;;  %v8250_v16 = vld [vmem:[#allocation2 + $0xa8] sm:$0xf] }
 0x517   : > { %v7018_v38 = vmul.f32 %v19317_v56, %v6841_v11  ;;  %v14722_v32 = vcombine.low %v8744_v62, %v8658_v21  ;;  %v7019_v27 = vmul.f32 %v19317_v56, %v6844_v54  ;;  %v11451_v1 = vrot.slane %v16431_v33, 1  ;;  %v16434_v0 = vld [vmem:[#allocation2 + $0x8c] ss:$0 sps:$4 sm:$0x11]   ;;  %v8406_v2 = vld [vmem:[#allocation2 + $0x88] sm:$0xf] }
 0x518   : > { %v7740_v9 = vrot.slane %v7738_v17, 7  ;;  %v7746_v20 = vshrl.u32 %v14918_v49, 16  ;;  %v7749_v15 = vshll.u32 %v14918_v49, 16  ;;  %v9181_v36 = vor.u32 %v9180_v28, %v9176_v35  ;;  %v8254_v17 = vld [vmem:[#allocation2 + $0xb0] sm:$0x1] }
 0x519   : > { %v7089_v14 = vadd.f32 %v19326_v29, %v7018_v38  ;;  %v19441_v42 = vpop.f32.mrb[68].mxu0  ;;  %v11450_v34 = vrot.slane %v14722_v32, 1  ;;  %v7090_v62 = vadd.f32 %v19326_v29, %v7019_v27  ;;  %v8405_v38 = vld [vmem:[#allocation2 + $0x84] sm:$0xf] }
 0x51a   : > { %v7743_v24 = vor.u32 %v7741_v55, %v7740_v9  ;;  %v7744_v57 = vrot.slane %v7740_v9, 4  ;;  %v7748_v11 = vrot.slane %v7746_v20, 7  ;;  %v6577_v50 = vpop.f32.mrb[69].mxu0  ;;  %v9186_v61 = vsel %vm2464_vm0, %v9181_v36, %v9185_v13  ;;  %v8660_v36 = vld [vmem:[#allocation2 + $0x94] sm:$0xf] }
 0x51b   : > { %vm7153_vm5 = vcmp.ge.f32.partialorder %v7089_v14, 0.0  ;;  %v7224_v21 = vmul.f32 %v19294_v22, %v7089_v14  ;;  %v19446_v49 = vpop.f32.mrb[70].mxu0  ;;  %12239 = vmatprep.mubr.bf16.mxu1 %v9186_v61  ;;  %v11452_v28 = vsel %vm2977_vm9, %v11450_v34, %v11451_v1  ;;  %vm7154_vm7 = vcmp.ge.f32.partialorder %v7090_v62, 0.0 }
 0x51c   : > { %v8251_v33 = vsel %vm19087_vm14, %v7743_v24, %v8250_v16  ;;  %v7751_v35 = vor.u32 %v7749_v15, %v7748_v11  ;;  %v7753_v55 = vrot.slane %v7748_v11, 4  ;;  %v6580_v54 = vpop.f32.mrb[71].mxu0  ;;  %12240 = vmatmul.mubr.bf16.gmra.mrb[104].mxu1 %v14467_v52  ;;  %v7225_v9 = vmul.f32 %v19294_v22, %v7090_v62  ;;  %15150 = vmatmul.mubr.bf16.gmra.mrb[144].mxu0 %v11452_v28  ;;  %v16495_v24 = vld [vmem:[#allocation8 + $0xd8] sm:$0xff]  }
 0x51d   : > { %8252 = vst [vmem:[#allocation2 + $0xa8] sm:$0xf] %v8251_v33  ;;  %v7288_v13 = vsel %vm7153_vm5, %v7089_v14, %v7224_v21  ;;  %v14468_v20 = vcombine.low %v8405_v38, %v8406_v2  ;;  %v9195_v61 = vshll.u32 %v16434_v0, 16  ;;  %v6849_v52 = vadd.f32 %v19068_v25, %v19401_v43  ;;  %v16436_v14 = vld [vmem:[#allocation2 + $0x98] ss:$0 sps:$4 sm:$0x11]   ;;  %12439 = vmatpush1.bf16.msra.mxu1 %v16495_v24 }
 0x51e   : > { %v7752_v32 = vsel %vm17552_vm6, %v7744_v57, %v7751_v35  ;;  %v8255_v16 = vsel %vm19095_vm2, %v7753_v55, %v8254_v17  ;;  %v14919_v15 = vpack.c.bf16 %v7288_v13, %v7288_v13  ;;  %v7289_v27 = vsel %vm7154_vm7, %v7090_v62, %v7225_v9  ;;  %v8745_v33 = vld [vmem:[#allocation2 + $0x90] sm:$0xe]  ;;  %v8257_v55 = vld [vmem:[#allocation2 + $0xb4] sm:$0xf]  ;;  %12440 = vmatprep.subr.bf16.mxu1 %v21063_v63  ;;  %v8261_v24 = vld [vmem:[#allocation2 + $0xbc] sm:$0x1] }
 0x51f   : > { %8253 = vst [vmem:[#allocation2 + $0xac] sm:$0xf] %v7752_v32  ;;  %8256 = vst [vmem:[#allocation2 + $0xb0] sm:$0x1] %v8255_v16  ;;  %v9190_v1 = vshll.u32 %v14468_v20, 16  ;;  %v14920_v2 = vpack.c.bf16 %v7289_v27, %v7289_v27  ;;  %v9188_v50 = vshrl.u32 %v14468_v20, 16  ;;  %v7020_v17 = vmul.f32 %v19317_v56, %v6849_v52 }
 0x520   : > { %v7755_v11 = vshrl.u32 %v14919_v15, 16  ;;  %v7758_v34 = vshll.u32 %v14919_v15, 16  ;;  %v9197_v21 = vrot.slane %v9195_v61, 1  ;;  %v6852_v0 = vadd.f32 %v19079_v48, %v19406_v60  ;;  %v16439_v16 = vld [vmem:[#allocation2 + $0x98] ss:$0 sps:$4 sm:$0x11]  }
 0x521   : > { %v9192_v57 = vrot.slane %v9190_v1, 1  ;;  %v19461_v35 = vpop.f32.mrb[72].mxu0  ;;  %v7763_v25 = vshrl.u32 %v14920_v2, 16  ;;  %v7766_v43 = vshll.u32 %v14920_v2, 16  ;;  %v14723_v28 = vcombine.low %v8745_v33, %v8660_v36  ;;  %v8408_v1 = vld [vmem:[#allocation2 + $0x94] sm:$0xf] }
 0x522   : > { %v7757_v62 = vrot.slane %v7755_v11, 7  ;;  %v6585_v38 = vpop.f32.mrb[73].mxu0  ;;  %v7091_v13 = vadd.f32 %v19326_v29, %v7020_v17  ;;  %v7021_v9 = vmul.f32 %v19317_v56, %v6852_v0  ;;  %v11454_v32 = vrot.slane %v16436_v14, 1  ;;  %v8407_v0 = vld [vmem:[#allocation2 + $0x90] sm:$0xf] }
 0x523   : > { %v9193_v54 = vor.u32 %v9192_v57, %v9188_v50  ;;  %v19466_v48 = vpop.f32.mrb[74].mxu0  ;;  %v7765_v61 = vrot.slane %v7763_v25, 7  ;;  %v11453_v27 = vrot.slane %v14723_v28, 1  ;;  %v19471_v50 = vpop.f32.mrb[56].mxu1  ;;  %v14469_v25 = vcombine.low %v8407_v0, %v8408_v1 }
 0x524   : > { %v7760_v60 = vor.u32 %v7758_v34, %v7757_v62  ;;  %v7761_v15 = vrot.slane %v7757_v62, 4  ;;  %v6588_v52 = vpop.f32.mrb[75].mxu0  ;;  %vm7155_vm8 = vcmp.ge.f32.partialorder %v7091_v13, 0.0  ;;  %v7226_v11 = vmul.f32 %v19294_v22, %v7091_v13  ;;  %v19476_v33 = vpop.f32.mrb[57].mxu1 }
 0x525   : > { %v9198_v36 = vsel %vm2464_vm0, %v9193_v54, %v9197_v21  ;;  %v7092_v2 = vadd.f32 %v19326_v29, %v7021_v9  ;;  %v7768_v57 = vor.u32 %v7766_v43, %v7765_v61  ;;  %v7770_v34 = vrot.slane %v7765_v61, 4  ;;  %v8662_v54 = vld [vmem:[#allocation2 + $0xa0] sm:$0xf] }
 0x526   : > { %v8258_v14 = vsel %vm19087_vm14, %v7760_v60, %v8257_v55  ;;  %12247 = vmatprep.mubr.bf16.mxu1 %v9198_v36  ;;  %v11455_v17 = vsel %vm2977_vm9, %v11453_v27, %v11454_v32  ;;  %v7290_v21 = vsel %vm7155_vm8, %v7091_v13, %v7226_v11  ;;  %v9207_v38 = vshll.u32 %v16439_v16, 16  ;;  %v8746_v13 = vld [vmem:[#allocation2 + $0x9c] sm:$0xe]  ;;  %v16442_v60 = vld [vmem:[#allocation2 + $0xa4] ss:$0 sps:$4 sm:$0x11]  }
 0x527   : > { %8259 = vst [vmem:[#allocation2 + $0xb4] sm:$0xf] %v8258_v14  ;;  %12248 = vmatmul.mubr.bf16.gmra.mrb[108].mxu1 %v14468_v20  ;;  %vm7156_vm10 = vcmp.ge.f32.partialorder %v7092_v2, 0.0  ;;  %v7227_v62 = vmul.f32 %v19294_v22, %v7092_v2  ;;  %15153 = vmatprep.mubr.bf16.mxu0 %v11455_v17  ;;  %v7769_v28 = vsel %vm17552_vm6, %v7761_v15, %v7768_v57  ;;  %v9202_v32 = vshll.u32 %v14469_v25, 16  ;;  %v19487_v27 = vpop.f32.mrb[58].mxu1 }
 0x528   : > { %v8262_v55 = vsel %vm19095_vm2, %v7770_v34, %v8261_v24  ;;  %v14921_v43 = vpack.c.bf16 %v7290_v21, %v7290_v21  ;;  %8260 = vst [vmem:[#allocation2 + $0xb8] sm:$0xf] %v7769_v28  ;;  %v6857_v20 = vadd.f32 %v19130_v39, %v19416_v31  ;;  %21080 = vst [vmem:[#allocation19_spill] sm:$0xff] %v19487_v27  ;;  %v9200_v24 = vshrl.u32 %v14469_v25, 16  ;;  %v19489_v16 = vpop.f32.mrb[59].mxu1 }
 0x529   : > { %8263 = vst [vmem:[#allocation2 + $0xbc] sm:$0x1] %v8262_v55  ;;  %v7291_v9 = vsel %vm7156_vm10, %v7092_v2, %v7227_v62  ;;  %v19485_v61 = vpop.f32.mrb[76].mxu0  ;;  %v9204_v11 = vrot.slane %v9202_v32, 1  ;;  %v9209_v14 = vrot.slane %v9207_v38, 1  ;;  %v6860_v39 = vadd.f32 %v19140_v30, %v19428_v47 }
 0x52a   : > { %v7772_v15 = vshrl.u32 %v14921_v43, 16  ;;  %v7775_v1 = vshll.u32 %v14921_v43, 16  ;;  %v14922_v52 = vpack.c.bf16 %v7291_v9, %v7291_v9  ;;  %v6593_v36 = vpop.f32.mrb[77].mxu0  ;;  %v7022_v2 = vmul.f32 %v19317_v56, %v6857_v20  ;;  %v8264_v62 = vld [vmem:[#allocation2 + $0xc0] sm:$0xf] }
 0x52b   : > { %v19494_v31 = vpop.f32.mrb[78].mxu0  ;;  %v14724_v0 = vcombine.low %v8746_v13, %v8662_v54  ;;  %v9205_v28 = vor.u32 %v9204_v11, %v9200_v24  ;;  %v7023_v43 = vmul.f32 %v19317_v56, %v6860_v39  ;;  %v11457_v9 = vrot.slane %v16442_v60, 1  ;;  %v8410_v38 = vld [vmem:[#allocation2 + $0xa0] sm:$0xf]  ;;  %v8268_v47 = vld [vmem:[#allocation2 + $0xc8] sm:$0x1] }
 0x52c   : > { %v7774_v57 = vrot.slane %v7772_v15, 7  ;;  %v7780_v34 = vshrl.u32 %v14922_v52, 16  ;;  %v7783_v17 = vshll.u32 %v14922_v52, 16  ;;  %v6596_v21 = vpop.f32.mrb[79].mxu0  ;;  %v7093_v55 = vadd.f32 %v19326_v29, %v7022_v2 }
 0x52d   : > { %v11456_v27 = vrot.slane %v14724_v0, 1  ;;  %v16445_v30 = vld [vmem:[#allocation2 + $0xa4] ss:$0 sps:$4 sm:$0x11]   ;;  %v9210_v15 = vsel %vm2464_vm0, %v9205_v28, %v9209_v14  ;;  %v7094_v13 = vadd.f32 %v19326_v29, %v7023_v43  ;;  %v8664_v21 = vld [vmem:[#allocation2 + $0xac] sm:$0xf] }
 0x52e   : > { %v7777_v32 = vor.u32 %v7775_v1, %v7774_v57  ;;  %v7778_v20 = vrot.slane %v7774_v57, 4  ;;  %v7782_v36 = vrot.slane %v7780_v34, 7  ;;  %vm7157_vm11 = vcmp.ge.f32.partialorder %v7093_v55, 0.0  ;;  %12255 = vmatprep.mubr.bf16.mxu1 %v9210_v15  ;;  %v8409_v1 = vld [vmem:[#allocation2 + $0x9c] sm:$0xf]  ;;  %v16506_v43 = vld [vmem:[#allocation8 + $0xe0] sm:$0xff]  }
 0x52f   : > { %v7228_v54 = vmul.f32 %v19294_v22, %v7093_v55  ;;  %v11458_v60 = vsel %vm2977_vm9, %v11456_v27, %v11457_v9  ;;  %12256 = vmatmul.mubr.bf16.gmra.mrb[112].mxu1 %v14469_v25  ;;  %vm7158_vm12 = vcmp.ge.f32.partialorder %v7094_v13, 0.0  ;;  %v7229_v14 = vmul.f32 %v19294_v22, %v7094_v13  ;;  %v16447_v28 = vld [vmem:[#allocation2 + $0xb0] ss:$0 sps:$4 sm:$0x11]  }
 0x530   : > { %v8265_v52 = vsel %vm19087_vm14, %v7777_v32, %v8264_v62  ;;  %v7785_v24 = vor.u32 %v7783_v17, %v7782_v36  ;;  %v7787_v11 = vrot.slane %v7782_v36, 4  ;;  %15154 = vmatmul.mubr.bf16.gmra.mrb[148].mxu0 %v11458_v60  ;;  %v14470_v39 = vcombine.low %v8409_v1, %v8410_v38  ;;  %12441 = vmatpush1.bf16.msra.mxu1 %v16506_v43 }
 0x531   : > { %8266 = vst [vmem:[#allocation2 + $0xc0] sm:$0xf] %v8265_v52  ;;  %v7292_v2 = vsel %vm7157_vm11, %v7093_v55, %v7228_v54  ;;  %v9219_v0 = vshll.u32 %v16445_v30, 16  ;;  %v7293_v27 = vsel %vm7158_vm12, %v7094_v13, %v7229_v14  ;;  %v6865_v25 = vadd.f32 %v19122_v45, %v19441_v42  ;;  %v19511_v55 = vpop.f32.mrb[80].mxu0  ;;  %v8271_v30 = vld [vmem:[#allocation2 + $0xe4] sm:$0xf]  ;;  %12442 = vmatprep.subr.bf16.mxu1 %v21063_v63 }
 0x532   : > { %v7786_v57 = vsel %vm17552_vm6, %v7778_v20, %v7785_v24  ;;  %v8269_v34 = vsel %vm19095_vm2, %v7787_v11, %v8268_v47  ;;  %v14923_v17 = vpack.c.bf16 %v7292_v2, %v7292_v2  ;;  %v9214_v62 = vshll.u32 %v14470_v39, 16  ;;  %v6601_v36 = vpop.f32.mrb[81].mxu0  ;;  %v19513_v47 = vpop.f32.mrb[60].mxu1  ;;  %v8747_v45 = vld [vmem:[#allocation2 + $0xa8] sm:$0xe] }
 0x533   : > { %8267 = vst [vmem:[#allocation2 + $0xc4] sm:$0xf] %v7786_v57  ;;  %8270 = vst [vmem:[#allocation2 + $0xc8] sm:$0x1] %v8269_v34  ;;  %v14924_v32 = vpack.c.bf16 %v7293_v27, %v7293_v27  ;;  %v9212_v20 = vshrl.u32 %v14470_v39, 16  ;;  %v9221_v54 = vrot.slane %v9219_v0, 1  ;;  %v7024_v13 = vmul.f32 %v19317_v56, %v6865_v25 }
 0x534   : > { %v7789_v9 = vshrl.u32 %v14923_v17, 16  ;;  %v7792_v38 = vshll.u32 %v14923_v17, 16  ;;  %v9216_v15 = vrot.slane %v9214_v62, 1  ;;  %v6868_v52 = vadd.f32 %v19137_v58, %v19446_v49  ;;  %v19518_v42 = vpop.f32.mrb[82].mxu0  ;;  %v19520_v24 = vpop.f32.mrb[61].mxu1 }
 0x535   : > { %v7797_v60 = vshrl.u32 %v14924_v32, 16  ;;  %v7800_v1 = vshll.u32 %v14924_v32, 16  ;;  %v14725_v2 = vcombine.low %v8747_v45, %v8664_v21  ;;  %v6604_v14 = vpop.f32.mrb[83].mxu0  ;;  %v19522_v57 = vpop.f32.mrb[62].mxu1  ;;  %v7095_v17 = vadd.f32 %v19326_v29, %v7024_v13  ;;  %v8412_v0 = vld [vmem:[#allocation2 + $0xac] sm:$0xf] }
 0x536   : > { %v7791_v11 = vrot.slane %v7789_v9, 7  ;;  %21081 = vst [vmem:[#allocation20_spill] sm:$0xff] %v19522_v57  ;;  %v9217_v34 = vor.u32 %v9216_v15, %v9212_v20  ;;  %v7025_v58 = vmul.f32 %v19317_v56, %v6868_v52  ;;  %v11460_v49 = vrot.slane %v16447_v28, 1  ;;  %v19527_v27 = vpop.f32.mrb[63].mxu1  ;;  %v8275_v21 = vld [vmem:[#allocation2 + $0xec] sm:$0x1] }
 0x537   : > { %v7799_v43 = vrot.slane %v7797_v60, 7  ;;  %v11459_v9 = vrot.slane %v14725_v2, 1  ;;  %v16450_v32 = vld [vmem:[#allocation2 + $0xb0] ss:$0 sps:$4 sm:$0x11]   ;;  %vm7159_vm13 = vcmp.ge.f32.partialorder %v7095_v17, 0.0  ;;  %v7230_v45 = vmul.f32 %v19294_v22, %v7095_v17 }
 0x538   : > { %v7794_v62 = vor.u32 %v7792_v38, %v7791_v11  ;;  %v7795_v25 = vrot.slane %v7791_v11, 4  ;;  %v9222_v36 = vsel %vm2464_vm0, %v9217_v34, %v9221_v54  ;;  %v7096_v20 = vadd.f32 %v19326_v29, %v7025_v58  ;;  %v8411_v52 = vld [vmem:[#allocation2 + $0xa8] sm:$0xf]  ;;  %v19540_v22 = vld [vmem:[%s20979_s7] ss:$0 sm:$0xff] }
 0x539   : > { %v19532_v15 = vpop.f32.mrb[84].mxu0  ;;  %v7802_v28 = vor.u32 %v7800_v1, %v7799_v43  ;;  %v7804_v13 = vrot.slane %v7799_v43, 4  ;;  %12263 = vmatprep.mubr.bf16.mxu1 %v9222_v36  ;;  %v11461_v38 = vsel %vm2977_vm9, %v11459_v9, %v11460_v49  ;;  %v7294_v54 = vsel %vm7159_vm13, %v7095_v17, %v7230_v45  ;;  %v8416_v57 = vld [vmem:[#allocation2 + $0xdc] sm:$0xf] }
 0x53a   : > { %v8272_v56 = vsel %vm19087_vm14, %v7794_v62, %v8271_v30  ;;  %v6609_v11 = vpop.f32.mrb[85].mxu0  ;;  %12264 = vmatmul.mubr.bf16.gmra.mrb[116].mxu1 %v14470_v39  ;;  %vm7160_vm15 = vcmp.ge.f32.partialorder %v7096_v20, 0.0  ;;  %v7231_v29 = vmul.f32 %v19540_v22, %v7096_v20  ;;  %15157 = vmatprep.mubr.bf16.mxu0 %v11461_v38  ;;  %v14471_v30 = vcombine.low %v8411_v52, %v8412_v0  ;;  %v8666_v62 = vld [vmem:[#allocation2 + $0xb8] sm:$0xf] }
 0x53b   : > { %8273 = vst [vmem:[#allocation2 + $0xe4] sm:$0xf] %v8272_v56  ;;  %v19543_v60 = vpop.f32.mrb[86].mxu0  ;;  %v7803_v1 = vsel %vm17552_vm6, %v7795_v25, %v7802_v28  ;;  %v8276_v2 = vsel %vm19095_vm2, %v7804_v13, %v8275_v21  ;;  %v14925_v39 = vpack.c.bf16 %v7294_v54, %v7294_v54  ;;  %v9231_v14 = vshll.u32 %v16450_v32, 16  ;;  %v19554_v32 = vld [vmem:[%s20977_s5] ss:$0 sm:$0xff] }
 0x53c   : > { %v6612_v34 = vpop.f32.mrb[87].mxu0  ;;  %8274 = vst [vmem:[#allocation2 + $0xe8] sm:$0xf] %v7803_v1  ;;  %8277 = vst [vmem:[#allocation2 + $0xec] sm:$0x1] %v8276_v2  ;;  %v7295_v17 = vsel %vm7160_vm15, %v7096_v20, %v7231_v29  ;;  %v9226_v58 = vshll.u32 %v14471_v30, 16  ;;  %v6873_v49 = vadd.f32 %v19180_v6, %v19461_v35  ;;  %v6876_v20 = vadd.f32 %v19190_v7, %v19466_v48 }
 0x53d   : > { %v16453_v0 = vld [vmem:[#allocation2 + $0xbc] ss:$0 sps:$4 sm:$0x11]   ;;  %v7806_v43 = vshrl.u32 %v14925_v39, 16  ;;  %v7809_v9 = vshll.u32 %v14925_v39, 16  ;;  %v14926_v36 = vpack.c.bf16 %v7295_v17, %v7295_v17  ;;  %v9224_v45 = vshrl.u32 %v14471_v30, 16 }
 0x53e   : > { %v9228_v25 = vrot.slane %v9226_v58, 1  ;;  %v9233_v56 = vrot.slane %v9231_v14, 1  ;;  %v7026_v21 = vmul.f32 %v19554_v32, %v6873_v49  ;;  %v8748_v28 = vld [vmem:[#allocation2 + $0xb4] sm:$0xe]  ;;  %v8278_v35 = vld [vmem:[#allocation2 + $0xf0] sm:$0xf]  ;;  %v7027_v1 = vmul.f32 %v19554_v32, %v6876_v20 }
 0x53f   : > { %v7808_v6 = vrot.slane %v7806_v43, 7  ;;  %v7814_v13 = vshrl.u32 %v14926_v36, 16  ;;  %v7817_v38 = vshll.u32 %v14926_v36, 16  ;;  %v14726_v52 = vcombine.low %v8748_v28, %v8666_v62  ;;  %v19562_v54 = vld [vmem:[%s20978_s6] ss:$0 sm:$0xff] }
 0x540   : > { %v9229_v11 = vor.u32 %v9228_v25, %v9224_v45  ;;  %v7097_v29 = vadd.f32 %v19562_v54, %v7026_v21  ;;  %v11463_v2 = vrot.slane %v16453_v0, 1  ;;  %v16456_v39 = vld [vmem:[#allocation2 + $0xbc] ss:$0 sps:$4 sm:$0x11]   ;;  %v8414_v58 = vld [vmem:[#allocation2 + $0xb8] sm:$0xf]  ;;  %v7098_v45 = vadd.f32 %v19562_v54, %v7027_v1 }
 0x541   : > { %v19566_v14 = vpop.f32.mrb[88].mxu0  ;;  %v7811_v7 = vor.u32 %v7809_v9, %v7808_v6  ;;  %v7812_v48 = vrot.slane %v7808_v6, 4  ;;  %v7816_v34 = vrot.slane %v7814_v13, 7  ;;  %v11462_v17 = vrot.slane %v14726_v52, 1  ;;  %v8282_v62 = vld [vmem:[#allocation2 + $0xf8] sm:$0x1] }
 0x542   : > { %v6617_v49 = vpop.f32.mrb[89].mxu0  ;;  %v9234_v43 = vsel %vm2464_vm0, %v9229_v11, %v9233_v56  ;;  %vm7161_vm3 = vcmp.ge.f32.partialorder %v7097_v29, 0.0  ;;  %v7232_v36 = vmul.f32 %v19540_v22, %v7097_v29  ;;  %v8413_v28 = vld [vmem:[#allocation2 + $0xb4] sm:$0xf]  ;;  %vm7162_vm1 = vcmp.ge.f32.partialorder %v7098_v45, 0.0 }
 0x543   : > { %v19571_v25 = vpop.f32.mrb[90].mxu0  ;;  %v8279_v0 = vsel %vm19087_vm14, %v7811_v7, %v8278_v35  ;;  %v7819_v21 = vor.u32 %v7817_v38, %v7816_v34  ;;  %v7821_v9 = vrot.slane %v7816_v34, 4  ;;  %12271 = vmatprep.mubr.bf16.mxu1 %v9234_v43  ;;  %v11464_v20 = vsel %vm2977_vm9, %v11462_v17, %v11463_v2  ;;  %v8668_v7 = vld [vmem:[#allocation2 + $0xc4] sm:$0xf]  ;;  %v16517_v49 = vld [vmem:[#allocation8 + $0xe8] sm:$0xff]  }
 0x544   : > { %v6620_v6 = vpop.f32.mrb[91].mxu0  ;;  %8280 = vst [vmem:[#allocation2 + $0xf0] sm:$0xf] %v8279_v0  ;;  %12272 = vmatmul.mubr.bf16.gmra.mrb[120].mxu1 %v14471_v30  ;;  %v7296_v56 = vsel %vm7161_vm3, %v7097_v29, %v7232_v36  ;;  %v7233_v13 = vmul.f32 %v19540_v22, %v7098_v45  ;;  %15158 = vmatmul.mubr.bf16.gmra.mrb[152].mxu0 %v11464_v20  ;;  %v9243_v1 = vshll.u32 %v16456_v39, 16  ;;  %v21082_v30 = vld [vmem:[#allocation16_spill] sm:$0xff]  ;;  %v21083_v39 = vld [vmem:[#allocation17_spill] sm:$0xff] }
 0x545   : > { %v14472_v52 = vcombine.low %v8413_v28, %v8414_v58  ;;  %v7820_v11 = vsel %vm17552_vm6, %v7812_v48, %v7819_v21  ;;  %v8283_v35 = vsel %vm19095_vm2, %v7821_v9, %v8282_v62  ;;  %v14927_v38 = vpack.c.bf16 %v7296_v56, %v7296_v56  ;;  %v16458_v17 = vld [vmem:[#allocation2 + $0xc8] ss:$0 sps:$4 sm:$0x11]   ;;  %v8285_v48 = vld [vmem:[#allocation2 + $0xfc] sm:$0xf]  ;;  %12443 = vmatpush1.bf16.msra.mxu1 %v16517_v49 }
 0x546   : > { %8281 = vst [vmem:[#allocation2 + $0xf4] sm:$0xf] %v7820_v11  ;;  %8284 = vst [vmem:[#allocation2 + $0xf8] sm:$0x1] %v8283_v35  ;;  %v7297_v2 = vsel %vm7162_vm1, %v7098_v45, %v7233_v13  ;;  %v6881_v29 = vadd.f32 %v21082_v30, %v19485_v61  ;;  %v9245_v20 = vrot.slane %v9243_v1, 1  ;;  %v6884_v9 = vadd.f32 %v21083_v39, %v19494_v31 }
 0x547   : > { %v9238_v34 = vshll.u32 %v14472_v52, 16  ;;  %v7823_v43 = vshrl.u32 %v14927_v38, 16  ;;  %v7826_v58 = vshll.u32 %v14927_v38, 16  ;;  %v14928_v36 = vpack.c.bf16 %v7297_v2, %v7297_v2  ;;  %v8749_v28 = vld [vmem:[#allocation2 + $0xc0] sm:$0xe]  ;;  %12444 = vmatprep.subr.bf16.mxu1 %v21063_v63 }
 0x548   : > { %v9236_v0 = vshrl.u32 %v14472_v52, 16  ;;  %v7028_v62 = vmul.f32 %v19554_v32, %v6881_v29  ;;  %v14727_v13 = vcombine.low %v8749_v28, %v8668_v7  ;;  %v8415_v11 = vld [vmem:[#allocation2 + $0xd8] sm:$0xf]  ;;  %v7029_v2 = vmul.f32 %v19554_v32, %v6884_v9  ;;  %v16461_v30 = vld [vmem:[#allocation2 + $0xe0] ss:$0 sps:$4 sm:$0x11]  }
 0x549   : > { %v9240_v21 = vrot.slane %v9238_v34, 1  ;;  %v19586_v45 = vpop.f32.mrb[92].mxu0  ;;  %v7825_v6 = vrot.slane %v7823_v43, 7  ;;  %v7831_v61 = vshrl.u32 %v14928_v36, 16  ;;  %v7834_v56 = vshll.u32 %v14928_v36, 16 }
 0x54a   : > { %v6625_v35 = vpop.f32.mrb[93].mxu0  ;;  %v7099_v1 = vadd.f32 %v19562_v54, %v7028_v62  ;;  %v11466_v34 = vrot.slane %v16458_v17, 1  ;;  %v11465_v43 = vrot.slane %v14727_v13, 1  ;;  %v8289_v7 = vld [vmem:[#allocation2 + $0x104] sm:$0x1] }
 0x54b   : > { %v9241_v38 = vor.u32 %v9240_v21, %v9236_v0  ;;  %v19591_v31 = vpop.f32.mrb[94].mxu0  ;;  %v7828_v29 = vor.u32 %v7826_v58, %v7825_v6  ;;  %v7829_v39 = vrot.slane %v7825_v6, 4  ;;  %v7833_v49 = vrot.slane %v7831_v61, 7  ;;  %v8418_v13 = vld [vmem:[#allocation2 + $0xe8] sm:$0xf] }
 0x54c   : > { %v6628_v36 = vpop.f32.mrb[95].mxu0  ;;  %vm7163_vm4 = vcmp.ge.f32.partialorder %v7099_v1, 0.0  ;;  %v7234_v0 = vmul.f32 %v19540_v22, %v7099_v1  ;;  %v7100_v21 = vadd.f32 %v19562_v54, %v7029_v2  ;;  %v11467_v58 = vsel %vm2977_vm9, %v11465_v43, %v11466_v34  ;;  %v16464_v2 = vld [vmem:[#allocation2 + $0xec] ss:$0 sps:$4 sm:$0x11]  }
 0x54d   : > { %v9246_v28 = vsel %vm2464_vm0, %v9241_v38, %v9245_v20  ;;  %v8286_v17 = vsel %vm19087_vm14, %v7828_v29, %v8285_v48  ;;  %v7836_v62 = vor.u32 %v7834_v56, %v7833_v49  ;;  %v7838_v9 = vrot.slane %v7833_v49, 4  ;;  %15161 = vmatprep.mubr.bf16.mxu0 %v11467_v58  ;;  %v8417_v36 = vld [vmem:[#allocation2 + $0xe4] sm:$0xf] }
 0x54e   : > { %12279 = vmatprep.mubr.bf16.mxu1 %v9246_v28  ;;  %8287 = vst [vmem:[#allocation2 + $0xfc] sm:$0xf] %v8286_v17  ;;  %v7298_v6 = vsel %vm7163_vm4, %v7099_v1, %v7234_v0  ;;  %vm7164_vm5 = vcmp.ge.f32.partialorder %v7100_v21, 0.0  ;;  %v7235_v61 = vmul.f32 %v19540_v22, %v7100_v21  ;;  %v14473_v20 = vcombine.low %v8415_v11, %v8416_v57 }
 0x54f   : > { %12280 = vmatmul.mubr.bf16.gmra.mrb[124].mxu1 %v14472_v52  ;;  %v7837_v35 = vsel %vm17552_vm6, %v7829_v39, %v7836_v62  ;;  %v8290_v48 = vsel %vm19095_vm2, %v7838_v9, %v8289_v7  ;;  %v14929_v56 = vpack.c.bf16 %v7298_v6, %v7298_v6  ;;  %v9255_v38 = vshll.u32 %v16461_v30, 16  ;;  %v16528_v62 = vld [vmem:[#allocation8 + $0xf0] sm:$0xff]  }
 0x550   : > { %8288 = vst [vmem:[#allocation2 + $0x100] sm:$0xf] %v7837_v35  ;;  %8291 = vst [vmem:[#allocation2 + $0x104] sm:$0x1] %v8290_v48  ;;  %v7299_v34 = vsel %vm7164_vm5, %v7100_v21, %v7235_v61  ;;  %v9248_v52 = vshrl.u32 %v14473_v20, 16  ;;  %v9250_v1 = vshll.u32 %v14473_v20, 16  ;;  %v6889_v29 = vadd.f32 %v19231_v4, %v19511_v55  ;;  %12445 = vmatpush1.bf16.msra.mxu1 %v16528_v62 }
 0x551   : > { %v19606_v49 = vpop.f32.mrb[96].mxu0  ;;  %v7840_v57 = vshrl.u32 %v14929_v56, 16  ;;  %v7843_v11 = vshll.u32 %v14929_v56, 16  ;;  %v14930_v43 = vpack.c.bf16 %v7299_v34, %v7299_v34  ;;  %v9257_v39 = vrot.slane %v9255_v38, 1  ;;  %v8292_v61 = vld [vmem:[#allocation2 + $0x108] sm:$0xf]  ;;  %12446 = vmatprep.subr.bf16.mxu1 %v21063_v63 }
 0x552   : > { %v6633_v28 = vpop.f32.mrb[97].mxu0  ;;  %v9252_v7 = vrot.slane %v9250_v1, 1  ;;  %v7030_v30 = vmul.f32 %v19554_v32, %v6889_v29  ;;  %v6892_v0 = vadd.f32 %v19246_v5, %v19518_v42  ;;  %v19611_v21 = vcombine.low %v8417_v36, %v8418_v13  ;;  %v8296_v1 = vld [vmem:[#allocation2 + $0x110] sm:$0x1] }
 0x553   : > { %v19613_v17 = vpop.f32.mrb[98].mxu0  ;;  %v7842_v4 = vrot.slane %v7840_v57, 7  ;;  %v7848_v55 = vshrl.u32 %v14930_v43, 16  ;;  %v7851_v9 = vshll.u32 %v14930_v43, 16  ;;  %v9267_v58 = vshll.u32 %v16464_v2, 16 }
 0x554   : > { %v6636_v6 = vpop.f32.mrb[99].mxu0  ;;  %v9253_v35 = vor.u32 %v9252_v7, %v9248_v52  ;;  %v7101_v48 = vadd.f32 %v19562_v54, %v7030_v30  ;;  %v7031_v56 = vmul.f32 %v19554_v32, %v6892_v0  ;;  %v9260_v38 = vshrl.u32 %v19611_v21, 16  ;;  %v8670_v57 = vld [vmem:[#allocation2 + $0xd0] sm:$0xf]  ;;  %v8750_v7 = vld [vmem:[#allocation2 + $0xcc] sm:$0xe] }
 0x555   : > { %v7845_v5 = vor.u32 %v7843_v11, %v7842_v4  ;;  %v7846_v42 = vrot.slane %v7842_v4, 4  ;;  %v7850_v13 = vrot.slane %v7848_v55, 7  ;;  %v9262_v34 = vshll.u32 %v19611_v21, 16  ;;  %v16466_v62 = vld [vmem:[#allocation2 + $0xd4] ss:$0 sps:$4 sm:$0x11]  }
 0x556   : > { %v9258_v2 = vsel %vm2464_vm0, %v9253_v35, %v9257_v39  ;;  %vm7165_vm7 = vcmp.ge.f32.partialorder %v7101_v48, 0.0  ;;  %v7236_v52 = vmul.f32 %v19540_v22, %v7101_v48  ;;  %v7102_v29 = vadd.f32 %v19562_v54, %v7031_v56 }
 0x557   : > { %v8293_v43 = vsel %vm19087_vm14, %v7845_v5, %v8292_v61  ;;  %v7853_v36 = vor.u32 %v7851_v9, %v7850_v13  ;;  %v7855_v11 = vrot.slane %v7850_v13, 4  ;;  %12287 = vmatprep.mubr.bf16.mxu1 %v9258_v2  ;;  %v9264_v28 = vrot.slane %v9262_v34, 1  ;;  %v16469_v2 = vld [vmem:[#allocation2 + $0xf8] ss:$0 sps:$4 sm:$0x11]  }
 0x558   : > { %8294 = vst [vmem:[#allocation2 + $0x108] sm:$0xf] %v8293_v43  ;;  %12288 = vmatmul.mubr.bf16.gmra.mrb[128].mxu1 %v14473_v20  ;;  %v7300_v30 = vsel %vm7165_vm7, %v7101_v48, %v7236_v52  ;;  %vm7166_vm8 = vcmp.ge.f32.partialorder %v7102_v29, 0.0  ;;  %v7237_v39 = vmul.f32 %v19540_v22, %v7102_v29  ;;  %v9269_v0 = vrot.slane %v9267_v58, 1  ;;  %v8672_v58 = vld [vmem:[#allocation2 + $0xf4] sm:$0xf] }
 0x559   : > { %v19626_v4 = vpop.f32.mrb[100].mxu0  ;;  %v7854_v55 = vsel %vm17552_vm6, %v7846_v42, %v7853_v36  ;;  %v8297_v9 = vsel %vm19095_vm2, %v7855_v11, %v8296_v1  ;;  %v14931_v6 = vpack.c.bf16 %v7300_v30, %v7300_v30  ;;  %v9265_v61 = vor.u32 %v9264_v28, %v9260_v38  ;;  %v8299_v1 = vld [vmem:[#allocation2 + $0x114] sm:$0xf]  ;;  %v8751_v28 = vld [vmem:[#allocation2 + $0xf0] sm:$0xe] }
 0x55a   : > { %v6641_v35 = vpop.f32.mrb[101].mxu0  ;;  %8295 = vst [vmem:[#allocation2 + $0x10c] sm:$0xf] %v7854_v55  ;;  %8298 = vst [vmem:[#allocation2 + $0x110] sm:$0x1] %v8297_v9  ;;  %v7301_v20 = vsel %vm7166_vm8, %v7102_v29, %v7237_v39  ;;  %v6897_v48 = vadd.f32 %v19227_v40, %v19532_v15  ;;  %v14728_v56 = vcombine.low %v8750_v7, %v8670_v57  ;;  %v11469_v36 = vrot.slane %v16466_v62, 1 }
 0x55b   : > { %v19634_v5 = vpop.f32.mrb[102].mxu0  ;;  %v7857_v13 = vshrl.u32 %v14931_v6, 16  ;;  %v14932_v34 = vpack.c.bf16 %v7301_v20, %v7301_v20  ;;  %v9270_v42 = vsel %vm2464_vm0, %v9265_v61, %v9269_v0  ;;  %v6900_v29 = vadd.f32 %v19242_v23, %v19543_v60  ;;  %v8303_v7 = vld [vmem:[#allocation2 + $0x11c] sm:$0x1]  ;;  %v8420_v9 = vld [vmem:[#allocation2 + $0xf4] sm:$0xf] }
 0x55c   : > { %v6644_v52 = vpop.f32.mrb[103].mxu0  ;;  %12295 = vmatprep.mubr.bf16.mxu1 %v9270_v42  ;;  %v7032_v38 = vmul.f32 %v19554_v32, %v6897_v48  ;;  %v11468_v43 = vrot.slane %v14728_v56, 1  ;;  %v7860_v15 = vshll.u32 %v14931_v6, 16  ;;  %v14729_v55 = vcombine.low %v8751_v28, %v8672_v58  ;;  %v8419_v23 = vld [vmem:[#allocation2 + $0xf0] sm:$0xf] }
 0x55d   : > { %v7859_v40 = vrot.slane %v7857_v13, 7  ;;  %v7865_v57 = vshrl.u32 %v14932_v34, 16  ;;  %v7868_v11 = vshll.u32 %v14932_v34, 16  ;;  %v7033_v0 = vmul.f32 %v19554_v32, %v6900_v29  ;;  %v16472_v56 = vld [vmem:[#allocation2 + $0xf8] ss:$0 sps:$4 sm:$0x11]  }
 0x55e   : > { %v7103_v30 = vadd.f32 %v19562_v54, %v7032_v38  ;;  %v11470_v39 = vsel %vm2977_vm9, %v11468_v43, %v11469_v36  ;;  %v11472_v20 = vrot.slane %v16469_v2, 1  ;;  %v11471_v48 = vrot.slane %v14729_v55, 1 }
 0x55f   : > { %v7862_v61 = vor.u32 %v7860_v15, %v7859_v40  ;;  %v7863_v35 = vrot.slane %v7859_v40, 4  ;;  %v7867_v62 = vrot.slane %v7865_v57, 7  ;;  %15162 = vmatmul.mubr.bf16.gmra.mrb[156].mxu0 %v11470_v39  ;;  %v7104_v6 = vadd.f32 %v19562_v54, %v7033_v0 }
 0x560   : > { %12296 = vmatmul.mubr.bf16.gmra.mrb[132].mxu1 %v19611_v21  ;;  %vm7167_vm10 = vcmp.ge.f32.partialorder %v7103_v30, 0.0  ;;  %v7238_v60 = vmul.f32 %v19540_v22, %v7103_v30  ;;  %v14475_v42 = vcombine.low %v8419_v23, %v8420_v9  ;;  %v11473_v38 = vsel %vm2977_vm9, %v11471_v48, %v11472_v20 }
 0x561   : > { %v8300_v13 = vsel %vm19087_vm14, %v7862_v61, %v8299_v1  ;;  %v7870_v58 = vor.u32 %v7868_v11, %v7867_v62  ;;  %v7872_v34 = vrot.slane %v7867_v62, 4  ;;  %v19648_v52 = vpop.f32.mrb[104].mxu0  ;;  %vm7168_vm11 = vcmp.ge.f32.partialorder %v7104_v6, 0.0  ;;  %15165 = vmatprep.mubr.bf16.mxu0 %v11473_v38  ;;  %v16475_v1 = vld [vmem:[#allocation2 + $0x104] ss:$0 sps:$4 sm:$0x11]  }
 0x562   : > { %8301 = vst [vmem:[#allocation2 + $0x114] sm:$0xf] %v8300_v13  ;;  %v7302_v2 = vsel %vm7167_vm10, %v7103_v30, %v7238_v60  ;;  %v7239_v21 = vmul.f32 %v19540_v22, %v7104_v6  ;;  %v9274_v15 = vshll.u32 %v14475_v42, 16  ;;  %v9279_v57 = vshll.u32 %v16472_v56, 16  ;;  %v6649_v28 = vpop.f32.mrb[105].mxu0  ;;  %v16536_v30 = vld [vmem:[#allocation8 + $0xf8] sm:$0xff]  }
 0x563   : > { %v7871_v43 = vsel %vm17552_vm6, %v7863_v35, %v7870_v58  ;;  %v8304_v36 = vsel %vm19095_vm2, %v7872_v34, %v8303_v7  ;;  %v14933_v29 = vpack.c.bf16 %v7302_v2, %v7302_v2  ;;  %v6905_v11 = vadd.f32 %v19281_v41, %v19566_v14  ;;  %v8674_v7 = vld [vmem:[#allocation2 + $0x100] sm:$0xf]  ;;  %v19660_v61 = vpop.f32.mrb[106].mxu0  ;;  %12447 = vmatpush1.bf16.msra.mxu1 %v16536_v30  ;;  %v8752_v13 = vld [vmem:[#allocation2 + $0xfc] sm:$0xe] }
 0x564   : > { %8302 = vst [vmem:[#allocation2 + $0x118] sm:$0xf] %v7871_v43  ;;  %8305 = vst [vmem:[#allocation2 + $0x11c] sm:$0x1] %v8304_v36  ;;  %v7303_v40 = vsel %vm7168_vm11, %v7104_v6, %v7239_v21  ;;  %v9272_v55 = vshrl.u32 %v14475_v42, 16  ;;  %v6908_v9 = vadd.f32 %v19320_v51, %v19571_v25  ;;  %v9276_v20 = vrot.slane %v9274_v15, 1  ;;  %12705 = vmatprep.subr.bf16.mxu1 %v21063_v63 }
 0x565   : > { %v7874_v39 = vshrl.u32 %v14933_v29, 16  ;;  %v14934_v0 = vpack.c.bf16 %v7303_v40, %v7303_v40  ;;  %v7877_v35 = vshll.u32 %v14933_v29, 16  ;;  %v8306_v62 = vld [vmem:[#allocation2 + $0x120] sm:$0xf]  ;;  %v9281_v23 = vrot.slane %v9279_v57, 1  ;;  %v6652_v6 = vpop.f32.mrb[107].mxu0 }
 0x566   : > { %v7034_v60 = vmul.f32 %v19554_v32, %v6905_v11  ;;  %v7035_v56 = vmul.f32 %v19554_v32, %v6908_v9  ;;  %v9277_v51 = vor.u32 %v9276_v20, %v9272_v55  ;;  %v14730_v58 = vcombine.low %v8752_v13, %v8674_v7  ;;  %v8422_v2 = vld [vmem:[#allocation2 + $0x100] sm:$0xf]  ;;  %v16478_v40 = vld [vmem:[#allocation2 + $0x104] ss:$0 sps:$4 sm:$0x11]  }
 0x567   : > { %v7876_v41 = vrot.slane %v7874_v39, 7  ;;  %v7882_v14 = vshrl.u32 %v14934_v0, 16  ;;  %v7885_v48 = vshll.u32 %v14934_v0, 16  ;;  %v11475_v34 = vrot.slane %v16475_v1, 1  ;;  %v8310_v15 = vld [vmem:[#allocation2 + $0x128] sm:$0x1] }
 0x568   : > { %v7105_v25 = vadd.f32 %v19562_v54, %v7034_v60  ;;  %v7106_v29 = vadd.f32 %v19562_v54, %v7035_v56  ;;  %v9282_v57 = vsel %vm2464_vm0, %v9277_v51, %v9281_v23  ;;  %v11474_v28 = vrot.slane %v14730_v58, 1  ;;  %v8421_v55 = vld [vmem:[#allocation2 + $0xfc] sm:$0xf]  ;;  %v16480_v13 = vld [vmem:[#allocation2 + $0x110] ss:$0 sps:$4 sm:$0x11]  }
 0x569   : > { %v19666_v21 = vpop.f32.mrb[108].mxu0  ;;  %v7879_v38 = vor.u32 %v7877_v35, %v7876_v41  ;;  %v7880_v43 = vrot.slane %v7876_v41, 4  ;;  %v7884_v36 = vrot.slane %v7882_v14, 7  ;;  %12303 = vmatprep.mubr.bf16.mxu1 %v9282_v57  ;;  %v14476_v20 = vcombine.low %v8421_v55, %v8422_v2  ;;  %v8676_v14 = vld [vmem:[#allocation2 + $0x10c] sm:$0xf] }
 0x56a   : > { %vm7169_vm12 = vcmp.ge.f32.partialorder %v7105_v25, 0.0  ;;  %v7240_v11 = vmul.f32 %v19540_v22, %v7105_v25  ;;  %v6657_v30 = vpop.f32.mrb[109].mxu0  ;;  %vm7170_vm13 = vcmp.ge.f32.partialorder %v7106_v29, 0.0  ;;  %12304 = vmatmul.mubr.bf16.gmra.mrb[136].mxu1 %v14475_v42  ;;  %v7241_v7 = vmul.f32 %v19540_v22, %v7106_v29 }
 0x56b   : > { %v8307_v1 = vsel %vm19087_vm14, %v7879_v38, %v8306_v62  ;;  %v7887_v39 = vor.u32 %v7885_v48, %v7884_v36  ;;  %v7889_v0 = vrot.slane %v7884_v36, 4  ;;  %v11476_v35 = vsel %vm2977_vm9, %v11474_v28, %v11475_v34  ;;  %v19675_v23 = vpop.f32.mrb[110].mxu0 }
 0x56c   : > { %8308 = vst [vmem:[#allocation2 + $0x120] sm:$0xf] %v8307_v1  ;;  %v7304_v9 = vsel %vm7169_vm12, %v7105_v25, %v7240_v11  ;;  %15166 = vmatmul.mubr.bf16.gmra.mrb[160].mxu0 %v11476_v35  ;;  %v9291_v41 = vshll.u32 %v16478_v40, 16  ;;  %v7305_v42 = vsel %vm7170_vm13, %v7106_v29, %v7241_v7  ;;  %v9286_v48 = vshll.u32 %v14476_v20, 16  ;;  %v6660_v51 = vpop.f32.mrb[111].mxu0 }
 0x56d   : > { %v7888_v60 = vsel %vm17552_vm6, %v7880_v43, %v7887_v39  ;;  %v8311_v62 = vsel %vm19095_vm2, %v7889_v0, %v8310_v15  ;;  %v14935_v6 = vpack.c.bf16 %v7304_v9, %v7304_v9  ;;  %v6913_v56 = vadd.f32 %v19276_v26, %v19586_v45  ;;  %v8753_v15 = vld [vmem:[#allocation2 + $0x108] sm:$0xe]  ;;  %v16483_v45 = vld [vmem:[#allocation2 + $0x110] ss:$0 sps:$4 sm:$0x11]  }
 0x56e   : > { %8309 = vst [vmem:[#allocation2 + $0x124] sm:$0xf] %v7888_v60  ;;  %8312 = vst [vmem:[#allocation2 + $0x128] sm:$0x1] %v8311_v62  ;;  %v14936_v34 = vpack.c.bf16 %v7305_v42, %v7305_v42  ;;  %v9284_v2 = vshrl.u32 %v14476_v20, 16  ;;  %v9288_v38 = vrot.slane %v9286_v48, 1  ;;  %v6916_v40 = vadd.f32 %v19309_v8, %v19591_v31 }
 0x56f   : > { %v7891_v25 = vshrl.u32 %v14935_v6, 16  ;;  %v7894_v58 = vshll.u32 %v14935_v6, 16  ;;  %v9293_v43 = vrot.slane %v9291_v41, 1  ;;  %v7036_v36 = vmul.f32 %v19554_v32, %v6913_v56  ;;  %v8313_v1 = vld [vmem:[#allocation2 + $0x12c] sm:$0xf] }
 0x570   : > { %v7899_v11 = vshrl.u32 %v14936_v34, 16  ;;  %v7902_v28 = vshll.u32 %v14936_v34, 16  ;;  %v14731_v26 = vcombine.low %v8753_v15, %v8676_v14  ;;  %v9289_v39 = vor.u32 %v9288_v38, %v9284_v2  ;;  %v8424_v62 = vld [vmem:[#allocation2 + $0x10c] sm:$0xf]  ;;  %v8317_v41 = vld [vmem:[#allocation2 + $0x134] sm:$0x1] }
 0x571   : > { %v19687_v57 = vpop.f32.mrb[112].mxu0  ;;  %v7893_v29 = vrot.slane %v7891_v25, 7  ;;  %v7107_v0 = vadd.f32 %v19562_v54, %v7036_v36  ;;  %v7037_v55 = vmul.f32 %v19554_v32, %v6916_v40  ;;  %v11478_v9 = vrot.slane %v16480_v13, 1 }
 0x572   : > { %v6665_v30 = vpop.f32.mrb[113].mxu0  ;;  %v7901_v31 = vrot.slane %v7899_v11, 7  ;;  %v11477_v60 = vrot.slane %v14731_v26, 1  ;;  %v9294_v14 = vsel %vm2464_vm0, %v9289_v39, %v9293_v43  ;;  %v9303_v15 = vshll.u32 %v16483_v45, 16 }
 0x573   : > { %v19691_v7 = vpop.f32.mrb[114].mxu0  ;;  %v7896_v35 = vor.u32 %v7894_v58, %v7893_v29  ;;  %v7897_v8 = vrot.slane %v7893_v29, 4  ;;  %vm7171_vm15 = vcmp.ge.f32.partialorder %v7107_v0, 0.0  ;;  %v7242_v42 = vmul.f32 %v19540_v22, %v7107_v0  ;;  %12311 = vmatprep.mubr.bf16.mxu1 %v9294_v14  ;;  %v8423_v58 = vld [vmem:[#allocation2 + $0x108] sm:$0xf] }
 0x574   : > { %v6668_v6 = vpop.f32.mrb[115].mxu0  ;;  %v7108_v48 = vadd.f32 %v19562_v54, %v7037_v55  ;;  %v7904_v13 = vor.u32 %v7902_v28, %v7901_v31  ;;  %v7906_v51 = vrot.slane %v7901_v31, 4  ;;  %v11479_v25 = vsel %vm2977_vm9, %v11477_v60, %v11478_v9  ;;  %12312 = vmatmul.mubr.bf16.gmra.mrb[140].mxu1 %v14476_v20  ;;  %v8678_v29 = vld [vmem:[#allocation2 + $0x118] sm:$0xf]  ;;  %v8754_v60 = vld [vmem:[#allocation2 + $0x114] sm:$0xe] }
 0x575   : > { %v8314_v56 = vsel %vm19087_vm14, %v7896_v35, %v8313_v1  ;;  %v7306_v34 = vsel %vm7171_vm15, %v7107_v0, %v7242_v42  ;;  %15169 = vmatprep.mubr.bf16.mxu0 %v11479_v25  ;;  %v14477_v38 = vcombine.low %v8423_v58, %v8424_v62  ;;  %v6921_v20 = vadd.f32 %v19366_v46, %v19606_v49  ;;  %v16486_v26 = vld [vmem:[#allocation2 + $0x11c] ss:$0 sps:$4 sm:$0x11]   ;;  %v8320_v42 = vld [vmem:[#allocation2 + $0x138] sm:$0xf] }
 0x576   : > { %8315 = vst [vmem:[#allocation2 + $0x12c] sm:$0xf] %v8314_v56  ;;  %vm7172_vm3 = vcmp.ge.f32.partialorder %v7108_v48, 0.0  ;;  %v7243_v2 = vmul.f32 %v19540_v22, %v7108_v48  ;;  %v7905_v43 = vsel %vm17552_vm6, %v7897_v8, %v7904_v13  ;;  %v8318_v36 = vsel %vm19095_vm2, %v7906_v51, %v8317_v41  ;;  %v8426_v25 = vld [vmem:[#allocation2 + $0x118] sm:$0xf] }
 0x577   : > { %v14937_v40 = vpack.c.bf16 %v7306_v34, %v7306_v34  ;;  %8316 = vst [vmem:[#allocation2 + $0x130] sm:$0xf] %v7905_v43  ;;  %8319 = vst [vmem:[#allocation2 + $0x134] sm:$0x1] %v8318_v36  ;;  %v9298_v28 = vshll.u32 %v14477_v38, 16  ;;  %v9296_v55 = vshrl.u32 %v14477_v38, 16  ;;  %v7038_v45 = vmul.f32 %v19554_v32, %v6921_v20 }
 0x578   : > { %v7307_v11 = vsel %vm7172_vm3, %v7108_v48, %v7243_v2  ;;  %v9305_v8 = vrot.slane %v9303_v15, 1  ;;  %v6924_v31 = vadd.f32 %v19379_v37, %v19613_v17  ;;  %v14732_v41 = vcombine.low %v8754_v60, %v8678_v29  ;;  %v16489_v17 = vld [vmem:[#allocation2 + $0x11c] ss:$0 sps:$4 sm:$0x11]   ;;  %v8324_v43 = vld [vmem:[#allocation2 + $0x140] sm:$0x1] }
 0x579   : > { %v19706_v30 = vpop.f32.mrb[116].mxu0  ;;  %v7908_v1 = vshrl.u32 %v14937_v40, 16  ;;  %v7911_v39 = vshll.u32 %v14937_v40, 16  ;;  %v14938_v0 = vpack.c.bf16 %v7307_v11, %v7307_v11  ;;  %v9300_v35 = vrot.slane %v9298_v28, 1 }
 0x57a   : > { %v6673_v9 = vpop.f32.mrb[117].mxu0  ;;  %v7109_v56 = vadd.f32 %v19562_v54, %v7038_v45  ;;  %v7039_v13 = vmul.f32 %v19554_v32, %v6924_v31  ;;  %v11481_v51 = vrot.slane %v16486_v26, 1  ;;  %v11480_v37 = vrot.slane %v14732_v41, 1  ;;  %v8425_v26 = vld [vmem:[#allocation2 + $0x114] sm:$0xf] }
 0x57b   : > { %v19711_v62 = vpop.f32.mrb[118].mxu0  ;;  %v7910_v6 = vrot.slane %v7908_v1, 7  ;;  %v7916_v46 = vshrl.u32 %v14938_v0, 16  ;;  %v7919_v49 = vshll.u32 %v14938_v0, 16  ;;  %v9301_v48 = vor.u32 %v9300_v35, %v9296_v55  ;;  %v8680_v45 = vld [vmem:[#allocation2 + $0x124] sm:$0xf] }
 0x57c   : > { %v6676_v14 = vpop.f32.mrb[119].mxu0  ;;  %vm7173_vm1 = vcmp.ge.f32.partialorder %v7109_v56, 0.0  ;;  %v7244_v40 = vmul.f32 %v19540_v22, %v7109_v56  ;;  %v7110_v15 = vadd.f32 %v19562_v54, %v7039_v13  ;;  %v11482_v20 = vsel %vm2977_vm9, %v11480_v37, %v11481_v51 }
 0x57d   : > { %v7913_v58 = vor.u32 %v7911_v39, %v7910_v6  ;;  %v7914_v34 = vrot.slane %v7910_v6, 4  ;;  %v7918_v2 = vrot.slane %v7916_v46, 7  ;;  %v9306_v36 = vsel %vm2464_vm0, %v9301_v48, %v9305_v8  ;;  %15170 = vmatmul.mubr.bf16.gmra.mrb[164].mxu0 %v11482_v20  ;;  %v16491_v6 = vld [vmem:[#allocation2 + $0x128] ss:$0 sps:$4 sm:$0x11]  }
 0x57e   : > { %12319 = vmatprep.mubr.bf16.mxu1 %v9306_v36  ;;  %v7308_v1 = vsel %vm7173_vm1, %v7109_v56, %v7244_v40  ;;  %vm7174_vm4 = vcmp.ge.f32.partialorder %v7110_v15, 0.0  ;;  %v7245_v39 = vmul.f32 %v19540_v22, %v7110_v15  ;;  %v14478_v0 = vcombine.low %v8425_v26, %v8426_v25 }
 0x57f   : > { %v8321_v29 = vsel %vm19087_vm14, %v7913_v58, %v8320_v42  ;;  %v7921_v11 = vor.u32 %v7919_v49, %v7918_v2  ;;  %v7923_v28 = vrot.slane %v7918_v2, 4  ;;  %12320 = vmatmul.mubr.bf16.gmra.mrb[144].mxu1 %v14477_v38  ;;  %v14939_v35 = vpack.c.bf16 %v7308_v1, %v7308_v1  ;;  %v8755_v58 = vld [vmem:[#allocation2 + $0x120] sm:$0xe]  ;;  %v8331_v1 = vld [vmem:[#allocation2 + $0x14c] sm:$0x1] }
 0x580   : > { %8322 = vst [vmem:[#allocation2 + $0x138] sm:$0xf] %v8321_v29  ;;  %v9315_v8 = vshll.u32 %v16489_v17, 16  ;;  %v7309_v31 = vsel %vm7174_vm4, %v7110_v15, %v7245_v39  ;;  %v9310_v60 = vshll.u32 %v14478_v0, 16  ;;  %v6929_v38 = vadd.f32 %v19361_v19, %v19626_v4  ;;  %v8327_v19 = vld [vmem:[#allocation2 + $0x144] sm:$0xf] }
 0x581   : > { %v7922_v55 = vsel %vm17552_vm6, %v7914_v34, %v7921_v11  ;;  %v8325_v9 = vsel %vm19095_vm2, %v7923_v28, %v8324_v43  ;;  %v19728_v46 = vpop.f32.mrb[120].mxu0  ;;  %v7925_v49 = vshrl.u32 %v14939_v35, 16  ;;  %v7928_v41 = vshll.u32 %v14939_v35, 16  ;;  %v8428_v11 = vld [vmem:[#allocation2 + $0x124] sm:$0xf] }
 0x582   : > { %8323 = vst [vmem:[#allocation2 + $0x13c] sm:$0xf] %v7922_v55  ;;  %8326 = vst [vmem:[#allocation2 + $0x140] sm:$0x1] %v8325_v9  ;;  %v14940_v14 = vpack.c.bf16 %v7309_v31, %v7309_v31  ;;  %v9308_v42 = vshrl.u32 %v14478_v0, 16  ;;  %v6681_v48 = vpop.f32.mrb[121].mxu0  ;;  %v7040_v51 = vmul.f32 %v19554_v32, %v6929_v38  ;;  %v6932_v25 = vadd.f32 %v19377_v12, %v19634_v5 }
 0x583   : > { %v9312_v56 = vrot.slane %v9310_v60, 1  ;;  %v9317_v13 = vrot.slane %v9315_v8, 1  ;;  %v19733_v34 = vpop.f32.mrb[122].mxu0  ;;  %v7927_v2 = vrot.slane %v7925_v49, 7  ;;  %v14733_v17 = vcombine.low %v8755_v58, %v8680_v45  ;;  %v8427_v38 = vld [vmem:[#allocation2 + $0x120] sm:$0xf] }
 0x584   : > { %v7933_v4 = vshrl.u32 %v14940_v14, 16  ;;  %v7936_v37 = vshll.u32 %v14940_v14, 16  ;;  %v6684_v43 = vpop.f32.mrb[123].mxu0  ;;  %v7111_v40 = vadd.f32 %v19562_v54, %v7040_v51  ;;  %v7041_v15 = vmul.f32 %v19554_v32, %v6932_v25  ;;  %v16494_v5 = vld [vmem:[#allocation2 + $0x128] ss:$0 sps:$4 sm:$0x11]  }
 0x585   : > { %v9313_v36 = vor.u32 %v9312_v56, %v9308_v42  ;;  %v11484_v29 = vrot.slane %v16491_v6, 1  ;;  %v7930_v28 = vor.u32 %v7928_v41, %v7927_v2  ;;  %v7931_v20 = vrot.slane %v7927_v2, 4  ;;  %v8682_v51 = vld [vmem:[#allocation2 + $0x130] sm:$0xf] }
 0x586   : > { %v7935_v26 = vrot.slane %v7933_v4, 7  ;;  %v11483_v12 = vrot.slane %v14733_v17, 1  ;;  %vm7175_vm5 = vcmp.ge.f32.partialorder %v7111_v40, 0.0  ;;  %v7246_v55 = vmul.f32 %v19540_v22, %v7111_v40  ;;  %v16497_v2 = vld [vmem:[#allocation2 + $0x134] ss:$0 sps:$4 sm:$0x11]  }
 0x587   : > { %v9318_v39 = vsel %vm2464_vm0, %v9313_v36, %v9317_v13  ;;  %v7112_v9 = vadd.f32 %v19562_v54, %v7041_v15  ;;  %v8328_v8 = vsel %vm19087_vm14, %v7930_v28, %v8327_v19  ;;  %v14479_v14 = vcombine.low %v8427_v38, %v8428_v11  ;;  %v8756_v11 = vld [vmem:[#allocation2 + $0x12c] sm:$0xe]  ;;  %v8338_v38 = vld [vmem:[#allocation2 + $0x158] sm:$0x1] }
 0x588   : > { %v7938_v45 = vor.u32 %v7936_v37, %v7935_v26  ;;  %v7940_v31 = vrot.slane %v7935_v26, 4  ;;  %12327 = vmatprep.mubr.bf16.mxu1 %v9318_v39  ;;  %v11485_v60 = vsel %vm2977_vm9, %v11483_v12, %v11484_v29  ;;  %8329 = vst [vmem:[#allocation2 + $0x144] sm:$0xf] %v8328_v8  ;;  %v7310_v49 = vsel %vm7175_vm5, %v7111_v40, %v7246_v55  ;;  %v8430_v55 = vld [vmem:[#allocation2 + $0x130] sm:$0xf] }
 0x589   : > { %v19740_v35 = vpop.f32.mrb[124].mxu0  ;;  %12328 = vmatmul.mubr.bf16.gmra.mrb[148].mxu1 %v14478_v0  ;;  %vm7176_vm7 = vcmp.ge.f32.partialorder %v7112_v9, 0.0  ;;  %v7247_v41 = vmul.f32 %v19540_v22, %v7112_v9  ;;  %15173 = vmatprep.mubr.bf16.mxu0 %v11485_v60  ;;  %v14941_v56 = vpack.c.bf16 %v7310_v49, %v7310_v49  ;;  %v9327_v13 = vshll.u32 %v16494_v5, 16  ;;  %v16500_v60 = vld [vmem:[#allocation2 + $0x134] ss:$0 sps:$4 sm:$0x11]  }
 0x58a   : > { %v6689_v6 = vpop.f32.mrb[125].mxu0  ;;  %v7939_v42 = vsel %vm17552_vm6, %v7931_v20, %v7938_v45  ;;  %v8332_v48 = vsel %vm19095_vm2, %v7940_v31, %v8331_v1  ;;  %v9322_v58 = vshll.u32 %v14479_v14, 16  ;;  %v6937_v0 = vadd.f32 %v19430_v18, %v19648_v52  ;;  %v8334_v20 = vld [vmem:[#allocation2 + $0x150] sm:$0xf] }
 0x58b   : > { %8330 = vst [vmem:[#allocation2 + $0x148] sm:$0xf] %v7939_v42  ;;  %8333 = vst [vmem:[#allocation2 + $0x14c] sm:$0x1] %v8332_v48  ;;  %v7311_v25 = vsel %vm7176_vm7, %v7112_v9, %v7247_v41  ;;  %v19752_v22 = vpop.f32.mrb[126].mxu0  ;;  %v7942_v19 = vshrl.u32 %v14941_v56, 16  ;;  %v6940_v29 = vadd.f32 %v19437_v44, %v19660_v61  ;;  %v14734_v52 = vcombine.low %v8756_v11, %v8682_v51 }
 0x58c   : > { %v7945_v4 = vshll.u32 %v14941_v56, 16  ;;  %v14942_v37 = vpack.c.bf16 %v7311_v25, %v7311_v25  ;;  %v9320_v17 = vshrl.u32 %v14479_v14, 16  ;;  %v6692_v43 = vpop.f32.mrb[127].mxu0  ;;  %v9324_v36 = vrot.slane %v9322_v58, 1  ;;  %v19763_v61 = vld [vmem:[%s20979_s7] ss:$0 sm:$0xff] }
 0x58d   : > { %v9329_v40 = vrot.slane %v9327_v13, 1  ;;  %v7042_v15 = vmul.f32 %v19554_v32, %v6937_v0  ;;  %v7944_v28 = vrot.slane %v7942_v19, 7  ;;  %v7043_v1 = vmul.f32 %v19554_v32, %v6940_v29  ;;  %v8429_v56 = vld [vmem:[#allocation2 + $0x12c] sm:$0xf]  ;;  %v8341_v29 = vld [vmem:[#allocation2 + $0x15c] sm:$0xf] }
 0x58e   : > { %v7950_v26 = vshrl.u32 %v14942_v37, 16  ;;  %v7953_v18 = vshll.u32 %v14942_v37, 16  ;;  %v9325_v12 = vor.u32 %v9324_v36, %v9320_v17  ;;  %v11487_v39 = vrot.slane %v16497_v2, 1  ;;  %v8684_v37 = vld [vmem:[#allocation2 + $0x13c] sm:$0xf] }
 0x58f   : > { %v7113_v5 = vadd.f32 %v19562_v54, %v7042_v15  ;;  %v7947_v9 = vor.u32 %v7945_v4, %v7944_v28  ;;  %v7948_v8 = vrot.slane %v7944_v28, 4  ;;  %v11486_v31 = vrot.slane %v14734_v52, 1  ;;  %v16502_v17 = vld [vmem:[#allocation2 + $0x140] ss:$0 sps:$4 sm:$0x11]  }
 0x590   : > { %v7952_v45 = vrot.slane %v7950_v26, 7  ;;  %v9330_v44 = vsel %vm2464_vm0, %v9325_v12, %v9329_v40  ;;  %v7114_v32 = vadd.f32 %v19562_v54, %v7043_v1  ;;  %v14480_v25 = vcombine.low %v8429_v56, %v8430_v55  ;;  %v19788_v55 = vld [vmem:[%s20978_s6] ss:$0 sm:$0xff] }
 0x591   : > { %vm7177_vm8 = vcmp.ge.f32.partialorder %v7113_v5, 0.0  ;;  %v7248_v6 = vmul.f32 %v19763_v61, %v7113_v5  ;;  %v8335_v49 = vsel %vm19087_vm14, %v7947_v9, %v8334_v20  ;;  %12335 = vmatprep.mubr.bf16.mxu1 %v9330_v44  ;;  %v11488_v48 = vsel %vm2977_vm9, %v11486_v31, %v11487_v39  ;;  %v19780_v20 = vld [vmem:[%s20977_s5] ss:$0 sm:$0xff]  ;;  %v8432_v31 = vld [vmem:[#allocation2 + $0x13c] sm:$0xf] }
 0x592   : > { %v7955_v41 = vor.u32 %v7953_v18, %v7952_v45  ;;  %v7957_v42 = vrot.slane %v7952_v45, 4  ;;  %8336 = vst [vmem:[#allocation2 + $0x150] sm:$0xf] %v8335_v49  ;;  %12336 = vmatmul.mubr.bf16.gmra.mrb[152].mxu1 %v14479_v14  ;;  %vm7178_vm10 = vcmp.ge.f32.partialorder %v7114_v32, 0.0  ;;  %v7249_v51 = vmul.f32 %v19763_v61, %v7114_v32  ;;  %15174 = vmatmul.mubr.bf16.gmra.mrb[168].mxu0 %v11488_v48  ;;  %v21084_v18 = vld [vmem:[#allocation18_spill] sm:$0xff] }
 0x593   : > { %v7312_v13 = vsel %vm7177_vm8, %v7113_v5, %v7248_v6  ;;  %v9339_v2 = vshll.u32 %v16500_v60, 16  ;;  %v9334_v4 = vshll.u32 %v14480_v25, 16  ;;  %v6945_v14 = vadd.f32 %v19411_v59, %v19666_v21  ;;  %v8757_v59 = vld [vmem:[#allocation2 + $0x138] sm:$0xe] }
 0x594   : > { %v7956_v54 = vsel %vm17552_vm6, %v7948_v8, %v7955_v41  ;;  %v8339_v58 = vsel %vm19095_vm2, %v7957_v42, %v8338_v38  ;;  %v14943_v0 = vpack.c.bf16 %v7312_v13, %v7312_v13  ;;  %v7313_v19 = vsel %vm7178_vm10, %v7114_v32, %v7249_v51  ;;  %v16505_v6 = vld [vmem:[#allocation2 + $0x140] ss:$0 sps:$4 sm:$0x11]   ;;  %v8345_v32 = vld [vmem:[#allocation2 + $0x164] sm:$0x1] }
 0x595   : > { %8337 = vst [vmem:[#allocation2 + $0x154] sm:$0xf] %v7956_v54  ;;  %8340 = vst [vmem:[#allocation2 + $0x158] sm:$0x1] %v8339_v58  ;;  %v14944_v40 = vpack.c.bf16 %v7313_v19, %v7313_v19  ;;  %v9332_v15 = vshrl.u32 %v14480_v25, 16  ;;  %v9336_v11 = vrot.slane %v9334_v4, 1  ;;  %v7044_v26 = vmul.f32 %v19780_v20, %v6945_v14 }
 0x596   : > { %v7959_v43 = vshrl.u32 %v14943_v0, 16  ;;  %v7962_v36 = vshll.u32 %v14943_v0, 16  ;;  %v9341_v28 = vrot.slane %v9339_v2, 1  ;;  %v6948_v52 = vadd.f32 %v21084_v18, %v19675_v23  ;;  %v8431_v54 = vld [vmem:[#allocation2 + $0x138] sm:$0xf] }
 0x597   : > { %v7967_v12 = vshrl.u32 %v14944_v40, 16  ;;  %v7970_v5 = vshll.u32 %v14944_v40, 16  ;;  %v14735_v1 = vcombine.low %v8757_v59, %v8684_v37  ;;  %v9337_v39 = vor.u32 %v9336_v11, %v9332_v15  ;;  %v16508_v40 = vld [vmem:[#allocation2 + $0x14c] ss:$0 sps:$4 sm:$0x11]  }
 0x598   : > { %v7961_v21 = vrot.slane %v7959_v43, 7  ;;  %v7115_v9 = vadd.f32 %v19788_v55, %v7044_v26  ;;  %v7045_v8 = vmul.f32 %v19780_v20, %v6948_v52  ;;  %v11490_v45 = vrot.slane %v16502_v17, 1  ;;  %v8686_v17 = vld [vmem:[#allocation2 + $0x148] sm:$0xf] }
 0x599   : > { %v7969_v23 = vrot.slane %v7967_v12, 7  ;;  %v11489_v44 = vrot.slane %v14735_v1, 1  ;;  %v9342_v49 = vsel %vm2464_vm0, %v9337_v39, %v9341_v28  ;;  %v14481_v2 = vcombine.low %v8431_v54, %v8432_v31 }
 0x59a   : > { %v7964_v60 = vor.u32 %v7962_v36, %v7961_v21  ;;  %v7965_v38 = vrot.slane %v7961_v21, 4  ;;  %vm7179_vm11 = vcmp.ge.f32.partialorder %v7115_v9, 0.0  ;;  %v7250_v41 = vmul.f32 %v19763_v61, %v7115_v9  ;;  %12343 = vmatprep.mubr.bf16.mxu1 %v9342_v49  ;;  %v16511_v49 = vld [vmem:[#allocation2 + $0x14c] ss:$0 sps:$4 sm:$0x11]  }
 0x59b   : > { %v7116_v42 = vadd.f32 %v19788_v55, %v7045_v8  ;;  %v7972_v56 = vor.u32 %v7970_v5, %v7969_v23  ;;  %v7974_v13 = vrot.slane %v7969_v23, 4  ;;  %v11491_v51 = vsel %vm2977_vm9, %v11489_v44, %v11490_v45  ;;  %12344 = vmatmul.mubr.bf16.gmra.mrb[156].mxu1 %v14480_v25  ;;  %v8758_v5 = vld [vmem:[#allocation2 + $0x144] sm:$0xe]  ;;  %v8348_v45 = vld [vmem:[#allocation2 + $0x168] sm:$0xf] }
 0x59c   : > { %v8342_v48 = vsel %vm19087_vm14, %v7964_v60, %v8341_v29  ;;  %v7314_v58 = vsel %vm7179_vm11, %v7115_v9, %v7250_v41  ;;  %15177 = vmatprep.mubr.bf16.mxu0 %v11491_v51  ;;  %v9351_v37 = vshll.u32 %v16505_v6, 16  ;;  %v9346_v36 = vshll.u32 %v14481_v2, 16  ;;  %v8434_v44 = vld [vmem:[#allocation2 + $0x148] sm:$0xf]  ;;  %v8352_v41 = vld [vmem:[#allocation2 + $0x170] sm:$0x1] }
 0x59d   : > { %8343 = vst [vmem:[#allocation2 + $0x15c] sm:$0xf] %v8342_v48  ;;  %vm7180_vm12 = vcmp.ge.f32.partialorder %v7116_v42, 0.0  ;;  %v7251_v0 = vmul.f32 %v19763_v61, %v7116_v42  ;;  %v7973_v19 = vsel %vm17552_vm6, %v7965_v38, %v7972_v56  ;;  %v8346_v4 = vsel %vm19095_vm2, %v7974_v13, %v8345_v32 }
 0x59e   : > { %v14945_v14 = vpack.c.bf16 %v7314_v58, %v7314_v58  ;;  %8344 = vst [vmem:[#allocation2 + $0x160] sm:$0xf] %v7973_v19  ;;  %8347 = vst [vmem:[#allocation2 + $0x164] sm:$0x1] %v8346_v4  ;;  %v6953_v25 = vadd.f32 %v19476_v33, %v19687_v57  ;;  %v9344_v26 = vshrl.u32 %v14481_v2, 16  ;;  %v9348_v52 = vrot.slane %v9346_v36, 1 }
 0x59f   : > { %v7315_v43 = vsel %vm7180_vm12, %v7116_v42, %v7251_v0  ;;  %v9353_v59 = vrot.slane %v9351_v37, 1  ;;  %v6956_v12 = vadd.f32 %v19489_v16, %v19691_v7  ;;  %v14736_v9 = vcombine.low %v8758_v5, %v8686_v17  ;;  %v8433_v0 = vld [vmem:[#allocation2 + $0x144] sm:$0xf] }
 0x5a0   : > { %v19805_v15 = vpop.f32.mrb[128].mxu0  ;;  %v7976_v29 = vshrl.u32 %v14945_v14, 16  ;;  %v7979_v11 = vshll.u32 %v14945_v14, 16  ;;  %v14946_v28 = vpack.c.bf16 %v7315_v43, %v7315_v43  ;;  %v7046_v21 = vmul.f32 %v19780_v20, %v6953_v25 }
 0x5a1   : > { %21085 = vst [vmem:[#allocation21_spill] sm:$0xff] %v19805_v15  ;;  %v19807_v18 = vpop.f32.mrb[129].mxu0  ;;  %v9349_v31 = vor.u32 %v9348_v52, %v9344_v26  ;;  %v7047_v38 = vmul.f32 %v19780_v20, %v6956_v12  ;;  %v11493_v23 = vrot.slane %v16508_v40, 1  ;;  %v11492_v7 = vrot.slane %v14736_v9, 1 }
 0x5a2   : > { %21086 = vst [vmem:[#allocation22_spill] sm:$0xff] %v19807_v18  ;;  %v19812_v1 = vpop.f32.mrb[130].mxu0  ;;  %v7978_v33 = vrot.slane %v7976_v29, 7  ;;  %v7984_v57 = vshrl.u32 %v14946_v28, 16  ;;  %v7987_v39 = vshll.u32 %v14946_v28, 16  ;;  %v7117_v60 = vadd.f32 %v19788_v55, %v7046_v21 }
 0x5a3   : > { %21087 = vst [vmem:[#allocation23_spill] sm:$0xff] %v19812_v1  ;;  %v19814_v8 = vpop.f32.mrb[131].mxu0  ;;  %v9354_v42 = vsel %vm2464_vm0, %v9349_v31, %v9353_v59  ;;  %v7118_v56 = vadd.f32 %v19788_v55, %v7047_v38  ;;  %v11494_v58 = vsel %vm2977_vm9, %v11492_v7, %v11493_v23  ;;  %v14482_v14 = vcombine.low %v8433_v0, %v8434_v44  ;;  %v8688_v29 = vld [vmem:[#allocation2 + $0x154] sm:$0xf]  ;;  %v8435_v0 = vld [vmem:[#allocation2 + $0x150] sm:$0xf] }
 0x5a4   : > { %21088 = vst [vmem:[#allocation15_spill] sm:$0xff] %v19814_v8  ;;  %v7981_v6 = vor.u32 %v7979_v11, %v7978_v33  ;;  %v7982_v32 = vrot.slane %v7978_v33, 4  ;;  %v7986_v16 = vrot.slane %v7984_v57, 7  ;;  %vm7181_vm13 = vcmp.ge.f32.partialorder %v7117_v60, 0.0  ;;  %12351 = vmatprep.mubr.bf16.mxu1 %v9354_v42  ;;  %15178 = vmatmul.mubr.bf16.gmra.mrb[172].mxu0 %v11494_v58  ;;  %v21089_v33 = vld [vmem:[#allocation19_spill] sm:$0xff] }
 0x5a5   : > { %v7252_v48 = vmul.f32 %v19763_v61, %v7117_v60  ;;  %12352 = vmatmul.mubr.bf16.gmra.mrb[160].mxu1 %v14481_v2  ;;  %vm7182_vm15 = vcmp.ge.f32.partialorder %v7118_v56, 0.0  ;;  %v7253_v4 = vmul.f32 %v19763_v61, %v7118_v56  ;;  %v9363_v36 = vshll.u32 %v16511_v49, 16  ;;  %v16513_v11 = vld [vmem:[#allocation2 + $0x158] ss:$0 sps:$4 sm:$0x11]  }
 0x5a6   : > { %v8349_v13 = vsel %vm19087_vm14, %v7981_v6, %v8348_v45  ;;  %v7989_v51 = vor.u32 %v7987_v39, %v7986_v16  ;;  %v7991_v54 = vrot.slane %v7986_v16, 4  ;;  %v9358_v40 = vshll.u32 %v14482_v14, 16  ;;  %v8759_v39 = vld [vmem:[#allocation2 + $0x150] sm:$0xe]  ;;  %v8355_v45 = vld [vmem:[#allocation2 + $0x174] sm:$0xf] }
 0x5a7   : > { %8350 = vst [vmem:[#allocation2 + $0x168] sm:$0xf] %v8349_v13  ;;  %v7316_v19 = vsel %vm7181_vm13, %v7117_v60, %v7252_v48  ;;  %v7317_v25 = vsel %vm7182_vm15, %v7118_v56, %v7253_v4  ;;  %v6961_v2 = vadd.f32 %v19471_v50, %v19706_v30  ;;  %v9356_v59 = vshrl.u32 %v14482_v14, 16  ;;  %v8436_v6 = vld [vmem:[#allocation2 + $0x154] sm:$0xf] }
 0x5a8   : > { %v7990_v37 = vsel %vm17552_vm6, %v7982_v32, %v7989_v51  ;;  %v8353_v17 = vsel %vm19095_vm2, %v7991_v54, %v8352_v41  ;;  %v14947_v43 = vpack.c.bf16 %v7316_v19, %v7316_v19  ;;  %v14948_v52 = vpack.c.bf16 %v7317_v25, %v7317_v25  ;;  %v16516_v41 = vld [vmem:[#allocation2 + $0x158] ss:$0 sps:$4 sm:$0x11]   ;;  %v8359_v42 = vld [vmem:[#allocation2 + $0x17c] sm:$0x1] }
 0x5a9   : > { %8351 = vst [vmem:[#allocation2 + $0x16c] sm:$0xf] %v7990_v37  ;;  %8354 = vst [vmem:[#allocation2 + $0x170] sm:$0x1] %v8353_v17  ;;  %v9360_v21 = vrot.slane %v9358_v40, 1  ;;  %v9365_v12 = vrot.slane %v9363_v36, 1  ;;  %v7048_v5 = vmul.f32 %v19780_v20, %v6961_v2  ;;  %v6964_v57 = vadd.f32 %v21089_v33, %v19711_v62 }
 0x5aa   : > { %v7993_v28 = vshrl.u32 %v14947_v43, 16  ;;  %v7996_v26 = vshll.u32 %v14947_v43, 16  ;;  %v8001_v31 = vshrl.u32 %v14948_v52, 16  ;;  %v8004_v60 = vshll.u32 %v14948_v52, 16  ;;  %v8690_v40 = vld [vmem:[#allocation2 + $0x160] sm:$0xf] }
 0x5ab   : > { %v14737_v38 = vcombine.low %v8759_v39, %v8688_v29  ;;  %v9361_v50 = vor.u32 %v9360_v21, %v9356_v59  ;;  %v7119_v30 = vadd.f32 %v19788_v55, %v7048_v5  ;;  %v7049_v23 = vmul.f32 %v19780_v20, %v6964_v57  ;;  %v8362_v5 = vld [vmem:[#allocation2 + $0x180] sm:$0xf]  ;;  %v8499_v8 = vld [vmem:[#allocation2 + $0x108] sm:$0xe] }
 0x5ac   : > { %v7995_v9 = vrot.slane %v7993_v28, 7  ;;  %v11496_v44 = vrot.slane %v16513_v11, 1  ;;  %v8003_v7 = vrot.slane %v8001_v31, 7  ;;  %v14483_v37 = vcombine.low %v8435_v0, %v8436_v6  ;;  %v16519_v11 = vld [vmem:[#allocation2 + $0x164] ss:$0 sps:$4 sm:$0x11]  }
 0x5ad   : > { %v11495_v49 = vrot.slane %v14737_v38, 1  ;;  %v9366_v62 = vsel %vm2464_vm0, %v9361_v50, %v9365_v12  ;;  %vm7183_vm3 = vcmp.ge.f32.partialorder %v7119_v30, 0.0  ;;  %v7254_v48 = vmul.f32 %v19763_v61, %v7119_v30 }
 0x5ae   : > { %v7998_v32 = vor.u32 %v7996_v26, %v7995_v9  ;;  %v7999_v16 = vrot.slane %v7995_v9, 4  ;;  %v7120_v56 = vadd.f32 %v19788_v55, %v7049_v23  ;;  %v8006_v51 = vor.u32 %v8004_v60, %v8003_v7  ;;  %12359 = vmatprep.mubr.bf16.mxu1 %v9366_v62 }
 0x5af   : > { %v8008_v54 = vrot.slane %v8003_v7, 4  ;;  %v11497_v58 = vsel %vm2977_vm9, %v11495_v49, %v11496_v44  ;;  %12360 = vmatmul.mubr.bf16.gmra.mrb[164].mxu1 %v14482_v14  ;;  %v7318_v19 = vsel %vm7183_vm3, %v7119_v30, %v7254_v48  ;;  %v9375_v25 = vshll.u32 %v16516_v41, 16  ;;  %v8366_v41 = vld [vmem:[#allocation2 + $0x188] sm:$0x1] }
 0x5b0   : > { %v8356_v13 = vsel %vm19087_vm14, %v7998_v32, %v8355_v45  ;;  %vm7184_vm1 = vcmp.ge.f32.partialorder %v7120_v56, 0.0  ;;  %v7255_v4 = vmul.f32 %v19763_v61, %v7120_v56  ;;  %15181 = vmatprep.mubr.bf16.mxu0 %v11497_v58  ;;  %v8007_v17 = vsel %vm17552_vm6, %v7999_v16, %v8006_v51  ;;  %v8760_v45 = vld [vmem:[#allocation2 + $0x15c] sm:$0xe]  ;;  %v8438_v32 = vld [vmem:[#allocation2 + $0x160] sm:$0xf] }
 0x5b1   : > { %8357 = vst [vmem:[#allocation2 + $0x174] sm:$0xf] %v8356_v13  ;;  %v8360_v43 = vsel %vm19095_vm2, %v8008_v54, %v8359_v42  ;;  %v14949_v36 = vpack.c.bf16 %v7318_v19, %v7318_v19  ;;  %8358 = vst [vmem:[#allocation2 + $0x178] sm:$0xf] %v8007_v17  ;;  %v9370_v29 = vshll.u32 %v14483_v37, 16  ;;  %v6969_v14 = vadd.f32 %v19520_v24, %v19728_v46 }
 0x5b2   : > { %8361 = vst [vmem:[#allocation2 + $0x17c] sm:$0x1] %v8360_v43  ;;  %v7319_v2 = vsel %vm7184_vm1, %v7120_v56, %v7255_v4  ;;  %v9368_v21 = vshrl.u32 %v14483_v37, 16  ;;  %v9377_v57 = vrot.slane %v9375_v25, 1  ;;  %v6972_v9 = vadd.f32 %v19527_v27, %v19733_v34  ;;  %v8437_v58 = vld [vmem:[#allocation2 + $0x15c] sm:$0xf] }
 0x5b3   : > { %v19849_v28 = vpop.f32.mrb[132].mxu0  ;;  %v8010_v26 = vshrl.u32 %v14949_v36, 16  ;;  %v8013_v52 = vshll.u32 %v14949_v36, 16  ;;  %v14950_v59 = vpack.c.bf16 %v7319_v2, %v7319_v2  ;;  %v9372_v33 = vrot.slane %v9370_v29, 1  ;;  %v8692_v29 = vld [vmem:[#allocation2 + $0x16c] sm:$0xf] }
 0x5b4   : > { %21090 = vst [vmem:[#allocation16_spill] sm:$0xff] %v19849_v28  ;;  %v19851_v12 = vpop.f32.mrb[133].mxu0  ;;  %v7050_v39 = vmul.f32 %v19780_v20, %v6969_v14  ;;  %v14738_v38 = vcombine.low %v8760_v45, %v8690_v40  ;;  %v7051_v44 = vmul.f32 %v19780_v20, %v6972_v9  ;;  %v11499_v6 = vrot.slane %v16519_v11, 1  ;;  %v16522_v34 = vld [vmem:[#allocation2 + $0x164] ss:$0 sps:$4 sm:$0x11]  }
 0x5b5   : > { %21091 = vst [vmem:[#allocation17_spill] sm:$0xff] %v19851_v12  ;;  %v19856_v31 = vpop.f32.mrb[134].mxu0  ;;  %v8012_v24 = vrot.slane %v8010_v26, 7  ;;  %v8018_v46 = vshrl.u32 %v14950_v59, 16  ;;  %v8021_v60 = vshll.u32 %v14950_v59, 16  ;;  %v9373_v30 = vor.u32 %v9372_v33, %v9368_v21 }
 0x5b6   : > { %21092 = vst [vmem:[#allocation18_spill] sm:$0xff] %v19856_v31  ;;  %v19858_v50 = vpop.f32.mrb[135].mxu0  ;;  %v7121_v23 = vadd.f32 %v19788_v55, %v7050_v39  ;;  %v11498_v27 = vrot.slane %v14738_v38, 1  ;;  %v7122_v48 = vadd.f32 %v19788_v55, %v7051_v44  ;;  %v14484_v4 = vcombine.low %v8437_v58, %v8438_v32  ;;  %v16524_v14 = vld [vmem:[#allocation2 + $0x170] ss:$0 sps:$4 sm:$0x11]  }
 0x5b7   : > { %21093 = vst [vmem:[#allocation19_spill] sm:$0xff] %v19858_v50  ;;  %v8015_v16 = vor.u32 %v8013_v52, %v8012_v24  ;;  %v8016_v7 = vrot.slane %v8012_v24, 4  ;;  %v8020_v49 = vrot.slane %v8018_v46, 7  ;;  %v9378_v42 = vsel %vm2464_vm0, %v9373_v30, %v9377_v57  ;;  %v21094_v57 = vld [vmem:[#allocation20_spill] sm:$0xff]  ;;  %v8761_v9 = vld [vmem:[#allocation2 + $0x168] sm:$0xe] }
 0x5b8   : > { %vm7185_vm4 = vcmp.ge.f32.partialorder %v7121_v23, 0.0  ;;  %v7256_v62 = vmul.f32 %v19763_v61, %v7121_v23  ;;  %12367 = vmatprep.mubr.bf16.mxu1 %v9378_v42  ;;  %v11500_v54 = vsel %vm2977_vm9, %v11498_v27, %v11499_v6  ;;  %vm7186_vm5 = vcmp.ge.f32.partialorder %v7122_v48, 0.0  ;;  %v8369_v38 = vld [vmem:[#allocation2 + $0x18c] sm:$0xf]  ;;  %v8694_v58 = vld [vmem:[#allocation2 + $0x178] sm:$0xf] }
 0x5b9   : > { %v8363_v56 = vsel %vm19087_vm14, %v8015_v16, %v8362_v5  ;;  %v8023_v13 = vor.u32 %v8021_v60, %v8020_v49  ;;  %v8025_v51 = vrot.slane %v8020_v49, 4  ;;  %12368 = vmatmul.mubr.bf16.gmra.mrb[168].mxu1 %v14483_v37  ;;  %v7257_v19 = vmul.f32 %v19763_v61, %v7122_v48  ;;  %15182 = vmatmul.mubr.bf16.gmra.mrb[176].mxu0 %v11500_v54  ;;  %v19880_v44 = vld [vmem:[#allocation2 + $0x16c] sm:$0xf]  ;;  %v19882_v49 = vld [vmem:[#allocation2 + $0x170] ss:$0 sps:$4 sm:$0x11]  }
 0x5ba   : > { %8364 = vst [vmem:[#allocation2 + $0x180] sm:$0xf] %v8363_v56  ;;  %v7320_v0 = vsel %vm7185_vm4, %v7121_v23, %v7256_v62  ;;  %v9387_v25 = vshll.u32 %v16522_v34, 16  ;;  %v9382_v2 = vshll.u32 %v14484_v4, 16  ;;  %v6977_v37 = vadd.f32 %v19513_v47, %v19740_v35  ;;  %v8439_v56 = vld [vmem:[#allocation2 + $0x168] sm:$0xf] }
 0x5bb   : > { %v8024_v17 = vsel %vm17552_vm6, %v8016_v7, %v8023_v13  ;;  %v8367_v43 = vsel %vm19095_vm2, %v8025_v51, %v8366_v41  ;;  %v14951_v36 = vpack.c.bf16 %v7320_v0, %v7320_v0  ;;  %v7321_v40 = vsel %vm7186_vm5, %v7122_v48, %v7257_v19  ;;  %v8497_v28 = vld [vmem:[#allocation2 + $0xf0] sm:$0xe] }
 0x5bc   : > { %8365 = vst [vmem:[#allocation2 + $0x184] sm:$0xf] %v8024_v17  ;;  %8368 = vst [vmem:[#allocation2 + $0x188] sm:$0x1] %v8367_v43  ;;  %v14952_v52 = vpack.c.bf16 %v7321_v40, %v7321_v40  ;;  %v9380_v59 = vshrl.u32 %v14484_v4, 16  ;;  %v9384_v21 = vrot.slane %v9382_v2, 1  ;;  %v7052_v33 = vmul.f32 %v19780_v20, %v6977_v37 }
 0x5bd   : > { %v8027_v11 = vshrl.u32 %v14951_v36, 16  ;;  %v8030_v26 = vshll.u32 %v14951_v36, 16  ;;  %v9389_v5 = vrot.slane %v9387_v25, 1  ;;  %v6980_v39 = vadd.f32 %v21094_v57, %v19752_v22  ;;  %v8373_v22 = vld [vmem:[#allocation2 + $0x194] sm:$0x1] }
 0x5be   : > { %v8035_v24 = vshrl.u32 %v14952_v52, 16  ;;  %v8038_v46 = vshll.u32 %v14952_v52, 16  ;;  %v14739_v60 = vcombine.low %v8761_v9, %v8692_v29  ;;  %v9385_v47 = vor.u32 %v9384_v21, %v9380_v59  ;;  %v19897_v36 = vld [vmem:[#allocation2 + $0x178] sm:$0xf]  ;;  %v8762_v40 = vld [vmem:[#allocation2 + $0x174] sm:$0xe] }
 0x5bf   : > { %v8029_v45 = vrot.slane %v8027_v11, 7  ;;  %v7123_v35 = vadd.f32 %v19788_v55, %v7052_v33  ;;  %v7053_v30 = vmul.f32 %v19780_v20, %v6980_v39  ;;  %v11502_v23 = vrot.slane %v16524_v14, 1  ;;  %v8441_v2 = vld [vmem:[#allocation2 + $0x174] sm:$0xf]  ;;  %v8376_v21 = vld [vmem:[#allocation2 + $0x198] sm:$0xf] }
 0x5c0   : > { %v8037_v16 = vrot.slane %v8035_v24, 7  ;;  %v11501_v7 = vrot.slane %v14739_v60, 1  ;;  %v9390_v27 = vsel %vm2464_vm0, %v9385_v47, %v9389_v5  ;;  %v14485_v54 = vcombine.low %v8439_v56, %v19880_v44 }
 0x5c1   : > { %v8032_v6 = vor.u32 %v8030_v26, %v8029_v45  ;;  %v8033_v32 = vrot.slane %v8029_v45, 4  ;;  %vm7187_vm7 = vcmp.ge.f32.partialorder %v7123_v35, 0.0  ;;  %v7258_v34 = vmul.f32 %v19763_v61, %v7123_v35  ;;  %12375 = vmatprep.mubr.bf16.mxu1 %v9390_v27  ;;  %v8443_v27 = vld [vmem:[#allocation2 + $0x180] sm:$0xf] }
 0x5c2   : > { %v7124_v41 = vadd.f32 %v19788_v55, %v7053_v30  ;;  %v8040_v42 = vor.u32 %v8038_v46, %v8037_v16  ;;  %v8042_v62 = vrot.slane %v8037_v16, 4  ;;  %v11503_v48 = vsel %vm2977_vm9, %v11501_v7, %v11502_v23  ;;  %12376 = vmatmul.mubr.bf16.gmra.mrb[172].mxu1 %v14484_v4  ;;  %v16530_v55 = vld [vmem:[#allocation2 + $0x17c] ss:$0 sps:$4 sm:$0x11]  }
 0x5c3   : > { %v8370_v20 = vsel %vm19087_vm14, %v8032_v6, %v8369_v38  ;;  %v7322_v13 = vsel %vm7187_vm7, %v7123_v35, %v7258_v34  ;;  %15185 = vmatprep.mubr.bf16.mxu0 %v11503_v48  ;;  %v9399_v43 = vshll.u32 %v19882_v49, 16  ;;  %v19899_v4 = vld [vmem:[#allocation2 + $0x17c] ss:$0 sps:$4 sm:$0x11]   ;;  %v9394_v25 = vshll.u32 %v14485_v54, 16 }
 0x5c4   : > { %8371 = vst [vmem:[#allocation2 + $0x18c] sm:$0xf] %v8370_v20  ;;  %vm7188_vm8 = vcmp.ge.f32.partialorder %v7124_v41, 0.0  ;;  %v7259_v51 = vmul.f32 %v19763_v61, %v7124_v41  ;;  %v8041_v0 = vsel %vm17552_vm6, %v8033_v32, %v8040_v42  ;;  %v8374_v19 = vsel %vm19095_vm2, %v8042_v62, %v8373_v22  ;;  %v19903_v52 = vld [vmem:[#allocation2 + $0x184] sm:$0xf] }
 0x5c5   : > { %v14953_v17 = vpack.c.bf16 %v7322_v13, %v7322_v13  ;;  %8372 = vst [vmem:[#allocation2 + $0x190] sm:$0xf] %v8041_v0  ;;  %8375 = vst [vmem:[#allocation2 + $0x194] sm:$0x1] %v8374_v19  ;;  %v9392_v26 = vshrl.u32 %v14485_v54, 16  ;;  %v9396_v5 = vrot.slane %v9394_v25, 1  ;;  %v14740_v33 = vcombine.low %v8762_v40, %v8694_v58 }
 0x5c6   : > { %v7323_v61 = vsel %vm7188_vm8, %v7124_v41, %v7259_v51  ;;  %v11505_v57 = vrot.slane %v16530_v55, 1  ;;  %v14486_v39 = vcombine.low %v8441_v2, %v19897_v36  ;;  %v9401_v46 = vrot.slane %v9399_v43, 1  ;;  %v19913_v6 = vld [vmem:[#allocation2 + $0x188] ss:$0 sps:$4 sm:$0x11]  }
 0x5c7   : > { %v8044_v29 = vshrl.u32 %v14953_v17, 16  ;;  %v8047_v14 = vshll.u32 %v14953_v17, 16  ;;  %v14954_v11 = vpack.c.bf16 %v7323_v61, %v7323_v61  ;;  %v9411_v60 = vshll.u32 %v19899_v4, 16  ;;  %v8380_v34 = vld [vmem:[#allocation2 + $0x1a0] sm:$0x1] }
 0x5c8   : > { %v9397_v35 = vor.u32 %v9396_v5, %v9392_v26  ;;  %v11504_v30 = vrot.slane %v14740_v33, 1  ;;  %v9406_v23 = vshll.u32 %v14486_v39, 16  ;;  %v9404_v22 = vshrl.u32 %v14486_v39, 16 }
 0x5c9   : > { %v19901_v37 = vpop.f32.mrb[136].mxu0  ;;  %v8046_v45 = vrot.slane %v8044_v29, 7  ;;  %v8052_v24 = vshrl.u32 %v14954_v11, 16  ;;  %v8055_v47 = vshll.u32 %v14954_v11, 16  ;;  %v14487_v62 = vcombine.low %v8443_v27, %v19903_v52  ;;  %v19948_v27 = vld [vmem:[#allocation2 + $0x1c] sm:$0xf] }
 0x5ca   : > { %21095 = vst [vmem:[#allocation20_spill] sm:$0xff] %v19901_v37  ;;  %v19905_v59 = vpop.f32.mrb[137].mxu0  ;;  %v9402_v41 = vsel %vm2464_vm0, %v9397_v35, %v9401_v46  ;;  %v11506_v20 = vsel %vm2977_vm9, %v11504_v30, %v11505_v57  ;;  %v9408_v42 = vrot.slane %v9406_v23, 1  ;;  %v9413_v58 = vrot.slane %v9411_v60, 1  ;;  %v16800_v35 = vld [vmem:[#allocation2 + $0x4] sm:$0xf] }
 0x5cb   : > { %21096 = vst [vmem:[#allocation24_spill] sm:$0xff] %v19905_v59  ;;  %v19908_v9 = vpop.f32.mrb[138].mxu0  ;;  %v8049_v32 = vor.u32 %v8047_v14, %v8046_v45  ;;  %v8050_v16 = vrot.slane %v8046_v45, 4  ;;  %v8054_v7 = vrot.slane %v8052_v24, 7  ;;  %v8445_v48 = vld [vmem:[#allocation2 + $0x18c] sm:$0xf]  ;;  %12383 = vmatprep.mubr.bf16.mxu1 %v9402_v41  ;;  %15186 = vmatmul.mubr.bf16.gmra.mrb[180].mxu0 %v11506_v20 }
 0x5cc   : > { %21097 = vst [vmem:[#allocation25_spill] sm:$0xff] %v19908_v9  ;;  %v19911_v38 = vpop.f32.mrb[139].mxu0  ;;  %v19920_v55 = vld [vmem:[#allocation2 + $0x190] sm:$0xf]  ;;  %12384 = vmatmul.mubr.bf16.gmra.mrb[176].mxu1 %v14485_v54  ;;  %v9409_v0 = vor.u32 %v9408_v42, %v9404_v22  ;;  %v9418_v19 = vshll.u32 %v14487_v62, 16  ;;  %v9423_v17 = vshll.u32 %v19913_v6, 16 }
 0x5cd   : > { %21098 = vst [vmem:[#allocation26_spill] sm:$0xff] %v19911_v38  ;;  %v8377_v56 = vsel %vm19087_vm14, %v8049_v32, %v8376_v21  ;;  %v8057_v13 = vor.u32 %v8055_v47, %v8054_v7  ;;  %v8059_v51 = vrot.slane %v8054_v7, 4  ;;  %v14488_v43 = vcombine.low %v8445_v48, %v19920_v55  ;;  %v19929_v11 = vld [vmem:[#allocation2 + $0x194] ss:$0 sps:$4 sm:$0x11]  }
 0x5ce   : > { %8378 = vst [vmem:[#allocation2 + $0x198] sm:$0xf] %v8377_v56  ;;  %v9414_v25 = vsel %vm2464_vm0, %v9409_v0, %v9413_v58  ;;  %v9416_v40 = vshrl.u32 %v14487_v62, 16  ;;  %v9420_v2 = vrot.slane %v9418_v19, 1  ;;  %v9425_v14 = vrot.slane %v9423_v17, 1  ;;  %v16544_v41 = vld [vmem:[#allocation8 + $0x100] sm:$0xff]  }
 0x5cf   : > { %v8058_v61 = vsel %vm17552_vm6, %v8050_v16, %v8057_v13  ;;  %v8381_v10 = vsel %vm19095_vm2, %v8059_v51, %v8380_v34  ;;  %v9430_v29 = vshll.u32 %v14488_v43, 16  ;;  %12391 = vmatprep.mubr.bf16.mxu1 %v9414_v25  ;;  %v9428_v3 = vshrl.u32 %v14488_v43, 16  ;;  %v8479_v47 = vld [vmem:[#allocation2] sm:$0xe]  ;;  %v8511_v23 = vld [vmem:[#allocation2 + $0xc] sm:$0xf] }
 0x5d0   : > { %8379 = vst [vmem:[#allocation2 + $0x19c] sm:$0xf] %v8058_v61  ;;  %8382 = vst [vmem:[#allocation2 + $0x1a0] sm:$0x1] %v8381_v10  ;;  %v9421_v54 = vor.u32 %v9420_v2, %v9416_v40  ;;  %v9435_v53 = vshll.u32 %v19929_v11, 16  ;;  %v14521_v30 = vcombine.low %v8479_v47, %v16800_v35  ;;  %v16551_v58 = vld [vmem:[#allocation8 + $0x108] sm:$0xff]  }
 0x5d1   : > { %v9432_v21 = vrot.slane %v9430_v29, 1  ;;  %v16801_v7 = vld [vmem:[#allocation2 + $0x8] ss:$0 sps:$4 sm:$0x11]   ;;  %v8513_v20 = vld [vmem:[#allocation2 + $0x18] sm:$0xf] }
 0x5d2   : > { %v9426_v26 = vsel %vm2464_vm0, %v9421_v54, %v9425_v14  ;;  %v9437_v57 = vrot.slane %v9435_v53, 1  ;;  %v9567_v16 = vrot.slane %v14521_v30, 1  ;;  %v9568_v22 = vrot.slane %v16801_v7, 1  ;;  %v8480_v42 = vld [vmem:[#allocation2 + $0xc] sm:$0xe]  ;;  %v16558_v25 = vld [vmem:[#allocation8 + $0x110] sm:$0xff]  }
 0x5d3   : > { %v9433_v5 = vor.u32 %v9432_v21, %v9428_v3  ;;  %v16802_v48 = vld [vmem:[#allocation2 + $0x10] sm:$0xf]  ;;  %v19964_v10 = vld [vmem:[#allocation2 + $0x28] sm:$0xf]  ;;  %v8515_v40 = vld [vmem:[#allocation2 + $0x24] sm:$0xf] }
 0x5d4   : > { %12392 = vmatmul.mubr.bf16.gmra.mrb[180].mxu1 %v14486_v39  ;;  %v19942_v39 = vld [vmem:[#allocation2 + $0x10] sm:$0xf]  ;;  %v9569_v34 = vsel %vm2977_vm9, %v9567_v16, %v9568_v22  ;;  %v14522_v56 = vcombine.low %v8480_v42, %v16802_v48  ;;  %v8481_v2 = vld [vmem:[#allocation2 + $0x18] sm:$0xe]  ;;  %v19969_v54 = vcombine.low %v8515_v40, %v19964_v10  ;;  %v16804_v14 = vld [vmem:[#allocation2 + $0x1c] sm:$0xf] }
 0x5d5   : > { %12399 = vmatprep.mubr.bf16.mxu1 %v9426_v26  ;;  %v9438_v46 = vsel %vm2464_vm0, %v9433_v5, %v9437_v57  ;;  %v19945_v32 = vcombine.low %v8511_v23, %v19942_v39  ;;  %v14523_v26 = vcombine.low %v8481_v2, %v16804_v14  ;;  %v16565_v21 = vld [vmem:[#allocation8 + $0x118] sm:$0xff]   ;;  %v16805_v53 = vld [vmem:[#allocation2 + $0x20] ss:$0 sps:$4 sm:$0x11]   ;;  %v19973_v57 = vld [vmem:[#allocation2 + $0x34] sm:$0xf] }
 0x5d6   : > { %v9570_v17 = vrot.slane %v14522_v56, 1  ;;  %v9574_v5 = vrot.slane %v16805_v53, 1  ;;  %v8517_v47 = vld [vmem:[#allocation2 + $0x30] sm:$0xf]  ;;  %v8482_v35 = vld [vmem:[#allocation2 + $0x24] sm:$0xe] }
 0x5d7   : > { %v9573_v3 = vrot.slane %v14523_v26, 1  ;;  %v19978_v23 = vcombine.low %v8517_v47, %v19973_v57  ;;  %v16806_v16 = vld [vmem:[#allocation2 + $0x28] sm:$0xf]  ;;  %v16579_v22 = vld [vmem:[#allocation8 + $0x128] sm:$0xff]   ;;  %v19984_v48 = vld [vmem:[#allocation2 + $0x40] sm:$0xf] }
 0x5d8   : > { %v14524_v7 = vcombine.low %v8482_v35, %v16806_v16  ;;  %v16593_v26 = vld [vmem:[#allocation8 + $0x138] sm:$0xff]   ;;  %v8484_v35 = vld [vmem:[#allocation2 + $0x3c] sm:$0xe]  ;;  %v8494_v9 = vld [vmem:[#allocation2 + $0xb4] sm:$0xe]  ;;  %vm13778_vm6 = vcmask 523264  }
 0x5d9   : > { %v9575_v30 = vsel %vm2977_vm9, %v9573_v3, %v9574_v5  ;;  %v16809_v3 = vld [vmem:[#allocation2 + $0x38] ss:$0 sps:$4 sm:$0x11]   ;;  %v19999_v5 = vld [vmem:[#allocation2 + $0x4c] sm:$0xf] }
 0x5da   : > { %v9580_v53 = vrot.slane %v16809_v3, 1  ;;  %v8521_v47 = vld [vmem:[#allocation2 + $0x48] sm:$0xf]  ;;  %v16832_v38 = vld [vmem:[#allocation2 + $0xdc] sm:$0xf] }
 0x5db   : > { %v19933_v33 = vpop.f32.mrb[140].mxu0  ;;  %v20004_v16 = vcombine.low %v8521_v47, %v19999_v5 }
 0x5dc   : > { %21099 = vst [vmem:[#allocation27_spill] sm:$0xff] %v19933_v33  ;;  %v19935_v45 = vpop.f32.mrb[141].mxu0  ;;  %12400 = vmatmul.mubr.bf16.gmra.mrb[184].mxu1 %v14487_v62  ;;  %v19952_v62 = vcombine.low %v8513_v20, %v19948_v27 }
 0x5dd   : > { %21100 = vst [vmem:[#allocation28_spill] sm:$0xff] %v19935_v45  ;;  %v19937_v24 = vpop.f32.mrb[142].mxu0  ;;  %12407 = vmatprep.mubr.bf16.mxu1 %v9438_v46  ;;  %v16572_v46 = vld [vmem:[#allocation8 + $0x120] sm:$0xff]   ;;  %v20109_v45 = vld [vmem:[#allocation2 + $0xc4] sm:$0xf] }
 0x5de   : > { %21101 = vst [vmem:[#allocation29_spill] sm:$0xff] %v19937_v24  ;;  %v19940_v60 = vpop.f32.mrb[143].mxu0 }
 0x5df   : > { %21102 = vst [vmem:[#allocation30_spill] sm:$0xff] %v19940_v60 }
 0x5e4   : > { %12408 = vmatmul.mubr.bf16.gmra.mrb[188].mxu1 %v14488_v43  ;;  %v16803_v43 = vld [vmem:[#allocation2 + $0x14] ss:$0 sps:$4 sm:$0x11]  }
 0x5e5   : > { %12448 = vmatprep.mubr.bf16.mxu1 %v19945_v32  ;;  %v9571_v61 = vrot.slane %v16803_v43, 1  ;;  %v8519_v43 = vld [vmem:[#allocation2 + $0x3c] sm:$0xf] }
 0x5e6   : > { %v19995_v2 = vcombine.low %v8519_v43, %v19984_v48  ;;  %v20008_v43 = vld [vmem:[#allocation2 + $0x58] sm:$0xf] }
 0x5e7   : > { %v9572_v29 = vsel %vm2977_vm9, %v9570_v17, %v9571_v61  ;;  %v16586_v17 = vld [vmem:[#allocation8 + $0x130] sm:$0xff]   ;;  %v8483_v61 = vld [vmem:[#allocation2 + $0x30] sm:$0xe] }
 0x5ec   : > { %12449 = vmatmul.mubr.bf16.vlgmr.msra.gmra.mrb[64].mxu1 %v9569_v34  ;;  %v9576_v34 = vrot.slane %v14524_v7, 1  ;;  %v16810_v7 = vld [vmem:[#allocation2 + $0x40] sm:$0xf] }
 0x5ed   : > { %12456 = vmatprep.mubr.bf16.mxu1 %v19952_v62  ;;  %12706 = vmatpush1.bf16.msra.mxu1 %v16544_v41  ;;  %v16807_v41 = vld [vmem:[#allocation2 + $0x2c] ss:$0 sps:$4 sm:$0x11]  }
 0x5ee   : > { %12707 = vmatprep.subr.bf16.mxu1 %v21063_v63  ;;  %v9577_v20 = vrot.slane %v16807_v41, 1 }
 0x5ef   : > { %v19954_v13 = vpop.f32.mrb[144].mxu0 }
 0x5f0   : > { %21103 = vst [vmem:[#allocation31_spill] sm:$0xff] %v19954_v13  ;;  %v19956_v51 = vpop.f32.mrb[145].mxu0  ;;  %v9578_v40 = vsel %vm2977_vm9, %v9576_v34, %v9577_v20  ;;  %v16607_v34 = vld [vmem:[#allocation8 + $0x148] sm:$0xff]   ;;  %v16811_v20 = vld [vmem:[#allocation2 + $0x44] ss:$0 sps:$4 sm:$0x11]  }
 0x5f1   : > { %21104 = vst [vmem:[#allocation32_spill] sm:$0xff] %v19956_v51  ;;  %v19959_v0 = vpop.f32.mrb[146].mxu0  ;;  %12708 = vmatpush1.bf16.msra.mxu1 %v16551_v58 }
 0x5f2   : > { %21105 = vst [vmem:[#allocation33_spill] sm:$0xff] %v19959_v0  ;;  %v19962_v19 = vpop.f32.mrb[147].mxu0  ;;  %12709 = vmatprep.subr.bf16.mxu1 %v21063_v63  ;;  %v8490_v0 = vld [vmem:[#allocation2 + $0x84] sm:$0xe] }
 0x5f3   : > { %21106 = vst [vmem:[#allocation34_spill] sm:$0xff] %v19962_v19 }
 0x5f4   : > { %12457 = vmatmul.mubr.bf16.gmra.mrb[68].mxu1 %v9572_v29  ;;  %v16808_v29 = vld [vmem:[#allocation2 + $0x34] sm:$0xf] }
 0x5f5   : > { %12464 = vmatprep.mubr.bf16.mxu1 %v19969_v54  ;;  %12710 = vmatpush1.bf16.msra.mxu1 %v16558_v25  ;;  %v14525_v14 = vcombine.low %v8483_v61, %v16808_v29  ;;  %v16614_v61 = vld [vmem:[#allocation8 + $0x150] sm:$0xff]   ;;  %v8485_v29 = vld [vmem:[#allocation2 + $0x48] sm:$0xe] }
 0x5f6   : > { %12711 = vmatprep.subr.bf16.mxu1 %v21063_v63 }
 0x5f9   : > { %12712 = vmatpush1.bf16.msra.mxu1 %v16565_v21  ;;  %v9579_v21 = vrot.slane %v14525_v14, 1 }
 0x5fa   : > { %12713 = vmatprep.subr.bf16.mxu1 %v21063_v63 }
 0x5fc   : > { %12465 = vmatmul.mubr.bf16.gmra.mrb[72].mxu1 %v9575_v30  ;;  %v9581_v30 = vsel %vm2977_vm9, %v9579_v21, %v9580_v53  ;;  %v16812_v21 = vld [vmem:[#allocation2 + $0x4c] sm:$0xf] }
 0x5fd   : > { %12472 = vmatprep.mubr.bf16.mxu1 %v19978_v23  ;;  %12714 = vmatpush1.bf16.msra.mxu1 %v16572_v46  ;;  %v16600_v46 = vld [vmem:[#allocation8 + $0x140] sm:$0xff]   ;;  %v14527_v3 = vcombine.low %v8485_v29, %v16812_v21  ;;  %v16814_v29 = vld [vmem:[#allocation2 + $0x58] sm:$0xf] }
 0x5fe   : > { %12715 = vmatprep.subr.bf16.mxu1 %v21063_v63 }
 0x601   : > { %12716 = vmatpush1.bf16.msra.mxu1 %v16579_v22  ;;  %v14526_v22 = vcombine.low %v8484_v35, %v16810_v7  ;;  %v16813_v7 = vld [vmem:[#allocation2 + $0x50] ss:$0 sps:$4 sm:$0x11]  }
 0x602   : > { %12717 = vmatprep.subr.bf16.mxu1 %v21063_v63 }
 0x603   : > { %v19982_v42 = vpop.f32.mrb[148].mxu0  ;;  %v9582_v41 = vrot.slane %v14526_v22, 1  ;;  %v9586_v22 = vrot.slane %v16813_v7, 1  ;;  %v20032_v7 = vld [vmem:[#allocation2 + $0x70] sm:$0xf] }
 0x604   : > { %21107 = vst [vmem:[#allocation35_spill] sm:$0xff] %v19982_v42  ;;  %v19986_v56 = vpop.f32.mrb[149].mxu0  ;;  %12473 = vmatmul.mubr.bf16.gmra.mrb[76].mxu1 %v9578_v40  ;;  %v8523_v40 = vld [vmem:[#allocation2 + $0x54] sm:$0xf] }
 0x605   : > { %21108 = vst [vmem:[#allocation36_spill] sm:$0xff] %v19986_v56  ;;  %v19988_v58 = vpop.f32.mrb[150].mxu0  ;;  %12480 = vmatprep.mubr.bf16.mxu1 %v19995_v2  ;;  %12718 = vmatpush1.bf16.msra.mxu1 %v16586_v17  ;;  %v9583_v17 = vrot.slane %v16811_v20, 1  ;;  %v8486_v20 = vld [vmem:[#allocation2 + $0x54] sm:$0xe] }
 0x606   : > { %21109 = vst [vmem:[#allocation37_spill] sm:$0xff] %v19988_v58  ;;  %v19990_v25 = vpop.f32.mrb[151].mxu0  ;;  %12719 = vmatprep.subr.bf16.mxu1 %v21063_v63  ;;  %v8533_v56 = vld [vmem:[#allocation2 + $0x90] sm:$0xf] }
 0x607   : > { %21110 = vst [vmem:[#allocation38_spill] sm:$0xff] %v19990_v25  ;;  %v9584_v14 = vsel %vm2977_vm9, %v9582_v41, %v9583_v17  ;;  %v8525_v41 = vld [vmem:[#allocation2 + $0x60] sm:$0xf]  ;;  %v20051_v25 = vld [vmem:[#allocation2 + $0x88] sm:$0xf] }
 0x609   : > { %12720 = vmatpush1.bf16.msra.mxu1 %v16593_v26  ;;  %v20013_v26 = vcombine.low %v8523_v40, %v20008_v43 }
 0x60a   : > { %12721 = vmatprep.subr.bf16.mxu1 %v21063_v63 }
 0x60c   : > { %12481 = vmatmul.mubr.bf16.gmra.mrb[80].mxu1 %v9581_v30  ;;  %v9585_v30 = vrot.slane %v14527_v3, 1 }
 0x60d   : > { %12488 = vmatprep.mubr.bf16.mxu1 %v20004_v16  ;;  %12722 = vmatpush1.bf16.msra.mxu1 %v16600_v46 }
 0x60e   : > { %12723 = vmatprep.subr.bf16.mxu1 %v21063_v63  ;;  %v9587_v17 = vsel %vm2977_vm9, %v9585_v30, %v9586_v22 }
 0x611   : > { %12724 = vmatpush1.bf16.msra.mxu1 %v16607_v34  ;;  %v20025_v34 = vld [vmem:[#allocation2 + $0x64] sm:$0xf] }
 0x612   : > { %12725 = vmatprep.subr.bf16.mxu1 %v21063_v63  ;;  %v20029_v40 = vcombine.low %v8525_v41, %v20025_v34  ;;  %v16816_v41 = vld [vmem:[#allocation2 + $0x64] sm:$0xf] }
 0x614   : > { %12489 = vmatmul.mubr.bf16.gmra.mrb[84].mxu1 %v9584_v14  ;;  %v14528_v14 = vcombine.low %v8486_v20, %v16814_v29  ;;  %v16817_v29 = vld [vmem:[#allocation2 + $0x68] ss:$0 sps:$4 sm:$0x11]  }
 0x615   : > { %12496 = vmatprep.mubr.bf16.mxu1 %v20013_v26  ;;  %12726 = vmatpush1.bf16.msra.mxu1 %v16614_v61  ;;  %v16621_v61 = vld [vmem:[#allocation8 + $0x158] sm:$0xff]  }
 0x616   : > { %12727 = vmatprep.subr.bf16.mxu1 %v21063_v63  ;;  %v9588_v21 = vrot.slane %v14528_v14, 1  ;;  %v20040_v14 = vld [vmem:[#allocation2 + $0x7c] sm:$0xf] }
 0x617   : > { %v20015_v53 = vpop.f32.mrb[152].mxu0 }
 0x618   : > { %21111 = vst [vmem:[#allocation39_spill] sm:$0xff] %v20015_v53  ;;  %v20017_v46 = vpop.f32.mrb[153].mxu0  ;;  %v8527_v53 = vld [vmem:[#allocation2 + $0x6c] sm:$0xf] }
 0x619   : > { %21112 = vst [vmem:[#allocation40_spill] sm:$0xff] %v20017_v46  ;;  %v20020_v47 = vpop.f32.mrb[154].mxu0  ;;  %12728 = vmatpush1.bf16.msra.mxu1 %v16621_v61  ;;  %v20037_v22 = vcombine.low %v8527_v53, %v20032_v7  ;;  %v8529_v61 = vld [vmem:[#allocation2 + $0x78] sm:$0xf]  ;;  %v8488_v46 = vld [vmem:[#allocation2 + $0x6c] sm:$0xe] }
 0x61a   : > { %21113 = vst [vmem:[#allocation41_spill] sm:$0xff] %v20020_v47  ;;  %v20022_v35 = vpop.f32.mrb[155].mxu0  ;;  %v16815_v47 = vld [vmem:[#allocation2 + $0x5c] ss:$0 sps:$4 sm:$0x11]   ;;  %12729 = vmatprep.subr.bf16.mxu1 %v21063_v63  ;;  %v20044_v42 = vcombine.low %v8529_v61, %v20040_v14 }
 0x61b   : > { %21114 = vst [vmem:[#allocation42_spill] sm:$0xff] %v20022_v35  ;;  %v9589_v3 = vrot.slane %v16815_v47, 1  ;;  %v8487_v35 = vld [vmem:[#allocation2 + $0x60] sm:$0xe]  ;;  %v9592_v47 = vrot.slane %v16817_v29, 1 }
 0x61c   : > { %12497 = vmatmul.mubr.bf16.gmra.mrb[88].mxu1 %v9587_v17  ;;  %v14529_v20 = vcombine.low %v8487_v35, %v16816_v41  ;;  %v16628_v35 = vld [vmem:[#allocation8 + $0x160] sm:$0xff]  }
 0x61d   : > { %12504 = vmatprep.mubr.bf16.mxu1 %v20029_v40  ;;  %v9590_v30 = vsel %vm2977_vm9, %v9588_v21, %v9589_v3  ;;  %v16818_v21 = vld [vmem:[#allocation2 + $0x70] sm:$0xf]  ;;  %v16819_v41 = vld [vmem:[#allocation2 + $0x74] ss:$0 sps:$4 sm:$0x11]   ;;  %12730 = vmatpush1.bf16.msra.mxu1 %v16628_v35 }
 0x61e   : > { %v9591_v17 = vrot.slane %v14529_v20, 1  ;;  %v14530_v53 = vcombine.low %v8488_v46, %v16818_v21  ;;  %v9595_v20 = vrot.slane %v16819_v41, 1  ;;  %12731 = vmatprep.subr.bf16.mxu1 %v21063_v63  ;;  %v8489_v46 = vld [vmem:[#allocation2 + $0x78] sm:$0xe] }
 0x620   : > { %v9593_v58 = vsel %vm2977_vm9, %v9591_v17, %v9592_v47 }
 0x624   : > { %12505 = vmatmul.mubr.bf16.gmra.mrb[92].mxu1 %v9590_v30  ;;  %v9594_v30 = vrot.slane %v14530_v53, 1  ;;  %v16820_v53 = vld [vmem:[#allocation2 + $0x7c] sm:$0xf] }
 0x625   : > { %12512 = vmatprep.mubr.bf16.mxu1 %v20037_v22  ;;  %v14531_v41 = vcombine.low %v8489_v46, %v16820_v53 }
 0x626   : > { %v9596_v61 = vsel %vm2977_vm9, %v9594_v30, %v9595_v20  ;;  %v16822_v30 = vld [vmem:[#allocation2 + $0x88] sm:$0xf] }
 0x627   : > { %v9597_v35 = vrot.slane %v14531_v41, 1  ;;  %v14532_v20 = vcombine.low %v8490_v0, %v16822_v30  ;;  %v16823_v41 = vld [vmem:[#allocation2 + $0x8c] ss:$0 sps:$4 sm:$0x11]   ;;  %v8535_v0 = vld [vmem:[#allocation2 + $0x9c] sm:$0xf] }
 0x628   : > { %v9601_v19 = vrot.slane %v16823_v41, 1  ;;  %v16824_v30 = vld [vmem:[#allocation2 + $0x94] sm:$0xf]  ;;  %v16825_v41 = vld [vmem:[#allocation2 + $0x98] ss:$0 sps:$4 sm:$0x11]  }
 0x629   : > { %v9600_v53 = vrot.slane %v14532_v20, 1 }
 0x62c   : > { %12513 = vmatmul.mubr.bf16.gmra.mrb[96].mxu1 %v9593_v58  ;;  %v8531_v58 = vld [vmem:[#allocation2 + $0x84] sm:$0xf] }
 0x62d   : > { %12520 = vmatprep.mubr.bf16.mxu1 %v20044_v42  ;;  %v20060_v21 = vcombine.low %v8531_v58, %v20051_v25 }
 0x632   : > { %v20047_v3 = vpop.f32.mrb[156].mxu0 }
 0x633   : > { %21115 = vst [vmem:[#allocation43_spill] sm:$0xff] %v20047_v3  ;;  %v20049_v29 = vpop.f32.mrb[157].mxu0  ;;  %v16821_v3 = vld [vmem:[#allocation2 + $0x80] ss:$0 sps:$4 sm:$0x11]  }
 0x634   : > { %21116 = vst [vmem:[#allocation44_spill] sm:$0xff] %v20049_v29  ;;  %v20053_v17 = vpop.f32.mrb[158].mxu0  ;;  %12521 = vmatmul.mubr.bf16.gmra.mrb[100].mxu1 %v9596_v61  ;;  %v9598_v29 = vrot.slane %v16821_v3, 1  ;;  %v16635_v61 = vld [vmem:[#allocation8 + $0x168] sm:$0xff]  }
 0x635   : > { %21117 = vst [vmem:[#allocation45_spill] sm:$0xff] %v20053_v17  ;;  %v20056_v47 = vpop.f32.mrb[159].mxu0  ;;  %12528 = vmatprep.mubr.bf16.mxu1 %v20060_v21  ;;  %v20063_v17 = vld [vmem:[#allocation2 + $0x94] sm:$0xf]  ;;  %12732 = vmatpush1.bf16.msra.mxu1 %v16635_v61  ;;  %v20086_v61 = vld [vmem:[#allocation2 + $0xac] sm:$0xf] }
 0x636   : > { %21118 = vst [vmem:[#allocation46_spill] sm:$0xff] %v20056_v47  ;;  %v9599_v47 = vsel %vm2977_vm9, %v9597_v35, %v9598_v29  ;;  %v20067_v13 = vcombine.low %v8533_v56, %v20063_v17  ;;  %v20078_v56 = vld [vmem:[#allocation2 + $0xa0] sm:$0xf]  ;;  %12733 = vmatprep.subr.bf16.mxu1 %v21063_v63  ;;  %v8491_v29 = vld [vmem:[#allocation2 + $0x90] sm:$0xe] }
 0x637   : > { %v20083_v35 = vcombine.low %v8535_v0, %v20078_v56  ;;  %v16642_v0 = vld [vmem:[#allocation8 + $0x170] sm:$0xff]  }
 0x639   : > { %12734 = vmatpush1.bf16.msra.mxu1 %v16642_v0 }
 0x63a   : > { %12735 = vmatprep.subr.bf16.mxu1 %v21063_v63 }
 0x63c   : > { %12529 = vmatmul.mubr.bf16.gmra.mrb[104].mxu1 %v9599_v47  ;;  %v9602_v47 = vsel %vm2977_vm9, %v9600_v53, %v9601_v19  ;;  %v16826_v19 = vld [vmem:[#allocation2 + $0xa0] sm:$0xf] }
 0x63d   : > { %12536 = vmatprep.mubr.bf16.mxu1 %v20067_v13 }
 0x63f   : > { %v20069_v58 = vpop.f32.mrb[160].mxu0 }
 0x640   : > { %21119 = vst [vmem:[#allocation47_spill] sm:$0xff] %v20069_v58  ;;  %v20072_v46 = vpop.f32.mrb[161].mxu0  ;;  %v14533_v58 = vcombine.low %v8491_v29, %v16824_v30 }
 0x641   : > { %21120 = vst [vmem:[#allocation48_spill] sm:$0xff] %v20072_v46  ;;  %v20074_v3 = vpop.f32.mrb[162].mxu0  ;;  %v8492_v46 = vld [vmem:[#allocation2 + $0x9c] sm:$0xe] }
 0x642   : > { %21121 = vst [vmem:[#allocation49_spill] sm:$0xff] %v20074_v3  ;;  %v20076_v51 = vpop.f32.mrb[163].mxu0  ;;  %v9603_v20 = vrot.slane %v14533_v58, 1  ;;  %v9604_v3 = vrot.slane %v16825_v41, 1  ;;  %v14534_v53 = vcombine.low %v8492_v46, %v16826_v19  ;;  %v20095_v41 = vld [vmem:[#allocation2 + $0xb8] sm:$0xf] }
 0x643   : > { %21122 = vst [vmem:[#allocation50_spill] sm:$0xff] %v20076_v51  ;;  %v8537_v51 = vld [vmem:[#allocation2 + $0xa8] sm:$0xf] }
 0x644   : > { %12537 = vmatmul.mubr.bf16.gmra.mrb[108].mxu1 %v9602_v47  ;;  %v9605_v24 = vsel %vm2977_vm9, %v9603_v20, %v9604_v3  ;;  %v20090_v33 = vcombine.low %v8537_v51, %v20086_v61  ;;  %v9606_v29 = vrot.slane %v14534_v53, 1  ;;  %v16827_v47 = vld [vmem:[#allocation2 + $0xa4] ss:$0 sps:$4 sm:$0x11]   ;;  %v8539_v3 = vld [vmem:[#allocation2 + $0xb4] sm:$0xf] }
 0x645   : > { %12544 = vmatprep.mubr.bf16.mxu1 %v20083_v35  ;;  %v9607_v58 = vrot.slane %v16827_v47, 1  ;;  %v8493_v46 = vld [vmem:[#allocation2 + $0xa8] sm:$0xe]  ;;  %v20106_v19 = vcombine.low %v8539_v3, %v20095_v41  ;;  %v16828_v53 = vld [vmem:[#allocation2 + $0xac] sm:$0xf] }
 0x646   : > { %v14535_v47 = vcombine.low %v8493_v46, %v16828_v53  ;;  %v16649_v3 = vld [vmem:[#allocation8 + $0x178] sm:$0xff]   ;;  %v8495_v46 = vld [vmem:[#allocation2 + $0xd8] sm:$0xe]  ;;  %v16831_v53 = vld [vmem:[#allocation2 + $0xbc] ss:$0 sps:$4 sm:$0x11]  }
 0x647   : > { %v9608_v20 = vsel %vm2977_vm9, %v9606_v29, %v9607_v58  ;;  %v16830_v29 = vld [vmem:[#allocation2 + $0xb8] sm:$0xf]  ;;  %12736 = vmatpush1.bf16.msra.mxu1 %v16649_v3  ;;  %v16833_v3 = vld [vmem:[#allocation2 + $0xe0] ss:$0 sps:$4 sm:$0x11]  }
 0x648   : > { %v9609_v0 = vrot.slane %v14535_v47, 1  ;;  %v14536_v58 = vcombine.low %v8494_v9, %v16830_v29  ;;  %v9613_v47 = vrot.slane %v16831_v53, 1  ;;  %12994 = vmatprep.subr.bf16.mxu1 %v21063_v63  ;;  %v9616_v53 = vrot.slane %v16833_v3, 1  ;;  %v16835_v3 = vld [vmem:[#allocation2 + $0xec] ss:$0 sps:$4 sm:$0x11]  }
 0x64c   : > { %12545 = vmatmul.mubr.bf16.gmra.mrb[112].mxu1 %v9605_v24 }
 0x64d   : > { %12552 = vmatprep.mubr.bf16.mxu1 %v20090_v33 }
 0x650   : > { %v20093_v30 = vpop.f32.mrb[164].mxu0 }
 0x651   : > { %21123 = vst [vmem:[#allocation51_spill] sm:$0xff] %v20093_v30  ;;  %v20097_v60 = vpop.f32.mrb[165].mxu0  ;;  %v16829_v30 = vld [vmem:[#allocation2 + $0xb0] ss:$0 sps:$4 sm:$0x11]  }
 0x652   : > { %21124 = vst [vmem:[#allocation52_spill] sm:$0xff] %v20097_v60  ;;  %v20100_v51 = vpop.f32.mrb[166].mxu0  ;;  %v9610_v60 = vrot.slane %v16829_v30, 1  ;;  %v20116_v30 = vld [vmem:[#allocation2 + $0xe8] sm:$0xf] }
 0x653   : > { %21125 = vst [vmem:[#allocation53_spill] sm:$0xff] %v20100_v51  ;;  %v20102_v24 = vpop.f32.mrb[167].mxu0  ;;  %v8541_v51 = vld [vmem:[#allocation2 + $0xc0] sm:$0xf] }
 0x654   : > { %21126 = vst [vmem:[#allocation54_spill] sm:$0xff] %v20102_v24  ;;  %12553 = vmatmul.mubr.bf16.gmra.mrb[116].mxu1 %v9608_v20  ;;  %v9611_v37 = vsel %vm2977_vm9, %v9609_v0, %v9610_v60  ;;  %v20113_v24 = vcombine.low %v8541_v51, %v20109_v45  ;;  %v9612_v20 = vrot.slane %v14536_v58, 1  ;;  %v14537_v60 = vcombine.low %v8495_v46, %v16832_v38  ;;  %v8543_v0 = vld [vmem:[#allocation2 + $0xe4] sm:$0xf]  ;;  %v20132_v38 = vld [vmem:[#allocation2 + $0xf4] sm:$0xf] }
 0x655   : > { %12560 = vmatprep.mubr.bf16.mxu1 %v20106_v19  ;;  %v20121_v9 = vcombine.low %v8543_v0, %v20116_v30 }
 0x656   : > { %v9614_v51 = vsel %vm2977_vm9, %v9612_v20, %v9613_v47  ;;  %v9615_v58 = vrot.slane %v14537_v60, 1  ;;  %v8545_v20 = vld [vmem:[#allocation2 + $0xf0] sm:$0xf]  ;;  %v8496_v47 = vld [vmem:[#allocation2 + $0xe4] sm:$0xe] }
 0x657   : > { %v20136_v0 = vcombine.low %v8545_v20, %v20132_v38 }
 0x658   : > { %v9617_v46 = vsel %vm2977_vm9, %v9615_v58, %v9616_v53  ;;  %v16836_v53 = vld [vmem:[#allocation2 + $0xf4] sm:$0xf] }
 0x659   : > { %v14539_v20 = vcombine.low %v8497_v28, %v16836_v53  ;;  %v16838_v53 = vld [vmem:[#allocation2 + $0x100] sm:$0xf] }
 0x65c   : > { %12561 = vmatmul.mubr.bf16.gmra.mrb[120].mxu1 %v9611_v37 }
 0x65d   : > { %12568 = vmatprep.mubr.bf16.mxu1 %v20113_v24 }
 0x664   : > { %12569 = vmatmul.mubr.bf16.gmra.mrb[124].mxu1 %v9614_v51  ;;  %v16834_v51 = vld [vmem:[#allocation2 + $0xe8] sm:$0xf] }
 0x665   : > { %v20123_v37 = vpop.f32.mrb[168].mxu0  ;;  %12576 = vmatprep.mubr.bf16.mxu1 %v20121_v9 }
 0x666   : > { %21127 = vst [vmem:[#allocation55_spill] sm:$0xff] %v20123_v37  ;;  %v20125_v29 = vpop.f32.mrb[169].mxu0  ;;  %v14538_v37 = vcombine.low %v8496_v47, %v16834_v51  ;;  %v16837_v47 = vld [vmem:[#allocation2 + $0xf8] ss:$0 sps:$4 sm:$0x11]  }
 0x667   : > { %21128 = vst [vmem:[#allocation56_spill] sm:$0xff] %v20125_v29  ;;  %v20128_v59 = vpop.f32.mrb[170].mxu0  ;;  %v9619_v29 = vrot.slane %v16835_v3, 1  ;;  %v9622_v51 = vrot.slane %v16837_v47, 1  ;;  %v20148_v3 = vld [vmem:[#allocation2 + $0x10c] sm:$0xf] }
 0x668   : > { %21129 = vst [vmem:[#allocation57_spill] sm:$0xff] %v20128_v59  ;;  %v20130_v31 = vpop.f32.mrb[171].mxu0  ;;  %v9618_v60 = vrot.slane %v14538_v37, 1  ;;  %v20139_v59 = vld [vmem:[#allocation2 + $0x100] sm:$0xf]  ;;  %21132 = vst [vmem:[#allocation60_spill] sm:$0xff] %v20148_v3 }
 0x669   : > { %21130 = vst [vmem:[#allocation58_spill] sm:$0xff] %v20130_v31  ;;  %v8547_v31 = vld [vmem:[#allocation2 + $0xfc] sm:$0xf] }
 0x66a   : > { %v9620_v50 = vsel %vm2977_vm9, %v9618_v60, %v9619_v29  ;;  %v20143_v58 = vcombine.low %v8547_v31, %v20139_v59  ;;  %v8549_v29 = vld [vmem:[#allocation2 + $0x108] sm:$0xf]  ;;  %v8498_v60 = vld [vmem:[#allocation2 + $0xfc] sm:$0xe] }
 0x66c   : > { %12577 = vmatmul.mubr.bf16.gmra.mrb[128].mxu1 %v9617_v46  ;;  %v9621_v46 = vrot.slane %v14539_v20, 1  ;;  %v14540_v20 = vcombine.low %v8498_v60, %v16838_v53  ;;  %v16841_v60 = vld [vmem:[#allocation2 + $0x110] ss:$0 sps:$4 sm:$0x11]   ;;  %v20168_v53 = vld [vmem:[#allocation2 + $0x124] sm:$0xf] }
 0x66d   : > { %12584 = vmatprep.mubr.bf16.mxu1 %v20136_v0  ;;  %21139 = vst [vmem:[#allocation67_spill] sm:$0xff] %v20168_v53 }
 0x66e   : > { %v9623_v28 = vsel %vm2977_vm9, %v9621_v46, %v9622_v51  ;;  %v9624_v47 = vrot.slane %v14540_v20, 1  ;;  %v16840_v46 = vld [vmem:[#allocation2 + $0x10c] sm:$0xf]  ;;  %v8500_v20 = vld [vmem:[#allocation2 + $0x114] sm:$0xe] }
 0x66f   : > { %v14541_v51 = vcombine.low %v8499_v8, %v16840_v46 }
 0x674   : > { %12585 = vmatmul.mubr.bf16.gmra.mrb[132].mxu1 %v9620_v50  ;;  %v20158_v50 = vcombine.low %v8549_v29, %v20148_v3  ;;  %v9627_v29 = vrot.slane %v14541_v51, 1 }
 0x675   : > { %12592 = vmatprep.mubr.bf16.mxu1 %v20143_v58 }
 0x676   : > { %21136 = vst [vmem:[#allocation64_spill] sm:$0xff] %v20158_v50 }
 0x677   : > { %v20146_v37 = vpop.f32.mrb[172].mxu0 }
 0x678   : > { %21131 = vst [vmem:[#allocation59_spill] sm:$0xff] %v20146_v37  ;;  %v20150_v12 = vpop.f32.mrb[173].mxu0  ;;  %v16839_v37 = vld [vmem:[#allocation2 + $0x104] ss:$0 sps:$4 sm:$0x11]  }
 0x679   : > { %21133 = vst [vmem:[#allocation61_spill] sm:$0xff] %v20150_v12  ;;  %v20152_v1 = vpop.f32.mrb[174].mxu0  ;;  %v9625_v15 = vrot.slane %v16839_v37, 1  ;;  %v20161_v12 = vld [vmem:[#allocation2 + $0x118] sm:$0xf] }
 0x67a   : > { %21134 = vst [vmem:[#allocation62_spill] sm:$0xff] %v20152_v1  ;;  %v20154_v31 = vpop.f32.mrb[175].mxu0  ;;  %21137 = vst [vmem:[#allocation65_spill] sm:$0xff] %v20161_v12  ;;  %v8551_v1 = vld [vmem:[#allocation2 + $0x114] sm:$0xf] }
 0x67b   : > { %21135 = vst [vmem:[#allocation63_spill] sm:$0xff] %v20154_v31  ;;  %v9626_v18 = vsel %vm2977_vm9, %v9624_v47, %v9625_v15  ;;  %v20165_v31 = vcombine.low %v8551_v1, %v20161_v12  ;;  %v8553_v37 = vld [vmem:[#allocation2 + $0x120] sm:$0xf]  ;;  %v16842_v1 = vld [vmem:[#allocation2 + $0x118] sm:$0xf] }
 0x67c   : > { %12593 = vmatmul.mubr.bf16.gmra.mrb[136].mxu1 %v9623_v28  ;;  %v9628_v28 = vrot.slane %v16841_v60, 1  ;;  %v20172_v3 = vcombine.low %v8553_v37, %v20168_v53  ;;  %v14542_v47 = vcombine.low %v8500_v20, %v16842_v1  ;;  %v16843_v60 = vld [vmem:[#allocation2 + $0x11c] ss:$0 sps:$4 sm:$0x11]   ;;  %v8501_v37 = vld [vmem:[#allocation2 + $0x120] sm:$0xe] }
 0x67d   : > { %12600 = vmatprep.mubr.bf16.mxu1 %v20158_v50  ;;  %21138 = vst [vmem:[#allocation66_spill] sm:$0xff] %v20165_v31 }
 0x67e   : > { %v9629_v50 = vsel %vm2977_vm9, %v9627_v29, %v9628_v28  ;;  %21140 = vst [vmem:[#allocation68_spill] sm:$0xff] %v20172_v3  ;;  %v9630_v51 = vrot.slane %v14542_v47, 1  ;;  %v20183_v29 = vld [vmem:[#allocation2 + $0x130] sm:$0xf]  ;;  %v8555_v28 = vld [vmem:[#allocation2 + $0x12c] sm:$0xf] }
 0x67f   : > { %21145 = vst [vmem:[#allocation73_spill] sm:$0xff] %v20183_v29  ;;  %v20187_v20 = vcombine.low %v8555_v28, %v20183_v29  ;;  %v20190_v47 = vld [vmem:[#allocation2 + $0x13c] sm:$0xf] }
 0x680   : > { %21147 = vst [vmem:[#allocation75_spill] sm:$0xff] %v20190_v47 }
 0x681   : > { %21146 = vst [vmem:[#allocation74_spill] sm:$0xff] %v20187_v20 }
 0x684   : > { %12601 = vmatmul.mubr.bf16.gmra.mrb[140].mxu1 %v9626_v18 }
 0x685   : > { %12608 = vmatprep.mubr.bf16.mxu1 %v20165_v31  ;;  %v9631_v31 = vrot.slane %v16843_v60, 1  ;;  %v8557_v60 = vld [vmem:[#allocation2 + $0x138] sm:$0xf] }
 0x686   : > { %v20194_v12 = vcombine.low %v8557_v60, %v20190_v47  ;;  %v8503_v60 = vld [vmem:[#allocation2 + $0x138] sm:$0xe]  ;;  %v8504_v47 = vld [vmem:[#allocation2 + $0x144] sm:$0xe] }
 0x688   : > { %21148 = vst [vmem:[#allocation76_spill] sm:$0xff] %v20194_v12 }
 0x68c   : > { %v20174_v15 = vpop.f32.mrb[176].mxu0  ;;  %12609 = vmatmul.mubr.bf16.gmra.mrb[144].mxu1 %v9629_v50  ;;  %v16844_v50 = vld [vmem:[#allocation2 + $0x124] sm:$0xf] }
 0x68d   : > { %21141 = vst [vmem:[#allocation69_spill] sm:$0xff] %v20174_v15  ;;  %v20176_v18 = vpop.f32.mrb[177].mxu0  ;;  %12616 = vmatprep.mubr.bf16.mxu1 %v20172_v3  ;;  %v9632_v15 = vsel %vm2977_vm9, %v9630_v51, %v9631_v31  ;;  %v14543_v1 = vcombine.low %v8501_v37, %v16844_v50  ;;  %v8502_v3 = vld [vmem:[#allocation2 + $0x12c] sm:$0xe]  ;;  %v16846_v31 = vld [vmem:[#allocation2 + $0x130] sm:$0xf] }
 0x68e   : > { %21142 = vst [vmem:[#allocation70_spill] sm:$0xff] %v20176_v18  ;;  %v20179_v8 = vpop.f32.mrb[178].mxu0  ;;  %v16845_v18 = vld [vmem:[#allocation2 + $0x128] ss:$0 sps:$4 sm:$0x11]   ;;  %v14544_v51 = vcombine.low %v8502_v3, %v16846_v31 }
 0x68f   : > { %21143 = vst [vmem:[#allocation71_spill] sm:$0xff] %v20179_v8  ;;  %v20181_v46 = vpop.f32.mrb[179].mxu0  ;;  %v9633_v8 = vrot.slane %v14543_v1, 1  ;;  %v16848_v31 = vld [vmem:[#allocation2 + $0x13c] sm:$0xf] }
 0x690   : > { %21144 = vst [vmem:[#allocation72_spill] sm:$0xff] %v20181_v46  ;;  %v9634_v46 = vrot.slane %v16845_v18, 1  ;;  %v9636_v37 = vrot.slane %v14544_v51, 1  ;;  %v16847_v18 = vld [vmem:[#allocation2 + $0x134] ss:$0 sps:$4 sm:$0x11]  }
 0x691   : > { %v9637_v50 = vrot.slane %v16847_v18, 1  ;;  %v16849_v18 = vld [vmem:[#allocation2 + $0x140] ss:$0 sps:$4 sm:$0x11]  }
 0x692   : > { %v9635_v53 = vsel %vm2977_vm9, %v9633_v8, %v9634_v46  ;;  %v8559_v46 = vld [vmem:[#allocation2 + $0x144] sm:$0xf] }
 0x693   : > { %v9638_v3 = vsel %vm2977_vm9, %v9636_v37, %v9637_v50  ;;  %v16850_v37 = vld [vmem:[#allocation2 + $0x148] sm:$0xf] }
 0x694   : > { %12617 = vmatmul.mubr.bf16.gmra.mrb[148].mxu1 %v9632_v15  ;;  %v14546_v50 = vcombine.low %v8504_v47, %v16850_v37  ;;  %v20226_v37 = vld [vmem:[#allocation2 + $0x16c] sm:$0xf] }
 0x695   : > { %12624 = vmatprep.mubr.bf16.mxu1 %v20187_v20  ;;  %v20203_v20 = vld [vmem:[#allocation2 + $0x148] sm:$0xf] }
 0x696   : > { %21152 = vst [vmem:[#allocation80_spill] sm:$0xff] %v20203_v20 }
 0x69c   : > { %12625 = vmatmul.mubr.bf16.gmra.mrb[152].mxu1 %v9635_v53  ;;  %v20209_v53 = vcombine.low %v8559_v46, %v20203_v20  ;;  %v9642_v46 = vrot.slane %v14546_v50, 1  ;;  %v8565_v50 = vld [vmem:[#allocation2 + $0x168] sm:$0xf] }
 0x69d   : > { %12632 = vmatprep.mubr.bf16.mxu1 %v20194_v12  ;;  %v8561_v12 = vld [vmem:[#allocation2 + $0x150] sm:$0xf] }
 0x69e   : > { %v20197_v15 = vpop.f32.mrb[180].mxu0  ;;  %21154 = vst [vmem:[#allocation82_spill] sm:$0xff] %v20209_v53 }
 0x69f   : > { %21149 = vst [vmem:[#allocation77_spill] sm:$0xff] %v20197_v15  ;;  %v20199_v28 = vpop.f32.mrb[181].mxu0  ;;  %v14545_v15 = vcombine.low %v8503_v60, %v16848_v31  ;;  %v16851_v60 = vld [vmem:[#allocation2 + $0x14c] ss:$0 sps:$4 sm:$0x11]  }
 0x6a0   : > { %21150 = vst [vmem:[#allocation78_spill] sm:$0xff] %v20199_v28  ;;  %v20201_v1 = vpop.f32.mrb[182].mxu0  ;;  %v9640_v28 = vrot.slane %v16849_v18, 1  ;;  %v8563_v31 = vld [vmem:[#allocation2 + $0x15c] sm:$0xf] }
 0x6a1   : > { %21151 = vst [vmem:[#allocation79_spill] sm:$0xff] %v20201_v1  ;;  %v20205_v8 = vpop.f32.mrb[183].mxu0  ;;  %v9639_v51 = vrot.slane %v14545_v15, 1  ;;  %v20212_v1 = vld [vmem:[#allocation2 + $0x154] sm:$0xf] }
 0x6a2   : > { %21153 = vst [vmem:[#allocation81_spill] sm:$0xff] %v20205_v8  ;;  %21155 = vst [vmem:[#allocation83_spill] sm:$0xff] %v20212_v1  ;;  %v20216_v29 = vcombine.low %v8561_v12, %v20212_v1  ;;  %v20219_v15 = vld [vmem:[#allocation2 + $0x160] sm:$0xf]  ;;  %v8505_v18 = vld [vmem:[#allocation2 + $0x150] sm:$0xe]  ;;  %v20230_v1 = vcombine.low %v8565_v50, %v20226_v37 }
 0x6a3   : > { %v9641_v8 = vsel %vm2977_vm9, %v9639_v51, %v9640_v28  ;;  %21157 = vst [vmem:[#allocation85_spill] sm:$0xff] %v20219_v15  ;;  %v20223_v20 = vcombine.low %v8563_v31, %v20219_v15  ;;  %v16852_v28 = vld [vmem:[#allocation2 + $0x154] sm:$0xf]  ;;  %v16855_v31 = vld [vmem:[#allocation2 + $0x164] ss:$0 sps:$4 sm:$0x11]  }
 0x6a4   : > { %12633 = vmatmul.mubr.bf16.gmra.mrb[156].mxu1 %v9638_v3  ;;  %21156 = vst [vmem:[#allocation84_spill] sm:$0xff] %v20216_v29  ;;  %v9643_v3 = vrot.slane %v16851_v60, 1  ;;  %v14547_v12 = vcombine.low %v8505_v18, %v16852_v28  ;;  %v8506_v60 = vld [vmem:[#allocation2 + $0x15c] sm:$0xe]  ;;  %v9649_v18 = vrot.slane %v16855_v31, 1 }
 0x6a5   : > { %12640 = vmatprep.mubr.bf16.mxu1 %v20209_v53  ;;  %21158 = vst [vmem:[#allocation86_spill] sm:$0xff] %v20223_v20  ;;  %v20233_v28 = vld [vmem:[#allocation2 + $0x178] sm:$0xf]  ;;  %v20242_v50 = vld [vmem:[#allocation2 + $0x184] sm:$0xf] }
 0x6a6   : > { %v9644_v53 = vsel %vm2977_vm9, %v9642_v46, %v9643_v3  ;;  %v9645_v47 = vrot.slane %v14547_v12, 1  ;;  %v16854_v46 = vld [vmem:[#allocation2 + $0x160] sm:$0xf]  ;;  %v8567_v12 = vld [vmem:[#allocation2 + $0x174] sm:$0xf] }
 0x6a7   : > { %v14548_v3 = vcombine.low %v8506_v60, %v16854_v46  ;;  %v20237_v15 = vcombine.low %v8567_v12, %v20233_v28  ;;  %v8569_v60 = vld [vmem:[#allocation2 + $0x180] sm:$0xf]  ;;  %v8508_v46 = vld [vmem:[#allocation2 + $0x174] sm:$0xe]  ;;  %v8571_v12 = vld [vmem:[#allocation2 + $0x18c] sm:$0xf] }
 0x6a8   : > { %v20246_v31 = vcombine.low %v8569_v60, %v20242_v50  ;;  %v8574_v60 = vld [vmem:[#allocation2 + $0x19c] sm:$0xf] }
 0x6aa   : > { %21159 = vst [vmem:[#allocation87_spill] sm:$0xff] %v20246_v31 }
 0x6ac   : > { %12641 = vmatmul.mubr.bf16.gmra.mrb[160].mxu1 %v9641_v8  ;;  %v16853_v8 = vld [vmem:[#allocation2 + $0x158] ss:$0 sps:$4 sm:$0x11]  }
 0x6ad   : > { %12648 = vmatprep.mubr.bf16.mxu1 %v20216_v29  ;;  %v9646_v51 = vrot.slane %v16853_v8, 1  ;;  %v8507_v8 = vld [vmem:[#allocation2 + $0x168] sm:$0xe] }
 0x6af   : > { %v9647_v29 = vsel %vm2977_vm9, %v9645_v47, %v9646_v51  ;;  %v14549_v47 = vcombine.low %v8507_v8, %v19880_v44  ;;  %v9652_v51 = vrot.slane %v19882_v49, 1  ;;  %v8509_v49 = vld [vmem:[#allocation2 + $0x180] sm:$0xe] }
 0x6b4   : > { %12649 = vmatmul.mubr.bf16.gmra.mrb[164].mxu1 %v9644_v53  ;;  %v9648_v53 = vrot.slane %v14548_v3, 1 }
 0x6b5   : > { %12656 = vmatprep.mubr.bf16.mxu1 %v20223_v20 }
 0x6b6   : > { %v9650_v20 = vsel %vm2977_vm9, %v9648_v53, %v9649_v18  ;;  %v14550_v53 = vcombine.low %v8508_v46, %v19897_v36  ;;  %v8572_v18 = vld [vmem:[#allocation2 + $0x190] sm:$0xf]  ;;  %v9658_v36 = vrot.slane %v19913_v6, 1  ;;  %v8573_v46 = vld [vmem:[#allocation2 + $0x198] sm:$0xf]  ;;  %v9661_v6 = vrot.slane %v19929_v11, 1 }
 0x6b8   : > { %v9654_v44 = vrot.slane %v14550_v53, 1  ;;  %v8607_v53 = vld [vmem:[#allocation2 + $0xc] sm:$0xe] }
 0x6bc   : > { %12657 = vmatmul.mubr.bf16.gmra.mrb[168].mxu1 %v9647_v29  ;;  %v9651_v29 = vrot.slane %v14549_v47, 1  ;;  %v20252_v47 = vcombine.low %v8571_v12, %v8572_v18  ;;  %v9986_v18 = vshll.u32 %v19945_v32, 16 }
 0x6bd   : > { %12664 = vmatprep.mubr.bf16.mxu1 %v20230_v1 }
 0x6be   : > { %v9653_v3 = vsel %vm2977_vm9, %v9651_v29, %v9652_v51  ;;  %21160 = vst [vmem:[#allocation88_spill] sm:$0xff] %v20252_v47  ;;  %v14551_v29 = vcombine.low %v8509_v49, %v19903_v52  ;;  %v16651_v52 = vld [vmem:[#allocation2 + $0x14] ss:$0 sps:$4 sm:$0x11]  }
 0x6c0   : > { %v9657_v51 = vrot.slane %v14551_v29, 1  ;;  %v9988_v29 = vrot.slane %v9986_v18, 1  ;;  %v8609_v18 = vld [vmem:[#allocation2 + $0x24] sm:$0xe] }
 0x6c4   : > { %12665 = vmatmul.mubr.bf16.gmra.mrb[172].mxu1 %v9650_v20  ;;  %v9655_v20 = vrot.slane %v19899_v4, 1  ;;  %v9659_v4 = vsel %vm2977_vm9, %v9657_v51, %v9658_v36 }
 0x6c5   : > { %12672 = vmatprep.mubr.bf16.mxu1 %v20237_v15 }
 0x6c6   : > { %v9656_v8 = vsel %vm2977_vm9, %v9654_v44, %v9655_v20  ;;  %v14617_v20 = vcombine.low %v8607_v53, %v19942_v39  ;;  %v16652_v39 = vld [vmem:[#allocation2 + $0x20] ss:$0 sps:$4 sm:$0x11]  }
 0x6c8   : > { %v10495_v49 = vrot.slane %v14617_v20, 1  ;;  %v16653_v20 = vld [vmem:[#allocation8 + $0x180] sm:$0xff]  }
 0x6cc   : > { %12673 = vmatmul.mubr.bf16.gmra.mrb[176].mxu1 %v9653_v3  ;;  %v8510_v3 = vld [vmem:[#allocation2 + $0x18c] sm:$0xe] }
 0x6cd   : > { %12680 = vmatprep.mubr.bf16.mxu1 %v20246_v31  ;;  %v20258_v31 = vcombine.low %v8573_v46, %v8574_v60  ;;  %v14552_v44 = vcombine.low %v8510_v3, %v19920_v55  ;;  %v9984_v60 = vshrl.u32 %v19945_v32, 16  ;;  %v9991_v46 = vshll.u32 %v16651_v52, 16 }
 0x6ce   : > { %v9998_v3 = vshll.u32 %v19952_v62, 16  ;;  %v9996_v32 = vshrl.u32 %v19952_v62, 16 }
 0x6cf   : > { %v9660_v12 = vrot.slane %v14552_v44, 1  ;;  %v9989_v53 = vor.u32 %v9988_v29, %v9984_v60  ;;  %v9993_v44 = vrot.slane %v9991_v46, 1  ;;  %v10010_v29 = vshll.u32 %v19969_v54, 16  ;;  %v8610_v46 = vld [vmem:[#allocation2 + $0x30] sm:$0xe] }
 0x6d0   : > { %v14620_v62 = vcombine.low %v8610_v46, %v19973_v57  ;;  %v16665_v57 = vld [vmem:[#allocation8 + $0x1a0] sm:$0xff]  }
 0x6d1   : > { %v9662_v51 = vsel %vm2977_vm9, %v9660_v12, %v9661_v6  ;;  %v9994_v12 = vsel %vm2464_vm0, %v9989_v53, %v9993_v44  ;;  %v10000_v6 = vrot.slane %v9998_v3, 1  ;;  %v10012_v53 = vrot.slane %v10010_v29, 1  ;;  %v16657_v29 = vld [vmem:[#allocation2 + $0x44] ss:$0 sps:$4 sm:$0x11]  }
 0x6d4   : > { %12681 = vmatmul.mubr.bf16.gmra.mrb[180].mxu1 %v9656_v8  ;;  %v10496_v8 = vrot.slane %v16651_v52, 1  ;;  %v10003_v52 = vshll.u32 %v16652_v39, 16 }
 0x6d5   : > { %12688 = vmatprep.mubr.bf16.mxu1 %v20252_v47  ;;  %v8608_v47 = vld [vmem:[#allocation2 + $0x18] sm:$0xe] }
 0x6d6   : > { %v14618_v36 = vcombine.low %v8608_v47, %v19948_v27  ;;  %v10497_v55 = vsel %vm2977_vm9, %v10495_v49, %v10496_v8  ;;  %v14619_v27 = vcombine.low %v8609_v18, %v19964_v10  ;;  %v16654_v49 = vld [vmem:[#allocation2 + $0x2c] ss:$0 sps:$4 sm:$0x11]   ;;  %v16656_v8 = vld [vmem:[#allocation8 + $0x188] sm:$0xff]   ;;  %v10005_v60 = vrot.slane %v10003_v52, 1  ;;  %v16659_v10 = vld [vmem:[#allocation8 + $0x190] sm:$0xff]  }
 0x6d7   : > { %v10015_v44 = vshll.u32 %v16654_v49, 16  ;;  %v10022_v18 = vshll.u32 %v19978_v23, 16 }
 0x6d8   : > { %v10498_v11 = vrot.slane %v14618_v36, 1  ;;  %v10501_v36 = vrot.slane %v14619_v27, 1 }
 0x6dc   : > { %12689 = vmatmul.mubr.bf16.gmra.mrb[184].mxu1 %v9659_v4  ;;  %v10499_v4 = vrot.slane %v16652_v39, 1 }
 0x6dd   : > { %12696 = vmatprep.mubr.bf16.mxu1 %v20258_v31 }
 0x6de   : > { %v10500_v47 = vsel %vm2977_vm9, %v10498_v11, %v10499_v4  ;;  %v16655_v11 = vld [vmem:[#allocation2 + $0x38] ss:$0 sps:$4 sm:$0x11]   ;;  %v10008_v4 = vshrl.u32 %v19969_v54, 16 }
 0x6df   : > { %v10505_v27 = vrot.slane %v16655_v11, 1 }
 0x6e4   : > { %12697 = vmatmul.mubr.bf16.gmra.mrb[188].mxu1 %v9662_v51  ;;  %v10001_v51 = vor.u32 %v10000_v6, %v9996_v32  ;;  %v10504_v6 = vrot.slane %v14620_v62, 1  ;;  %v8611_v32 = vld [vmem:[#allocation2 + $0x3c] sm:$0xe]  ;;  %v8612_v62 = vld [vmem:[#allocation2 + $0x48] sm:$0xe] }
 0x6e5   : > { %12737 = vmatprep.mubr.bf16.mxu1 %v10497_v55  ;;  %v10502_v55 = vrot.slane %v16654_v49, 1  ;;  %v14621_v54 = vcombine.low %v8611_v32, %v19984_v48  ;;  %v16671_v48 = vld [vmem:[#allocation8 + $0x1b0] sm:$0xff]  }
 0x6e6   : > { %v10006_v3 = vsel %vm2464_vm0, %v10001_v51, %v10005_v60  ;;  %v10506_v49 = vsel %vm2977_vm9, %v10504_v6, %v10505_v27  ;;  %v10020_v51 = vshrl.u32 %v19978_v23, 16  ;;  %v10034_v60 = vshll.u32 %v19995_v2, 16 }
 0x6e7   : > { %v10503_v39 = vsel %vm2977_vm9, %v10501_v36, %v10502_v55  ;;  %v10027_v36 = vshll.u32 %v16655_v11, 16  ;;  %v16668_v55 = vld [vmem:[#allocation8 + $0x1a8] sm:$0xff]   ;;  %v10507_v46 = vrot.slane %v14621_v54, 1  ;;  %v14622_v23 = vcombine.low %v8612_v62, %v19999_v5  ;;  %v16677_v5 = vld [vmem:[#allocation8 + $0x1c0] sm:$0xff]  }
 0x6e8   : > { %v10046_v6 = vshll.u32 %v20004_v16, 16 }
 0x6ea   : > { %v10048_v54 = vrot.slane %v10046_v6, 1 }
 0x6ec   : > { %12738 = vmatmul.mubr.bf16.vlgmr.msra.gmra.mrb[64].mxu1 %v9994_v12  ;;  %v10013_v12 = vor.u32 %v10012_v53, %v10008_v4  ;;  %v10029_v53 = vrot.slane %v10027_v36, 1  ;;  %v10036_v4 = vrot.slane %v10034_v60, 1  ;;  %v10058_v60 = vshll.u32 %v20013_v26, 16 }
 0x6ed   : > { %12745 = vmatprep.mubr.bf16.mxu1 %v10500_v47  ;;  %12995 = vmatpush1.bf16.msra.mxu1 %v16653_v20  ;;  %v16662_v20 = vld [vmem:[#allocation8 + $0x198] sm:$0xff]   ;;  %v10017_v47 = vrot.slane %v10015_v44, 1  ;;  %v16658_v44 = vld [vmem:[#allocation2 + $0x50] ss:$0 sps:$4 sm:$0x11]  }
 0x6ee   : > { %12996 = vmatprep.subr.bf16.mxu1 %v21063_v63  ;;  %v10051_v36 = vshll.u32 %v16658_v44, 16 }
 0x6ef   : > { %v10018_v52 = vsel %vm2464_vm0, %v10013_v12, %v10017_v47  ;;  %v16674_v12 = vld [vmem:[#allocation8 + $0x1b8] sm:$0xff]   ;;  %v10510_v47 = vrot.slane %v14622_v23, 1 }
 0x6f0   : > { %v16661_v23 = vld [vmem:[#allocation2 + $0x68] ss:$0 sps:$4 sm:$0x11]  }
 0x6f1   : > { %12997 = vmatpush1.bf16.msra.mxu1 %v16656_v8  ;;  %v10024_v8 = vrot.slane %v10022_v18, 1  ;;  %v10039_v18 = vshll.u32 %v16657_v29, 16  ;;  %v10517_v6 = vrot.slane %v16661_v23, 1 }
 0x6f2   : > { %12998 = vmatprep.subr.bf16.mxu1 %v21063_v63 }
 0x6f3   : > { %v10041_v32 = vrot.slane %v10039_v18, 1 }
 0x6f4   : > { %12746 = vmatmul.mubr.bf16.gmra.mrb[68].mxu1 %v10006_v3  ;;  %v10508_v3 = vrot.slane %v16657_v29, 1  ;;  %v16660_v29 = vld [vmem:[#allocation2 + $0x5c] ss:$0 sps:$4 sm:$0x11]  }
 0x6f5   : > { %12753 = vmatprep.mubr.bf16.mxu1 %v10503_v39  ;;  %12999 = vmatpush1.bf16.msra.mxu1 %v16659_v10  ;;  %v10025_v10 = vor.u32 %v10024_v8, %v10020_v51  ;;  %v10044_v51 = vshrl.u32 %v20004_v16, 16 }
 0x6f6   : > { %13000 = vmatprep.subr.bf16.mxu1 %v21063_v63  ;;  %v10509_v11 = vsel %vm2977_vm9, %v10507_v46, %v10508_v3  ;;  %v10514_v3 = vrot.slane %v16660_v29, 1 }
 0x6f7   : > { %v10030_v39 = vsel %vm2464_vm0, %v10025_v10, %v10029_v53  ;;  %v10049_v10 = vor.u32 %v10048_v54, %v10044_v51  ;;  %v10053_v53 = vrot.slane %v10051_v36, 1  ;;  %v16686_v54 = vld [vmem:[#allocation8 + $0x1d8] sm:$0xff]  }
 0x6f9   : > { %13001 = vmatpush1.bf16.msra.mxu1 %v16662_v20  ;;  %v10032_v20 = vshrl.u32 %v19995_v2, 16  ;;  %v10054_v62 = vsel %vm2464_vm0, %v10049_v10, %v10053_v53 }
 0x6fa   : > { %13002 = vmatprep.subr.bf16.mxu1 %v21063_v63 }
 0x6fb   : > { %v10037_v27 = vor.u32 %v10036_v4, %v10032_v20  ;;  %v10070_v20 = vshll.u32 %v20029_v40, 16 }
 0x6fc   : > { %12754 = vmatmul.mubr.bf16.gmra.mrb[72].mxu1 %v10018_v52  ;;  %v8613_v52 = vld [vmem:[#allocation2 + $0x54] sm:$0xe] }
 0x6fd   : > { %12761 = vmatprep.mubr.bf16.mxu1 %v10506_v49  ;;  %13003 = vmatpush1.bf16.msra.mxu1 %v16665_v57  ;;  %v10511_v57 = vrot.slane %v16658_v44, 1  ;;  %v10042_v8 = vsel %vm2464_vm0, %v10037_v27, %v10041_v32  ;;  %v14623_v2 = vcombine.low %v8613_v52, %v20008_v43  ;;  %v16683_v43 = vld [vmem:[#allocation8 + $0x1d0] sm:$0xff]   ;;  %v10063_v44 = vshll.u32 %v16660_v29, 16 }
 0x6fe   : > { %13004 = vmatprep.subr.bf16.mxu1 %v21063_v63  ;;  %v10068_v52 = vshrl.u32 %v20029_v40, 16 }
 0x6ff   : > { %v10512_v49 = vsel %vm2977_vm9, %v10510_v47, %v10511_v57  ;;  %v10513_v46 = vrot.slane %v14623_v2, 1  ;;  %v10065_v27 = vrot.slane %v10063_v44, 1  ;;  %v8615_v47 = vld [vmem:[#allocation2 + $0x6c] sm:$0xe]  ;;  %v10072_v57 = vrot.slane %v10070_v20, 1 }
 0x700   : > { %v14625_v32 = vcombine.low %v8615_v47, %v20032_v7  ;;  %v10082_v2 = vshll.u32 %v20037_v22, 16  ;;  %v16666_v20 = vld [vmem:[#allocation2 + $0x8c] ss:$0 sps:$4 sm:$0x11]  }
 0x701   : > { %13005 = vmatpush1.bf16.msra.mxu1 %v16668_v55  ;;  %v16680_v55 = vld [vmem:[#allocation8 + $0x1c8] sm:$0xff]   ;;  %v10515_v4 = vsel %vm2977_vm9, %v10513_v46, %v10514_v3  ;;  %v16664_v46 = vld [vmem:[#allocation2 + $0x80] ss:$0 sps:$4 sm:$0x11]   ;;  %v10080_v3 = vshrl.u32 %v20037_v22, 16  ;;  %v10092_v22 = vshrl.u32 %v20044_v42, 16 }
 0x702   : > { %13006 = vmatprep.subr.bf16.mxu1 %v21063_v63  ;;  %v10519_v29 = vrot.slane %v14625_v32, 1  ;;  %v8618_v32 = vld [vmem:[#allocation2 + $0x90] sm:$0xe] }
 0x704   : > { %12762 = vmatmul.mubr.bf16.gmra.mrb[76].mxu1 %v10030_v39  ;;  %v10060_v39 = vrot.slane %v10058_v60, 1  ;;  %v10084_v60 = vrot.slane %v10082_v2, 1  ;;  %v10118_v2 = vshll.u32 %v20067_v13, 16 }
 0x705   : > { %12769 = vmatprep.mubr.bf16.mxu1 %v10509_v11  ;;  %13007 = vmatpush1.bf16.msra.mxu1 %v16671_v48  ;;  %v8614_v48 = vld [vmem:[#allocation2 + $0x60] sm:$0xe]  ;;  %v10056_v11 = vshrl.u32 %v20013_v26, 16  ;;  %v16663_v26 = vld [vmem:[#allocation2 + $0x74] ss:$0 sps:$4 sm:$0x11]  }
 0x706   : > { %13008 = vmatprep.subr.bf16.mxu1 %v21063_v63  ;;  %v14624_v16 = vcombine.low %v8614_v48, %v20025_v34  ;;  %v10520_v51 = vrot.slane %v16663_v26, 1  ;;  %v10087_v53 = vshll.u32 %v16663_v26, 16  ;;  %v10085_v48 = vor.u32 %v10084_v60, %v10080_v3  ;;  %v16692_v3 = vld [vmem:[#allocation8 + $0x1e8] sm:$0xff]  }
 0x707   : > { %v10061_v18 = vor.u32 %v10060_v39, %v10056_v11  ;;  %v10523_v39 = vrot.slane %v16664_v46, 1  ;;  %v14628_v26 = vcombine.low %v8618_v32, %v20063_v17  ;;  %v10120_v60 = vrot.slane %v10118_v2, 1  ;;  %v16672_v32 = vld [vmem:[#allocation2 + $0xbc] ss:$0 sps:$4 sm:$0x11]  }
 0x708   : > { %v10521_v40 = vsel %vm2977_vm9, %v10519_v29, %v10520_v51  ;;  %v8622_v2 = vld [vmem:[#allocation2 + $0xc0] sm:$0xe] }
 0x709   : > { %13009 = vmatpush1.bf16.msra.mxu1 %v16674_v12  ;;  %v10516_v12 = vrot.slane %v14624_v16, 1  ;;  %v10066_v34 = vsel %vm2464_vm0, %v10061_v18, %v10065_v27  ;;  %v10089_v16 = vrot.slane %v10087_v53, 1  ;;  %v10099_v18 = vshll.u32 %v16664_v46, 16 }
 0x70a   : > { %13010 = vmatprep.subr.bf16.mxu1 %v21063_v63  ;;  %v10528_v29 = vrot.slane %v14628_v26, 1  ;;  %v10130_v53 = vshll.u32 %v20083_v35, 16  ;;  %v10154_v26 = vshll.u32 %v20106_v19, 16 }
 0x70c   : > { %12770 = vmatmul.mubr.bf16.gmra.mrb[80].mxu1 %v10042_v8  ;;  %v10075_v8 = vshll.u32 %v16661_v23, 16  ;;  %v10090_v23 = vsel %vm2464_vm0, %v10085_v48, %v10089_v16  ;;  %v8620_v16 = vld [vmem:[#allocation2 + $0xa8] sm:$0xe] }
 0x70d   : > { %12777 = vmatprep.mubr.bf16.mxu1 %v10512_v49  ;;  %13011 = vmatpush1.bf16.msra.mxu1 %v16677_v5  ;;  %v10518_v5 = vsel %vm2977_vm9, %v10516_v12, %v10517_v6  ;;  %v10073_v49 = vor.u32 %v10072_v57, %v10068_v52  ;;  %v16689_v12 = vld [vmem:[#allocation8 + $0x1e0] sm:$0xff]   ;;  %v10106_v6 = vshll.u32 %v20060_v21, 16  ;;  %v10101_v57 = vrot.slane %v10099_v18, 1  ;;  %v16667_v52 = vld [vmem:[#allocation2 + $0x98] ss:$0 sps:$4 sm:$0x11]  }
 0x70e   : > { %13012 = vmatprep.subr.bf16.mxu1 %v21063_v63  ;;  %v10077_v36 = vrot.slane %v10075_v8, 1  ;;  %v10104_v8 = vshrl.u32 %v20060_v21, 16  ;;  %v10529_v51 = vrot.slane %v16667_v52, 1  ;;  %v10116_v21 = vshrl.u32 %v20067_v13, 16 }
 0x70f   : > { %v10123_v46 = vshll.u32 %v16667_v52, 16 }
 0x710   : > { %v10078_v7 = vsel %vm2464_vm0, %v10073_v49, %v10077_v36 }
 0x711   : > { %13013 = vmatpush1.bf16.msra.mxu1 %v16680_v55  ;;  %v8616_v55 = vld [vmem:[#allocation2 + $0x78] sm:$0xe] }
 0x712   : > { %13014 = vmatprep.subr.bf16.mxu1 %v21063_v63  ;;  %v14626_v10 = vcombine.low %v8616_v55, %v20040_v14  ;;  %v8619_v55 = vld [vmem:[#allocation2 + $0x9c] sm:$0xe] }
 0x713   : > { %v14629_v17 = vcombine.low %v8619_v55, %v20078_v56  ;;  %v10159_v55 = vshll.u32 %v16672_v32, 16 }
 0x714   : > { %12778 = vmatmul.mubr.bf16.gmra.mrb[84].mxu1 %v10054_v62  ;;  %v10522_v62 = vrot.slane %v14626_v10, 1  ;;  %v10530_v10 = vsel %vm2977_vm9, %v10528_v29, %v10529_v51  ;;  %v14632_v29 = vcombine.low %v8622_v2, %v20109_v45  ;;  %v16673_v51 = vld [vmem:[#allocation2 + $0xc8] ss:$0 sps:$4 sm:$0x11]  }
 0x715   : > { %12785 = vmatprep.mubr.bf16.mxu1 %v10515_v4  ;;  %13015 = vmatpush1.bf16.msra.mxu1 %v16683_v43  ;;  %v10094_v43 = vshll.u32 %v20044_v42, 16  ;;  %v8617_v4 = vld [vmem:[#allocation2 + $0x84] sm:$0xe]  ;;  %v10531_v48 = vrot.slane %v14629_v17, 1 }
 0x716   : > { %13016 = vmatprep.subr.bf16.mxu1 %v21063_v63  ;;  %v14627_v14 = vcombine.low %v8617_v4, %v20051_v25  ;;  %v10524_v44 = vsel %vm2977_vm9, %v10522_v62, %v10523_v39  ;;  %v10125_v39 = vrot.slane %v10123_v46, 1  ;;  %v10132_v4 = vrot.slane %v10130_v53, 1  ;;  %v16675_v53 = vld [vmem:[#allocation2 + $0xec] ss:$0 sps:$4 sm:$0x11]  }
 0x717   : > { %v10096_v11 = vrot.slane %v10094_v43, 1  ;;  %v10121_v43 = vor.u32 %v10120_v60, %v10116_v21  ;;  %v10540_v17 = vrot.slane %v14632_v29, 1 }
 0x718   : > { %v10525_v47 = vrot.slane %v14627_v14, 1  ;;  %v10128_v14 = vshrl.u32 %v20083_v35, 16  ;;  %v10140_v35 = vshrl.u32 %v20090_v33, 16 }
 0x719   : > { %13017 = vmatpush1.bf16.msra.mxu1 %v16686_v54  ;;  %v10097_v27 = vor.u32 %v10096_v11, %v10092_v22  ;;  %v10111_v54 = vshll.u32 %v16666_v20, 16  ;;  %v10126_v56 = vsel %vm2464_vm0, %v10121_v43, %v10125_v39  ;;  %v16670_v11 = vld [vmem:[#allocation2 + $0xb0] ss:$0 sps:$4 sm:$0x11]   ;;  %v10171_v43 = vshll.u32 %v16673_v51, 16 }
 0x71a   : > { %13018 = vmatprep.subr.bf16.mxu1 %v21063_v63  ;;  %v10133_v22 = vor.u32 %v10132_v4, %v10128_v14  ;;  %v20360_v4 = vld [vmem:[#allocation8 + $0x200] sm:$0xff]  }
 0x71b   : > { %v10102_v25 = vsel %vm2464_vm0, %v10097_v27, %v10101_v57  ;;  %v10113_v36 = vrot.slane %v10111_v54, 1  ;;  %v8621_v27 = vld [vmem:[#allocation2 + $0xb4] sm:$0xe] }
 0x71c   : > { %12786 = vmatmul.mubr.bf16.gmra.mrb[88].mxu1 %v10066_v34  ;;  %v10526_v34 = vrot.slane %v16666_v20, 1  ;;  %v10142_v20 = vshll.u32 %v20090_v33, 16 }
 0x71d   : > { %12793 = vmatprep.mubr.bf16.mxu1 %v10518_v5  ;;  %13019 = vmatpush1.bf16.msra.mxu1 %v16689_v12  ;;  %v10108_v5 = vrot.slane %v10106_v6, 1  ;;  %v10535_v12 = vrot.slane %v16670_v11, 1 }
 0x71e   : > { %13020 = vmatprep.subr.bf16.mxu1 %v21063_v63  ;;  %v10527_v42 = vsel %vm2977_vm9, %v10525_v47, %v10526_v34  ;;  %v10144_v34 = vrot.slane %v10142_v20, 1  ;;  %v10176_v20 = vshrl.u32 %v20121_v9, 16 }
 0x71f   : > { %v10109_v49 = vor.u32 %v10108_v5, %v10104_v8  ;;  %v16695_v5 = vld [vmem:[#allocation8 + $0x1f0] sm:$0xff]   ;;  %v10538_v8 = vrot.slane %v16672_v32, 1 }
 0x721   : > { %13021 = vmatpush1.bf16.msra.mxu1 %v16692_v3 }
 0x722   : > { %13022 = vmatprep.subr.bf16.mxu1 %v21063_v63 }
 0x724   : > { %12794 = vmatmul.mubr.bf16.gmra.mrb[92].mxu1 %v10078_v7  ;;  %v10114_v7 = vsel %vm2464_vm0, %v10109_v49, %v10113_v36  ;;  %v10156_v49 = vrot.slane %v10154_v26, 1  ;;  %v10152_v36 = vshrl.u32 %v20106_v19, 16  ;;  %v10164_v19 = vshrl.u32 %v20113_v24, 16 }
 0x725   : > { %12801 = vmatprep.mubr.bf16.mxu1 %v10521_v40  ;;  %v16669_v40 = vld [vmem:[#allocation2 + $0xa4] ss:$0 sps:$4 sm:$0x11]   ;;  %13023 = vmatpush1.bf16.msra.mxu1 %v16695_v5  ;;  %v10202_v5 = vshll.u32 %v20143_v58, 16 }
 0x726   : > { %v10532_v62 = vrot.slane %v16669_v40, 1  ;;  %13024 = vmatprep.subr.bf16.mxu1 %v21063_v63  ;;  %v10157_v60 = vor.u32 %v10156_v49, %v10152_v36  ;;  %v10541_v63 = vrot.slane %v16673_v51, 1  ;;  %v21161_v49 = vld [vmem:[#allocation60_spill] sm:$0xff] }
 0x727   : > { %v21162_v36 = vld [vmem:[#allocation64_spill] sm:$0xff] }
 0x728   : > { %v10533_v13 = vsel %vm2977_vm9, %v10531_v48, %v10532_v62  ;;  %v10542_v3 = vsel %vm2977_vm9, %v10540_v17, %v10541_v63  ;;  %v16698_v48 = vld [vmem:[#allocation8 + $0x1f8] sm:$0xff]   ;;  %v10178_v62 = vshll.u32 %v20121_v9, 16  ;;  %v10188_v9 = vshrl.u32 %v20136_v0, 16 }
 0x729   : > { %13025 = vmatpush1.bf16.msra.mxu1 %v16698_v48 }
 0x72a   : > { %15197 = vmatprep.subr.bf16.mxu1 %v20360_v4 }
 0x72c   : > { %12802 = vmatmul.mubr.bf16.gmra.mrb[96].mxu1 %v10090_v23  ;;  %v14630_v23 = vcombine.low %v8620_v16, %v20086_v61  ;;  %v14631_v61 = vcombine.low %v8621_v27, %v20095_v41 }
 0x72d   : > { %12809 = vmatprep.mubr.bf16.mxu1 %v10524_v44  ;;  %v10135_v44 = vshll.u32 %v16669_v40, 16  ;;  %v8623_v40 = vld [vmem:[#allocation2 + $0xe4] sm:$0xe] }
 0x72e   : > { %v10534_v18 = vrot.slane %v14630_v23, 1  ;;  %v10537_v52 = vrot.slane %v14631_v61, 1  ;;  %v14633_v45 = vcombine.low %v8623_v40, %v20116_v30  ;;  %v10173_v30 = vrot.slane %v10171_v43, 1  ;;  %v8624_v23 = vld [vmem:[#allocation2 + $0xf0] sm:$0xe]  ;;  %v21164_v43 = vld [vmem:[#allocation66_spill] sm:$0xff] }
 0x72f   : > { %v10137_v6 = vrot.slane %v10135_v44, 1  ;;  %v14634_v14 = vcombine.low %v8624_v23, %v20132_v38  ;;  %v16676_v44 = vld [vmem:[#allocation2 + $0xf8] ss:$0 sps:$4 sm:$0x11]   ;;  %v10226_v48 = vshll.u32 %v21164_v43, 16 }
 0x730   : > { %v10536_v57 = vsel %vm2977_vm9, %v10534_v18, %v10535_v12  ;;  %v10539_v33 = vsel %vm2977_vm9, %v10537_v52, %v10538_v8  ;;  %v10543_v16 = vrot.slane %v14633_v45, 1  ;;  %v10190_v18 = vshll.u32 %v20136_v0, 16 }
 0x731   : > { %v10138_v47 = vsel %vm2464_vm0, %v10133_v22, %v10137_v6  ;;  %v10183_v22 = vshll.u32 %v16675_v53, 16  ;;  %v10546_v6 = vrot.slane %v14634_v14, 1  ;;  %v10547_v27 = vrot.slane %v16676_v44, 1 }
 0x732   : > { %v10200_v0 = vshrl.u32 %v20143_v58, 16  ;;  %v10212_v58 = vshrl.u32 %v21162_v36, 16 }
 0x733   : > { %v10548_v32 = vsel %vm2977_vm9, %v10546_v6, %v10547_v27 }
 0x734   : > { %12810 = vmatmul.mubr.bf16.gmra.mrb[100].mxu1 %v10102_v25  ;;  %v10147_v25 = vshll.u32 %v16670_v11, 16  ;;  %v10180_v11 = vrot.slane %v10178_v62, 1 }
 0x735   : > { %12817 = vmatprep.mubr.bf16.mxu1 %v10527_v42  ;;  %v10145_v42 = vor.u32 %v10144_v34, %v10140_v35  ;;  %v8625_v34 = vld [vmem:[#allocation2 + $0xfc] sm:$0xe]  ;;  %v16678_v35 = vld [vmem:[#allocation2 + $0x104] ss:$0 sps:$4 sm:$0x11]  }
 0x736   : > { %v10149_v54 = vrot.slane %v10147_v25, 1  ;;  %v10181_v12 = vor.u32 %v10180_v11, %v10176_v20  ;;  %v14635_v38 = vcombine.low %v8625_v34, %v20139_v59  ;;  %v10195_v25 = vshll.u32 %v16676_v44, 16  ;;  %v21165_v11 = vld [vmem:[#allocation67_spill] sm:$0xff]  ;;  %v16682_v44 = vld [vmem:[#allocation2 + $0x128] ss:$0 sps:$4 sm:$0x11]  }
 0x737   : > { %v10550_v52 = vrot.slane %v16678_v35, 1  ;;  %v10207_v51 = vshll.u32 %v16678_v35, 16  ;;  %v10224_v20 = vshrl.u32 %v21164_v43, 16  ;;  %v16687_v43 = vld [vmem:[#allocation2 + $0x14c] ss:$0 sps:$4 sm:$0x11]  }
 0x738   : > { %v10150_v41 = vsel %vm2464_vm0, %v10145_v42, %v10149_v54  ;;  %v10549_v42 = vrot.slane %v14635_v38, 1  ;;  %v10197_v8 = vrot.slane %v10195_v25, 1  ;;  %v8626_v54 = vld [vmem:[#allocation2 + $0x108] sm:$0xe] }
 0x739   : > { %v14636_v59 = vcombine.low %v8626_v54, %v21161_v49  ;;  %v10209_v63 = vrot.slane %v10207_v51, 1  ;;  %v16684_v25 = vld [vmem:[#allocation2 + $0x134] ss:$0 sps:$4 sm:$0x11]   ;;  %v8630_v49 = vld [vmem:[#allocation2 + $0x138] sm:$0xe] }
 0x73a   : > { %v10551_v29 = vsel %vm2977_vm9, %v10549_v42, %v10550_v52  ;;  %v21168_v42 = vld [vmem:[#allocation74_spill] sm:$0xff] }
 0x73b   : > { %v10250_v52 = vshll.u32 %v21168_v42, 16 }
 0x73c   : > { %12818 = vmatmul.mubr.bf16.gmra.mrb[104].mxu1 %v10114_v7  ;;  %v10166_v7 = vshll.u32 %v20113_v24, 16 }
 0x73d   : > { %12825 = vmatprep.mubr.bf16.mxu1 %v10530_v10  ;;  %v10161_v10 = vrot.slane %v10159_v55, 1  ;;  %v10214_v55 = vshll.u32 %v21162_v36, 16  ;;  %v16685_v36 = vld [vmem:[#allocation2 + $0x140] ss:$0 sps:$4 sm:$0x11]  }
 0x73e   : > { %v10168_v46 = vrot.slane %v10166_v7, 1 }
 0x73f   : > { %v10162_v21 = vsel %vm2464_vm0, %v10157_v60, %v10161_v10  ;;  %v10552_v60 = vrot.slane %v14636_v59, 1  ;;  %v8627_v10 = vld [vmem:[#allocation2 + $0x114] sm:$0xe] }
 0x740   : > { %v10169_v39 = vor.u32 %v10168_v46, %v10164_v19  ;;  %v21163_v46 = vld [vmem:[#allocation65_spill] sm:$0xff] }
 0x741   : > { %v14637_v45 = vcombine.low %v8627_v10, %v21163_v46  ;;  %v8631_v46 = vld [vmem:[#allocation2 + $0x144] sm:$0xe] }
 0x744   : > { %12826 = vmatmul.mubr.bf16.gmra.mrb[108].mxu1 %v10126_v56  ;;  %v10544_v56 = vrot.slane %v16675_v53, 1  ;;  %v16681_v53 = vld [vmem:[#allocation2 + $0x11c] ss:$0 sps:$4 sm:$0x11]  }
 0x745   : > { %12833 = vmatprep.mubr.bf16.mxu1 %v10533_v13  ;;  %v10174_v13 = vsel %vm2464_vm0, %v10169_v39, %v10173_v30  ;;  %v10555_v39 = vrot.slane %v14637_v45, 1  ;;  %v8628_v30 = vld [vmem:[#allocation2 + $0x120] sm:$0xe] }
 0x746   : > { %v10545_v24 = vsel %vm2977_vm9, %v10543_v16, %v10544_v56  ;;  %v10556_v16 = vrot.slane %v16681_v53, 1  ;;  %v14638_v14 = vcombine.low %v8628_v30, %v21165_v11  ;;  %v8632_v11 = vld [vmem:[#allocation2 + $0x150] sm:$0xe] }
 0x748   : > { %v10558_v27 = vrot.slane %v14638_v14, 1 }
 0x74c   : > { %12834 = vmatmul.mubr.bf16.gmra.mrb[112].mxu1 %v10138_v47  ;;  %v10185_v47 = vrot.slane %v10183_v22, 1  ;;  %v10231_v22 = vshll.u32 %v16681_v53, 16  ;;  %v21171_v53 = vld [vmem:[#allocation80_spill] sm:$0xff] }
 0x74d   : > { %12841 = vmatprep.mubr.bf16.mxu1 %v10536_v57  ;;  %v10192_v57 = vrot.slane %v10190_v18, 1  ;;  %v21166_v18 = vld [vmem:[#allocation68_spill] sm:$0xff] }
 0x74e   : > { %v10186_v61 = vsel %vm2464_vm0, %v10181_v12, %v10185_v47  ;;  %v10238_v12 = vshll.u32 %v21166_v18, 16  ;;  %v10559_v47 = vrot.slane %v16682_v44, 1  ;;  %v10233_v34 = vrot.slane %v10231_v22, 1 }
 0x74f   : > { %v10193_v26 = vor.u32 %v10192_v57, %v10188_v9 }
 0x750   : > { %v10240_v38 = vrot.slane %v10238_v12, 1  ;;  %v10560_v9 = vsel %vm2977_vm9, %v10558_v27, %v10559_v47  ;;  %v21174_v27 = vld [vmem:[#allocation84_spill] sm:$0xff] }
 0x751   : > { %v10198_v2 = vsel %vm2464_vm0, %v10193_v26, %v10197_v8  ;;  %v10243_v26 = vshll.u32 %v16682_v44, 16  ;;  %v21173_v44 = vld [vmem:[#allocation83_spill] sm:$0xff]  ;;  %v10286_v47 = vshll.u32 %v21174_v27, 16 }
 0x754   : > { %12842 = vmatmul.mubr.bf16.gmra.mrb[116].mxu1 %v10150_v41  ;;  %v10204_v41 = vrot.slane %v10202_v5, 1  ;;  %v10236_v5 = vshrl.u32 %v21166_v18, 16  ;;  %v16688_v18 = vld [vmem:[#allocation2 + $0x158] ss:$0 sps:$4 sm:$0x11]  }
 0x755   : > { %12849 = vmatprep.mubr.bf16.mxu1 %v10539_v33  ;;  %v16679_v33 = vld [vmem:[#allocation2 + $0x110] ss:$0 sps:$4 sm:$0x11]  }
 0x756   : > { %v10205_v7 = vor.u32 %v10204_v41, %v10200_v0  ;;  %v10553_v17 = vrot.slane %v16679_v33, 1  ;;  %v10219_v19 = vshll.u32 %v16679_v33, 16  ;;  %v10241_v8 = vor.u32 %v10240_v38, %v10236_v5  ;;  %v21169_v33 = vld [vmem:[#allocation75_spill] sm:$0xff] }
 0x757   : > { %v10245_v41 = vrot.slane %v10243_v26, 1  ;;  %v14640_v0 = vcombine.low %v8630_v49, %v21169_v33  ;;  %v8634_v33 = vld [vmem:[#allocation2 + $0x168] sm:$0xe] }
 0x758   : > { %v10210_v40 = vsel %vm2464_vm0, %v10205_v7, %v10209_v63  ;;  %v10221_v56 = vrot.slane %v10219_v19, 1  ;;  %v10255_v7 = vshll.u32 %v16684_v25, 16 }
 0x759   : > { %v10246_v59 = vsel %vm2464_vm0, %v10241_v8, %v10245_v41  ;;  %v10564_v10 = vrot.slane %v14640_v0, 1  ;;  %v10291_v8 = vshll.u32 %v16688_v18, 16 }
 0x75c   : > { %12850 = vmatmul.mubr.bf16.gmra.mrb[120].mxu1 %v10162_v21  ;;  %v10216_v21 = vrot.slane %v10214_v55, 1  ;;  %v10248_v55 = vshrl.u32 %v21168_v42, 16  ;;  %v16690_v42 = vld [vmem:[#allocation2 + $0x164] ss:$0 sps:$4 sm:$0x11]  }
 0x75d   : > { %12857 = vmatprep.mubr.bf16.mxu1 %v10542_v3  ;;  %v10554_v3 = vsel %vm2977_vm9, %v10552_v60, %v10553_v17  ;;  %v21170_v60 = vld [vmem:[#allocation76_spill] sm:$0xff] }
 0x75e   : > { %v10217_v62 = vor.u32 %v10216_v21, %v10212_v58  ;;  %v10262_v17 = vshll.u32 %v21170_v60, 16  ;;  %v10257_v21 = vrot.slane %v10255_v7, 1  ;;  %v14641_v58 = vcombine.low %v8631_v46, %v21171_v53  ;;  %v16691_v7 = vld [vmem:[#allocation2 + $0x170] ss:$0 sps:$4 sm:$0x11]  }
 0x760   : > { %v10222_v23 = vsel %vm2464_vm0, %v10217_v62, %v10221_v56  ;;  %v10267_v62 = vshll.u32 %v16685_v36, 16  ;;  %v10567_v30 = vrot.slane %v14641_v58, 1 }
 0x764   : > { %12858 = vmatmul.mubr.bf16.gmra.mrb[124].mxu1 %v10174_v13  ;;  %v10228_v13 = vrot.slane %v10226_v48, 1  ;;  %v10260_v48 = vshrl.u32 %v21170_v60, 16 }
 0x765   : > { %12865 = vmatprep.mubr.bf16.mxu1 %v10545_v24  ;;  %v10557_v24 = vsel %vm2977_vm9, %v10555_v39, %v10556_v16  ;;  %v21172_v39 = vld [vmem:[#allocation82_spill] sm:$0xff] }
 0x766   : > { %v10229_v6 = vor.u32 %v10228_v13, %v10224_v20  ;;  %v10274_v16 = vshll.u32 %v21172_v39, 16  ;;  %v10269_v13 = vrot.slane %v10267_v62, 1  ;;  %v14642_v20 = vcombine.low %v8632_v11, %v21173_v44 }
 0x767   : > { %v10272_v12 = vshrl.u32 %v21172_v39, 16  ;;  %v10322_v62 = vshll.u32 %v20237_v15, 16 }
 0x768   : > { %v10234_v57 = vsel %vm2464_vm0, %v10229_v6, %v10233_v34  ;;  %v10279_v6 = vshll.u32 %v16687_v43, 16 }
 0x769   : > { %v10324_v11 = vrot.slane %v10322_v62, 1  ;;  %v16861_v62 = vld [vmem:[#allocation2 + $0x20] ss:$0 sps:$4 sm:$0x11]  }
 0x76a   : > { %v10281_v38 = vrot.slane %v10279_v6, 1 }
 0x76c   : > { %12866 = vmatmul.mubr.bf16.gmra.mrb[128].mxu1 %v10186_v61  ;;  %v8629_v61 = vld [vmem:[#allocation2 + $0x12c] sm:$0xe] }
 0x76d   : > { %12873 = vmatprep.mubr.bf16.mxu1 %v10548_v32  ;;  %v21167_v32 = vld [vmem:[#allocation73_spill] sm:$0xff] }
 0x76e   : > { %v14639_v35 = vcombine.low %v8629_v61, %v21167_v32  ;;  %v10570_v61 = vrot.slane %v14642_v20, 1  ;;  %v8633_v32 = vld [vmem:[#allocation2 + $0x15c] sm:$0xe]  ;;  %v21177_v20 = vld [vmem:[#allocation87_spill] sm:$0xff] }
 0x770   : > { %v10561_v54 = vrot.slane %v14639_v35, 1 }
 0x774   : > { %12874 = vmatmul.mubr.bf16.gmra.mrb[132].mxu1 %v10198_v2  ;;  %v10562_v2 = vrot.slane %v16684_v25, 1  ;;  %v21175_v25 = vld [vmem:[#allocation85_spill] sm:$0xff] }
 0x775   : > { %12881 = vmatprep.mubr.bf16.mxu1 %v10551_v29  ;;  %v10252_v29 = vrot.slane %v10250_v52, 1  ;;  %v14643_v5 = vcombine.low %v8633_v32, %v21175_v25  ;;  %v10284_v52 = vshrl.u32 %v21174_v27, 16  ;;  %v16696_v32 = vld [vmem:[#allocation2 + $0x194] ss:$0 sps:$4 sm:$0x11]  }
 0x776   : > { %v10563_v51 = vsel %vm2977_vm9, %v10561_v54, %v10562_v2  ;;  %v21176_v54 = vld [vmem:[#allocation86_spill] sm:$0xff] }
 0x777   : > { %v10253_v63 = vor.u32 %v10252_v29, %v10248_v55  ;;  %v10298_v2 = vshll.u32 %v21176_v54, 16  ;;  %v10573_v49 = vrot.slane %v14643_v5, 1  ;;  %v10293_v29 = vrot.slane %v10291_v8, 1  ;;  %v8639_v8 = vld [vmem:[#allocation2 + $0x18] sm:$0xf] }
 0x778   : > { %v10296_v60 = vshrl.u32 %v21176_v54, 16  ;;  %v8638_v54 = vld [vmem:[#allocation2 + $0x198] sm:$0xe] }
 0x779   : > { %v10258_v45 = vsel %vm2464_vm0, %v10253_v63, %v10257_v21  ;;  %v10310_v63 = vshll.u32 %v20230_v1, 16  ;;  %v10577_v21 = vrot.slane %v16691_v7, 1 }
 0x77b   : > { %v10312_v53 = vrot.slane %v10310_v63, 1 }
 0x77c   : > { %12882 = vmatmul.mubr.bf16.gmra.mrb[136].mxu1 %v10210_v40  ;;  %v10565_v40 = vrot.slane %v16685_v36, 1  ;;  %v14644_v36 = vcombine.low %v8634_v33, %v20226_v37 }
 0x77d   : > { %12889 = vmatprep.mubr.bf16.mxu1 %v10554_v3  ;;  %v10264_v3 = vrot.slane %v10262_v17, 1  ;;  %v10303_v17 = vshll.u32 %v16690_v42, 16 }
 0x77e   : > { %v10566_v19 = vsel %vm2977_vm9, %v10564_v10, %v10565_v40  ;;  %v10576_v40 = vrot.slane %v14644_v36, 1 }
 0x77f   : > { %v10265_v56 = vor.u32 %v10264_v3, %v10260_v48  ;;  %v10305_v46 = vrot.slane %v10303_v17, 1  ;;  %v10315_v48 = vshll.u32 %v16691_v7, 16  ;;  %v10358_v7 = vshll.u32 %v20258_v31, 16 }
 0x780   : > { %v10578_v58 = vsel %vm2977_vm9, %v10576_v40, %v10577_v21 }
 0x781   : > { %v10270_v14 = vsel %vm2464_vm0, %v10265_v56, %v10269_v13 }
 0x784   : > { %12890 = vmatmul.mubr.bf16.gmra.mrb[140].mxu1 %v10222_v23  ;;  %v10568_v23 = vrot.slane %v16687_v43, 1  ;;  %v10308_v43 = vshrl.u32 %v20230_v1, 16  ;;  %v10320_v1 = vshrl.u32 %v20237_v15, 16  ;;  %v10332_v15 = vshrl.u32 %v21177_v20, 16 }
 0x785   : > { %12897 = vmatprep.mubr.bf16.mxu1 %v10557_v24  ;;  %v10276_v24 = vrot.slane %v10274_v16, 1 }
 0x786   : > { %v10569_v22 = vsel %vm2977_vm9, %v10567_v30, %v10568_v23  ;;  %v10313_v39 = vor.u32 %v10312_v53, %v10308_v43  ;;  %v10317_v30 = vrot.slane %v10315_v48, 1  ;;  %v8636_v23 = vld [vmem:[#allocation2 + $0x180] sm:$0xe] }
 0x787   : > { %v10277_v34 = vor.u32 %v10276_v24, %v10272_v12  ;;  %v16694_v24 = vld [vmem:[#allocation2 + $0x188] ss:$0 sps:$4 sm:$0x11]  }
 0x788   : > { %v10318_v13 = vsel %vm2464_vm0, %v10313_v39, %v10317_v30  ;;  %v10583_v6 = vrot.slane %v16694_v24, 1  ;;  %v10919_v39 = vshll.u32 %v16861_v62, 16  ;;  %v16877_v62 = vld [vmem:[#allocation2 + $0x5c] ss:$0 sps:$4 sm:$0x11]  }
 0x789   : > { %v10282_v35 = vsel %vm2464_vm0, %v10277_v34, %v10281_v38 }
 0x78c   : > { %12898 = vmatmul.mubr.bf16.gmra.mrb[144].mxu1 %v10234_v57  ;;  %v10571_v57 = vrot.slane %v16688_v18, 1  ;;  %v10325_v18 = vor.u32 %v10324_v11, %v10320_v1  ;;  %v8643_v11 = vld [vmem:[#allocation2 + $0x30] sm:$0xf] }
 0x78d   : > { %12905 = vmatprep.mubr.bf16.mxu1 %v10560_v9  ;;  %v10288_v9 = vrot.slane %v10286_v47, 1  ;;  %v8637_v47 = vld [vmem:[#allocation2 + $0x18c] sm:$0xe] }
 0x78e   : > { %v10572_v26 = vsel %vm2977_vm9, %v10570_v61, %v10571_v57  ;;  %v16857_v57 = vld [vmem:[#allocation2 + $0x190] sm:$0xf] }
 0x78f   : > { %v10289_v41 = vor.u32 %v10288_v9, %v10284_v52  ;;  %v21178_v9 = vld [vmem:[#allocation88_spill] sm:$0xff] }
 0x790   : > { %v10346_v25 = vshll.u32 %v21178_v9, 16  ;;  %v10344_v36 = vshrl.u32 %v21178_v9, 16 }
 0x791   : > { %v10294_v0 = vsel %vm2464_vm0, %v10289_v41, %v10293_v29  ;;  %v16859_v29 = vld [vmem:[#allocation2 + $0x19c] sm:$0xf] }
 0x792   : > { %v10348_v41 = vrot.slane %v10346_v25, 1  ;;  %v14648_v33 = vcombine.low %v8638_v54, %v16859_v29 }
 0x794   : > { %12906 = vmatmul.mubr.bf16.gmra.mrb[148].mxu1 %v10246_v59  ;;  %v10574_v59 = vrot.slane %v16690_v42, 1  ;;  %v10586_v42 = vrot.slane %v16696_v32, 1  ;;  %v10588_v17 = vrot.slane %v14648_v33, 1 }
 0x795   : > { %12913 = vmatprep.mubr.bf16.mxu1 %v10563_v51  ;;  %v10300_v51 = vrot.slane %v10298_v2, 1 }
 0x796   : > { %v10575_v55 = vsel %vm2977_vm9, %v10573_v49, %v10574_v59  ;;  %v16858_v49 = vld [vmem:[#allocation2 + $0x1c] sm:$0xf] }
 0x797   : > { %v10301_v10 = vor.u32 %v10300_v51, %v10296_v60  ;;  %v14649_v59 = vcombine.low %v8639_v8, %v16858_v49  ;;  %v16697_v51 = vld [vmem:[#allocation2 + $0x1a0] ss:$0 sps:$4 sm:$0x11]   ;;  %v10349_v60 = vor.u32 %v10348_v41, %v10344_v36  ;;  %v16870_v49 = vld [vmem:[#allocation8 + $0x218] sm:$0xff]   ;;  %v16872_v36 = vld [vmem:[#allocation2 + $0x58] sm:$0xf] }
 0x798   : > { %v10589_v63 = vrot.slane %v16697_v51, 1  ;;  %v10363_v43 = vshll.u32 %v16697_v51, 16  ;;  %v8649_v51 = vld [vmem:[#allocation2 + $0x54] sm:$0xf] }
 0x799   : > { %v10306_v3 = vsel %vm2464_vm0, %v10301_v10, %v10305_v46  ;;  %v10914_v10 = vshll.u32 %v14649_v59, 16  ;;  %v10360_v46 = vrot.slane %v10358_v7, 1  ;;  %v10912_v48 = vshrl.u32 %v14649_v59, 16 }
 0x79b   : > { %v10916_v53 = vrot.slane %v10914_v10, 1 }
 0x79c   : > { %12914 = vmatmul.mubr.bf16.gmra.mrb[152].mxu1 %v10258_v45  ;;  %v8635_v45 = vld [vmem:[#allocation2 + $0x174] sm:$0xe] }
 0x79d   : > { %12921 = vmatprep.mubr.bf16.mxu1 %v10566_v19  ;;  %v14645_v37 = vcombine.low %v8635_v45, %v20233_v28  ;;  %v16693_v19 = vld [vmem:[#allocation2 + $0x17c] ss:$0 sps:$4 sm:$0x11]   ;;  %v14646_v28 = vcombine.low %v8636_v23, %v20242_v50  ;;  %v14647_v50 = vcombine.low %v8637_v47, %v16857_v57  ;;  %v8641_v45 = vld [vmem:[#allocation2 + $0x24] sm:$0xf]  ;;  %v10365_v23 = vrot.slane %v10363_v43, 1 }
 0x79e   : > { %v10580_v56 = vrot.slane %v16693_v19, 1  ;;  %v10327_v44 = vshll.u32 %v16693_v19, 16  ;;  %v10356_v19 = vshrl.u32 %v20258_v31, 16  ;;  %v16864_v47 = vld [vmem:[#allocation2 + $0x40] sm:$0xf] }
 0x79f   : > { %v10579_v16 = vrot.slane %v14645_v37, 1  ;;  %v10582_v12 = vrot.slane %v14646_v28, 1  ;;  %v16860_v37 = vld [vmem:[#allocation2 + $0x28] sm:$0xf] }
 0x7a0   : > { %v10329_v27 = vrot.slane %v10327_v44, 1 }
 0x7a1   : > { %v10584_v38 = vsel %vm2977_vm9, %v10582_v12, %v10583_v6 }
 0x7a2   : > { %v10330_v34 = vsel %vm2464_vm0, %v10325_v18, %v10329_v27  ;;  %v8645_v27 = vld [vmem:[#allocation2 + $0x3c] sm:$0xf] }
 0x7a4   : > { %12922 = vmatmul.mubr.bf16.gmra.mrb[156].mxu1 %v10270_v14  ;;  %v10581_v14 = vsel %vm2977_vm9, %v10579_v16, %v10580_v56  ;;  %v10361_v16 = vor.u32 %v10360_v46, %v10356_v19  ;;  %v10917_v56 = vor.u32 %v10916_v53, %v10912_v48  ;;  %v8651_v53 = vld [vmem:[#allocation2 + $0x60] sm:$0xf] }
 0x7a5   : > { %12929 = vmatprep.mubr.bf16.mxu1 %v10569_v22  ;;  %v10334_v22 = vshll.u32 %v21177_v20, 16  ;;  %v16863_v20 = vld [vmem:[#allocation2 + $0x2c] ss:$0 sps:$4 sm:$0x11]  }
 0x7a6   : > { %v10366_v28 = vsel %vm2464_vm0, %v10361_v16, %v10365_v23  ;;  %v16878_v16 = vld [vmem:[#allocation8 + $0x238] sm:$0xff]  }
 0x7a7   : > { %v10336_v61 = vrot.slane %v10334_v22, 1  ;;  %v10931_v22 = vshll.u32 %v16863_v20, 16 }
 0x7a9   : > { %v10337_v5 = vor.u32 %v10336_v61, %v10332_v15  ;;  %v10933_v6 = vrot.slane %v10931_v22, 1  ;;  %v16866_v15 = vld [vmem:[#allocation8 + $0x208] sm:$0xff]  }
 0x7ac   : > { %12930 = vmatmul.mubr.bf16.gmra.mrb[160].mxu1 %v10282_v35  ;;  %v10339_v35 = vshll.u32 %v16694_v24, 16 }
 0x7ad   : > { %12937 = vmatprep.mubr.bf16.mxu1 %v10572_v26  ;;  %v10585_v26 = vrot.slane %v14647_v50, 1 }
 0x7ae   : > { %v10341_v52 = vrot.slane %v10339_v35, 1 }
 0x7b0   : > { %v10342_v2 = vsel %vm2464_vm0, %v10337_v5, %v10341_v52  ;;  %v16867_v5 = vld [vmem:[#allocation8 + $0x210] sm:$0xff]  }
 0x7b4   : > { %12938 = vmatmul.mubr.bf16.gmra.mrb[164].mxu1 %v10294_v0  ;;  %v10587_v0 = vsel %vm2977_vm9, %v10585_v26, %v10586_v42  ;;  %v8647_v26 = vld [vmem:[#allocation2 + $0x48] sm:$0xf]  ;;  %v16868_v42 = vld [vmem:[#allocation2 + $0x4c] sm:$0xf] }
 0x7b5   : > { %12945 = vmatprep.mubr.bf16.mxu1 %v10575_v55  ;;  %v10351_v55 = vshll.u32 %v16696_v32, 16  ;;  %v14653_v52 = vcombine.low %v8647_v26, %v16868_v42 }
 0x7b7   : > { %v10353_v40 = vrot.slane %v10351_v55, 1  ;;  %v10962_v29 = vshll.u32 %v14653_v52, 16  ;;  %v14654_v55 = vcombine.low %v8649_v51, %v16872_v36  ;;  %v16886_v51 = vld [vmem:[#allocation2 + $0x8c] ss:$0 sps:$4 sm:$0x11]  }
 0x7b8   : > { %v11027_v36 = vshll.u32 %v16886_v51, 16  ;;  %v8671_v51 = vld [vmem:[#allocation2 + $0xf0] sm:$0xf] }
 0x7b9   : > { %v10354_v21 = vsel %vm2464_vm0, %v10349_v60, %v10353_v40  ;;  %v10964_v60 = vrot.slane %v10962_v29, 1  ;;  %v16874_v40 = vld [vmem:[#allocation8 + $0x228] sm:$0xff]   ;;  %v10974_v46 = vshll.u32 %v14654_v55, 16  ;;  %v10972_v48 = vshrl.u32 %v14654_v55, 16 }
 0x7bb   : > { %v10976_v43 = vrot.slane %v10974_v46, 1 }
 0x7bc   : > { %12946 = vmatmul.mubr.bf16.gmra.mrb[168].mxu1 %v10306_v3  ;;  %v10590_v3 = vsel %vm2977_vm9, %v10588_v17, %v10589_v63  ;;  %v10960_v17 = vshrl.u32 %v14653_v52, 16  ;;  %v16873_v63 = vld [vmem:[#allocation2 + $0x50] ss:$0 sps:$4 sm:$0x11]  }
 0x7bd   : > { %12953 = vmatprep.mubr.bf16.mxu1 %v10578_v58  ;;  %v14650_v58 = vcombine.low %v8641_v45, %v16860_v37  ;;  %v10967_v10 = vshll.u32 %v16873_v63, 16  ;;  %v16876_v37 = vld [vmem:[#allocation2 + $0x64] sm:$0xf]  ;;  %v16887_v63 = vld [vmem:[#allocation2 + $0xa0] sm:$0xf] }
 0x7bf   : > { %v10926_v30 = vshll.u32 %v14650_v58, 16  ;;  %v10924_v31 = vshrl.u32 %v14650_v58, 16  ;;  %v10969_v45 = vrot.slane %v10967_v10, 1 }
 0x7c1   : > { %v10928_v44 = vrot.slane %v10926_v30, 1 }
 0x7c3   : > { %v10929_v18 = vor.u32 %v10928_v44, %v10924_v31  ;;  %v16880_v44 = vld [vmem:[#allocation2 + $0x68] ss:$0 sps:$4 sm:$0x11]  }
 0x7c4   : > { %12954 = vmatmul.mubr.bf16.gmra.mrb[172].mxu1 %v10318_v13  ;;  %v10921_v13 = vrot.slane %v10919_v39, 1  ;;  %v10979_v39 = vshll.u32 %v16877_v62, 16  ;;  %v10991_v31 = vshll.u32 %v16880_v44, 16 }
 0x7c5   : > { %12961 = vmatprep.mubr.bf16.mxu1 %v10581_v14  ;;  %v16862_v14 = vld [vmem:[#allocation2 + $0x34] sm:$0xf]  ;;  %v10934_v61 = vsel %vm2464_vm0, %v10929_v18, %v10933_v6  ;;  %v16881_v6 = vld [vmem:[#allocation2 + $0x7c] sm:$0xf] }
 0x7c6   : > { %v14651_v24 = vcombine.low %v8643_v11, %v16862_v14  ;;  %v10922_v1 = vsel %vm2464_vm0, %v10917_v56, %v10921_v13  ;;  %v10977_v56 = vor.u32 %v10976_v43, %v10972_v48  ;;  %v10981_v23 = vrot.slane %v10979_v39, 1  ;;  %v8653_v13 = vld [vmem:[#allocation2 + $0x6c] sm:$0xf]  ;;  %v16879_v11 = vld [vmem:[#allocation2 + $0x70] sm:$0xf] }
 0x7c7   : > { %v10993_v18 = vrot.slane %v10991_v31, 1  ;;  %v16889_v43 = vld [vmem:[#allocation2 + $0xac] sm:$0xf] }
 0x7c8   : > { %v10938_v12 = vshll.u32 %v14651_v24, 16  ;;  %v10936_v50 = vshrl.u32 %v14651_v24, 16  ;;  %v10982_v14 = vsel %vm2464_vm0, %v10977_v56, %v10981_v23  ;;  %v16890_v56 = vld [vmem:[#allocation2 + $0xa4] ss:$0 sps:$4 sm:$0x11]  }
 0x7ca   : > { %v10940_v57 = vrot.slane %v10938_v12, 1  ;;  %v8655_v12 = vld [vmem:[#allocation2 + $0x78] sm:$0xf] }
 0x7cc   : > { %12962 = vmatmul.mubr.bf16.gmra.mrb[176].mxu1 %v10330_v34  ;;  %v14652_v34 = vcombine.low %v8645_v27, %v16864_v47  ;;  %v10941_v35 = vor.u32 %v10940_v57, %v10936_v50  ;;  %v14657_v27 = vcombine.low %v8655_v12, %v16881_v6  ;;  %v16882_v57 = vld [vmem:[#allocation2 + $0x74] ss:$0 sps:$4 sm:$0x11]  }
 0x7cd   : > { %12969 = vmatprep.mubr.bf16.mxu1 %v10584_v38  ;;  %v16865_v38 = vld [vmem:[#allocation2 + $0x38] ss:$0 sps:$4 sm:$0x11]   ;;  %v11003_v50 = vshll.u32 %v16882_v57, 16 }
 0x7ce   : > { %v10943_v32 = vshll.u32 %v16865_v38, 16  ;;  %v10950_v9 = vshll.u32 %v14652_v34, 16  ;;  %v11008_v42 = vshrl.u32 %v14657_v27, 16 }
 0x7d0   : > { %v10945_v25 = vrot.slane %v10943_v32, 1  ;;  %v10952_v54 = vrot.slane %v10950_v9, 1  ;;  %v11010_v32 = vshll.u32 %v14657_v27, 16  ;;  %v16883_v9 = vld [vmem:[#allocation2 + $0x88] sm:$0xf] }
 0x7d2   : > { %v10946_v8 = vsel %vm2464_vm0, %v10941_v35, %v10945_v25  ;;  %v8657_v35 = vld [vmem:[#allocation2 + $0x84] sm:$0xf]  ;;  %v11012_v26 = vrot.slane %v11010_v32, 1 }
 0x7d3   : > { %v14658_v25 = vcombine.low %v8657_v35, %v16883_v9 }
 0x7d4   : > { %12970 = vmatmul.mubr.bf16.gmra.mrb[180].mxu1 %v10342_v2  ;;  %v16869_v2 = vld [vmem:[#allocation2 + $0x44] ss:$0 sps:$4 sm:$0x11]  }
 0x7d5   : > { %12977 = vmatprep.mubr.bf16.mxu1 %v10587_v0  ;;  %v10955_v41 = vshll.u32 %v16869_v2, 16  ;;  %v16871_v0 = vld [vmem:[#allocation8 + $0x220] sm:$0xff]  }
 0x7d7   : > { %v10957_v33 = vrot.slane %v10955_v41, 1  ;;  %v8659_v41 = vld [vmem:[#allocation2 + $0x90] sm:$0xf] }
 0x7dc   : > { %12978 = vmatmul.mubr.bf16.gmra.mrb[184].mxu1 %v10354_v21  ;;  %v10965_v21 = vor.u32 %v10964_v60, %v10960_v17  ;;  %v11029_v60 = vrot.slane %v11027_v36, 1  ;;  %v8661_v17 = vld [vmem:[#allocation2 + $0x9c] sm:$0xf]  ;;  %v16898_v36 = vld [vmem:[#allocation2 + $0xf4] sm:$0xf] }
 0x7dd   : > { %12985 = vmatprep.mubr.bf16.mxu1 %v10590_v3  ;;  %v16875_v3 = vld [vmem:[#allocation8 + $0x230] sm:$0xff]   ;;  %v14660_v10 = vcombine.low %v8661_v17, %v16887_v63 }
 0x7de   : > { %v10970_v19 = vsel %vm2464_vm0, %v10965_v21, %v10969_v45  ;;  %v16888_v45 = vld [vmem:[#allocation2 + $0x98] ss:$0 sps:$4 sm:$0x11]  }
 0x7e4   : > { %12986 = vmatmul.mubr.bf16.gmra.mrb[188].mxu1 %v10366_v28  ;;  %v14656_v28 = vcombine.low %v8653_v13, %v16879_v11 }
 0x7e5   : > { %13026 = vmatprep.mubr.bf16.mxu1 %v10922_v1 }
 0x7e6   : > { %v10998_v22 = vshll.u32 %v14656_v28, 16 }
 0x7ec   : > { %13027 = vmatmul.mubr.bf16.vlgmr.msra.gmra.mrb[64].mxu1 %v14649_v59 }
 0x7ed   : > { %13034 = vmatprep.mubr.bf16.mxu1 %v10934_v61  ;;  %15205 = vmatpush3.bf16.msra.mxu1 %v20360_v4  ;;  %v10948_v4 = vshrl.u32 %v14652_v34, 16  ;;  %v10996_v61 = vshrl.u32 %v14656_v28, 16 }
 0x7ee   : > { %15198 = vmatprep.subr.bf16.mxu1 %v16866_v15 }
 0x7ef   : > { %v10953_v59 = vor.u32 %v10952_v54, %v10948_v4  ;;  %v11013_v54 = vor.u32 %v11012_v26, %v11008_v42  ;;  %v11022_v4 = vshll.u32 %v14658_v25, 16 }
 0x7f1   : > { %15206 = vmatpush3.bf16.msra.mxu1 %v16866_v15  ;;  %v10958_v7 = vsel %vm2464_vm0, %v10953_v59, %v10957_v33  ;;  %v11005_v15 = vrot.slane %v11003_v50, 1  ;;  %v11024_v33 = vrot.slane %v11022_v4, 1 }
 0x7f2   : > { %15199 = vmatprep.subr.bf16.mxu1 %v16867_v5 }
 0x7f4   : > { %13035 = vmatmul.mubr.bf16.gmra.mrb[68].mxu1 %v14650_v58  ;;  %v14655_v58 = vcombine.low %v8651_v53, %v16876_v37  ;;  %v11046_v37 = vshll.u32 %v14660_v10, 16 }
 0x7f5   : > { %13042 = vmatprep.mubr.bf16.mxu1 %v10946_v8  ;;  %15207 = vmatpush3.bf16.msra.mxu1 %v16867_v5 }
 0x7f6   : > { %15200 = vmatprep.subr.bf16.mxu1 %v16870_v49  ;;  %v10986_v30 = vshll.u32 %v14655_v58, 16  ;;  %v10984_v1 = vshrl.u32 %v14655_v58, 16  ;;  %v11048_v39 = vrot.slane %v11046_v37, 1 }
 0x7f9   : > { %15208 = vmatpush3.bf16.msra.mxu1 %v16870_v49  ;;  %v16885_v49 = vld [vmem:[#allocation2 + $0x94] sm:$0xf] }
 0x7fa   : > { %15201 = vmatprep.subr.bf16.mxu1 %v16871_v0  ;;  %v14659_v59 = vcombine.low %v8659_v41, %v16885_v49 }
 0x7fc   : > { %13043 = vmatmul.mubr.bf16.gmra.mrb[72].mxu1 %v14651_v24  ;;  %v10988_v24 = vrot.slane %v10986_v30, 1  ;;  %v11032_v46 = vshrl.u32 %v14659_v59, 16  ;;  %v11051_v30 = vshll.u32 %v16890_v56, 16 }
 0x7fd   : > { %13050 = vmatprep.mubr.bf16.mxu1 %v10958_v7  ;;  %15209 = vmatpush3.bf16.msra.mxu1 %v16871_v0  ;;  %v11020_v0 = vshrl.u32 %v14658_v25, 16  ;;  %v11034_v7 = vshll.u32 %v14659_v59, 16 }
 0x7fe   : > { %15202 = vmatprep.subr.bf16.mxu1 %v16874_v40  ;;  %v10989_v20 = vor.u32 %v10988_v24, %v10984_v1  ;;  %v11053_v11 = vrot.slane %v11051_v30, 1 }
 0x7ff   : > { %v11036_v21 = vrot.slane %v11034_v7, 1 }
 0x800   : > { %v10994_v47 = vsel %vm2464_vm0, %v10989_v20, %v10993_v18  ;;  %v16892_v20 = vld [vmem:[#allocation2 + $0xb0] ss:$0 sps:$4 sm:$0x11]  }
 0x801   : > { %15210 = vmatpush3.bf16.msra.mxu1 %v16874_v40  ;;  %v11037_v53 = vor.u32 %v11036_v21, %v11032_v46  ;;  %v16899_v21 = vld [vmem:[#allocation2 + $0x100] sm:$0xf] }
 0x802   : > { %15203 = vmatprep.subr.bf16.mxu1 %v16875_v3 }
 0x804   : > { %13051 = vmatmul.mubr.bf16.gmra.mrb[76].mxu1 %v14652_v34  ;;  %v11000_v34 = vrot.slane %v10998_v22, 1  ;;  %v11063_v22 = vshll.u32 %v16892_v20, 16 }
 0x805   : > { %13058 = vmatprep.mubr.bf16.mxu1 %v10970_v19  ;;  %15211 = vmatpush3.bf16.msra.mxu1 %v16875_v3  ;;  %v11039_v3 = vshll.u32 %v16888_v45, 16  ;;  %v8663_v19 = vld [vmem:[#allocation2 + $0xa8] sm:$0xf] }
 0x806   : > { %15204 = vmatprep.subr.bf16.mxu1 %v16878_v16  ;;  %v11001_v38 = vor.u32 %v11000_v34, %v10996_v61  ;;  %v14661_v48 = vcombine.low %v8663_v19, %v16889_v43  ;;  %v11065_v6 = vrot.slane %v11063_v22, 1 }
 0x808   : > { %v11006_v5 = vsel %vm2464_vm0, %v11001_v38, %v11005_v15  ;;  %v11058_v13 = vshll.u32 %v14661_v48, 16  ;;  %v11056_v31 = vshrl.u32 %v14661_v48, 16  ;;  %v16894_v38 = vld [vmem:[#allocation2 + $0xbc] ss:$0 sps:$4 sm:$0x11]  }
 0x809   : > { %15212 = vmatpush3.bf16.msra.mxu1 %v16878_v16  ;;  %v11044_v16 = vshrl.u32 %v14660_v10, 16  ;;  %v11075_v32 = vshll.u32 %v16894_v38, 16  ;;  %v8669_v15 = vld [vmem:[#allocation2 + $0xcc] sm:$0xf] }
 0x80a   : > { %v11060_v44 = vrot.slane %v11058_v13, 1 }
 0x80b   : > { %v11049_v23 = vor.u32 %v11048_v39, %v11044_v16  ;;  %v11077_v26 = vrot.slane %v11075_v32, 1 }
 0x80c   : > { %13059 = vmatmul.mubr.bf16.gmra.mrb[80].mxu1 %v14653_v52  ;;  %v16884_v52 = vld [vmem:[#allocation2 + $0x80] ss:$0 sps:$4 sm:$0x11]   ;;  %v11061_v18 = vor.u32 %v11060_v44, %v11056_v31 }
 0x80d   : > { %13066 = vmatprep.mubr.bf16.mxu1 %v10982_v14  ;;  %v11015_v8 = vshll.u32 %v16884_v52, 16  ;;  %v16891_v14 = vld [vmem:[#allocation2 + $0xb8] sm:$0xf]  ;;  %v11054_v1 = vsel %vm2464_vm0, %v11049_v23, %v11053_v11  ;;  %v16902_v23 = vld [vmem:[#allocation2 + $0x104] ss:$0 sps:$4 sm:$0x11]  }
 0x80e   : > { %v11066_v61 = vsel %vm2464_vm0, %v11061_v18, %v11065_v6  ;;  %v11123_v13 = vshll.u32 %v16902_v23, 16  ;;  %v16904_v18 = vld [vmem:[#allocation2 + $0x110] ss:$0 sps:$4 sm:$0x11]  }
 0x80f   : > { %v11017_v2 = vrot.slane %v11015_v8, 1 }
 0x811   : > { %v11018_v29 = vsel %vm2464_vm0, %v11013_v54, %v11017_v2  ;;  %v16896_v54 = vld [vmem:[#allocation2 + $0xc8] ss:$0 sps:$4 sm:$0x11]  }
 0x812   : > { %v11087_v4 = vshll.u32 %v16896_v54, 16 }
 0x814   : > { %13067 = vmatmul.mubr.bf16.gmra.mrb[84].mxu1 %v14654_v55  ;;  %v11025_v55 = vor.u32 %v11024_v33, %v11020_v0  ;;  %v11089_v49 = vrot.slane %v11087_v4, 1  ;;  %v16897_v33 = vld [vmem:[#allocation2 + $0xd4] ss:$0 sps:$4 sm:$0x11]  }
 0x815   : > { %13074 = vmatprep.mubr.bf16.mxu1 %v10994_v47  ;;  %v16893_v47 = vld [vmem:[#allocation2 + $0xc4] sm:$0xf]  ;;  %v11099_v0 = vshll.u32 %v16897_v33, 16  ;;  %v8683_v33 = vld [vmem:[#allocation2 + $0x138] sm:$0xf] }
 0x816   : > { %v11030_v40 = vsel %vm2464_vm0, %v11025_v55, %v11029_v60  ;;  %v14665_v55 = vcombine.low %v8671_v51, %v16898_v36 }
 0x817   : > { %v11101_v17 = vrot.slane %v11099_v0, 1  ;;  %v16909_v0 = vld [vmem:[#allocation2 + $0x13c] sm:$0xf] }
 0x818   : > { %v11106_v63 = vshll.u32 %v14665_v55, 16  ;;  %v14671_v51 = vcombine.low %v8683_v33, %v16909_v0  ;;  %v20467_v0 = vld [vmem:[#allocation2 + $0x184] sm:$0xf] }
 0x81a   : > { %v11108_v45 = vrot.slane %v11106_v63, 1 }
 0x81c   : > { %13075 = vmatmul.mubr.bf16.gmra.mrb[88].mxu1 %v14655_v58  ;;  %v11041_v58 = vrot.slane %v11039_v3, 1  ;;  %v11104_v3 = vshrl.u32 %v14665_v55, 16 }
 0x81d   : > { %13082 = vmatprep.mubr.bf16.mxu1 %v11006_v5 }
 0x81e   : > { %v11042_v62 = vsel %vm2464_vm0, %v11037_v53, %v11041_v58  ;;  %v16900_v53 = vld [vmem:[#allocation2 + $0xf8] ss:$0 sps:$4 sm:$0x11]   ;;  %v11109_v58 = vor.u32 %v11108_v45, %v11104_v3 }
 0x81f   : > { %v11111_v37 = vshll.u32 %v16900_v53, 16 }
 0x821   : > { %v11113_v43 = vrot.slane %v11111_v37, 1  ;;  %v11176_v37 = vshrl.u32 %v14671_v51, 16 }
 0x823   : > { %v11114_v16 = vsel %vm2464_vm0, %v11109_v58, %v11113_v43  ;;  %v16912_v58 = vld [vmem:[#allocation2 + $0x140] ss:$0 sps:$4 sm:$0x11]  }
 0x824   : > { %13083 = vmatmul.mubr.bf16.gmra.mrb[92].mxu1 %v14656_v28  ;;  %v8665_v28 = vld [vmem:[#allocation2 + $0xb4] sm:$0xf] }
 0x825   : > { %13090 = vmatprep.mubr.bf16.mxu1 %v11018_v29  ;;  %v14662_v24 = vcombine.low %v8665_v28, %v16891_v14  ;;  %v11125_v14 = vrot.slane %v11123_v13, 1 }
 0x827   : > { %v11070_v12 = vshll.u32 %v14662_v24, 16  ;;  %v11068_v50 = vshrl.u32 %v14662_v24, 16 }
 0x829   : > { %v11072_v57 = vrot.slane %v11070_v12, 1  ;;  %v11135_v12 = vshll.u32 %v16904_v18, 16 }
 0x82b   : > { %v11073_v35 = vor.u32 %v11072_v57, %v11068_v50 }
 0x82c   : > { %13091 = vmatmul.mubr.bf16.gmra.mrb[96].mxu1 %v14657_v27  ;;  %v8667_v27 = vld [vmem:[#allocation2 + $0xc0] sm:$0xf] }
 0x82d   : > { %13098 = vmatprep.mubr.bf16.mxu1 %v11030_v40  ;;  %v14663_v34 = vcombine.low %v8667_v27, %v16893_v47  ;;  %v11078_v42 = vsel %vm2464_vm0, %v11073_v35, %v11077_v26  ;;  %v8673_v40 = vld [vmem:[#allocation2 + $0xfc] sm:$0xf]  ;;  %v11137_v47 = vrot.slane %v11135_v12, 1  ;;  %v8681_v26 = vld [vmem:[#allocation2 + $0x12c] sm:$0xf] }
 0x82e   : > { %v14666_v46 = vcombine.low %v8673_v40, %v16899_v21  ;;  %v8685_v21 = vld [vmem:[#allocation2 + $0x144] sm:$0xf] }
 0x82f   : > { %v11082_v9 = vshll.u32 %v14663_v34, 16  ;;  %v11080_v8 = vshrl.u32 %v14663_v34, 16 }
 0x830   : > { %v11118_v19 = vshll.u32 %v14666_v46, 16  ;;  %v11116_v30 = vshrl.u32 %v14666_v46, 16 }
 0x831   : > { %v11084_v52 = vrot.slane %v11082_v9, 1 }
 0x832   : > { %v11120_v56 = vrot.slane %v11118_v19, 1  ;;  %v11183_v19 = vshll.u32 %v16912_v58, 16 }
 0x833   : > { %v11085_v41 = vor.u32 %v11084_v52, %v11080_v8 }
 0x834   : > { %13099 = vmatmul.mubr.bf16.gmra.mrb[100].mxu1 %v14658_v25  ;;  %v16895_v25 = vld [vmem:[#allocation2 + $0xd0] sm:$0xf]  ;;  %v11121_v11 = vor.u32 %v11120_v56, %v11116_v30 }
 0x835   : > { %13106 = vmatprep.mubr.bf16.mxu1 %v11042_v62  ;;  %v14664_v5 = vcombine.low %v8669_v15, %v16895_v25  ;;  %v11090_v7 = vsel %vm2464_vm0, %v11085_v41, %v11089_v49  ;;  %v16901_v62 = vld [vmem:[#allocation2 + $0x10c] sm:$0xf]  ;;  %v16906_v15 = vld [vmem:[#allocation2 + $0x11c] ss:$0 sps:$4 sm:$0x11]  }
 0x836   : > { %v11126_v31 = vsel %vm2464_vm0, %v11121_v11, %v11125_v14  ;;  %v11147_v35 = vshll.u32 %v16906_v15, 16  ;;  %v16914_v11 = vld [vmem:[#allocation2 + $0x14c] ss:$0 sps:$4 sm:$0x11]  }
 0x837   : > { %v11094_v2 = vshll.u32 %v14664_v5, 16 }
 0x839   : > { %v11096_v29 = vrot.slane %v11094_v2, 1  ;;  %v16908_v2 = vld [vmem:[#allocation2 + $0x128] ss:$0 sps:$4 sm:$0x11]  }
 0x83a   : > { %v11159_v41 = vshll.u32 %v16908_v2, 16 }
 0x83c   : > { %13107 = vmatmul.mubr.bf16.gmra.mrb[104].mxu1 %v14659_v59  ;;  %v11092_v59 = vshrl.u32 %v14664_v5, 16 }
 0x83d   : > { %13114 = vmatprep.mubr.bf16.mxu1 %v11054_v1  ;;  %v16903_v1 = vld [vmem:[#allocation2 + $0x118] sm:$0xf] }
 0x83e   : > { %v11097_v60 = vor.u32 %v11096_v29, %v11092_v59  ;;  %v11161_v29 = vrot.slane %v11159_v41, 1 }
 0x844   : > { %13115 = vmatmul.mubr.bf16.gmra.mrb[108].mxu1 %v14660_v10  ;;  %v11102_v10 = vsel %vm2464_vm0, %v11097_v60, %v11101_v17  ;;  %v16910_v60 = vld [vmem:[#allocation2 + $0x134] ss:$0 sps:$4 sm:$0x11]  }
 0x845   : > { %13122 = vmatprep.mubr.bf16.mxu1 %v11066_v61  ;;  %v16905_v61 = vld [vmem:[#allocation2 + $0x124] sm:$0xf]  ;;  %v11171_v17 = vshll.u32 %v16910_v60, 16 }
 0x847   : > { %v11173_v40 = vrot.slane %v11171_v17, 1 }
 0x84c   : > { %13123 = vmatmul.mubr.bf16.gmra.mrb[112].mxu1 %v14661_v48  ;;  %v8675_v48 = vld [vmem:[#allocation2 + $0x108] sm:$0xf] }
 0x84d   : > { %13130 = vmatprep.mubr.bf16.mxu1 %v11078_v42  ;;  %v14667_v39 = vcombine.low %v8675_v48, %v16901_v62  ;;  %v16907_v42 = vld [vmem:[#allocation2 + $0x130] sm:$0xf]  ;;  %v11185_v62 = vrot.slane %v11183_v19, 1 }
 0x84e   : > { %v14670_v52 = vcombine.low %v8681_v26, %v16907_v42 }
 0x84f   : > { %v11130_v28 = vshll.u32 %v14667_v39, 16  ;;  %v11128_v22 = vshrl.u32 %v14667_v39, 16 }
 0x850   : > { %v11166_v59 = vshll.u32 %v14670_v52, 16 }
 0x851   : > { %v11132_v20 = vrot.slane %v11130_v28, 1  ;;  %v11195_v28 = vshll.u32 %v16914_v11, 16  ;;  %v20494_v11 = vld [vmem:[%s20981_s9] ss:$0 sm:$0xff] }
 0x853   : > { %v11133_v6 = vor.u32 %v11132_v20, %v11128_v22 }
 0x854   : > { %13131 = vmatmul.mubr.bf16.gmra.mrb[116].mxu1 %v14662_v24  ;;  %v8677_v24 = vld [vmem:[#allocation2 + $0x114] sm:$0xf] }
 0x855   : > { %13138 = vmatprep.mubr.bf16.mxu1 %v11090_v7  ;;  %v14668_v44 = vcombine.low %v8677_v24, %v16903_v1  ;;  %v11138_v50 = vsel %vm2464_vm0, %v11133_v6, %v11137_v47  ;;  %v11164_v7 = vshrl.u32 %v14670_v52, 16  ;;  %v11197_v1 = vrot.slane %v11195_v28, 1  ;;  %v16916_v6 = vld [vmem:[#allocation2 + $0x158] ss:$0 sps:$4 sm:$0x11]  }
 0x857   : > { %v11142_v27 = vshll.u32 %v14668_v44, 16  ;;  %v11140_v32 = vshrl.u32 %v14668_v44, 16 }
 0x859   : > { %v11144_v38 = vrot.slane %v11142_v27, 1  ;;  %v11207_v27 = vshll.u32 %v16916_v6, 16 }
 0x85b   : > { %v11145_v9 = vor.u32 %v11144_v38, %v11140_v32 }
 0x85c   : > { %13139 = vmatmul.mubr.bf16.gmra.mrb[120].mxu1 %v14663_v34  ;;  %v8679_v34 = vld [vmem:[#allocation2 + $0x120] sm:$0xf] }
 0x85d   : > { %13146 = vmatprep.mubr.bf16.mxu1 %v11102_v10  ;;  %v14669_v57 = vcombine.low %v8679_v34, %v16905_v61  ;;  %v11178_v10 = vshll.u32 %v14671_v51, 16  ;;  %v11209_v61 = vrot.slane %v11207_v27, 1 }
 0x85f   : > { %v11154_v25 = vshll.u32 %v14669_v57, 16  ;;  %v11152_v4 = vshrl.u32 %v14669_v57, 16  ;;  %v11180_v53 = vrot.slane %v11178_v10, 1 }
 0x861   : > { %v11156_v54 = vrot.slane %v11154_v25, 1  ;;  %v11181_v43 = vor.u32 %v11180_v53, %v11176_v37  ;;  %v8697_v37 = vld [vmem:[#allocation2 + $0x18c] sm:$0xf] }
 0x863   : > { %v11157_v49 = vor.u32 %v11156_v54, %v11152_v4  ;;  %v11186_v30 = vsel %vm2464_vm0, %v11181_v43, %v11185_v62 }
 0x864   : > { %13147 = vmatmul.mubr.bf16.gmra.mrb[124].mxu1 %v14664_v5  ;;  %v11149_v5 = vrot.slane %v11147_v35, 1 }
 0x865   : > { %13154 = vmatprep.mubr.bf16.mxu1 %v11114_v16  ;;  %v11162_v36 = vsel %vm2464_vm0, %v11157_v49, %v11161_v29  ;;  %v16913_v16 = vld [vmem:[#allocation2 + $0x154] sm:$0xf]  ;;  %v16920_v49 = vld [vmem:[#allocation2 + $0x170] ss:$0 sps:$4 sm:$0x11]  }
 0x866   : > { %v11150_v8 = vsel %vm2464_vm0, %v11145_v9, %v11149_v5  ;;  %v16918_v9 = vld [vmem:[#allocation2 + $0x164] ss:$0 sps:$4 sm:$0x11]  }
 0x867   : > { %v11219_v25 = vshll.u32 %v16918_v9, 16  ;;  %v20512_v9 = vld [vmem:[#allocation2 + $0x1a8] sm:$0xf] }
 0x869   : > { %v11221_v42 = vrot.slane %v11219_v25, 1  ;;  %v16923_v25 = vld [vmem:[%s17390_s26 + $0x8] sm:$0xff] }
 0x86c   : > { %13155 = vmatmul.mubr.bf16.gmra.mrb[128].mxu1 %v14665_v55  ;;  %v11168_v55 = vrot.slane %v11166_v59, 1  ;;  %v11231_v59 = vshll.u32 %v16920_v49, 16  ;;  %v21182_v49 = vld [vmem:[#allocation23_spill] sm:$0xff] }
 0x86d   : > { %13162 = vmatprep.mubr.bf16.mxu1 %v11126_v31  ;;  %v16915_v31 = vld [vmem:[#allocation2 + $0x160] sm:$0xf] }
 0x86e   : > { %v11169_v63 = vor.u32 %v11168_v55, %v11164_v7 }
 0x870   : > { %v11174_v3 = vsel %vm2464_vm0, %v11169_v63, %v11173_v40  ;;  %v16921_v63 = vld [vmem:[#allocation2 + $0x17c] ss:$0 sps:$4 sm:$0x11]  }
 0x871   : > { %v11243_v10 = vshll.u32 %v16921_v63, 16 }
 0x874   : > { %13163 = vmatmul.mubr.bf16.gmra.mrb[132].mxu1 %v14666_v46  ;;  %v16911_v46 = vld [vmem:[#allocation2 + $0x148] sm:$0xf] }
 0x875   : > { %13170 = vmatprep.mubr.bf16.mxu1 %v11138_v50  ;;  %v14672_v45 = vcombine.low %v8685_v21, %v16911_v46  ;;  %v16917_v50 = vld [vmem:[#allocation2 + $0x16c] sm:$0xf]  ;;  %v20474_v46 = vld [vmem:[#allocation2 + $0x188] ss:$0 sps:$4 sm:$0x11]  }
 0x877   : > { %v11190_v48 = vshll.u32 %v14672_v45, 16  ;;  %v11188_v13 = vshrl.u32 %v14672_v45, 16 }
 0x879   : > { %v11192_v23 = vrot.slane %v11190_v48, 1  ;;  %v11255_v48 = vshll.u32 %v20474_v46, 16 }
 0x87b   : > { %v11193_v14 = vor.u32 %v11192_v23, %v11188_v13 }
 0x87c   : > { %13171 = vmatmul.mubr.bf16.gmra.mrb[136].mxu1 %v14667_v39  ;;  %v8687_v39 = vld [vmem:[#allocation2 + $0x150] sm:$0xf] }
 0x87d   : > { %13178 = vmatprep.mubr.bf16.mxu1 %v11150_v8  ;;  %v14673_v56 = vcombine.low %v8687_v39, %v16913_v16  ;;  %v11198_v22 = vsel %vm2464_vm0, %v11193_v14, %v11197_v1  ;;  %v16919_v8 = vld [vmem:[#allocation2 + $0x178] sm:$0xf]  ;;  %v20487_v39 = vld [vmem:[%s20980_s8] ss:$0 sm:$0xff]  ;;  %v11257_v14 = vrot.slane %v11255_v48, 1 }
 0x87e   : > { %v21183_v48 = vld [vmem:[#allocation17_spill] sm:$0xff] }
 0x87f   : > { %v11202_v24 = vshll.u32 %v14673_v56, 16  ;;  %v11200_v12 = vshrl.u32 %v14673_v56, 16 }
 0x881   : > { %v11204_v18 = vrot.slane %v11202_v24, 1  ;;  %v20496_v24 = vld [vmem:[#allocation2 + $0x19c] sm:$0xf] }
 0x883   : > { %v11205_v47 = vor.u32 %v11204_v18, %v11200_v12  ;;  %v8699_v12 = vld [vmem:[#allocation2 + $0x198] sm:$0xf] }
 0x884   : > { %13179 = vmatmul.mubr.bf16.gmra.mrb[140].mxu1 %v14668_v44  ;;  %v8689_v44 = vld [vmem:[#allocation2 + $0x15c] sm:$0xf] }
 0x885   : > { %13186 = vmatprep.mubr.bf16.mxu1 %v11162_v36  ;;  %v14674_v20 = vcombine.low %v8689_v44, %v16915_v31  ;;  %v11210_v32 = vsel %vm2464_vm0, %v11205_v47, %v11209_v61  ;;  %v8695_v36 = vld [vmem:[#allocation2 + $0x180] sm:$0xf]  ;;  %v21180_v44 = vld [vmem:[#allocation15_spill] sm:$0xff] }
 0x886   : > { %v20470_v55 = vcombine.low %v8695_v36, %v20467_v0  ;;  %v16922_v61 = vld [vmem:[%s17390_s26] sm:$0xff] }
 0x887   : > { %v11214_v34 = vshll.u32 %v14674_v20, 16  ;;  %v11212_v35 = vshrl.u32 %v14674_v20, 16 }
 0x888   : > { %v11250_v40 = vshll.u32 %v20470_v55, 16  ;;  %v11248_v43 = vshrl.u32 %v20470_v55, 16 }
 0x889   : > { %v11216_v15 = vrot.slane %v11214_v34, 1  ;;  %v20506_v34 = vcombine.low %v8699_v12, %v20496_v24 }
 0x88a   : > { %v11252_v53 = vrot.slane %v11250_v40, 1 }
 0x88b   : > { %v11217_v5 = vor.u32 %v11216_v15, %v11212_v35  ;;  %v8701_v35 = vld [vmem:[#allocation2 + $0x1a4] sm:$0xf] }
 0x88c   : > { %13187 = vmatmul.mubr.bf16.gmra.mrb[144].mxu1 %v14669_v57  ;;  %v8691_v57 = vld [vmem:[#allocation2 + $0x168] sm:$0xf]  ;;  %v11253_v16 = vor.u32 %v11252_v53, %v11248_v43  ;;  %v20540_v53 = vld [vmem:[#allocation2 + $0x1ac] ss:$0 sps:$4 sm:$0x11]  }
 0x88d   : > { %13194 = vmatprep.mubr.bf16.mxu1 %v11174_v3  ;;  %v14675_v38 = vcombine.low %v8691_v57, %v16917_v50  ;;  %v11222_v4 = vsel %vm2464_vm0, %v11217_v5, %v11221_v42  ;;  %v11245_v3 = vrot.slane %v11243_v10, 1  ;;  %v16924_v10 = vld [vmem:[%s17390_s26 + $0x10] sm:$0xff] }
 0x88e   : > { %v11258_v18 = vsel %vm2464_vm0, %v11253_v16, %v11257_v14  ;;  %v21184_v14 = vld [vmem:[#allocation19_spill] sm:$0xff] }
 0x88f   : > { %v11226_v26 = vshll.u32 %v14675_v38, 16  ;;  %v11224_v41 = vshrl.u32 %v14675_v38, 16 }
 0x891   : > { %v11228_v2 = vrot.slane %v11226_v26, 1  ;;  %v21181_v26 = vld [vmem:[#allocation21_spill] sm:$0xff] }
 0x893   : > { %v11229_v29 = vor.u32 %v11228_v2, %v11224_v41  ;;  %v20523_v2 = vld [vmem:[#allocation2 + $0x1a0] ss:$0 sps:$4 sm:$0x11]  }
 0x894   : > { %13195 = vmatmul.mubr.bf16.gmra.mrb[148].mxu1 %v14670_v52  ;;  %v8693_v52 = vld [vmem:[#allocation2 + $0x174] sm:$0xf]  ;;  %v11279_v63 = vshll.u32 %v20523_v2, 16 }
 0x895   : > { %13202 = vmatprep.mubr.bf16.mxu1 %v11186_v30  ;;  %v14676_v54 = vcombine.low %v8693_v52, %v16919_v8 }
 0x897   : > { %v11238_v33 = vshll.u32 %v14676_v54, 16  ;;  %v11236_v17 = vshrl.u32 %v14676_v54, 16 }
 0x899   : > { %v11240_v60 = vrot.slane %v11238_v33, 1 }
 0x89b   : > { %v11241_v21 = vor.u32 %v11240_v60, %v11236_v17 }
 0x89c   : > { %13203 = vmatmul.mubr.bf16.gmra.mrb[152].mxu1 %v14671_v51  ;;  %v11233_v51 = vrot.slane %v11231_v59, 1 }
 0x89d   : > { %13210 = vmatprep.mubr.bf16.mxu1 %v11198_v22  ;;  %v11246_v58 = vsel %vm2464_vm0, %v11241_v21, %v11245_v3  ;;  %v20500_v22 = vld [vmem:[#allocation2 + $0x194] ss:$0 sps:$4 sm:$0x11]   ;;  %v11272_v3 = vshrl.u32 %v20506_v34, 16 }
 0x89e   : > { %v11234_v7 = vsel %vm2464_vm0, %v11229_v29, %v11233_v51  ;;  %v20530_v51 = vcombine.low %v8701_v35, %v20512_v9  ;;  %v21185_v35 = vld [vmem:[#allocation16_spill] sm:$0xff] }
 0x8a4   : > { %13211 = vmatmul.mubr.bf16.gmra.mrb[156].mxu1 %v14672_v45  ;;  %v20476_v45 = vld [vmem:[#allocation2 + $0x190] sm:$0xf] }
 0x8a5   : > { %13218 = vmatprep.mubr.bf16.mxu1 %v11210_v32  ;;  %v20480_v19 = vcombine.low %v8697_v37, %v20476_v45  ;;  %v11267_v32 = vshll.u32 %v20500_v22, 16  ;;  %v11286_v37 = vshll.u32 %v20530_v51, 16 }
 0x8a7   : > { %v11262_v13 = vshll.u32 %v20480_v19, 16  ;;  %v11269_v33 = vrot.slane %v11267_v32, 1  ;;  %v16927_v32 = vld [vmem:[%s17390_s26 + $0x28] sm:$0xff] }
 0x8a9   : > { %v11264_v47 = vrot.slane %v11262_v13, 1  ;;  %v11284_v13 = vshrl.u32 %v20530_v51, 16 }
 0x8ac   : > { %13219 = vmatmul.mubr.bf16.gmra.mrb[160].mxu1 %v14673_v56  ;;  %v21179_v56 = vld [vmem:[#allocation22_spill] sm:$0xff] }
 0x8ad   : > { %13226 = vmatprep.mubr.bf16.mxu1 %v11222_v4 }
 0x8b4   : > { %13227 = vmatmul.mubr.bf16.gmra.mrb[164].mxu1 %v14674_v20 }
 0x8b5   : > { %13234 = vmatprep.mubr.bf16.mxu1 %v11234_v7 }
 0x8bc   : > { %13235 = vmatmul.mubr.bf16.gmra.mrb[168].mxu1 %v14675_v38  ;;  %v11260_v38 = vshrl.u32 %v20480_v19, 16 }
 0x8bd   : > { %13242 = vmatprep.mubr.bf16.mxu1 %v11246_v58 }
 0x8be   : > { %v11265_v8 = vor.u32 %v11264_v47, %v11260_v38 }
 0x8bf   : > { %v13028_v62 = vpop.f32.mrb[64].mxu1 }
 0x8c0   : > { %v13318_v30 = vadd.f32 %v21179_v56, %v13028_v62  ;;  %v13030_v23 = vpop.f32.mrb[65].mxu1  ;;  %v11270_v60 = vsel %vm2464_vm0, %v11265_v8, %v11269_v33 }
 0x8c1   : > { %v13031_v28 = vpop.f32.mrb[66].mxu1  ;;  %v11281_v23 = vrot.slane %v11279_v63, 1  ;;  %v21187_v63 = vld [vmem:[#allocation24_spill] sm:$0xff] }
 0x8c2   : > { %v13579_v1 = vmul.f32 %v20487_v39, %v13318_v30  ;;  %v13321_v31 = vadd.f32 %v21180_v44, %v13031_v28  ;;  %v13033_v20 = vpop.f32.mrb[67].mxu1 }
 0x8c3   : > { %v11291_v20 = vshll.u32 %v20540_v53, 16 }
 0x8c4   : > { %v13650_v6 = vadd.f32 %v20494_v11, %v13579_v1  ;;  %v13580_v27 = vmul.f32 %v20487_v39, %v13321_v31  ;;  %13243 = vmatmul.mubr.bf16.gmra.mrb[172].mxu1 %v14676_v54  ;;  %v11274_v54 = vshll.u32 %v20506_v34, 16  ;;  %v11288_v31 = vrot.slane %v11286_v37, 1  ;;  %v21188_v37 = vld [vmem:[#allocation26_spill] sm:$0xff] }
 0x8c5   : > { %13250 = vmatprep.mubr.bf16.mxu1 %v11258_v18 }
 0x8c6   : > { %v13714_v57 = vadd.f32 %v16922_v61, %v13650_v6  ;;  %v13651_v50 = vadd.f32 %v20494_v11, %v13580_v27  ;;  %v11276_v17 = vrot.slane %v11274_v54, 1  ;;  %v16926_v27 = vld [vmem:[%s17390_s26 + $0x20] sm:$0xff] }
 0x8c7   : > { %v13036_v15 = vpop.f32.mrb[68].mxu1 }
 0x8c8   : > { %13779 = vst.msk [vmem:[%s20516_s20] sm:$0xff] %vm13778_vm6, %v13714_v57  ;;  %v13715_v5 = vadd.f32 %v16923_v25, %v13651_v50  ;;  %v13326_v42 = vadd.f32 %v21181_v26, %v13036_v15  ;;  %v13038_v52 = vpop.f32.mrb[69].mxu1  ;;  %v11277_v56 = vor.u32 %v11276_v17, %v11272_v3  ;;  %v11289_v57 = vor.u32 %v11288_v31, %v11284_v13  ;;  %v16931_v31 = vld [vmem:[%s17390_s26 + $0x48] sm:$0xff] }
 0x8c9   : > { %v13039_v4 = vpop.f32.mrb[70].mxu1  ;;  %v11293_v50 = vrot.slane %v11291_v20, 1  ;;  %v11508_v3 = vrot.slane %v20474_v46, 1 }
 0x8ca   : > { %13780 = vst.msk [vmem:[%s20516_s20 + $0x8] sm:$0xff] %vm13778_vm6, %v13715_v5  ;;  %v13581_v41 = vmul.f32 %v20487_v39, %v13326_v42  ;;  %v13329_v59 = vadd.f32 %v21182_v49, %v13039_v4  ;;  %v13041_v29 = vpop.f32.mrb[71].mxu1  ;;  %v11282_v6 = vsel %vm2464_vm0, %v11277_v56, %v11281_v23  ;;  %v21186_v42 = vld [vmem:[#allocation18_spill] sm:$0xff]  ;;  %v8763_v4 = vld [vmem:[#allocation2 + $0x180] sm:$0xe]  ;;  %v16930_v23 = vld [vmem:[%s17390_s26 + $0x40] sm:$0xff] }
 0x8cb   : > { %v11294_v54 = vsel %vm2464_vm0, %v11289_v57, %v11293_v50  ;;  %v16928_v29 = vld [vmem:[%s17390_s26 + $0x30] sm:$0xff] }
 0x8cc   : > { %v13652_v36 = vadd.f32 %v20494_v11, %v13581_v41  ;;  %v13582_v7 = vmul.f32 %v20487_v39, %v13329_v59  ;;  %13251 = vmatmul.mubr.bf16.gmra.mrb[176].mxu1 %v20470_v55  ;;  %v16925_v55 = vld [vmem:[%s17390_s26 + $0x18] sm:$0xff]  ;;  %v14741_v59 = vcombine.low %v8763_v4, %v20467_v0 }
 0x8cd   : > { %13258 = vmatprep.mubr.bf16.mxu1 %v11270_v60  ;;  %v16929_v60 = vld [vmem:[%s17390_s26 + $0x38] sm:$0xff] }
 0x8ce   : > { %v13716_v40 = vadd.f32 %v16924_v10, %v13652_v36  ;;  %v13653_v21 = vadd.f32 %v20494_v11, %v13582_v7 }
 0x8cf   : > { %v13044_v58 = vpop.f32.mrb[72].mxu1 }
 0x8d0   : > { %13781 = vst.msk [vmem:[%s20516_s20 + $0x10] sm:$0xff] %vm13778_vm6, %v13716_v40  ;;  %v13717_v43 = vadd.f32 %v16925_v55, %v13653_v21  ;;  %v13334_v62 = vadd.f32 %v21183_v48, %v13044_v58  ;;  %v13046_v16 = vpop.f32.mrb[73].mxu1  ;;  %v11507_v21 = vrot.slane %v14741_v59, 1  ;;  %v21192_v59 = vld [vmem:[#allocation30_spill] sm:$0xff] }
 0x8d1   : > { %v13047_v30 = vpop.f32.mrb[74].mxu1 }
 0x8d2   : > { %13782 = vst.msk [vmem:[%s20516_s20 + $0x18] sm:$0xff] %vm13778_vm6, %v13717_v43  ;;  %v13583_v28 = vmul.f32 %v20487_v39, %v13334_v62  ;;  %v13337_v1 = vadd.f32 %v21184_v14, %v13047_v30  ;;  %v13049_v44 = vpop.f32.mrb[75].mxu1  ;;  %v8764_v43 = vld [vmem:[#allocation2 + $0x18c] sm:$0xe]  ;;  %v8765_v62 = vld [vmem:[#allocation2 + $0x198] sm:$0xe]  ;;  %v11509_v46 = vsel %vm2977_vm9, %v11507_v21, %v11508_v3 }
 0x8d3   : > { %v14742_v48 = vcombine.low %v8764_v43, %v20476_v45  ;;  %v14743_v30 = vcombine.low %v8765_v62, %v20496_v24  ;;  %v8766_v14 = vld [vmem:[#allocation2 + $0x1a4] sm:$0xe]  ;;  %v11511_v44 = vrot.slane %v20500_v22, 1  ;;  %v11514_v24 = vrot.slane %v20523_v2, 1  ;;  %v21193_v3 = vld [vmem:[#allocation27_spill] sm:$0xff] }
 0x8d4   : > { %v13654_v18 = vadd.f32 %v20494_v11, %v13583_v28  ;;  %v13584_v12 = vmul.f32 %v20487_v39, %v13337_v1  ;;  %13259 = vmatmul.mubr.bf16.gmra.mrb[180].mxu1 %v20480_v19  ;;  %v21190_v22 = vld [vmem:[#allocation25_spill] sm:$0xff] }
 0x8d5   : > { %13266 = vmatprep.mubr.bf16.mxu1 %v11282_v6  ;;  %v11510_v1 = vrot.slane %v14742_v48, 1  ;;  %v11513_v6 = vrot.slane %v14743_v30, 1 }
 0x8d6   : > { %v13718_v47 = vadd.f32 %v16926_v27, %v13654_v18  ;;  %v13655_v61 = vadd.f32 %v20494_v11, %v13584_v12 }
 0x8d7   : > { %v13052_v38 = vpop.f32.mrb[76].mxu1  ;;  %v11515_v2 = vsel %vm2977_vm9, %v11513_v6, %v11514_v24  ;;  %v16938_v24 = vld [vmem:[%s17390_s26 + $0x80] sm:$0xff] }
 0x8d8   : > { %13783 = vst.msk [vmem:[%s20516_s20 + $0x20] sm:$0xff] %vm13778_vm6, %v13718_v47  ;;  %v13719_v15 = vadd.f32 %v16927_v32, %v13655_v61  ;;  %v13342_v25 = vadd.f32 %v21185_v35, %v13052_v38  ;;  %v13054_v5 = vpop.f32.mrb[77].mxu1  ;;  %v14744_v47 = vcombine.low %v8766_v14, %v20512_v9  ;;  %v11512_v38 = vsel %vm2977_vm9, %v11510_v1, %v11511_v44  ;;  %v21195_v14 = vld [vmem:[#allocation32_spill] sm:$0xff] }
 0x8d9   : > { %v13055_v26 = vpop.f32.mrb[78].mxu1  ;;  %v11517_v35 = vrot.slane %v20540_v53, 1 }
 0x8da   : > { %13784 = vst.msk [vmem:[%s20516_s20 + $0x28] sm:$0xff] %vm13778_vm6, %v13719_v15  ;;  %v13585_v19 = vmul.f32 %v20487_v39, %v13342_v25  ;;  %v13345_v52 = vadd.f32 %v21186_v42, %v13055_v26  ;;  %v13057_v8 = vpop.f32.mrb[79].mxu1  ;;  %v11516_v9 = vrot.slane %v14744_v47, 1  ;;  %v16932_v25 = vld [vmem:[%s17390_s26 + $0x50] sm:$0xff]  ;;  %v16933_v42 = vld [vmem:[%s17390_s26 + $0x58] sm:$0xff] }
 0x8db   : > { %v21191_v8 = vld [vmem:[#allocation28_spill] sm:$0xff] }
 0x8dc   : > { %v13656_v41 = vadd.f32 %v20494_v11, %v13585_v19  ;;  %v13586_v49 = vmul.f32 %v20487_v39, %v13345_v52  ;;  %13267 = vmatmul.mubr.bf16.gmra.mrb[184].mxu1 %v20506_v34 }
 0x8dd   : > { %13274 = vmatprep.mubr.bf16.mxu1 %v11294_v54 }
 0x8de   : > { %v13720_v33 = vadd.f32 %v16928_v29, %v13656_v41  ;;  %v13657_v36 = vadd.f32 %v20494_v11, %v13586_v49  ;;  %v11518_v49 = vsel %vm2977_vm9, %v11516_v9, %v11517_v35  ;;  %v21198_v9 = vld [vmem:[#allocation33_spill] sm:$0xff] }
 0x8df   : > { %v13060_v7 = vpop.f32.mrb[80].mxu1 }
 0x8e0   : > { %13785 = vst.msk [vmem:[%s20516_s20 + $0x30] sm:$0xff] %vm13778_vm6, %v13720_v33  ;;  %v13721_v17 = vadd.f32 %v16929_v60, %v13657_v36  ;;  %v13350_v10 = vadd.f32 %v21187_v63, %v13060_v7  ;;  %v13062_v40 = vpop.f32.mrb[81].mxu1  ;;  %v16934_v60 = vld [vmem:[%s17390_s26 + $0x60] sm:$0xff] }
 0x8e1   : > { %v13063_v34 = vpop.f32.mrb[82].mxu1  ;;  %v16935_v40 = vld [vmem:[%s17390_s26 + $0x68] sm:$0xff] }
 0x8e2   : > { %13786 = vst.msk [vmem:[%s20516_s20 + $0x38] sm:$0xff] %vm13778_vm6, %v13721_v17  ;;  %v13587_v0 = vmul.f32 %v20487_v39, %v13350_v10  ;;  %v13353_v58 = vadd.f32 %v21188_v37, %v13063_v34  ;;  %v13065_v55 = vpop.f32.mrb[83].mxu1 }
 0x8e3   : > { %v21194_v55 = vld [vmem:[#allocation29_spill] sm:$0xff] }
 0x8e4   : > { %v13658_v16 = vadd.f32 %v20494_v11, %v13587_v0  ;;  %v13588_v56 = vmul.f32 %v20487_v39, %v13353_v58  ;;  %13275 = vmatmul.mubr.bf16.gmra.mrb[188].mxu1 %v20530_v51  ;;  %v21189_v51 = vld [vmem:[#allocation20_spill] sm:$0xff] }
 0x8e5   : > { %15189 = vmatprep.mubr.bf16.mxu1 %v11509_v46 }
 0x8e6   : > { %v13722_v13 = vadd.f32 %v16930_v23, %v13658_v16  ;;  %v13659_v28 = vadd.f32 %v20494_v11, %v13588_v56  ;;  %v16936_v56 = vld [vmem:[%s17390_s26 + $0x70] sm:$0xff] }
 0x8e7   : > { %v13068_v45 = vpop.f32.mrb[84].mxu1 }
 0x8e8   : > { %13787 = vst.msk [vmem:[%s20516_s20 + $0x40] sm:$0xff] %vm13778_vm6, %v13722_v13  ;;  %v13723_v20 = vadd.f32 %v16931_v31, %v13659_v28  ;;  %v13358_v18 = vadd.f32 %v21189_v51, %v13068_v45  ;;  %v13070_v12 = vpop.f32.mrb[85].mxu1  ;;  %v16937_v13 = vld [vmem:[%s17390_s26 + $0x78] sm:$0xff] }
 0x8e9   : > { %v13071_v27 = vpop.f32.mrb[86].mxu1 }
 0x8ea   : > { %13788 = vst.msk [vmem:[%s20516_s20 + $0x48] sm:$0xff] %vm13778_vm6, %v13723_v20  ;;  %v13589_v61 = vmul.f32 %v20487_v39, %v13358_v18  ;;  %v13361_v57 = vadd.f32 %v21190_v22, %v13071_v27  ;;  %v13073_v50 = vpop.f32.mrb[87].mxu1  ;;  %v21196_v20 = vld [vmem:[#allocation34_spill] sm:$0xff]  ;;  %v16939_v22 = vld [vmem:[%s17390_s26 + $0x88] sm:$0xff] }
 0x8eb   : > { %v21197_v50 = vld [vmem:[#allocation31_spill] sm:$0xff] }
 0x8ec   : > { %v13660_v32 = vadd.f32 %v20494_v11, %v13589_v61  ;;  %v13590_v15 = vmul.f32 %v20487_v39, %v13361_v57  ;;  %15190 = vmatmul.mubr.bf16.vlgmr.msra.gmra.mrb[192].mxu1 %v11512_v38 }
 0x8ed   : > { %15193 = vmatprep.mubr.bf16.mxu1 %v11515_v2 }
 0x8ee   : > { %v13724_v5 = vadd.f32 %v16932_v25, %v13660_v32  ;;  %v13661_v26 = vadd.f32 %v20494_v11, %v13590_v15 }
 0x8ef   : > { %v13076_v19 = vpop.f32.mrb[88].mxu1 }
 0x8f0   : > { %13789 = vst.msk [vmem:[%s20516_s20 + $0x50] sm:$0xff] %vm13778_vm6, %v13724_v5  ;;  %v13725_v52 = vadd.f32 %v16933_v42, %v13661_v26  ;;  %v13366_v54 = vadd.f32 %v21191_v8, %v13076_v19  ;;  %v13078_v4 = vpop.f32.mrb[89].mxu1  ;;  %v16940_v19 = vld [vmem:[%s17390_s26 + $0x90] sm:$0xff] }
 0x8f1   : > { %v13079_v41 = vpop.f32.mrb[90].mxu1 }
 0x8f2   : > { %13790 = vst.msk [vmem:[%s20516_s20 + $0x58] sm:$0xff] %vm13778_vm6, %v13725_v52  ;;  %v13591_v53 = vmul.f32 %v20487_v39, %v13366_v54  ;;  %v13369_v29 = vadd.f32 %v21192_v59, %v13079_v41  ;;  %v13081_v33 = vpop.f32.mrb[91].mxu1  ;;  %v16941_v54 = vld [vmem:[%s17390_s26 + $0x98] sm:$0xff]  ;;  %v21199_v41 = vld [vmem:[#allocation36_spill] sm:$0xff] }
 0x8f3   : > { %v21200_v33 = vld [vmem:[#allocation38_spill] sm:$0xff] }
 0x8f4   : > { %v13662_v36 = vadd.f32 %v20494_v11, %v13591_v53  ;;  %v13592_v7 = vmul.f32 %v20487_v39, %v13369_v29  ;;  %15194 = vmatmul.mubr.bf16.gmra.mrb[196].mxu1 %v11518_v49 }
 0x8f6   : > { %v13726_v17 = vadd.f32 %v16934_v60, %v13662_v36  ;;  %v13663_v63 = vadd.f32 %v20494_v11, %v13592_v7 }
 0x8f7   : > { %v13084_v10 = vpop.f32.mrb[92].mxu1 }
 0x8f8   : > { %13791 = vst.msk [vmem:[%s20516_s20 + $0x60] sm:$0xff] %vm13778_vm6, %v13726_v17  ;;  %v13727_v21 = vadd.f32 %v16935_v40, %v13663_v63  ;;  %v13374_v34 = vadd.f32 %v21193_v3, %v13084_v10  ;;  %v13086_v0 = vpop.f32.mrb[93].mxu1  ;;  %v16942_v63 = vld [vmem:[%s17390_s26 + $0xa0] sm:$0xff]  ;;  %v16943_v3 = vld [vmem:[%s17390_s26 + $0xa8] sm:$0xff] }
 0x8f9   : > { %v13087_v37 = vpop.f32.mrb[94].mxu1  ;;  %v21201_v0 = vld [vmem:[#allocation35_spill] sm:$0xff] }
 0x8fa   : > { %13792 = vst.msk [vmem:[%s20516_s20 + $0x68] sm:$0xff] %vm13778_vm6, %v13727_v21  ;;  %v13593_v58 = vmul.f32 %v20487_v39, %v13374_v34  ;;  %v13377_v43 = vadd.f32 %v21194_v55, %v13087_v37  ;;  %v13089_v48 = vpop.f32.mrb[95].mxu1 }
 0x8fb   : > { %v21202_v48 = vld [vmem:[#allocation37_spill] sm:$0xff] }
 0x8fc   : > { %v13664_v62 = vadd.f32 %v20494_v11, %v13593_v58  ;;  %v13594_v16 = vmul.f32 %v20487_v39, %v13377_v43 }
 0x8fe   : > { %v13728_v46 = vadd.f32 %v16936_v56, %v13664_v62  ;;  %v13665_v30 = vadd.f32 %v20494_v11, %v13594_v16 }
 0x8ff   : > { %v13092_v23 = vpop.f32.mrb[96].mxu1 }
 0x900   : > { %13793 = vst.msk [vmem:[%s20516_s20 + $0x70] sm:$0xff] %vm13778_vm6, %v13728_v46  ;;  %v13729_v28 = vadd.f32 %v16937_v13, %v13665_v30  ;;  %v13382_v45 = vadd.f32 %v21195_v14, %v13092_v23  ;;  %v13094_v1 = vpop.f32.mrb[97].mxu1  ;;  %v16944_v30 = vld [vmem:[%s17390_s26 + $0xb0] sm:$0xff]  ;;  %v16945_v14 = vld [vmem:[%s17390_s26 + $0xb8] sm:$0xff] }
 0x901   : > { %v13095_v44 = vpop.f32.mrb[98].mxu1  ;;  %v21203_v1 = vld [vmem:[#allocation40_spill] sm:$0xff] }
 0x902   : > { %13794 = vst.msk [vmem:[%s20516_s20 + $0x78] sm:$0xff] %vm13778_vm6, %v13729_v28  ;;  %v13595_v31 = vmul.f32 %v20487_v39, %v13382_v45  ;;  %v13385_v51 = vadd.f32 %v21196_v20, %v13095_v44  ;;  %v13097_v18 = vpop.f32.mrb[99].mxu1 }
 0x903   : > { %v21204_v18 = vld [vmem:[#allocation42_spill] sm:$0xff] }
 0x904   : > { %v13666_v12 = vadd.f32 %v20494_v11, %v13595_v31  ;;  %v13596_v6 = vmul.f32 %v20487_v39, %v13385_v51 }
 0x906   : > { %v13730_v27 = vadd.f32 %v16938_v24, %v13666_v12  ;;  %v13667_v47 = vadd.f32 %v20494_v11, %v13596_v6 }
 0x907   : > { %v13100_v61 = vpop.f32.mrb[100].mxu1 }
 0x908   : > { %13795 = vst.msk [vmem:[%s20516_s20 + $0x80] sm:$0xff] %vm13778_vm6, %v13730_v27  ;;  %v13731_v57 = vadd.f32 %v16939_v22, %v13667_v47  ;;  %v13390_v38 = vadd.f32 %v21197_v50, %v13100_v61  ;;  %v13102_v32 = vpop.f32.mrb[101].mxu1  ;;  %v16946_v47 = vld [vmem:[%s17390_s26 + $0xc0] sm:$0xff]  ;;  %v16947_v50 = vld [vmem:[%s17390_s26 + $0xc8] sm:$0xff] }
 0x909   : > { %v13103_v15 = vpop.f32.mrb[102].mxu1  ;;  %v21205_v32 = vld [vmem:[#allocation39_spill] sm:$0xff] }
 0x90a   : > { %13796 = vst.msk [vmem:[%s20516_s20 + $0x88] sm:$0xff] %vm13778_vm6, %v13731_v57  ;;  %v13597_v2 = vmul.f32 %v20487_v39, %v13390_v38  ;;  %v13393_v35 = vadd.f32 %v21198_v9, %v13103_v15  ;;  %v13105_v25 = vpop.f32.mrb[103].mxu1 }
 0x90b   : > { %v21206_v25 = vld [vmem:[#allocation41_spill] sm:$0xff] }
 0x90c   : > { %v13668_v5 = vadd.f32 %v20494_v11, %v13597_v2  ;;  %v13598_v26 = vmul.f32 %v20487_v39, %v13393_v35 }
 0x90e   : > { %v13732_v42 = vadd.f32 %v16940_v19, %v13668_v5  ;;  %v13669_v52 = vadd.f32 %v20494_v11, %v13598_v26 }
 0x90f   : > { %v13108_v8 = vpop.f32.mrb[104].mxu1 }
 0x910   : > { %13797 = vst.msk [vmem:[%s20516_s20 + $0x90] sm:$0xff] %vm13778_vm6, %v13732_v42  ;;  %v13733_v4 = vadd.f32 %v16941_v54, %v13669_v52  ;;  %v13398_v49 = vadd.f32 %v21199_v41, %v13108_v8  ;;  %v13110_v53 = vpop.f32.mrb[105].mxu1  ;;  %v16948_v52 = vld [vmem:[%s17390_s26 + $0xd0] sm:$0xff]  ;;  %v16949_v41 = vld [vmem:[%s17390_s26 + $0xd8] sm:$0xff] }
 0x911   : > { %v13111_v59 = vpop.f32.mrb[106].mxu1  ;;  %v21207_v53 = vld [vmem:[#allocation44_spill] sm:$0xff] }
 0x912   : > { %13798 = vst.msk [vmem:[%s20516_s20 + $0x98] sm:$0xff] %vm13778_vm6, %v13733_v4  ;;  %v13599_v29 = vmul.f32 %v20487_v39, %v13398_v49  ;;  %v13401_v36 = vadd.f32 %v21200_v33, %v13111_v59  ;;  %v13113_v7 = vpop.f32.mrb[107].mxu1 }
 0x913   : > { %v21208_v7 = vld [vmem:[#allocation46_spill] sm:$0xff] }
 0x914   : > { %v13670_v60 = vadd.f32 %v20494_v11, %v13599_v29  ;;  %v13600_v17 = vmul.f32 %v20487_v39, %v13401_v36 }
 0x916   : > { %v13734_v10 = vadd.f32 %v16942_v63, %v13670_v60  ;;  %v13671_v40 = vadd.f32 %v20494_v11, %v13600_v17 }
 0x917   : > { %v13116_v21 = vpop.f32.mrb[108].mxu1 }
 0x918   : > { %13799 = vst.msk [vmem:[%s20516_s20 + $0xa0] sm:$0xff] %vm13778_vm6, %v13734_v10  ;;  %v13735_v34 = vadd.f32 %v16943_v3, %v13671_v40  ;;  %v13406_v37 = vadd.f32 %v21201_v0, %v13116_v21  ;;  %v13118_v58 = vpop.f32.mrb[109].mxu1  ;;  %v16950_v40 = vld [vmem:[%s17390_s26 + $0xe0] sm:$0xff]  ;;  %v16951_v0 = vld [vmem:[%s17390_s26 + $0xe8] sm:$0xff] }
 0x919   : > { %v13119_v55 = vpop.f32.mrb[110].mxu1  ;;  %v21209_v58 = vld [vmem:[#allocation43_spill] sm:$0xff] }
 0x91a   : > { %13800 = vst.msk [vmem:[%s20516_s20 + $0xa8] sm:$0xff] %vm13778_vm6, %v13735_v34  ;;  %v13601_v43 = vmul.f32 %v20487_v39, %v13406_v37  ;;  %v13409_v62 = vadd.f32 %v21202_v48, %v13119_v55  ;;  %v13121_v16 = vpop.f32.mrb[111].mxu1 }
 0x91b   : > { %v21210_v16 = vld [vmem:[#allocation45_spill] sm:$0xff] }
 0x91c   : > { %v13672_v56 = vadd.f32 %v20494_v11, %v13601_v43  ;;  %v13602_v46 = vmul.f32 %v20487_v39, %v13409_v62 }
 0x91e   : > { %v13736_v23 = vadd.f32 %v16944_v30, %v13672_v56  ;;  %v13673_v13 = vadd.f32 %v20494_v11, %v13602_v46 }
 0x91f   : > { %v13124_v28 = vpop.f32.mrb[112].mxu1 }
 0x920   : > { %13801 = vst.msk [vmem:[%s20516_s20 + $0xb0] sm:$0xff] %vm13778_vm6, %v13736_v23  ;;  %v13737_v45 = vadd.f32 %v16945_v14, %v13673_v13  ;;  %v13414_v44 = vadd.f32 %v21203_v1, %v13124_v28  ;;  %v13126_v31 = vpop.f32.mrb[113].mxu1  ;;  %v16952_v13 = vld [vmem:[%s17390_s26 + $0xf0] sm:$0xff]  ;;  %v16953_v1 = vld [vmem:[%s17390_s26 + $0xf8] sm:$0xff] }
 0x921   : > { %v13127_v20 = vpop.f32.mrb[114].mxu1  ;;  %v21211_v31 = vld [vmem:[#allocation48_spill] sm:$0xff] }
 0x922   : > { %13802 = vst.msk [vmem:[%s20516_s20 + $0xb8] sm:$0xff] %vm13778_vm6, %v13737_v45  ;;  %v13603_v51 = vmul.f32 %v20487_v39, %v13414_v44  ;;  %v13417_v12 = vadd.f32 %v21204_v18, %v13127_v20  ;;  %v13129_v6 = vpop.f32.mrb[115].mxu1 }
 0x923   : > { %v21212_v6 = vld [vmem:[#allocation50_spill] sm:$0xff] }
 0x924   : > { %v13674_v24 = vadd.f32 %v20494_v11, %v13603_v51  ;;  %v13604_v27 = vmul.f32 %v20487_v39, %v13417_v12 }
 0x926   : > { %v13738_v61 = vadd.f32 %v16946_v47, %v13674_v24  ;;  %v13675_v22 = vadd.f32 %v20494_v11, %v13604_v27 }
 0x927   : > { %v13132_v57 = vpop.f32.mrb[116].mxu1 }
 0x928   : > { %13803 = vst.msk [vmem:[%s20516_s20 + $0xc0] sm:$0xff] %vm13778_vm6, %v13738_v61  ;;  %v13739_v38 = vadd.f32 %v16947_v50, %v13675_v22  ;;  %v13422_v15 = vadd.f32 %v21205_v32, %v13132_v57  ;;  %v13134_v2 = vpop.f32.mrb[117].mxu1  ;;  %v16954_v22 = vld [vmem:[%s17390_s26 + $0x100] sm:$0xff]  ;;  %v16955_v32 = vld [vmem:[%s17390_s26 + $0x108] sm:$0xff] }
 0x929   : > { %v13135_v9 = vpop.f32.mrb[118].mxu1  ;;  %v21213_v2 = vld [vmem:[#allocation47_spill] sm:$0xff] }
 0x92a   : > { %13804 = vst.msk [vmem:[%s20516_s20 + $0xc8] sm:$0xff] %vm13778_vm6, %v13739_v38  ;;  %v13605_v35 = vmul.f32 %v20487_v39, %v13422_v15  ;;  %v13425_v5 = vadd.f32 %v21206_v25, %v13135_v9  ;;  %v13137_v26 = vpop.f32.mrb[119].mxu1 }
 0x92b   : > { %v21214_v26 = vld [vmem:[#allocation49_spill] sm:$0xff] }
 0x92c   : > { %v13676_v19 = vadd.f32 %v20494_v11, %v13605_v35  ;;  %v13606_v42 = vmul.f32 %v20487_v39, %v13425_v5 }
 0x92e   : > { %v13740_v8 = vadd.f32 %v16948_v52, %v13676_v19  ;;  %v13677_v54 = vadd.f32 %v20494_v11, %v13606_v42 }
 0x92f   : > { %v13140_v4 = vpop.f32.mrb[120].mxu1 }
 0x930   : > { %13805 = vst.msk [vmem:[%s20516_s20 + $0xd0] sm:$0xff] %vm13778_vm6, %v13740_v8  ;;  %v13741_v49 = vadd.f32 %v16949_v41, %v13677_v54  ;;  %v13430_v59 = vadd.f32 %v21207_v53, %v13140_v4  ;;  %v13142_v29 = vpop.f32.mrb[121].mxu1  ;;  %v16956_v54 = vld [vmem:[%s17390_s26 + $0x110] sm:$0xff]  ;;  %v16957_v53 = vld [vmem:[%s17390_s26 + $0x118] sm:$0xff] }
 0x931   : > { %v13143_v33 = vpop.f32.mrb[122].mxu1  ;;  %v21215_v29 = vld [vmem:[#allocation52_spill] sm:$0xff] }
 0x932   : > { %13806 = vst.msk [vmem:[%s20516_s20 + $0xd8] sm:$0xff] %vm13778_vm6, %v13741_v49  ;;  %v13607_v36 = vmul.f32 %v20487_v39, %v13430_v59  ;;  %v13433_v60 = vadd.f32 %v21208_v7, %v13143_v33  ;;  %v13145_v17 = vpop.f32.mrb[123].mxu1 }
 0x933   : > { %v21216_v17 = vld [vmem:[#allocation54_spill] sm:$0xff] }
 0x934   : > { %v13678_v63 = vadd.f32 %v20494_v11, %v13607_v36  ;;  %v13608_v10 = vmul.f32 %v20487_v39, %v13433_v60 }
 0x936   : > { %v13742_v21 = vadd.f32 %v16950_v40, %v13678_v63  ;;  %v13679_v3 = vadd.f32 %v20494_v11, %v13608_v10 }
 0x937   : > { %v13148_v34 = vpop.f32.mrb[124].mxu1 }
 0x938   : > { %13807 = vst.msk [vmem:[%s20516_s20 + $0xe0] sm:$0xff] %vm13778_vm6, %v13742_v21  ;;  %v13743_v37 = vadd.f32 %v16951_v0, %v13679_v3  ;;  %v13438_v55 = vadd.f32 %v21209_v58, %v13148_v34  ;;  %v13150_v43 = vpop.f32.mrb[125].mxu1  ;;  %v16958_v3 = vld [vmem:[%s17390_s26 + $0x120] sm:$0xff]  ;;  %v16959_v58 = vld [vmem:[%s17390_s26 + $0x128] sm:$0xff] }
 0x939   : > { %v13151_v48 = vpop.f32.mrb[126].mxu1  ;;  %v21217_v43 = vld [vmem:[#allocation51_spill] sm:$0xff] }
 0x93a   : > { %13808 = vst.msk [vmem:[%s20516_s20 + $0xe8] sm:$0xff] %vm13778_vm6, %v13743_v37  ;;  %v13609_v62 = vmul.f32 %v20487_v39, %v13438_v55  ;;  %v13441_v56 = vadd.f32 %v21210_v16, %v13151_v48  ;;  %v13153_v46 = vpop.f32.mrb[127].mxu1 }
 0x93b   : > { %v21218_v46 = vld [vmem:[#allocation53_spill] sm:$0xff] }
 0x93c   : > { %v13680_v30 = vadd.f32 %v20494_v11, %v13609_v62  ;;  %v13610_v23 = vmul.f32 %v20487_v39, %v13441_v56 }
 0x93e   : > { %v13744_v28 = vadd.f32 %v16952_v13, %v13680_v30  ;;  %v13681_v14 = vadd.f32 %v20494_v11, %v13610_v23 }
 0x93f   : > { %v13156_v45 = vpop.f32.mrb[128].mxu1 }
 0x940   : > { %13809 = vst.msk [vmem:[%s20516_s20 + $0xf0] sm:$0xff] %vm13778_vm6, %v13744_v28  ;;  %v13745_v44 = vadd.f32 %v16953_v1, %v13681_v14  ;;  %v13446_v20 = vadd.f32 %v21211_v31, %v13156_v45  ;;  %v13158_v51 = vpop.f32.mrb[129].mxu1  ;;  %v16960_v14 = vld [vmem:[%s17390_s26 + $0x130] sm:$0xff]  ;;  %v16961_v31 = vld [vmem:[%s17390_s26 + $0x138] sm:$0xff] }
 0x941   : > { %v13159_v18 = vpop.f32.mrb[130].mxu1  ;;  %v21219_v51 = vld [vmem:[#allocation56_spill] sm:$0xff] }
 0x942   : > { %13810 = vst.msk [vmem:[%s20516_s20 + $0xf8] sm:$0xff] %vm13778_vm6, %v13745_v44  ;;  %v13611_v12 = vmul.f32 %v20487_v39, %v13446_v20  ;;  %v13449_v24 = vadd.f32 %v21212_v6, %v13159_v18  ;;  %v13161_v27 = vpop.f32.mrb[131].mxu1 }
 0x943   : > { %v21220_v27 = vld [vmem:[#allocation58_spill] sm:$0xff] }
 0x944   : > { %v13682_v47 = vadd.f32 %v20494_v11, %v13611_v12  ;;  %v13612_v61 = vmul.f32 %v20487_v39, %v13449_v24 }
 0x946   : > { %v13746_v57 = vadd.f32 %v16954_v22, %v13682_v47  ;;  %v13683_v50 = vadd.f32 %v20494_v11, %v13612_v61 }
 0x947   : > { %v13164_v38 = vpop.f32.mrb[132].mxu1 }
 0x948   : > { %13811 = vst.msk [vmem:[%s20516_s20 + $0x100] sm:$0xff] %vm13778_vm6, %v13746_v57  ;;  %v13747_v15 = vadd.f32 %v16955_v32, %v13683_v50  ;;  %v13454_v9 = vadd.f32 %v21213_v2, %v13164_v38  ;;  %v13166_v35 = vpop.f32.mrb[133].mxu1  ;;  %v16962_v50 = vld [vmem:[%s17390_s26 + $0x140] sm:$0xff]  ;;  %v16963_v2 = vld [vmem:[%s17390_s26 + $0x148] sm:$0xff] }
 0x949   : > { %v13167_v25 = vpop.f32.mrb[134].mxu1  ;;  %v21221_v35 = vld [vmem:[#allocation55_spill] sm:$0xff] }
 0x94a   : > { %13812 = vst.msk [vmem:[%s20516_s20 + $0x108] sm:$0xff] %vm13778_vm6, %v13747_v15  ;;  %v13613_v5 = vmul.f32 %v20487_v39, %v13454_v9  ;;  %v13457_v19 = vadd.f32 %v21214_v26, %v13167_v25  ;;  %v13169_v42 = vpop.f32.mrb[135].mxu1 }
 0x94b   : > { %v21222_v42 = vld [vmem:[#allocation57_spill] sm:$0xff] }
 0x94c   : > { %v13684_v52 = vadd.f32 %v20494_v11, %v13613_v5  ;;  %v13614_v8 = vmul.f32 %v20487_v39, %v13457_v19 }
 0x94e   : > { %v13748_v4 = vadd.f32 %v16956_v54, %v13684_v52  ;;  %v13685_v41 = vadd.f32 %v20494_v11, %v13614_v8 }
 0x94f   : > { %v13172_v49 = vpop.f32.mrb[136].mxu1 }
 0x950   : > { %13813 = vst.msk [vmem:[%s20516_s20 + $0x110] sm:$0xff] %vm13778_vm6, %v13748_v4  ;;  %v13749_v59 = vadd.f32 %v16957_v53, %v13685_v41  ;;  %v13462_v33 = vadd.f32 %v21215_v29, %v13172_v49  ;;  %v13174_v36 = vpop.f32.mrb[137].mxu1  ;;  %v16964_v41 = vld [vmem:[%s17390_s26 + $0x150] sm:$0xff]  ;;  %v16965_v29 = vld [vmem:[%s17390_s26 + $0x158] sm:$0xff] }
 0x951   : > { %v13175_v7 = vpop.f32.mrb[138].mxu1  ;;  %v21223_v36 = vld [vmem:[#allocation61_spill] sm:$0xff] }
 0x952   : > { %13814 = vst.msk [vmem:[%s20516_s20 + $0x118] sm:$0xff] %vm13778_vm6, %v13749_v59  ;;  %v13615_v60 = vmul.f32 %v20487_v39, %v13462_v33  ;;  %v13465_v63 = vadd.f32 %v21216_v17, %v13175_v7  ;;  %v13177_v10 = vpop.f32.mrb[139].mxu1 }
 0x953   : > { %v21224_v10 = vld [vmem:[#allocation63_spill] sm:$0xff] }
 0x954   : > { %v13686_v40 = vadd.f32 %v20494_v11, %v13615_v60  ;;  %v13616_v21 = vmul.f32 %v20487_v39, %v13465_v63 }
 0x956   : > { %v13750_v34 = vadd.f32 %v16958_v3, %v13686_v40  ;;  %v13687_v0 = vadd.f32 %v20494_v11, %v13616_v21 }
 0x957   : > { %v13180_v37 = vpop.f32.mrb[140].mxu1 }
 0x958   : > { %13815 = vst.msk [vmem:[%s20516_s20 + $0x120] sm:$0xff] %vm13778_vm6, %v13750_v34  ;;  %v13751_v55 = vadd.f32 %v16959_v58, %v13687_v0  ;;  %v13470_v48 = vadd.f32 %v21217_v43, %v13180_v37  ;;  %v13182_v62 = vpop.f32.mrb[141].mxu1  ;;  %v16966_v0 = vld [vmem:[%s17390_s26 + $0x160] sm:$0xff]  ;;  %v16967_v43 = vld [vmem:[%s17390_s26 + $0x168] sm:$0xff] }
 0x959   : > { %v13183_v16 = vpop.f32.mrb[142].mxu1  ;;  %v21225_v62 = vld [vmem:[#allocation59_spill] sm:$0xff] }
 0x95a   : > { %13816 = vst.msk [vmem:[%s20516_s20 + $0x128] sm:$0xff] %vm13778_vm6, %v13751_v55  ;;  %v13617_v56 = vmul.f32 %v20487_v39, %v13470_v48  ;;  %v13473_v30 = vadd.f32 %v21218_v46, %v13183_v16  ;;  %v13185_v23 = vpop.f32.mrb[143].mxu1 }
 0x95b   : > { %v21226_v23 = vld [vmem:[#allocation62_spill] sm:$0xff] }
 0x95c   : > { %v13688_v13 = vadd.f32 %v20494_v11, %v13617_v56  ;;  %v13618_v28 = vmul.f32 %v20487_v39, %v13473_v30 }
 0x95e   : > { %v13752_v45 = vadd.f32 %v16960_v14, %v13688_v13  ;;  %v13689_v1 = vadd.f32 %v20494_v11, %v13618_v28 }
 0x95f   : > { %v13188_v44 = vpop.f32.mrb[144].mxu1 }
 0x960   : > { %13817 = vst.msk [vmem:[%s20516_s20 + $0x130] sm:$0xff] %vm13778_vm6, %v13752_v45  ;;  %v13753_v20 = vadd.f32 %v16961_v31, %v13689_v1  ;;  %v13478_v18 = vadd.f32 %v21219_v51, %v13188_v44  ;;  %v13190_v12 = vpop.f32.mrb[145].mxu1  ;;  %v16968_v1 = vld [vmem:[%s17390_s26 + $0x170] sm:$0xff]  ;;  %v16969_v51 = vld [vmem:[%s17390_s26 + $0x178] sm:$0xff] }
 0x961   : > { %v13191_v6 = vpop.f32.mrb[146].mxu1  ;;  %v21227_v12 = vld [vmem:[#allocation70_spill] sm:$0xff] }
 0x962   : > { %13818 = vst.msk [vmem:[%s20516_s20 + $0x138] sm:$0xff] %vm13778_vm6, %v13753_v20  ;;  %v13619_v24 = vmul.f32 %v20487_v39, %v13478_v18  ;;  %v13481_v47 = vadd.f32 %v21220_v27, %v13191_v6  ;;  %v13193_v61 = vpop.f32.mrb[147].mxu1 }
 0x963   : > { %v21228_v61 = vld [vmem:[#allocation72_spill] sm:$0xff] }
 0x964   : > { %v13690_v22 = vadd.f32 %v20494_v11, %v13619_v24  ;;  %v13620_v57 = vmul.f32 %v20487_v39, %v13481_v47 }
 0x966   : > { %v13754_v38 = vadd.f32 %v16962_v50, %v13690_v22  ;;  %v13691_v32 = vadd.f32 %v20494_v11, %v13620_v57 }
 0x967   : > { %v13196_v15 = vpop.f32.mrb[148].mxu1 }
 0x968   : > { %13819 = vst.msk [vmem:[%s20516_s20 + $0x140] sm:$0xff] %vm13778_vm6, %v13754_v38  ;;  %v13755_v9 = vadd.f32 %v16963_v2, %v13691_v32  ;;  %v13486_v25 = vadd.f32 %v21221_v35, %v13196_v15  ;;  %v13198_v5 = vpop.f32.mrb[149].mxu1  ;;  %v16970_v32 = vld [vmem:[%s17390_s26 + $0x180] sm:$0xff]  ;;  %v16971_v35 = vld [vmem:[%s17390_s26 + $0x188] sm:$0xff] }
 0x969   : > { %v13199_v26 = vpop.f32.mrb[150].mxu1  ;;  %v21229_v5 = vld [vmem:[#allocation69_spill] sm:$0xff] }
 0x96a   : > { %13820 = vst.msk [vmem:[%s20516_s20 + $0x148] sm:$0xff] %vm13778_vm6, %v13755_v9  ;;  %v13621_v19 = vmul.f32 %v20487_v39, %v13486_v25  ;;  %v13489_v52 = vadd.f32 %v21222_v42, %v13199_v26  ;;  %v13201_v8 = vpop.f32.mrb[151].mxu1 }
 0x96b   : > { %v21230_v8 = vld [vmem:[#allocation71_spill] sm:$0xff] }
 0x96c   : > { %v13692_v54 = vadd.f32 %v20494_v11, %v13621_v19  ;;  %v13622_v4 = vmul.f32 %v20487_v39, %v13489_v52 }
 0x96e   : > { %v13756_v49 = vadd.f32 %v16964_v41, %v13692_v54  ;;  %v13693_v53 = vadd.f32 %v20494_v11, %v13622_v4 }
 0x96f   : > { %v13204_v59 = vpop.f32.mrb[152].mxu1 }
 0x970   : > { %13821 = vst.msk [vmem:[%s20516_s20 + $0x150] sm:$0xff] %vm13778_vm6, %v13756_v49  ;;  %v13757_v33 = vadd.f32 %v16965_v29, %v13693_v53  ;;  %v13494_v7 = vadd.f32 %v21223_v36, %v13204_v59  ;;  %v13206_v60 = vpop.f32.mrb[153].mxu1  ;;  %v16972_v53 = vld [vmem:[%s17390_s26 + $0x190] sm:$0xff]  ;;  %v16973_v36 = vld [vmem:[%s17390_s26 + $0x198] sm:$0xff] }
 0x971   : > { %v13207_v17 = vpop.f32.mrb[154].mxu1  ;;  %v21231_v60 = vld [vmem:[#allocation78_spill] sm:$0xff] }
 0x972   : > { %13822 = vst.msk [vmem:[%s20516_s20 + $0x158] sm:$0xff] %vm13778_vm6, %v13757_v33  ;;  %v13623_v63 = vmul.f32 %v20487_v39, %v13494_v7  ;;  %v13497_v40 = vadd.f32 %v21224_v10, %v13207_v17  ;;  %v13209_v21 = vpop.f32.mrb[155].mxu1 }
 0x973   : > { %v21232_v21 = vld [vmem:[#allocation81_spill] sm:$0xff] }
 0x974   : > { %v13694_v3 = vadd.f32 %v20494_v11, %v13623_v63  ;;  %v13624_v34 = vmul.f32 %v20487_v39, %v13497_v40 }
 0x976   : > { %v13758_v37 = vadd.f32 %v16966_v0, %v13694_v3  ;;  %v13695_v58 = vadd.f32 %v20494_v11, %v13624_v34 }
 0x977   : > { %v13212_v55 = vpop.f32.mrb[156].mxu1 }
 0x978   : > { %13823 = vst.msk [vmem:[%s20516_s20 + $0x160] sm:$0xff] %vm13778_vm6, %v13758_v37  ;;  %v13759_v48 = vadd.f32 %v16967_v43, %v13695_v58  ;;  %v13502_v16 = vadd.f32 %v21225_v62, %v13212_v55  ;;  %v13214_v56 = vpop.f32.mrb[157].mxu1  ;;  %v16974_v58 = vld [vmem:[%s17390_s26 + $0x1a0] sm:$0xff]  ;;  %v16975_v62 = vld [vmem:[%s17390_s26 + $0x1a8] sm:$0xff] }
 0x979   : > { %v13215_v46 = vpop.f32.mrb[158].mxu1  ;;  %v21233_v56 = vld [vmem:[#allocation77_spill] sm:$0xff] }
 0x97a   : > { %13824 = vst.msk [vmem:[%s20516_s20 + $0x168] sm:$0xff] %vm13778_vm6, %v13759_v48  ;;  %v13625_v30 = vmul.f32 %v20487_v39, %v13502_v16  ;;  %v13505_v13 = vadd.f32 %v21226_v23, %v13215_v46  ;;  %v13217_v28 = vpop.f32.mrb[159].mxu1 }
 0x97b   : > { %v21234_v28 = vld [vmem:[#allocation79_spill] sm:$0xff] }
 0x97c   : > { %v13696_v14 = vadd.f32 %v20494_v11, %v13625_v30  ;;  %v13626_v45 = vmul.f32 %v20487_v39, %v13505_v13 }
 0x97e   : > { %v13760_v44 = vadd.f32 %v16968_v1, %v13696_v14  ;;  %v13697_v31 = vadd.f32 %v20494_v11, %v13626_v45 }
 0x97f   : > { %v13220_v20 = vpop.f32.mrb[160].mxu1 }
 0x980   : > { %13825 = vst.msk [vmem:[%s20516_s20 + $0x170] sm:$0xff] %vm13778_vm6, %v13760_v44  ;;  %v13761_v18 = vadd.f32 %v16969_v51, %v13697_v31  ;;  %v13510_v6 = vadd.f32 %v21227_v12, %v13220_v20  ;;  %v13222_v24 = vpop.f32.mrb[161].mxu1  ;;  %v16976_v31 = vld [vmem:[%s17390_s26 + $0x1b0] sm:$0xff]  ;;  %v16977_v12 = vld [vmem:[%s17390_s26 + $0x1b8] sm:$0xff] }
 0x981   : > { %v13223_v27 = vpop.f32.mrb[162].mxu1 }
 0x982   : > { %13826 = vst.msk [vmem:[%s20516_s20 + $0x178] sm:$0xff] %vm13778_vm6, %v13761_v18  ;;  %v13627_v47 = vmul.f32 %v20487_v39, %v13510_v6  ;;  %v13513_v22 = vadd.f32 %v21228_v61, %v13223_v27  ;;  %v13225_v57 = vpop.f32.mrb[163].mxu1 }
 0x984   : > { %v13698_v50 = vadd.f32 %v20494_v11, %v13627_v47  ;;  %v13628_v38 = vmul.f32 %v20487_v39, %v13513_v22 }
 0x986   : > { %v13762_v15 = vadd.f32 %v16970_v32, %v13698_v50  ;;  %v13699_v2 = vadd.f32 %v20494_v11, %v13628_v38 }
 0x987   : > { %v13228_v9 = vpop.f32.mrb[164].mxu1 }
 0x988   : > { %13827 = vst.msk [vmem:[%s20516_s20 + $0x180] sm:$0xff] %vm13778_vm6, %v13762_v15  ;;  %v13763_v25 = vadd.f32 %v16971_v35, %v13699_v2  ;;  %v13518_v26 = vadd.f32 %v21229_v5, %v13228_v9  ;;  %v13230_v19 = vpop.f32.mrb[165].mxu1 }
 0x989   : > { %v13231_v42 = vpop.f32.mrb[166].mxu1 }
 0x98a   : > { %13828 = vst.msk [vmem:[%s20516_s20 + $0x188] sm:$0xff] %vm13778_vm6, %v13763_v25  ;;  %v13629_v52 = vmul.f32 %v20487_v39, %v13518_v26  ;;  %v13521_v54 = vadd.f32 %v21230_v8, %v13231_v42  ;;  %v13233_v4 = vpop.f32.mrb[167].mxu1 }
 0x98c   : > { %v13700_v41 = vadd.f32 %v20494_v11, %v13629_v52  ;;  %v13630_v49 = vmul.f32 %v20487_v39, %v13521_v54 }
 0x98e   : > { %v13764_v59 = vadd.f32 %v16972_v53, %v13700_v41  ;;  %v13701_v29 = vadd.f32 %v20494_v11, %v13630_v49 }
 0x98f   : > { %v13236_v33 = vpop.f32.mrb[168].mxu1 }
 0x990   : > { %13829 = vst.msk [vmem:[%s20516_s20 + $0x190] sm:$0xff] %vm13778_vm6, %v13764_v59  ;;  %v13765_v7 = vadd.f32 %v16973_v36, %v13701_v29  ;;  %v13526_v17 = vadd.f32 %v21231_v60, %v13236_v33  ;;  %v13238_v63 = vpop.f32.mrb[169].mxu1 }
 0x991   : > { %v13239_v10 = vpop.f32.mrb[170].mxu1  ;;  %v16979_v63 = vld [vmem:[%s17390_s26 + $0x1c0] sm:$0xff] }
 0x992   : > { %13830 = vst.msk [vmem:[%s20516_s20 + $0x198] sm:$0xff] %vm13778_vm6, %v13765_v7  ;;  %v13631_v40 = vmul.f32 %v20487_v39, %v13526_v17  ;;  %v13529_v3 = vadd.f32 %v21232_v21, %v13239_v10  ;;  %v13241_v34 = vpop.f32.mrb[171].mxu1  ;;  %v16978_v7 = vld [vmem:[%s17390_s26 + $0x1d0] sm:$0xff] }
 0x994   : > { %v13702_v0 = vadd.f32 %v20494_v11, %v13631_v40  ;;  %v13632_v37 = vmul.f32 %v20487_v39, %v13529_v3  ;;  %v16980_v3 = vld [vmem:[%s17390_s26 + $0x1d8] sm:$0xff] }
 0x996   : > { %v13766_v55 = vadd.f32 %v16974_v58, %v13702_v0  ;;  %v13703_v43 = vadd.f32 %v20494_v11, %v13632_v37  ;;  %v16981_v58 = vld [vmem:[%s17390_s26 + $0x1c8] sm:$0xff] }
 0x997   : > { %v13244_v48 = vpop.f32.mrb[172].mxu1 }
 0x998   : > { %13831 = vst.msk [vmem:[%s20516_s20 + $0x1a0] sm:$0xff] %vm13778_vm6, %v13766_v55  ;;  %v13767_v16 = vadd.f32 %v16975_v62, %v13703_v43  ;;  %v13534_v46 = vadd.f32 %v21233_v56, %v13244_v48  ;;  %v13246_v30 = vpop.f32.mrb[173].mxu1 }
 0x999   : > { %v13247_v23 = vpop.f32.mrb[174].mxu1 }
 0x99a   : > { %13832 = vst.msk [vmem:[%s20516_s20 + $0x1a8] sm:$0xff] %vm13778_vm6, %v13767_v16  ;;  %v13633_v13 = vmul.f32 %v20487_v39, %v13534_v46  ;;  %v13537_v14 = vadd.f32 %v21234_v28, %v13247_v23  ;;  %v13249_v45 = vpop.f32.mrb[175].mxu1 }
 0x99c   : > { %v13704_v1 = vadd.f32 %v20494_v11, %v13633_v13  ;;  %v13634_v44 = vmul.f32 %v20487_v39, %v13537_v14  ;;  %v16982_v13 = vld [vmem:[%s20980_s8] ss:$0 sm:$0xff] }
 0x99e   : > { %v13768_v20 = vadd.f32 %v16976_v31, %v13704_v1  ;;  %v13705_v51 = vadd.f32 %v20494_v11, %v13634_v44  ;;  %v16983_v1 = vld [vmem:[%s17390_s26 + $0x1f0] sm:$0xff] }
 0x99f   : > { %v13252_v18 = vpop.f32.mrb[176].mxu1  ;;  %v16984_v44 = vld [vmem:[%s20981_s9] ss:$0 sm:$0xff] }
 0x9a0   : > { %13833 = vst.msk [vmem:[%s20516_s20 + $0x1b0] sm:$0xff] %vm13778_vm6, %v13768_v20  ;;  %v13769_v6 = vadd.f32 %v16977_v12, %v13705_v51  ;;  %v13254_v24 = vpop.f32.mrb[177].mxu1  ;;  %v16985_v20 = vld [vmem:[%s17390_s26 + $0x1e0] sm:$0xff] }
 0x9a1   : > { %v13255_v27 = vpop.f32.mrb[178].mxu1 }
 0x9a2   : > { %13834 = vst.msk [vmem:[%s20516_s20 + $0x1b8] sm:$0xff] %vm13778_vm6, %v13769_v6  ;;  %v13257_v47 = vpop.f32.mrb[179].mxu1  ;;  %v16987_v6 = vld [vmem:[%s17390_s26 + $0x1e8] sm:$0xff] }
 0x9a7   : > { %v13260_v61 = vpop.f32.mrb[180].mxu1 }
 0x9a8   : > { %v13262_v22 = vpop.f32.mrb[181].mxu1 }
 0x9a9   : > { %v13263_v57 = vpop.f32.mrb[182].mxu1 }
 0x9aa   : > { %v13265_v50 = vpop.f32.mrb[183].mxu1 }
 0x9af   : > { %v13268_v38 = vpop.f32.mrb[184].mxu1 }
 0x9b0   : > { %v13270_v32 = vpop.f32.mrb[185].mxu1 }
 0x9b1   : > { %v13271_v15 = vpop.f32.mrb[186].mxu1 }
 0x9b2   : > { %v13273_v2 = vpop.f32.mrb[187].mxu1 }
 0x9b7   : > { %v13276_v9 = vpop.f32.mrb[188].mxu1 }
 0x9b8   : > { %v13278_v35 = vpop.f32.mrb[189].mxu1 }
 0x9b9   : > { %v13279_v25 = vpop.f32.mrb[190].mxu1 }
 0x9ba   : > { %v13281_v5 = vpop.f32.mrb[191].mxu1 }
 0x9bf   : > { %v15191_v26 = vpop.f32.mrb[192].mxu1 }
 0x9c0   : > { %v13550_v19 = vadd.f32 %v15191_v26, %v13260_v61  ;;  %v13541_v42 = vpop.f32.mrb[193].mxu1 }
 0x9c1   : > { %v13542_v52 = vadd.f32 %v13541_v42, %v13252_v18  ;;  %v15192_v8 = vpop.f32.mrb[194].mxu1 }
 0x9c2   : > { %v13637_v54 = vmul.f32 %v20487_v39, %v13550_v19  ;;  %v13553_v4 = vadd.f32 %v15192_v8, %v13263_v57  ;;  %v13544_v41 = vpop.f32.mrb[195].mxu1 }
 0x9c3   : > { %v13635_v49 = vmul.f32 %v20487_v39, %v13542_v52  ;;  %v13545_v53 = vadd.f32 %v13544_v41, %v13255_v27 }
 0x9c4   : > { %v13708_v59 = vadd.f32 %v20494_v11, %v13637_v54  ;;  %v13638_v29 = vmul.f32 %v20487_v39, %v13553_v4 }
 0x9c5   : > { %v13706_v33 = vadd.f32 %v20494_v11, %v13635_v49  ;;  %v13636_v36 = vmul.f32 %v20487_v39, %v13545_v53 }
 0x9c6   : > { %v13772_v60 = vadd.f32 %v16978_v7, %v13708_v59  ;;  %v13709_v17 = vadd.f32 %v20494_v11, %v13638_v29 }
 0x9c7   : > { %v13770_v10 = vadd.f32 %v16979_v63, %v13706_v33  ;;  %v13707_v40 = vadd.f32 %v20494_v11, %v13636_v36  ;;  %v15195_v21 = vpop.f32.mrb[196].mxu1 }
 0x9c8   : > { %13837 = vst.msk [vmem:[%s20516_s20 + $0x1d0] sm:$0xff] %vm13778_vm6, %v13772_v60  ;;  %v13773_v34 = vadd.f32 %v16980_v3, %v13709_v17  ;;  %v13566_v0 = vadd.f32 %v15195_v21, %v13276_v9  ;;  %v13557_v37 = vpop.f32.mrb[197].mxu1 }
 0x9c9   : > { %13835 = vst.msk [vmem:[%s20516_s20 + $0x1c0] sm:$0xff] %vm13778_vm6, %v13770_v10  ;;  %v13771_v55 = vadd.f32 %v16981_v58, %v13707_v40  ;;  %v13558_v43 = vadd.f32 %v13557_v37, %v13268_v38  ;;  %v15196_v48 = vpop.f32.mrb[198].mxu1 }
 0x9ca   : > { %13838 = vst.msk [vmem:[%s20516_s20 + $0x1d8] sm:$0xff] %vm13778_vm6, %v13773_v34  ;;  %v13641_v62 = vmul.f32 %v20487_v39, %v13566_v0  ;;  %v13569_v16 = vadd.f32 %v15196_v48, %v13279_v25  ;;  %v13560_v56 = vpop.f32.mrb[199].mxu1 }
 0x9cb   : > { %13836 = vst.msk [vmem:[%s20516_s20 + $0x1c8] sm:$0xff] %vm13778_vm6, %v13771_v55  ;;  %v13639_v46 = vmul.f32 %v20487_v39, %v13558_v43  ;;  %v13561_v30 = vadd.f32 %v13560_v56, %v13271_v15 }
 0x9cc   : > { %v13712_v23 = vadd.f32 %v20494_v11, %v13641_v62  ;;  %v13642_v28 = vmul.f32 %v16982_v13, %v13569_v16 }
 0x9cd   : > { %v13710_v14 = vadd.f32 %v20494_v11, %v13639_v46  ;;  %v13640_v45 = vmul.f32 %v16982_v13, %v13561_v30  ;;  %v16986_v11 = vld [vmem:[%s17390_s26 + $0x1f8] sm:$0xff] }
 0x9ce   : > { %v13776_v39 = vadd.f32 %v16983_v1, %v13712_v23  ;;  %v13713_v31 = vadd.f32 %v16984_v44, %v13642_v28 }
 0x9cf   : > { %v13774_v51 = vadd.f32 %v16985_v20, %v13710_v14  ;;  %v13711_v18 = vadd.f32 %v16984_v44, %v13640_v45 }
 0x9d0   : > { %13841 = vst.msk [vmem:[%s20516_s20 + $0x1f0] sm:$0xff] %vm13778_vm6, %v13776_v39  ;;  %v13777_v12 = vadd.f32 %v16986_v11, %v13713_v31 }
 0x9d1   : > { %13839 = vst.msk [vmem:[%s20516_s20 + $0x1e0] sm:$0xff] %vm13778_vm6, %v13774_v51  ;;  %v13775_v24 = vadd.f32 %v16987_v6, %v13711_v18 }
 0x9d2   : > { %13842 = vst.msk [vmem:[%s20516_s20 + $0x1f8] sm:$0xff] %vm13778_vm6, %v13777_v12 }
 0x9d3   : > { %13840 = vst.msk [vmem:[%s20516_s20 + $0x1e8] sm:$0xff] %vm13778_vm6, %v13775_v24 }
 0x9d4   : > { %17087 = shalt.err (!%p17084_p2)
}
 0x9d5   : > { %s17088_s26 = scalar_lea.hbm %s20919_s21, 8192  ;;  %s17092_s18 = scalar_lea.hbm %s20982_s10, 16384 }
 0x9d6   : > { %p17089_p13 = scmp.ne.s32.totalorder %s20919_s21, %s17088_s26  ;;  %p17093_p4 = scmp.lt.u32.totalorder %s20919_s21, %s20982_s10 }
 0x9d7   : > { %p17094_p5 = scmp.lt.u32.totalorder %s17092_s18, %s17088_s26  ;;  %p17096_p11 = scmp.lt.u32.totalorder %s17088_s26, %s20919_s21 }
 0x9d8   : > { %p17090_p6 = pnand %p17089_p13, %p21235_p0 }
 0x9d9   : > { %p17095_p8 = por %p17094_p5, %p17093_p4 }
 0x9da   : > { %p17091_p10 = pneg %p17090_p6 }
 0x9db   : > { %p17097_p1 = por %p17096_p11, %p17095_p8 }
 0x9dd   : > { %p17098_p3 = pnand %p17097_p1, %p17091_p10 }
 0x9df   : > { %17101 = shalt.err (!%p17098_p3)
}
 0x9e0   : > { %s17155_s13 = smov 128   ;;  %s17156_s12 = smov 8  }
 0x9e1   : > { %15991 = dma.vmem_to_hbm [thread:$0]  (%p21235_p0), %s20921_s29, 8192, %s20919_s21, %s13844_s22, %s17155_s13, %s17155_s13, %s17156_s12  }
 0x9e2 PF: > { %s21236_s24 = sld [smem:[#allocation13_spill]]  ;;  %s21237_s27 = sld [smem:[#allocation14_spill]] }
 0x9e3   : > { %p21239_p9 = scmp.ge.s32.totalorder %s17144_s16, 2 }
 0x9e8   : > { %s13873_s20 = sand.u32 1, %s21236_s24   ;;  %p21238_p7 = scmp.ne.s32.totalorder %s21237_s27, 0 }
 0x9e9   : > { %s13874_s26 = scalar_lea.sflag [#allocation5], %s13873_s20 }
 0x9ea   : > { %p16005_p12 = pnand %p21239_p9, %p21238_p7 }
 0x9ec   : > { %17127 = dma.done.wait (!%p16005_p12), %s13874_s26, 8192  }
 0x9ed   : > { %17129 = vsyncadd (!%p16005_p12), %s13874_s26, 4294959104  ;;  %p24_p2 = scmp.ge.s32.totalorder %s17322_s28, 4   ;;  %s21240_s13 = smov %s17136_s14 }
 0x9ee   : > { %s21241_s14 = smov %s17140_s15  ;;  %s21242_s15 = smov %s17338_s11 }
 0x9ef   : > { %s21243_s16 = smov %s17322_s28  ;;  %26 = sbr.rel (!%p24_p2) target bundleno = 6 (0x6), region = 115 }
 0x9f6   :  { %13879 = vsyncpa [#allocation4], 1 }
 0x9f7   :  { %13881 = vsyncpa [#allocation4 + $0x1], 1 }
 0x9f8   :  { %13882 = vsyncpa [#allocation7], 1 }
 0x9f9   :  { %13883 = vsyncpa [#allocation5], 1 }
 0x9fa   :  { %13885 = vsyncpa [#allocation5 + $0x1], 1 }

</bundles_post_ra>
